<compile_context>
chip_gen: v5e
topology: v5e:2x2
jax: 0.10.0
libtpu: 0.0.40
codegen_flags: <defaults>
</compile_context>

<pallas_src>
import functools
import math

import jax
import jax.numpy as jnp
from jax.experimental import pallas as pl
from jax.experimental.pallas import tpu as pltpu

_LANE = 128
_HAS_EINSHAPE = hasattr(pltpu, "einshape")


def _round_up(x, m):
    return ((x + m - 1) // m) * m


def _swap01(x):
    """Swap the two leading dims of a 3-D array (lane dim untouched)."""
    if _HAS_EINSHAPE:                       # lane-layout-aware relayout when available
        return pltpu.einshape("abc->bac", x)
    return jnp.transpose(x, (1, 0, 2))


def _vmem_limit_bytes():
    """~3/4 of the chip's VMEM (headroom for compiler scratch), capped at 100 MiB.

    v5e/v6e (128 MiB) -> 96 MiB; v7x (64 MiB per TC) -> 48 MiB.
    """
    cap = 64 * 1024 * 1024
    try:
        info = pltpu.get_tpu_info()
        cap = int(getattr(info, "vmem_capacity_bytes", cap) or cap)
    except Exception:
        pass
    return int(min(cap * 3 // 4, 100 * 1024 * 1024))


def _pick_batch_block(N, Lt):
    """Batch rows per grid step.

    Prefer several grid steps (megacore sharding on v7x, DMA/compute overlap on
    v5e/v6e) as long as the chunk is sublane-aligned (bb % 8 == 0, required by the
    BlockSpec (8,128) rule when bb < N) and keeps the matmul M dimension >= ~256 rows;
    otherwise fold the whole batch into a single step.
    """
    for g in (8, 4, 2):
        if N % g == 0:
            bb = N // g
            if bb % 8 == 0 and bb * Lt >= 256:
                return bb
    return N


# --------------------------------- kernel -------------------------------------

def decoder_layer_kernel(tgt_ref, mem_ref,
                         w_in_s_ref, b_in_s_ref, wo_s_ref, bo_s_ref,
                         wq_c_ref, bq_c_ref, wkv_c_ref, bkv_c_ref,
                         wo_c_ref, bo_c_ref,
                         w1_ref, b1_ref, w2_ref, b2_ref,
                         out_ref, *, nhead):
    lt, bb, ep = tgt_ref.shape
    lm = mem_ref.shape[0]
    hd_p = ep // nhead

    # Relayout the (seq, batch, emb) blocks to batch-major ONCE, inside VMEM, so the
    # (batch*head) attention batching below reduces to pure reshapes after the
    # (proven) head relayout.  Rows are ordered (b, t).  Residual stream stays f32.
    x = _swap01(tgt_ref[...]).reshape(bb * lt, ep)
    mem = _swap01(mem_ref[...]).reshape(bb * lm, ep)

    def split_heads(y16, length):
        # (bb*length, nhead*hd_p) bf16 -> (nhead*bb, length, hd_p)
        y3 = _swap01(y16.reshape(bb * length, nhead, hd_p))   # (nhead, bb*length, hd_p)
        return y3.reshape(nhead * bb, length, hd_p)

    def merge_heads(o16, length):
        # (nhead*bb, length, hd_p) bf16 -> (bb*length, nhead*hd_p)
        o3 = _swap01(o16.reshape(nhead, bb * length, hd_p))   # (bb*length, nhead, hd_p)
        return o3.reshape(bb * length, nhead * hd_p)

    def attend(q16, k16, v16, lq, lk, wo_ref, bo_ref):
        """Batched multi-head attention (g = batch*heads); all matmuls bf16 on MXU."""
        q3 = split_heads(q16, lq)
        k3 = split_heads(k16, lk)
        v3 = split_heads(v16, lk)
        s = jnp.einsum('gqd,gkd->gqk', q3, k3,
                       preferred_element_type=jnp.float32)    # (nhead*bb, lq, lk) f32
        s = s - jnp.max(s, axis=-1, keepdims=True)
        p = jnp.exp(s)
        p = p * pl.reciprocal(jnp.sum(p, axis=-1, keepdims=True), approx=True)
        o3 = jnp.einsum('gqk,gkd->gqd', p.astype(jnp.bfloat16), v3,
                        preferred_element_type=jnp.float32)   # (nhead*bb, lq, hd_p)
        o = merge_heads(o3.astype(jnp.bfloat16), lq)
        return jnp.dot(o, wo_ref[...], preferred_element_type=jnp.float32) + bo_ref[...]

    # ---- 1) self-attention (fused QKV matmul; 1/sqrt(hd) pre-folded into Q) ----
    qkv = jnp.dot(x.astype(jnp.bfloat16), w_in_s_ref[...],
                  preferred_element_type=jnp.float32) + b_in_s_ref[...]
    qkv16 = qkv.astype(jnp.bfloat16)        # single cast before the head relayouts
    x = x + attend(qkv16[:, 0:ep], qkv16[:, ep:2 * ep], qkv16[:, 2 * ep:3 * ep],
                   lt, lt, wo_s_ref, bo_s_ref)

    # ---- 2) cross-attention (Q matmul + fused KV matmul on memory) ----
    q = jnp.dot(x.astype(jnp.bfloat16), wq_c_ref[...],
                preferred_element_type=jnp.float32) + bq_c_ref[...]
    kv = jnp.dot(mem.astype(jnp.bfloat16), wkv_c_ref[...],
                 preferred_element_type=jnp.float32) + bkv_c_ref[...]
    q16 = q.astype(jnp.bfloat16)
    kv16 = kv.astype(jnp.bfloat16)
    x = x + attend(q16, kv16[:, 0:ep], kv16[:, ep:2 * ep],
                   lt, lm, wo_c_ref, bo_c_ref)

    # ---- 3) feed-forward + residual ----
    # TODO(synk): tile over Fp (extra 'arbitrary' grid axis / emit_pipeline) and over
    #             the K/V axis (flash-style) for production sizes on v7x.
    h = jnp.dot(x.astype(jnp.bfloat16), w1_ref[...],
                preferred_element_type=jnp.float32) + b1_ref[...]
    # nn.LeakyReLU(True) => negative_slope = 1.0 => exact identity (omitted).
    ff = jnp.dot(h.astype(jnp.bfloat16), w2_ref[...],
                 preferred_element_type=jnp.float32) + b2_ref[...]
    x = x + ff

    # Back to (seq, batch, emb) for a lane-dense (Ep multiple of 128) unmasked store.
    out_ref[...] = _swap01(x.reshape(bb, lt, ep))


# -------------------------- parameter preparation -----------------------------

def init_params(key, d_model, dim_feedforward):
    """PyTorch-layout parameters (f32)."""
    E, F = d_model, dim_feedforward
    ks = jax.random.split(key, 12)
    s = 0.1
    return {
        'self_in_w':  jax.random.normal(ks[0], (3 * E, E), jnp.float32) * s,
        'self_in_b':  jax.random.normal(ks[1], (3 * E,), jnp.float32) * s,
        'self_out_w': jax.random.normal(ks[2], (E, E), jnp.float32) * s,
        'self_out_b': jax.random.normal(ks[3], (E,), jnp.float32) * s,
        'cross_in_w':  jax.random.normal(ks[4], (3 * E, E), jnp.float32) * s,
        'cross_in_b':  jax.random.normal(ks[5], (3 * E,), jnp.float32) * s,
        'cross_out_w': jax.random.normal(ks[6], (E, E), jnp.float32) * s,
        'cross_out_b': jax.random.normal(ks[7], (E,), jnp.float32) * s,
        'lin1_w': jax.random.normal(ks[8], (F, E), jnp.float32) * s,
        'lin1_b': jax.random.normal(ks[9], (F,), jnp.float32) * s,
        'lin2_w': jax.random.normal(ks[10], (E, F), jnp.float32) * s,
        'lin2_b': jax.random.normal(ks[11], (E,), jnp.float32) * s,
    }


def prepare_params(params, nhead, d_model, dim_feedforward):
    """Transpose to x@W layout, zero-pad to lane-dense shapes, fold the 1/sqrt(hd)
    scale into the Q projections, and cast weights to bf16 (biases stay f32).

    Per-head zero padding (hd -> hd_p) keeps attention semantics exact; padded biases
    are zero so padded q/k/v/activation columns stay exactly zero.
    """
    E, F = d_model, dim_feedforward
    assert E % nhead == 0
    hd = E // nhead
    Ep = _round_up(E, _LANE)
    if Ep % nhead != 0:
        hd_p = -(-Ep // nhead)
        Ep = nhead * hd_p
    else:
        hd_p = Ep // nhead
    Fp = _round_up(F, _LANE)
    scale = 1.0 / math.sqrt(hd)              # scale uses the *original* head dim

    def pad_self_in(w, b):                   # w: (3E, E) torch layout, b: (3E,)
        wt = w.T.reshape(E, 3, nhead, hd)    # columns = [Q | K | V], head-major
        wt = jnp.pad(wt, ((0, Ep - E), (0, 0), (0, 0), (0, hd_p - hd)))
        wt = wt.at[:, 0].multiply(scale)     # fold 1/sqrt(hd) into Q columns
        bt = jnp.pad(b.reshape(3, nhead, hd), ((0, 0), (0, 0), (0, hd_p - hd)))
        bt = bt.at[0].multiply(scale)
        return (wt.reshape(Ep, 3 * Ep).astype(jnp.bfloat16),
                bt.reshape(1, 3 * Ep).astype(jnp.float32))

    def pad_cross_in(w, b):                  # -> scaled W_q (Ep,Ep) and fused W_kv (Ep,2Ep)
        wq = jnp.pad(w[:E].T.reshape(E, nhead, hd),
                     ((0, Ep - E), (0, 0), (0, hd_p - hd))) * scale
        bq = jnp.pad(b[:E].reshape(nhead, hd), ((0, 0), (0, hd_p - hd))) * scale
        wkv = jnp.pad(w[E:].T.reshape(E, 2, nhead, hd),
                      ((0, Ep - E), (0, 0), (0, 0), (0, hd_p - hd)))
        bkv = jnp.pad(b[E:].reshape(2, nhead, hd), ((0, 0), (0, 0), (0, hd_p - hd)))
        return (wq.reshape(Ep, Ep).astype(jnp.bfloat16),
                bq.reshape(1, Ep).astype(jnp.float32),
                wkv.reshape(Ep, 2 * Ep).astype(jnp.bfloat16),
                bkv.reshape(1, 2 * Ep).astype(jnp.float32))

    def pad_out_proj(w, b):                  # w: (E, E) torch layout, b: (E,)
        wt = w.T.reshape(nhead, hd, E)       # rows = attention features (head-major)
        wt = jnp.pad(wt, ((0, 0), (0, hd_p - hd), (0, Ep - E)))
        return (wt.reshape(Ep, Ep).astype(jnp.bfloat16),
                jnp.pad(b, (0, Ep - E)).reshape(1, Ep).astype(jnp.float32))

    def pad_linear(wT, b, rpad, cpad):       # wT already transposed to (in, out)
        return (jnp.pad(wT, ((0, rpad), (0, cpad))).astype(jnp.bfloat16),
                jnp.pad(b, (0, cpad)).reshape(1, -1).astype(jnp.float32))

    w_in_s, b_in_s = pad_self_in(params['self_in_w'], params['self_in_b'])
    wo_s, bo_s = pad_out_proj(params['self_out_w'], params['self_out_b'])
    wq_c, bq_c, wkv_c, bkv_c = pad_cross_in(params['cross_in_w'], params['cross_in_b'])
    wo_c, bo_c = pad_out_proj(params['cross_out_w'], params['cross_out_b'])
    w1p, b1p = pad_linear(params['lin1_w'].T, params['lin1_b'], Ep - E, Fp - F)
    w2p, b2p = pad_linear(params['lin2_w'].T, params['lin2_b'], Fp - F, Ep - E)

    weights = [w_in_s, b_in_s, wo_s, bo_s,
               wq_c, bq_c, wkv_c, bkv_c, wo_c, bo_c,
               w1p, b1p, w2p, b2p]
    meta = dict(Ep=Ep, Fp=Fp, hd=hd, hd_p=hd_p)
    return weights, meta


# -------------------------------- wrapper --------------------------------------

def make_decoder_layer(params, nhead, d_model, dim_feedforward):
    """Prepare the padded / bf16 / scale-folded weights ONCE (hoisted out of the
    per-call path) and return forward(tgt, memory) in PyTorch (seq, batch, embed)
    layout."""
    weights, meta = prepare_params(params, nhead, d_model, dim_feedforward)
    weights = [jax.device_put(w) for w in weights]
    E, Ep = d_model, meta['Ep']
    vmem_limit = _vmem_limit_bytes()

    def forward(tgt, memory):
        Lt, N, _E = tgt.shape
        Lm = memory.shape[0]
        assert _E == E
        tgt_p = jnp.pad(tgt, ((0, 0), (0, 0), (0, Ep - E))) if Ep != E else tgt
        mem_p = jnp.pad(memory, ((0, 0), (0, 0), (0, Ep - E))) if Ep != E else memory

        bb = _pick_batch_block(N, Lt)
        grid = (N // bb,)

        def build(single_buffer_weights):
            def const_spec(arr):
                zeros = (0,) * arr.ndim
                kw = {}
                if single_buffer_weights:
                    # Grid-constant weights: single buffer (halves weight VMEM).
                    kw['pipeline_mode'] = pl.Buffered(1)
                return pl.BlockSpec(arr.shape, lambda b, _z=zeros: _z, **kw)

            in_specs = ([pl.BlockSpec((Lt, bb, Ep), lambda b: (0, b, 0)),
                         pl.BlockSpec((Lm, bb, Ep), lambda b: (0, b, 0))]
                        + [const_spec(a) for a in weights])
            return pl.pallas_call(
                functools.partial(decoder_layer_kernel, nhead=nhead),
                out_shape=jax.ShapeDtypeStruct((Lt, N, Ep), jnp.float32),
                grid_spec=pltpu.PrefetchScalarGridSpec(
                    num_scalar_prefetch=0,
                    grid=grid,
                    in_specs=in_specs,
                    out_specs=pl.BlockSpec((Lt, bb, Ep), lambda b: (0, b, 0)),
                ),
                compiler_params=pltpu.CompilerParams(
                    dimension_semantics=("parallel",),
                    vmem_limit_bytes=vmem_limit,
                ),
            )

        try:
            out_p = build(True)(tgt_p, mem_p, *weights)
        except Exception:
            # pipeline_mode=pl.Buffered(1) not supported by this jax build; fall back
            # to the default (double-buffered) grid-constant weight blocks.
            out_p = build(False)(tgt_p, mem_p, *weights)
        return out_p[:, :, :E] if Ep != E else out_p

    return forward


# ------------------------------- reference -------------------------------------

def reference_forward(tgt, memory, params, nhead):
    """Pure-JAX f32 reference with PyTorch nn.MultiheadAttention semantics."""
    E = tgt.shape[-1]
    hd = E // nhead

    def mha(xq, xkv, w_in, b_in, w_out, b_out):
        Lq, Lk = xq.shape[0], xkv.shape[0]
        q = xq @ w_in[:E].T + b_in[:E]
        k = xkv @ w_in[E:2 * E].T + b_in[E:2 * E]
        v = xkv @ w_in[2 * E:].T + b_in[2 * E:]
        q = q.reshape(Lq, nhead, hd).transpose(1, 0, 2) / math.sqrt(hd)
        k = k.reshape(Lk, nhead, hd).transpose(1, 0, 2)
        v = v.reshape(Lk, nhead, hd).transpose(1, 0, 2)
        s = jnp.einsum('hqd,hkd->hqk', q, k)
        p = jax.nn.softmax(s, axis=-1)
        o = jnp.einsum('hqk,hkd->hqd', p, v)
        return o.transpose(1, 0, 2).reshape(Lq, E) @ w_out.T + b_out

    def layer(x, m):
        x = x + mha(x, x, params['self_in_w'], params['self_in_b'],
                    params['self_out_w'], params['self_out_b'])
        x = x + mha(x, m, params['cross_in_w'], params['cross_in_b'],
                    params['cross_out_w'], params['cross_out_b'])
        h = x @ params['lin1_w'].T + params['lin1_b']
        # LeakyReLU(negative_slope=1.0) is the identity; dropouts are p=0.
        return x + (h @ params['lin2_w'].T + params['lin2_b'])

    return jax.vmap(layer, in_axes=(1, 1), out_axes=1)(tgt, memory)


# --------------------------------- main -----------------------------------------

if __name__ == "__main__":
    d_model, nhead, dim_feedforward = 32, 4, 16
    Lt, Lm, N = 8, 12, 2

    key = jax.random.PRNGKey(0)
    k_t, k_m, k_p = jax.random.split(key, 3)
    tgt = jax.random.normal(k_t, (Lt, N, d_model), jnp.float32)
    memory = jax.random.normal(k_m, (Lm, N, d_model), jnp.float32)
    params = init_params(k_p, d_model, dim_feedforward)

    layer = make_decoder_layer(params, nhead, d_model, dim_feedforward)
    out = jax.block_until_ready(layer(tgt, memory))

    ref = jax.block_until_ready(reference_forward(tgt, memory, params, nhead))
    assert out.shape == (Lt, N, d_model)
    # bf16 MXU matmuls (f32 accumulation) + approx reciprocal -> relaxed tolerance.
    assert jnp.allclose(out, ref, atol=5e-2, rtol=5e-2), \
        f"max abs diff = {jnp.max(jnp.abs(out - ref))}"

    print("KERNEL_OK")
</pallas_src>

<mosaic_0001>
module attributes {stable_mosaic.version = 11 : i64} {
  func.func @decoder_layer_kernel(%arg0: i32, %arg1: memref<8x2x128xf32, #tpu.memory_space<vmem>>, %arg2: memref<12x2x128xf32, #tpu.memory_space<vmem>>, %arg3: memref<128x384xbf16, #tpu.memory_space<vmem>>, %arg4: memref<1x384xf32, #tpu.memory_space<vmem>>, %arg5: memref<128x128xbf16, #tpu.memory_space<vmem>>, %arg6: memref<1x128xf32, #tpu.memory_space<vmem>>, %arg7: memref<128x128xbf16, #tpu.memory_space<vmem>>, %arg8: memref<1x128xf32, #tpu.memory_space<vmem>>, %arg9: memref<128x256xbf16, #tpu.memory_space<vmem>>, %arg10: memref<1x256xf32, #tpu.memory_space<vmem>>, %arg11: memref<128x128xbf16, #tpu.memory_space<vmem>>, %arg12: memref<1x128xf32, #tpu.memory_space<vmem>>, %arg13: memref<128x128xbf16, #tpu.memory_space<vmem>>, %arg14: memref<1x128xf32, #tpu.memory_space<vmem>>, %arg15: memref<128x128xbf16, #tpu.memory_space<vmem>>, %arg16: memref<1x128xf32, #tpu.memory_space<vmem>>, %arg17: memref<8x2x128xf32, #tpu.memory_space<vmem>>) attributes {dimension_semantics = [#tpu.dimension_semantics<parallel>], iteration_bounds = array<i64: 1>, scalar_prefetch = 0 : i64, scratch_operands = 0 : i64, tpu.core_type = #tpu.core_type<tc>, window_params = [{transform_indices = @transform_0, window_bounds = array<i64: 8, 2, 128>}, {transform_indices = @transform_1, window_bounds = array<i64: 12, 2, 128>}, {pipeline_mode = #tpu.pipeline_mode<synchronous>, transform_indices = @transform_2, window_bounds = array<i64: 128, 384>}, {pipeline_mode = #tpu.pipeline_mode<synchronous>, transform_indices = @transform_3, window_bounds = array<i64: 1, 384>}, {pipeline_mode = #tpu.pipeline_mode<synchronous>, transform_indices = @transform_4, window_bounds = array<i64: 128, 128>}, {pipeline_mode = #tpu.pipeline_mode<synchronous>, transform_indices = @transform_5, window_bounds = array<i64: 1, 128>}, {pipeline_mode = #tpu.pipeline_mode<synchronous>, transform_indices = @transform_6, window_bounds = array<i64: 128, 128>}, {pipeline_mode = #tpu.pipeline_mode<synchronous>, transform_indices = @transform_7, window_bounds = array<i64: 1, 128>}, {pipeline_mode = #tpu.pipeline_mode<synchronous>, transform_indices = @transform_8, window_bounds = array<i64: 128, 256>}, {pipeline_mode = #tpu.pipeline_mode<synchronous>, transform_indices = @transform_9, window_bounds = array<i64: 1, 256>}, {pipeline_mode = #tpu.pipeline_mode<synchronous>, transform_indices = @transform_10, window_bounds = array<i64: 128, 128>}, {pipeline_mode = #tpu.pipeline_mode<synchronous>, transform_indices = @transform_11, window_bounds = array<i64: 1, 128>}, {pipeline_mode = #tpu.pipeline_mode<synchronous>, transform_indices = @transform_12, window_bounds = array<i64: 128, 128>}, {pipeline_mode = #tpu.pipeline_mode<synchronous>, transform_indices = @transform_13, window_bounds = array<i64: 1, 128>}, {pipeline_mode = #tpu.pipeline_mode<synchronous>, transform_indices = @transform_14, window_bounds = array<i64: 128, 128>}, {pipeline_mode = #tpu.pipeline_mode<synchronous>, transform_indices = @transform_15, window_bounds = array<i64: 1, 128>}, {transform_indices = @transform_16, window_bounds = array<i64: 8, 2, 128>}]} {
    %c0 = arith.constant 0 : index
    %c0_0 = arith.constant 0 : index
    %c0_1 = arith.constant 0 : index
    %0 = vector.load %arg1[%c0, %c0_0, %c0_1] : memref<8x2x128xf32, #tpu.memory_space<vmem>>, vector<8x2x128xf32>
    %1 = tpu.transpose %0, [1, 0, 2] : vector<8x2x128xf32> -> vector<2x8x128xf32>
    %2 = vector.shape_cast %1 : vector<2x8x128xf32> to vector<16x128xf32>
    %c0_2 = arith.constant 0 : index
    %c0_3 = arith.constant 0 : index
    %c0_4 = arith.constant 0 : index
    %3 = vector.load %arg2[%c0_2, %c0_3, %c0_4] : memref<12x2x128xf32, #tpu.memory_space<vmem>>, vector<12x2x128xf32>
    %4 = tpu.transpose %3, [1, 0, 2] : vector<12x2x128xf32> -> vector<2x12x128xf32>
    %5 = vector.shape_cast %4 : vector<2x12x128xf32> to vector<24x128xf32>
    %6 = arith.truncf %2 : vector<16x128xf32> to vector<16x128xbf16>
    %c0_5 = arith.constant 0 : index
    %c0_6 = arith.constant 0 : index
    %7 = vector.load %arg3[%c0_5, %c0_6] : memref<128x384xbf16, #tpu.memory_space<vmem>>, vector<128x384xbf16>
    %cst = arith.constant dense<0.000000e+00> : vector<16x384xf32>
    %8 = tpu.matmul %6, %7, %cst {dimension_numbers = #tpu.dot_dimension_numbers<[1], [0], [0], [1], [0, 0, 1, 1], [], []>} : vector<16x128xbf16>, vector<128x384xbf16>, vector<16x384xf32> -> vector<16x384xf32>
    %c0_7 = arith.constant 0 : index
    %c0_8 = arith.constant 0 : index
    %9 = vector.load %arg4[%c0_7, %c0_8] : memref<1x384xf32, #tpu.memory_space<vmem>>, vector<1x384xf32>
    %10 = vector.broadcast %9 : vector<1x384xf32> to vector<16x384xf32>
    %11 = arith.addf %8, %10 : vector<16x384xf32>
    %12 = arith.truncf %11 : vector<16x384xf32> to vector<16x384xbf16>
    %13 = vector.extract_strided_slice %12 {offsets = [0, 0], sizes = [16, 128], strides = [1, 1]} : vector<16x384xbf16> to vector<16x128xbf16>
    %14 = vector.extract_strided_slice %12 {offsets = [0, 128], sizes = [16, 128], strides = [1, 1]} : vector<16x384xbf16> to vector<16x128xbf16>
    %15 = vector.extract_strided_slice %12 {offsets = [0, 256], sizes = [16, 128], strides = [1, 1]} : vector<16x384xbf16> to vector<16x128xbf16>
    %16 = vector.shape_cast %13 : vector<16x128xbf16> to vector<16x4x32xbf16>
    %17 = tpu.transpose %16, [1, 0, 2] : vector<16x4x32xbf16> -> vector<4x16x32xbf16>
    %18 = vector.shape_cast %17 : vector<4x16x32xbf16> to vector<8x8x32xbf16>
    %19 = vector.shape_cast %14 : vector<16x128xbf16> to vector<16x4x32xbf16>
    %20 = tpu.transpose %19, [1, 0, 2] : vector<16x4x32xbf16> -> vector<4x16x32xbf16>
    %21 = vector.shape_cast %20 : vector<4x16x32xbf16> to vector<8x8x32xbf16>
    %22 = vector.shape_cast %15 : vector<16x128xbf16> to vector<16x4x32xbf16>
    %23 = tpu.transpose %22, [1, 0, 2] : vector<16x4x32xbf16> -> vector<4x16x32xbf16>
    %24 = vector.shape_cast %23 : vector<4x16x32xbf16> to vector<8x8x32xbf16>
    "tpu.trace_start"() <{level = 10 : i32, message = "gqd,gkd->gqk"}> : () -> ()
    %cst_9 = arith.constant dense<0.000000e+00> : vector<8x8x8xf32>
    %25 = tpu.matmul %18, %21, %cst_9 {dimension_numbers = #tpu.dot_dimension_numbers<[2], [2], [1], [1], [0, 0, 0, 1, 1, 1], [0], [0]>} : vector<8x8x32xbf16>, vector<8x8x32xbf16>, vector<8x8x8xf32> -> vector<8x8x8xf32>
    "tpu.trace_stop"() : () -> ()
    %cst_10 = arith.constant dense<0xFF800000> : vector<8x8xf32>
    %26 = vector.multi_reduction <maximumf>, %25, %cst_10 [2] : vector<8x8x8xf32> to vector<8x8xf32>
    %27 = vector.shape_cast %26 : vector<8x8xf32> to vector<8x8x1xf32>
    %28 = vector.broadcast %27 : vector<8x8x1xf32> to vector<8x8x8xf32>
    %29 = arith.subf %25, %28 : vector<8x8x8xf32>
    %30 = math.exp %29 : vector<8x8x8xf32>
    %cst_11 = arith.constant dense<0.000000e+00> : vector<8x8xf32>
    %31 = vector.multi_reduction <add>, %30, %cst_11 [2] : vector<8x8x8xf32> to vector<8x8xf32>
    %32 = vector.shape_cast %31 : vector<8x8xf32> to vector<8x8x1xf32>
    %33 = tpu.reciprocal %32 {approx = true} : vector<8x8x1xf32> -> vector<8x8x1xf32>
    %34 = vector.broadcast %33 : vector<8x8x1xf32> to vector<8x8x8xf32>
    %35 = arith.mulf %30, %34 : vector<8x8x8xf32>
    %36 = arith.truncf %35 : vector<8x8x8xf32> to vector<8x8x8xbf16>
    "tpu.trace_start"() <{level = 10 : i32, message = "gqk,gkd->gqd"}> : () -> ()
    %cst_12 = arith.constant dense<0.000000e+00> : vector<8x8x32xf32>
    %37 = tpu.matmul %36, %24, %cst_12 {dimension_numbers = #tpu.dot_dimension_numbers<[2], [1], [1], [2], [0, 0, 0, 1, 1, 2], [0], [0]>} : vector<8x8x8xbf16>, vector<8x8x32xbf16>, vector<8x8x32xf32> -> vector<8x8x32xf32>
    "tpu.trace_stop"() : () -> ()
    %38 = arith.truncf %37 : vector<8x8x32xf32> to vector<8x8x32xbf16>
    %39 = vector.shape_cast %38 : vector<8x8x32xbf16> to vector<4x16x32xbf16>
    %40 = tpu.transpose %39, [1, 0, 2] : vector<4x16x32xbf16> -> vector<16x4x32xbf16>
    %41 = vector.shape_cast %40 : vector<16x4x32xbf16> to vector<16x128xbf16>
    %c0_13 = arith.constant 0 : index
    %c0_14 = arith.constant 0 : index
    %42 = vector.load %arg5[%c0_13, %c0_14] : memref<128x128xbf16, #tpu.memory_space<vmem>>, vector<128x128xbf16>
    %cst_15 = arith.constant dense<0.000000e+00> : vector<16x128xf32>
    %43 = tpu.matmul %41, %42, %cst_15 {dimension_numbers = #tpu.dot_dimension_numbers<[1], [0], [0], [1], [0, 0, 1, 1], [], []>} : vector<16x128xbf16>, vector<128x128xbf16>, vector<16x128xf32> -> vector<16x128xf32>
    %c0_16 = arith.constant 0 : index
    %c0_17 = arith.constant 0 : index
    %44 = vector.load %arg6[%c0_16, %c0_17] : memref<1x128xf32, #tpu.memory_space<vmem>>, vector<1x128xf32>
    %45 = vector.broadcast %44 : vector<1x128xf32> to vector<16x128xf32>
    %46 = arith.addf %43, %45 : vector<16x128xf32>
    %47 = arith.addf %2, %46 : vector<16x128xf32>
    %48 = arith.truncf %47 : vector<16x128xf32> to vector<16x128xbf16>
    %c0_18 = arith.constant 0 : index
    %c0_19 = arith.constant 0 : index
    %49 = vector.load %arg7[%c0_18, %c0_19] : memref<128x128xbf16, #tpu.memory_space<vmem>>, vector<128x128xbf16>
    %cst_20 = arith.constant dense<0.000000e+00> : vector<16x128xf32>
    %50 = tpu.matmul %48, %49, %cst_20 {dimension_numbers = #tpu.dot_dimension_numbers<[1], [0], [0], [1], [0, 0, 1, 1], [], []>} : vector<16x128xbf16>, vector<128x128xbf16>, vector<16x128xf32> -> vector<16x128xf32>
    %c0_21 = arith.constant 0 : index
    %c0_22 = arith.constant 0 : index
    %51 = vector.load %arg8[%c0_21, %c0_22] : memref<1x128xf32, #tpu.memory_space<vmem>>, vector<1x128xf32>
    %52 = vector.broadcast %51 : vector<1x128xf32> to vector<16x128xf32>
    %53 = arith.addf %50, %52 : vector<16x128xf32>
    %54 = arith.truncf %5 : vector<24x128xf32> to vector<24x128xbf16>
    %c0_23 = arith.constant 0 : index
    %c0_24 = arith.constant 0 : index
    %55 = vector.load %arg9[%c0_23, %c0_24] : memref<128x256xbf16, #tpu.memory_space<vmem>>, vector<128x256xbf16>
    %cst_25 = arith.constant dense<0.000000e+00> : vector<24x256xf32>
    %56 = tpu.matmul %54, %55, %cst_25 {dimension_numbers = #tpu.dot_dimension_numbers<[1], [0], [0], [1], [0, 0, 1, 1], [], []>} : vector<24x128xbf16>, vector<128x256xbf16>, vector<24x256xf32> -> vector<24x256xf32>
    %c0_26 = arith.constant 0 : index
    %c0_27 = arith.constant 0 : index
    %57 = vector.load %arg10[%c0_26, %c0_27] : memref<1x256xf32, #tpu.memory_space<vmem>>, vector<1x256xf32>
    %58 = vector.broadcast %57 : vector<1x256xf32> to vector<24x256xf32>
    %59 = arith.addf %56, %58 : vector<24x256xf32>
    %60 = arith.truncf %53 : vector<16x128xf32> to vector<16x128xbf16>
    %61 = arith.truncf %59 : vector<24x256xf32> to vector<24x256xbf16>
    %62 = vector.extract_strided_slice %61 {offsets = [0, 0], sizes = [24, 128], strides = [1, 1]} : vector<24x256xbf16> to vector<24x128xbf16>
    %63 = vector.extract_strided_slice %61 {offsets = [0, 128], sizes = [24, 128], strides = [1, 1]} : vector<24x256xbf16> to vector<24x128xbf16>
    %64 = vector.shape_cast %60 : vector<16x128xbf16> to vector<16x4x32xbf16>
    %65 = tpu.transpose %64, [1, 0, 2] : vector<16x4x32xbf16> -> vector<4x16x32xbf16>
    %66 = vector.shape_cast %65 : vector<4x16x32xbf16> to vector<8x8x32xbf16>
    %67 = vector.shape_cast %62 : vector<24x128xbf16> to vector<24x4x32xbf16>
    %68 = tpu.transpose %67, [1, 0, 2] : vector<24x4x32xbf16> -> vector<4x24x32xbf16>
    %69 = vector.shape_cast %68 : vector<4x24x32xbf16> to vector<8x12x32xbf16>
    %70 = vector.shape_cast %63 : vector<24x128xbf16> to vector<24x4x32xbf16>
    %71 = tpu.transpose %70, [1, 0, 2] : vector<24x4x32xbf16> -> vector<4x24x32xbf16>
    %72 = vector.shape_cast %71 : vector<4x24x32xbf16> to vector<8x12x32xbf16>
    "tpu.trace_start"() <{level = 10 : i32, message = "gqd,gkd->gqk"}> : () -> ()
    %cst_28 = arith.constant dense<0.000000e+00> : vector<8x8x12xf32>
    %73 = tpu.matmul %66, %69, %cst_28 {dimension_numbers = #tpu.dot_dimension_numbers<[2], [2], [1], [1], [0, 0, 0, 1, 1, 1], [0], [0]>} : vector<8x8x32xbf16>, vector<8x12x32xbf16>, vector<8x8x12xf32> -> vector<8x8x12xf32>
    "tpu.trace_stop"() : () -> ()
    %cst_29 = arith.constant dense<0xFF800000> : vector<8x8xf32>
    %74 = vector.multi_reduction <maximumf>, %73, %cst_29 [2] : vector<8x8x12xf32> to vector<8x8xf32>
    %75 = vector.shape_cast %74 : vector<8x8xf32> to vector<8x8x1xf32>
    %76 = vector.broadcast %75 : vector<8x8x1xf32> to vector<8x8x12xf32>
    %77 = arith.subf %73, %76 : vector<8x8x12xf32>
    %78 = math.exp %77 : vector<8x8x12xf32>
    %cst_30 = arith.constant dense<0.000000e+00> : vector<8x8xf32>
    %79 = vector.multi_reduction <add>, %78, %cst_30 [2] : vector<8x8x12xf32> to vector<8x8xf32>
    %80 = vector.shape_cast %79 : vector<8x8xf32> to vector<8x8x1xf32>
    %81 = tpu.reciprocal %80 {approx = true} : vector<8x8x1xf32> -> vector<8x8x1xf32>
    %82 = vector.broadcast %81 : vector<8x8x1xf32> to vector<8x8x12xf32>
    %83 = arith.mulf %78, %82 : vector<8x8x12xf32>
    %84 = arith.truncf %83 : vector<8x8x12xf32> to vector<8x8x12xbf16>
    "tpu.trace_start"() <{level = 10 : i32, message = "gqk,gkd->gqd"}> : () -> ()
    %cst_31 = arith.constant dense<0.000000e+00> : vector<8x8x32xf32>
    %85 = tpu.matmul %84, %72, %cst_31 {dimension_numbers = #tpu.dot_dimension_numbers<[2], [1], [1], [2], [0, 0, 0, 1, 1, 2], [0], [0]>} : vector<8x8x12xbf16>, vector<8x12x32xbf16>, vector<8x8x32xf32> -> vector<8x8x32xf32>
    "tpu.trace_stop"() : () -> ()
    %86 = arith.truncf %85 : vector<8x8x32xf32> to vector<8x8x32xbf16>
    %87 = vector.shape_cast %86 : vector<8x8x32xbf16> to vector<4x16x32xbf16>
    %88 = tpu.transpose %87, [1, 0, 2] : vector<4x16x32xbf16> -> vector<16x4x32xbf16>
    %89 = vector.shape_cast %88 : vector<16x4x32xbf16> to vector<16x128xbf16>
    %c0_32 = arith.constant 0 : index
    %c0_33 = arith.constant 0 : index
    %90 = vector.load %arg11[%c0_32, %c0_33] : memref<128x128xbf16, #tpu.memory_space<vmem>>, vector<128x128xbf16>
    %cst_34 = arith.constant dense<0.000000e+00> : vector<16x128xf32>
    %91 = tpu.matmul %89, %90, %cst_34 {dimension_numbers = #tpu.dot_dimension_numbers<[1], [0], [0], [1], [0, 0, 1, 1], [], []>} : vector<16x128xbf16>, vector<128x128xbf16>, vector<16x128xf32> -> vector<16x128xf32>
    %c0_35 = arith.constant 0 : index
    %c0_36 = arith.constant 0 : index
    %92 = vector.load %arg12[%c0_35, %c0_36] : memref<1x128xf32, #tpu.memory_space<vmem>>, vector<1x128xf32>
    %93 = vector.broadcast %92 : vector<1x128xf32> to vector<16x128xf32>
    %94 = arith.addf %91, %93 : vector<16x128xf32>
    %95 = arith.addf %47, %94 : vector<16x128xf32>
    %96 = arith.truncf %95 : vector<16x128xf32> to vector<16x128xbf16>
    %c0_37 = arith.constant 0 : index
    %c0_38 = arith.constant 0 : index
    %97 = vector.load %arg13[%c0_37, %c0_38] : memref<128x128xbf16, #tpu.memory_space<vmem>>, vector<128x128xbf16>
    %cst_39 = arith.constant dense<0.000000e+00> : vector<16x128xf32>
    %98 = tpu.matmul %96, %97, %cst_39 {dimension_numbers = #tpu.dot_dimension_numbers<[1], [0], [0], [1], [0, 0, 1, 1], [], []>} : vector<16x128xbf16>, vector<128x128xbf16>, vector<16x128xf32> -> vector<16x128xf32>
    %c0_40 = arith.constant 0 : index
    %c0_41 = arith.constant 0 : index
    %99 = vector.load %arg14[%c0_40, %c0_41] : memref<1x128xf32, #tpu.memory_space<vmem>>, vector<1x128xf32>
    %100 = vector.broadcast %99 : vector<1x128xf32> to vector<16x128xf32>
    %101 = arith.addf %98, %100 : vector<16x128xf32>
    %102 = arith.truncf %101 : vector<16x128xf32> to vector<16x128xbf16>
    %c0_42 = arith.constant 0 : index
    %c0_43 = arith.constant 0 : index
    %103 = vector.load %arg15[%c0_42, %c0_43] : memref<128x128xbf16, #tpu.memory_space<vmem>>, vector<128x128xbf16>
    %cst_44 = arith.constant dense<0.000000e+00> : vector<16x128xf32>
    %104 = tpu.matmul %102, %103, %cst_44 {dimension_numbers = #tpu.dot_dimension_numbers<[1], [0], [0], [1], [0, 0, 1, 1], [], []>} : vector<16x128xbf16>, vector<128x128xbf16>, vector<16x128xf32> -> vector<16x128xf32>
    %c0_45 = arith.constant 0 : index
    %c0_46 = arith.constant 0 : index
    %105 = vector.load %arg16[%c0_45, %c0_46] : memref<1x128xf32, #tpu.memory_space<vmem>>, vector<1x128xf32>
    %106 = vector.broadcast %105 : vector<1x128xf32> to vector<16x128xf32>
    %107 = arith.addf %104, %106 : vector<16x128xf32>
    %108 = arith.addf %95, %107 : vector<16x128xf32>
    %109 = vector.shape_cast %108 : vector<16x128xf32> to vector<2x8x128xf32>
    %110 = tpu.transpose %109, [1, 0, 2] : vector<2x8x128xf32> -> vector<8x2x128xf32>
    %c0_47 = arith.constant 0 : index
    %c0_48 = arith.constant 0 : index
    %c0_49 = arith.constant 0 : index
    %111 = vector.load %arg17[%c0_47, %c0_48, %c0_49] : memref<8x2x128xf32, #tpu.memory_space<vmem>>, vector<8x2x128xf32>
    tpu.vector_store %arg17[%c0_47, %c0_48, %c0_49], %110 {strides = array<i32>} : memref<8x2x128xf32, #tpu.memory_space<vmem>>, vector<8x2x128xf32>,
    return
  }
  func.func @transform_0(%arg0: i32) -> (i32, i32, i32) {
    %c0_i32 = arith.constant 0 : i32
    %c0_i32_0 = arith.constant 0 : i32
    %c0_i32_1 = arith.constant 0 : i32
    return %c0_i32, %arg0, %c0_i32_0 : i32, i32, i32
  }
  func.func @transform_1(%arg0: i32) -> (i32, i32, i32) {
    %c0_i32 = arith.constant 0 : i32
    %c0_i32_0 = arith.constant 0 : i32
    %c0_i32_1 = arith.constant 0 : i32
    return %c0_i32, %arg0, %c0_i32_0 : i32, i32, i32
  }
  func.func @transform_2(%arg0: i32) -> (i32, i32) {
    %c0_i32 = arith.constant 0 : i32
    %c0_i32_0 = arith.constant 0 : i32
    %c0_i32_1 = arith.constant 0 : i32
    return %c0_i32, %c0_i32_0 : i32, i32
  }
  func.func @transform_3(%arg0: i32) -> (i32, i32) {
    %c0_i32 = arith.constant 0 : i32
    %c0_i32_0 = arith.constant 0 : i32
    %c0_i32_1 = arith.constant 0 : i32
    return %c0_i32, %c0_i32_0 : i32, i32
  }
  func.func @transform_4(%arg0: i32) -> (i32, i32) {
    %c0_i32 = arith.constant 0 : i32
    %c0_i32_0 = arith.constant 0 : i32
    %c0_i32_1 = arith.constant 0 : i32
    return %c0_i32, %c0_i32_0 : i32, i32
  }
  func.func @transform_5(%arg0: i32) -> (i32, i32) {
    %c0_i32 = arith.constant 0 : i32
    %c0_i32_0 = arith.constant 0 : i32
    %c0_i32_1 = arith.constant 0 : i32
    return %c0_i32, %c0_i32_0 : i32, i32
  }
  func.func @transform_6(%arg0: i32) -> (i32, i32) {
    %c0_i32 = arith.constant 0 : i32
    %c0_i32_0 = arith.constant 0 : i32
    %c0_i32_1 = arith.constant 0 : i32
    return %c0_i32, %c0_i32_0 : i32, i32
  }
  func.func @transform_7(%arg0: i32) -> (i32, i32) {
    %c0_i32 = arith.constant 0 : i32
    %c0_i32_0 = arith.constant 0 : i32
    %c0_i32_1 = arith.constant 0 : i32
    return %c0_i32, %c0_i32_0 : i32, i32
  }
  func.func @transform_8(%arg0: i32) -> (i32, i32) {
    %c0_i32 = arith.constant 0 : i32
    %c0_i32_0 = arith.constant 0 : i32
    %c0_i32_1 = arith.constant 0 : i32
    return %c0_i32, %c0_i32_0 : i32, i32
  }
  func.func @transform_9(%arg0: i32) -> (i32, i32) {
    %c0_i32 = arith.constant 0 : i32
    %c0_i32_0 = arith.constant 0 : i32
    %c0_i32_1 = arith.constant 0 : i32
    return %c0_i32, %c0_i32_0 : i32, i32
  }
  func.func @transform_10(%arg0: i32) -> (i32, i32) {
    %c0_i32 = arith.constant 0 : i32
    %c0_i32_0 = arith.constant 0 : i32
    %c0_i32_1 = arith.constant 0 : i32
    return %c0_i32, %c0_i32_0 : i32, i32
  }
  func.func @transform_11(%arg0: i32) -> (i32, i32) {
    %c0_i32 = arith.constant 0 : i32
    %c0_i32_0 = arith.constant 0 : i32
    %c0_i32_1 = arith.constant 0 : i32
    return %c0_i32, %c0_i32_0 : i32, i32
  }
  func.func @transform_12(%arg0: i32) -> (i32, i32) {
    %c0_i32 = arith.constant 0 : i32
    %c0_i32_0 = arith.constant 0 : i32
    %c0_i32_1 = arith.constant 0 : i32
    return %c0_i32, %c0_i32_0 : i32, i32
  }
  func.func @transform_13(%arg0: i32) -> (i32, i32) {
    %c0_i32 = arith.constant 0 : i32
    %c0_i32_0 = arith.constant 0 : i32
    %c0_i32_1 = arith.constant 0 : i32
    return %c0_i32, %c0_i32_0 : i32, i32
  }
  func.func @transform_14(%arg0: i32) -> (i32, i32) {
    %c0_i32 = arith.constant 0 : i32
    %c0_i32_0 = arith.constant 0 : i32
    %c0_i32_1 = arith.constant 0 : i32
    return %c0_i32, %c0_i32_0 : i32, i32
  }
  func.func @transform_15(%arg0: i32) -> (i32, i32) {
    %c0_i32 = arith.constant 0 : i32
    %c0_i32_0 = arith.constant 0 : i32
    %c0_i32_1 = arith.constant 0 : i32
    return %c0_i32, %c0_i32_0 : i32, i32
  }
  func.func @transform_16(%arg0: i32) -> (i32, i32, i32) {
    %c0_i32 = arith.constant 0 : i32
    %c0_i32_0 = arith.constant 0 : i32
    %c0_i32_1 = arith.constant 0 : i32
    return %c0_i32, %arg0, %c0_i32_0 : i32, i32, i32
  }
}

module attributes {stable_mosaic.version = 11 : i64} {
  func.func @decoder_layer_kernel(%arg0: i32, %arg1: memref<8x2x128xf32, #tpu.memory_space<vmem>>, %arg2: memref<12x2x128xf32, #tpu.memory_space<vmem>>, %arg3: memref<128x384xbf16, #tpu.memory_space<vmem>>, %arg4: memref<1x384xf32, #tpu.memory_space<vmem>>, %arg5: memref<128x128xbf16, #tpu.memory_space<vmem>>, %arg6: memref<1x128xf32, #tpu.memory_space<vmem>>, %arg7: memref<128x128xbf16, #tpu.memory_space<vmem>>, %arg8: memref<1x128xf32, #tpu.memory_space<vmem>>, %arg9: memref<128x256xbf16, #tpu.memory_space<vmem>>, %arg10: memref<1x256xf32, #tpu.memory_space<vmem>>, %arg11: memref<128x128xbf16, #tpu.memory_space<vmem>>, %arg12: memref<1x128xf32, #tpu.memory_space<vmem>>, %arg13: memref<128x128xbf16, #tpu.memory_space<vmem>>, %arg14: memref<1x128xf32, #tpu.memory_space<vmem>>, %arg15: memref<128x128xbf16, #tpu.memory_space<vmem>>, %arg16: memref<1x128xf32, #tpu.memory_space<vmem>>, %arg17: memref<8x2x128xf32, #tpu.memory_space<vmem>>) attributes {dimension_semantics = [#tpu.dimension_semantics<parallel>], iteration_bounds = array<i64: 1>, scalar_prefetch = 0 : i64, scratch_operands = 0 : i64, tpu.core_type = #tpu.core_type<tc>, window_params = [{transform_indices = @transform_0, window_bounds = array<i64: 8, 2, 128>}, {transform_indices = @transform_1, window_bounds = array<i64: 12, 2, 128>}, {pipeline_mode = #tpu.pipeline_mode<synchronous>, transform_indices = @transform_2, window_bounds = array<i64: 128, 384>}, {pipeline_mode = #tpu.pipeline_mode<synchronous>, transform_indices = @transform_3, window_bounds = array<i64: 1, 384>}, {pipeline_mode = #tpu.pipeline_mode<synchronous>, transform_indices = @transform_4, window_bounds = array<i64: 128, 128>}, {pipeline_mode = #tpu.pipeline_mode<synchronous>, transform_indices = @transform_5, window_bounds = array<i64: 1, 128>}, {pipeline_mode = #tpu.pipeline_mode<synchronous>, transform_indices = @transform_6, window_bounds = array<i64: 128, 128>}, {pipeline_mode = #tpu.pipeline_mode<synchronous>, transform_indices = @transform_7, window_bounds = array<i64: 1, 128>}, {pipeline_mode = #tpu.pipeline_mode<synchronous>, transform_indices = @transform_8, window_bounds = array<i64: 128, 256>}, {pipeline_mode = #tpu.pipeline_mode<synchronous>, transform_indices = @transform_9, window_bounds = array<i64: 1, 256>}, {pipeline_mode = #tpu.pipeline_mode<synchronous>, transform_indices = @transform_10, window_bounds = array<i64: 128, 128>}, {pipeline_mode = #tpu.pipeline_mode<synchronous>, transform_indices = @transform_11, window_bounds = array<i64: 1, 128>}, {pipeline_mode = #tpu.pipeline_mode<synchronous>, transform_indices = @transform_12, window_bounds = array<i64: 128, 128>}, {pipeline_mode = #tpu.pipeline_mode<synchronous>, transform_indices = @transform_13, window_bounds = array<i64: 1, 128>}, {pipeline_mode = #tpu.pipeline_mode<synchronous>, transform_indices = @transform_14, window_bounds = array<i64: 128, 128>}, {pipeline_mode = #tpu.pipeline_mode<synchronous>, transform_indices = @transform_15, window_bounds = array<i64: 1, 128>}, {transform_indices = @transform_16, window_bounds = array<i64: 8, 2, 128>}]} {
    %c0 = arith.constant 0 : index
    %c0_0 = arith.constant 0 : index
    %c0_1 = arith.constant 0 : index
    %0 = vector.load %arg1[%c0, %c0_0, %c0_1] : memref<8x2x128xf32, #tpu.memory_space<vmem>>, vector<8x2x128xf32>
    %1 = tpu.transpose %0, [1, 0, 2] : vector<8x2x128xf32> -> vector<2x8x128xf32>
    %2 = vector.shape_cast %1 : vector<2x8x128xf32> to vector<16x128xf32>
    %c0_2 = arith.constant 0 : index
    %c0_3 = arith.constant 0 : index
    %c0_4 = arith.constant 0 : index
    %3 = vector.load %arg2[%c0_2, %c0_3, %c0_4] : memref<12x2x128xf32, #tpu.memory_space<vmem>>, vector<12x2x128xf32>
    %4 = tpu.transpose %3, [1, 0, 2] : vector<12x2x128xf32> -> vector<2x12x128xf32>
    %5 = vector.shape_cast %4 : vector<2x12x128xf32> to vector<24x128xf32>
    %6 = arith.truncf %2 : vector<16x128xf32> to vector<16x128xbf16>
    %c0_5 = arith.constant 0 : index
    %c0_6 = arith.constant 0 : index
    %7 = vector.load %arg3[%c0_5, %c0_6] : memref<128x384xbf16, #tpu.memory_space<vmem>>, vector<128x384xbf16>
    %cst = arith.constant dense<0.000000e+00> : vector<16x384xf32>
    %8 = tpu.matmul %6, %7, %cst {dimension_numbers = #tpu.dot_dimension_numbers<[1], [0], [0], [1], [0, 0, 1, 1], [], []>} : vector<16x128xbf16>, vector<128x384xbf16>, vector<16x384xf32> -> vector<16x384xf32>
    %c0_7 = arith.constant 0 : index
    %c0_8 = arith.constant 0 : index
    %9 = vector.load %arg4[%c0_7, %c0_8] : memref<1x384xf32, #tpu.memory_space<vmem>>, vector<1x384xf32>
    %10 = vector.broadcast %9 : vector<1x384xf32> to vector<16x384xf32>
    %11 = arith.addf %8, %10 : vector<16x384xf32>
    %12 = arith.truncf %11 : vector<16x384xf32> to vector<16x384xbf16>
    %13 = vector.extract_strided_slice %12 {offsets = [0, 0], sizes = [16, 128], strides = [1, 1]} : vector<16x384xbf16> to vector<16x128xbf16>
    %14 = vector.extract_strided_slice %12 {offsets = [0, 128], sizes = [16, 128], strides = [1, 1]} : vector<16x384xbf16> to vector<16x128xbf16>
    %15 = vector.extract_strided_slice %12 {offsets = [0, 256], sizes = [16, 128], strides = [1, 1]} : vector<16x384xbf16> to vector<16x128xbf16>
    %16 = vector.shape_cast %13 : vector<16x128xbf16> to vector<16x4x32xbf16>
    %17 = tpu.transpose %16, [1, 0, 2] : vector<16x4x32xbf16> -> vector<4x16x32xbf16>
    %18 = vector.shape_cast %17 : vector<4x16x32xbf16> to vector<8x8x32xbf16>
    %19 = vector.shape_cast %14 : vector<16x128xbf16> to vector<16x4x32xbf16>
    %20 = tpu.transpose %19, [1, 0, 2] : vector<16x4x32xbf16> -> vector<4x16x32xbf16>
    %21 = vector.shape_cast %20 : vector<4x16x32xbf16> to vector<8x8x32xbf16>
    %22 = vector.shape_cast %15 : vector<16x128xbf16> to vector<16x4x32xbf16>
    %23 = tpu.transpose %22, [1, 0, 2] : vector<16x4x32xbf16> -> vector<4x16x32xbf16>
    %24 = vector.shape_cast %23 : vector<4x16x32xbf16> to vector<8x8x32xbf16>
    "tpu.trace_start"() <{level = 10 : i32, message = "gqd,gkd->gqk"}> : () -> ()
    %cst_9 = arith.constant dense<0.000000e+00> : vector<8x8x8xf32>
    %25 = tpu.matmul %18, %21, %cst_9 {dimension_numbers = #tpu.dot_dimension_numbers<[2], [2], [1], [1], [0, 0, 0, 1, 1, 1], [0], [0]>} : vector<8x8x32xbf16>, vector<8x8x32xbf16>, vector<8x8x8xf32> -> vector<8x8x8xf32>
    "tpu.trace_stop"() : () -> ()
    %cst_10 = arith.constant dense<0xFF800000> : vector<8x8xf32>
    %26 = vector.multi_reduction <maximumf>, %25, %cst_10 [2] : vector<8x8x8xf32> to vector<8x8xf32>
    %27 = vector.shape_cast %26 : vector<8x8xf32> to vector<8x8x1xf32>
    %28 = vector.broadcast %27 : vector<8x8x1xf32> to vector<8x8x8xf32>
    %29 = arith.subf %25, %28 : vector<8x8x8xf32>
    %30 = math.exp %29 : vector<8x8x8xf32>
    %cst_11 = arith.constant dense<0.000000e+00> : vector<8x8xf32>
    %31 = vector.multi_reduction <add>, %30, %cst_11 [2] : vector<8x8x8xf32> to vector<8x8xf32>
    %32 = vector.shape_cast %31 : vector<8x8xf32> to vector<8x8x1xf32>
    %33 = tpu.reciprocal %32 {approx = true} : vector<8x8x1xf32> -> vector<8x8x1xf32>
    %34 = vector.broadcast %33 : vector<8x8x1xf32> to vector<8x8x8xf32>
    %35 = arith.mulf %30, %34 : vector<8x8x8xf32>
    %36 = arith.truncf %35 : vector<8x8x8xf32> to vector<8x8x8xbf16>
    "tpu.trace_start"() <{level = 10 : i32, message = "gqk,gkd->gqd"}> : () -> ()
    %cst_12 = arith.constant dense<0.000000e+00> : vector<8x8x32xf32>
    %37 = tpu.matmul %36, %24, %cst_12 {dimension_numbers = #tpu.dot_dimension_numbers<[2], [1], [1], [2], [0, 0, 0, 1, 1, 2], [0], [0]>} : vector<8x8x8xbf16>, vector<8x8x32xbf16>, vector<8x8x32xf32> -> vector<8x8x32xf32>
    "tpu.trace_stop"() : () -> ()
    %38 = arith.truncf %37 : vector<8x8x32xf32> to vector<8x8x32xbf16>
    %39 = vector.shape_cast %38 : vector<8x8x32xbf16> to vector<4x16x32xbf16>
    %40 = tpu.transpose %39, [1, 0, 2] : vector<4x16x32xbf16> -> vector<16x4x32xbf16>
    %41 = vector.shape_cast %40 : vector<16x4x32xbf16> to vector<16x128xbf16>
    %c0_13 = arith.constant 0 : index
    %c0_14 = arith.constant 0 : index
    %42 = vector.load %arg5[%c0_13, %c0_14] : memref<128x128xbf16, #tpu.memory_space<vmem>>, vector<128x128xbf16>
    %cst_15 = arith.constant dense<0.000000e+00> : vector<16x128xf32>
    %43 = tpu.matmul %41, %42, %cst_15 {dimension_numbers = #tpu.dot_dimension_numbers<[1], [0], [0], [1], [0, 0, 1, 1], [], []>} : vector<16x128xbf16>, vector<128x128xbf16>, vector<16x128xf32> -> vector<16x128xf32>
    %c0_16 = arith.constant 0 : index
    %c0_17 = arith.constant 0 : index
    %44 = vector.load %arg6[%c0_16, %c0_17] : memref<1x128xf32, #tpu.memory_space<vmem>>, vector<1x128xf32>
    %45 = vector.broadcast %44 : vector<1x128xf32> to vector<16x128xf32>
    %46 = arith.addf %43, %45 : vector<16x128xf32>
    %47 = arith.addf %2, %46 : vector<16x128xf32>
    %48 = arith.truncf %47 : vector<16x128xf32> to vector<16x128xbf16>
    %c0_18 = arith.constant 0 : index
    %c0_19 = arith.constant 0 : index
    %49 = vector.load %arg7[%c0_18, %c0_19] : memref<128x128xbf16, #tpu.memory_space<vmem>>, vector<128x128xbf16>
    %cst_20 = arith.constant dense<0.000000e+00> : vector<16x128xf32>
    %50 = tpu.matmul %48, %49, %cst_20 {dimension_numbers = #tpu.dot_dimension_numbers<[1], [0], [0], [1], [0, 0, 1, 1], [], []>} : vector<16x128xbf16>, vector<128x128xbf16>, vector<16x128xf32> -> vector<16x128xf32>
    %c0_21 = arith.constant 0 : index
    %c0_22 = arith.constant 0 : index
    %51 = vector.load %arg8[%c0_21, %c0_22] : memref<1x128xf32, #tpu.memory_space<vmem>>, vector<1x128xf32>
    %52 = vector.broadcast %51 : vector<1x128xf32> to vector<16x128xf32>
    %53 = arith.addf %50, %52 : vector<16x128xf32>
    %54 = arith.truncf %5 : vector<24x128xf32> to vector<24x128xbf16>
    %c0_23 = arith.constant 0 : index
    %c0_24 = arith.constant 0 : index
    %55 = vector.load %arg9[%c0_23, %c0_24] : memref<128x256xbf16, #tpu.memory_space<vmem>>, vector<128x256xbf16>
    %cst_25 = arith.constant dense<0.000000e+00> : vector<24x256xf32>
    %56 = tpu.matmul %54, %55, %cst_25 {dimension_numbers = #tpu.dot_dimension_numbers<[1], [0], [0], [1], [0, 0, 1, 1], [], []>} : vector<24x128xbf16>, vector<128x256xbf16>, vector<24x256xf32> -> vector<24x256xf32>
    %c0_26 = arith.constant 0 : index
    %c0_27 = arith.constant 0 : index
    %57 = vector.load %arg10[%c0_26, %c0_27] : memref<1x256xf32, #tpu.memory_space<vmem>>, vector<1x256xf32>
    %58 = vector.broadcast %57 : vector<1x256xf32> to vector<24x256xf32>
    %59 = arith.addf %56, %58 : vector<24x256xf32>
    %60 = arith.truncf %53 : vector<16x128xf32> to vector<16x128xbf16>
    %61 = arith.truncf %59 : vector<24x256xf32> to vector<24x256xbf16>
    %62 = vector.extract_strided_slice %61 {offsets = [0, 0], sizes = [24, 128], strides = [1, 1]} : vector<24x256xbf16> to vector<24x128xbf16>
    %63 = vector.extract_strided_slice %61 {offsets = [0, 128], sizes = [24, 128], strides = [1, 1]} : vector<24x256xbf16> to vector<24x128xbf16>
    %64 = vector.shape_cast %60 : vector<16x128xbf16> to vector<16x4x32xbf16>
    %65 = tpu.transpose %64, [1, 0, 2] : vector<16x4x32xbf16> -> vector<4x16x32xbf16>
    %66 = vector.shape_cast %65 : vector<4x16x32xbf16> to vector<8x8x32xbf16>
    %67 = vector.shape_cast %62 : vector<24x128xbf16> to vector<24x4x32xbf16>
    %68 = tpu.transpose %67, [1, 0, 2] : vector<24x4x32xbf16> -> vector<4x24x32xbf16>
    %69 = vector.shape_cast %68 : vector<4x24x32xbf16> to vector<8x12x32xbf16>
    %70 = vector.shape_cast %63 : vector<24x128xbf16> to vector<24x4x32xbf16>
    %71 = tpu.transpose %70, [1, 0, 2] : vector<24x4x32xbf16> -> vector<4x24x32xbf16>
    %72 = vector.shape_cast %71 : vector<4x24x32xbf16> to vector<8x12x32xbf16>
    "tpu.trace_start"() <{level = 10 : i32, message = "gqd,gkd->gqk"}> : () -> ()
    %cst_28 = arith.constant dense<0.000000e+00> : vector<8x8x12xf32>
    %73 = tpu.matmul %66, %69, %cst_28 {dimension_numbers = #tpu.dot_dimension_numbers<[2], [2], [1], [1], [0, 0, 0, 1, 1, 1], [0], [0]>} : vector<8x8x32xbf16>, vector<8x12x32xbf16>, vector<8x8x12xf32> -> vector<8x8x12xf32>
    "tpu.trace_stop"() : () -> ()
    %cst_29 = arith.constant dense<0xFF800000> : vector<8x8xf32>
    %74 = vector.multi_reduction <maximumf>, %73, %cst_29 [2] : vector<8x8x12xf32> to vector<8x8xf32>
    %75 = vector.shape_cast %74 : vector<8x8xf32> to vector<8x8x1xf32>
    %76 = vector.broadcast %75 : vector<8x8x1xf32> to vector<8x8x12xf32>
    %77 = arith.subf %73, %76 : vector<8x8x12xf32>
    %78 = math.exp %77 : vector<8x8x12xf32>
    %cst_30 = arith.constant dense<0.000000e+00> : vector<8x8xf32>
    %79 = vector.multi_reduction <add>, %78, %cst_30 [2] : vector<8x8x12xf32> to vector<8x8xf32>
    %80 = vector.shape_cast %79 : vector<8x8xf32> to vector<8x8x1xf32>
    %81 = tpu.reciprocal %80 {approx = true} : vector<8x8x1xf32> -> vector<8x8x1xf32>
    %82 = vector.broadcast %81 : vector<8x8x1xf32> to vector<8x8x12xf32>
    %83 = arith.mulf %78, %82 : vector<8x8x12xf32>
    %84 = arith.truncf %83 : vector<8x8x12xf32> to vector<8x8x12xbf16>
    "tpu.trace_start"() <{level = 10 : i32, message = "gqk,gkd->gqd"}> : () -> ()
    %cst_31 = arith.constant dense<0.000000e+00> : vector<8x8x32xf32>
    %85 = tpu.matmul %84, %72, %cst_31 {dimension_numbers = #tpu.dot_dimension_numbers<[2], [1], [1], [2], [0, 0, 0, 1, 1, 2], [0], [0]>} : vector<8x8x12xbf16>, vector<8x12x32xbf16>, vector<8x8x32xf32> -> vector<8x8x32xf32>
    "tpu.trace_stop"() : () -> ()
    %86 = arith.truncf %85 : vector<8x8x32xf32> to vector<8x8x32xbf16>
    %87 = vector.shape_cast %86 : vector<8x8x32xbf16> to vector<4x16x32xbf16>
    %88 = tpu.transpose %87, [1, 0, 2] : vector<4x16x32xbf16> -> vector<16x4x32xbf16>
    %89 = vector.shape_cast %88 : vector<16x4x32xbf16> to vector<16x128xbf16>
    %c0_32 = arith.constant 0 : index
    %c0_33 = arith.constant 0 : index
    %90 = vector.load %arg11[%c0_32, %c0_33] : memref<128x128xbf16, #tpu.memory_space<vmem>>, vector<128x128xbf16>
    %cst_34 = arith.constant dense<0.000000e+00> : vector<16x128xf32>
    %91 = tpu.matmul %89, %90, %cst_34 {dimension_numbers = #tpu.dot_dimension_numbers<[1], [0], [0], [1], [0, 0, 1, 1], [], []>} : vector<16x128xbf16>, vector<128x128xbf16>, vector<16x128xf32> -> vector<16x128xf32>
    %c0_35 = arith.constant 0 : index
    %c0_36 = arith.constant 0 : index
    %92 = vector.load %arg12[%c0_35, %c0_36] : memref<1x128xf32, #tpu.memory_space<vmem>>, vector<1x128xf32>
    %93 = vector.broadcast %92 : vector<1x128xf32> to vector<16x128xf32>
    %94 = arith.addf %91, %93 : vector<16x128xf32>
    %95 = arith.addf %47, %94 : vector<16x128xf32>
    %96 = arith.truncf %95 : vector<16x128xf32> to vector<16x128xbf16>
    %c0_37 = arith.constant 0 : index
    %c0_38 = arith.constant 0 : index
    %97 = vector.load %arg13[%c0_37, %c0_38] : memref<128x128xbf16, #tpu.memory_space<vmem>>, vector<128x128xbf16>
    %cst_39 = arith.constant dense<0.000000e+00> : vector<16x128xf32>
    %98 = tpu.matmul %96, %97, %cst_39 {dimension_numbers = #tpu.dot_dimension_numbers<[1], [0], [0], [1], [0, 0, 1, 1], [], []>} : vector<16x128xbf16>, vector<128x128xbf16>, vector<16x128xf32> -> vector<16x128xf32>
    %c0_40 = arith.constant 0 : index
    %c0_41 = arith.constant 0 : index
    %99 = vector.load %arg14[%c0_40, %c0_41] : memref<1x128xf32, #tpu.memory_space<vmem>>, vector<1x128xf32>
    %100 = vector.broadcast %99 : vector<1x128xf32> to vector<16x128xf32>
    %101 = arith.addf %98, %100 : vector<16x128xf32>
    %102 = arith.truncf %101 : vector<16x128xf32> to vector<16x128xbf16>
    %c0_42 = arith.constant 0 : index
    %c0_43 = arith.constant 0 : index
    %103 = vector.load %arg15[%c0_42, %c0_43] : memref<128x128xbf16, #tpu.memory_space<vmem>>, vector<128x128xbf16>
    %cst_44 = arith.constant dense<0.000000e+00> : vector<16x128xf32>
    %104 = tpu.matmul %102, %103, %cst_44 {dimension_numbers = #tpu.dot_dimension_numbers<[1], [0], [0], [1], [0, 0, 1, 1], [], []>} : vector<16x128xbf16>, vector<128x128xbf16>, vector<16x128xf32> -> vector<16x128xf32>
    %c0_45 = arith.constant 0 : index
    %c0_46 = arith.constant 0 : index
    %105 = vector.load %arg16[%c0_45, %c0_46] : memref<1x128xf32, #tpu.memory_space<vmem>>, vector<1x128xf32>
    %106 = vector.broadcast %105 : vector<1x128xf32> to vector<16x128xf32>
    %107 = arith.addf %104, %106 : vector<16x128xf32>
    %108 = arith.addf %95, %107 : vector<16x128xf32>
    %109 = vector.shape_cast %108 : vector<16x128xf32> to vector<2x8x128xf32>
    %110 = tpu.transpose %109, [1, 0, 2] : vector<2x8x128xf32> -> vector<8x2x128xf32>
    %c0_47 = arith.constant 0 : index
    %c0_48 = arith.constant 0 : index
    %c0_49 = arith.constant 0 : index
    %111 = vector.load %arg17[%c0_47, %c0_48, %c0_49] : memref<8x2x128xf32, #tpu.memory_space<vmem>>, vector<8x2x128xf32>
    tpu.vector_store %arg17[%c0_47, %c0_48, %c0_49], %110 {strides = array<i32>} : memref<8x2x128xf32, #tpu.memory_space<vmem>>, vector<8x2x128xf32>,
    return
  }
  func.func @transform_0(%arg0: i32) -> (i32, i32, i32) {
    %c0_i32 = arith.constant 0 : i32
    %c0_i32_0 = arith.constant 0 : i32
    %c0_i32_1 = arith.constant 0 : i32
    return %c0_i32, %arg0, %c0_i32_0 : i32, i32, i32
  }
  func.func @transform_1(%arg0: i32) -> (i32, i32, i32) {
    %c0_i32 = arith.constant 0 : i32
    %c0_i32_0 = arith.constant 0 : i32
    %c0_i32_1 = arith.constant 0 : i32
    return %c0_i32, %arg0, %c0_i32_0 : i32, i32, i32
  }
  func.func @transform_2(%arg0: i32) -> (i32, i32) {
    %c0_i32 = arith.constant 0 : i32
    %c0_i32_0 = arith.constant 0 : i32
    %c0_i32_1 = arith.constant 0 : i32
    return %c0_i32, %c0_i32_0 : i32, i32
  }
  func.func @transform_3(%arg0: i32) -> (i32, i32) {
    %c0_i32 = arith.constant 0 : i32
    %c0_i32_0 = arith.constant 0 : i32
    %c0_i32_1 = arith.constant 0 : i32
    return %c0_i32, %c0_i32_0 : i32, i32
  }
  func.func @transform_4(%arg0: i32) -> (i32, i32) {
    %c0_i32 = arith.constant 0 : i32
    %c0_i32_0 = arith.constant 0 : i32
    %c0_i32_1 = arith.constant 0 : i32
    return %c0_i32, %c0_i32_0 : i32, i32
  }
  func.func @transform_5(%arg0: i32) -> (i32, i32) {
    %c0_i32 = arith.constant 0 : i32
    %c0_i32_0 = arith.constant 0 : i32
    %c0_i32_1 = arith.constant 0 : i32
    return %c0_i32, %c0_i32_0 : i32, i32
  }
  func.func @transform_6(%arg0: i32) -> (i32, i32) {
    %c0_i32 = arith.constant 0 : i32
    %c0_i32_0 = arith.constant 0 : i32
    %c0_i32_1 = arith.constant 0 : i32
    return %c0_i32, %c0_i32_0 : i32, i32
  }
  func.func @transform_7(%arg0: i32) -> (i32, i32) {
    %c0_i32 = arith.constant 0 : i32
    %c0_i32_0 = arith.constant 0 : i32
    %c0_i32_1 = arith.constant 0 : i32
    return %c0_i32, %c0_i32_0 : i32, i32
  }
  func.func @transform_8(%arg0: i32) -> (i32, i32) {
    %c0_i32 = arith.constant 0 : i32
    %c0_i32_0 = arith.constant 0 : i32
    %c0_i32_1 = arith.constant 0 : i32
    return %c0_i32, %c0_i32_0 : i32, i32
  }
  func.func @transform_9(%arg0: i32) -> (i32, i32) {
    %c0_i32 = arith.constant 0 : i32
    %c0_i32_0 = arith.constant 0 : i32
    %c0_i32_1 = arith.constant 0 : i32
    return %c0_i32, %c0_i32_0 : i32, i32
  }
  func.func @transform_10(%arg0: i32) -> (i32, i32) {
    %c0_i32 = arith.constant 0 : i32
    %c0_i32_0 = arith.constant 0 : i32
    %c0_i32_1 = arith.constant 0 : i32
    return %c0_i32, %c0_i32_0 : i32, i32
  }
  func.func @transform_11(%arg0: i32) -> (i32, i32) {
    %c0_i32 = arith.constant 0 : i32
    %c0_i32_0 = arith.constant 0 : i32
    %c0_i32_1 = arith.constant 0 : i32
    return %c0_i32, %c0_i32_0 : i32, i32
  }
  func.func @transform_12(%arg0: i32) -> (i32, i32) {
    %c0_i32 = arith.constant 0 : i32
    %c0_i32_0 = arith.constant 0 : i32
    %c0_i32_1 = arith.constant 0 : i32
    return %c0_i32, %c0_i32_0 : i32, i32
  }
  func.func @transform_13(%arg0: i32) -> (i32, i32) {
    %c0_i32 = arith.constant 0 : i32
    %c0_i32_0 = arith.constant 0 : i32
    %c0_i32_1 = arith.constant 0 : i32
    return %c0_i32, %c0_i32_0 : i32, i32
  }
  func.func @transform_14(%arg0: i32) -> (i32, i32) {
    %c0_i32 = arith.constant 0 : i32
    %c0_i32_0 = arith.constant 0 : i32
    %c0_i32_1 = arith.constant 0 : i32
    return %c0_i32, %c0_i32_0 : i32, i32
  }
  func.func @transform_15(%arg0: i32) -> (i32, i32) {
    %c0_i32 = arith.constant 0 : i32
    %c0_i32_0 = arith.constant 0 : i32
    %c0_i32_1 = arith.constant 0 : i32
    return %c0_i32, %c0_i32_0 : i32, i32
  }
  func.func @transform_16(%arg0: i32) -> (i32, i32, i32) {
    %c0_i32 = arith.constant 0 : i32
    %c0_i32_0 = arith.constant 0 : i32
    %c0_i32_1 = arith.constant 0 : i32
    return %c0_i32, %arg0, %c0_i32_0 : i32, i32, i32
  }
}

</mosaic_0001>

<bundles_post_ra>
// kernel: tpu_custom_call.1
= control target key start
LH: loop header
LB: loop body
LE: loop exit
PB: predicated region body
PF: predicated region fallthrough
CT: control target
= control target key end

     0   :  { %s6609_s0 = inlined_call_operand.hbm [shape: f32[8,2,128], index: 0, kind: input, shape index: {}]   ;;  %s6610_s1 = inlined_call_operand.hbm [shape: f32[12,2,128], index: 1, kind: input, shape index: {}]   ;;  %s6611_s2 = inlined_call_operand.hbm [shape: bf16[128,384], index: 2, kind: input, shape index: {}]   ;;  %s6612_s3 = inlined_call_operand.hbm [shape: f32[1,384], index: 3, kind: input, shape index: {}]   ;;  %s6613_s4 = inlined_call_operand.hbm [shape: bf16[128,128], index: 4, kind: input, shape index: {}]   ;;  %s6614_s5 = inlined_call_operand.vmem [shape: f32[1,128], index: 5, kind: input, shape index: {}]   ;;  %s6615_s6 = inlined_call_operand.hbm [shape: bf16[128,128], index: 6, kind: input, shape index: {}]   ;;  %s6616_s7 = inlined_call_operand.vmem [shape: f32[1,128], index: 7, kind: input, shape index: {}]   ;;  %s6617_s8 = inlined_call_operand.hbm [shape: bf16[128,256], index: 8, kind: input, shape index: {}]   ;;  %s6618_s9 = inlined_call_operand.vmem [shape: f32[1,256], index: 9, kind: input, shape index: {}]   ;;  %s6619_s10 = inlined_call_operand.hbm [shape: bf16[128,128], index: 10, kind: input, shape index: {}]   ;;  %s6620_s11 = inlined_call_operand.vmem [shape: f32[1,128], index: 11, kind: input, shape index: {}]   ;;  %s6621_s12 = inlined_call_operand.hbm [shape: bf16[128,128], index: 12, kind: input, shape index: {}]   ;;  %s6622_s13 = inlined_call_operand.vmem [shape: f32[1,128], index: 13, kind: input, shape index: {}]   ;;  %s6623_s14 = inlined_call_operand.hbm [shape: bf16[128,128], index: 14, kind: input, shape index: {}]   ;;  %s6624_s15 = inlined_call_operand.vmem [shape: f32[1,128], index: 15, kind: input, shape index: {}]   ;;  %s6625_s16 = inlined_call_operand.hbm [shape: f32[8,2,128], index: 16, kind: output, shape index: {}]  }
   0x1   :  { %6626 = sst [smem:[#allocation27_spill]] %s6609_s0 }
   0x2   :  { %21 = vsyncpa [#allocation3], 0 }
   0x3   :  { %22 = vsyncpa [#allocation6], 0 }
   0x4   :  { %23 = vsyncpa [#allocation9], 0 }
   0x5   :  { %24 = vsyncpa [#allocation12], 0 }
   0x6   :  { %25 = vsyncpa [#allocation15], 0 }
   0x7   :  { %26 = vsyncpa [#allocation18], 0 }
   0x8   :  { %27 = vsyncpa [#allocation4], 0  ;;  %s45_s23 = sshll.u32 %s6610_s1, 4  ;;  %s5306_s24 = smov [#allocation5]   ;;  %s46_s23 = int_to_ptr.hbm [resolvable:$true] %s45_s23 }
   0x9   :  { %s47_s25 = sshll.u32 %s5306_s24, 4  ;;  %s72_s28 = sshll.u32 %s6612_s3, 4  ;;  %s48_s25 = int_to_ptr.vmem [resolvable:$true] %s47_s25  ;;  %s73_s28 = int_to_ptr.hbm [resolvable:$true] %s72_s28 }
   0xa   :  { %s5307_s29 = smov 32   ;;  %s5308_s30 = smov 2  }
   0xb   :  { %53 = dma.hbm_to_vmem [thread:$0]  %s46_s23, 384, %s48_s25, [#allocation6], %s5307_s29, %s5307_s29, %s5308_s30  }
   0xc   :  { %s5309_s0 = smov [#allocation8]   ;;  %s97_s19 = sshll.u32 %s6615_s6, 4  ;;  %s98_s19 = int_to_ptr.hbm [resolvable:$true] %s97_s19 }
   0xd   :  { %s74_s17 = sshll.u32 %s5309_s0, 4  ;;  %s5310_s20 = smov [#allocation11]   ;;  %s75_s17 = int_to_ptr.vmem [resolvable:$true] %s74_s17 }
   0xe   :  { %77 = dma.hbm_to_vmem [thread:$0]  %s73_s28, 48, %s75_s17, [#allocation9]  }
   0xf   :  { %s99_s21 = sshll.u32 %s5310_s20, 4  ;;  %s127_s24 = sshll.u32 %s6619_s10, 4  ;;  %s100_s21 = int_to_ptr.vmem [resolvable:$true] %s99_s21  ;;  %s128_s24 = int_to_ptr.hbm [resolvable:$true] %s127_s24 }
  0x10   :  { %s5311_s26 = smov 64   ;;  %s5312_s27 = smov 4  }
  0x11   :  { %105 = dma.hbm_to_vmem [thread:$0]  %s98_s19, 1024, %s100_s21, [#allocation12], %s5311_s26, %s5311_s26, %s5312_s27  }
  0x12   :  { %s5313_s23 = smov [#allocation14]   ;;  %s6627_s6 = sld [smem:[#allocation27_spill]] }
  0x13   :  { %s129_s25 = sshll.u32 %s5313_s23, 4  ;;  %s58_s18 = sshll.u32 %s6611_s2, 4  ;;  %s130_s25 = int_to_ptr.vmem [resolvable:$true] %s129_s25  ;;  %s59_s18 = int_to_ptr.hbm [resolvable:$true] %s58_s18 }
  0x14   :  { %135 = dma.hbm_to_vmem [thread:$0]  %s128_s24, 1024, %s130_s25, [#allocation15], %s5311_s26, %s5311_s26, %s5312_s27  }
  0x15   :  { %s5314_s20 = smov [#allocation2]   ;;  %s5315_s19 = smov [#allocation7]  }
  0x16   :  { %s34_s3 = sshll.u32 %s5314_s20, 4  ;;  %s60_s21 = sshll.u32 %s5315_s19, 4  ;;  %s35_s3 = int_to_ptr.vmem [resolvable:$true] %s34_s3  ;;  %s61_s21 = int_to_ptr.vmem [resolvable:$true] %s60_s21 }
  0x17   :  { %s5316_s22 = smov 192   ;;  %s5317_s23 = smov 12  }
  0x18   :  { %s32_s17 = sshll.u32 %s6627_s6, 4  ;;  %s82_s25 = sshll.u32 %s6613_s4, 4  ;;  %s33_s17 = int_to_ptr.hbm [resolvable:$true] %s32_s17  ;;  %s83_s25 = int_to_ptr.hbm [resolvable:$true] %s82_s25 }
  0x19   :  { %40 = dma.hbm_to_vmem [thread:$0]  %s33_s17, 256, %s35_s3, [#allocation3], %s5307_s29, %s5307_s29, %s5308_s30  }
  0x1a   :  { %66 = dma.hbm_to_vmem [thread:$0]  %s59_s18, 3072, %s61_s21, [#allocation6], %s5316_s22, %s5316_s22, %s5317_s23  }
  0x1b   :  { %s5318_s2 = smov [#allocation10]   ;;  %s112_s1 = sshll.u32 %s6617_s8, 4  ;;  %s113_s1 = int_to_ptr.hbm [resolvable:$true] %s112_s1 }
  0x1c   :  { %s84_s0 = sshll.u32 %s5318_s2, 4  ;;  %s5319_s17 = smov [#allocation13]   ;;  %s85_s0 = int_to_ptr.vmem [resolvable:$true] %s84_s0 }
  0x1d   :  { %90 = dma.hbm_to_vmem [thread:$0]  %s83_s25, 1024, %s85_s0, [#allocation9], %s5311_s26, %s5311_s26, %s5312_s27  }
  0x1e   :  { %s114_s20 = sshll.u32 %s5319_s17, 4  ;;  %s5320_s18 = smov 128   ;;  %s115_s20 = int_to_ptr.vmem [resolvable:$true] %s114_s20 }
  0x1f   :  { %s5321_s3 = smov 8   ;;  %s142_s21 = sshll.u32 %s6621_s12, 4  ;;  %s143_s21 = int_to_ptr.hbm [resolvable:$true] %s142_s21 }
  0x20   :  { %120 = dma.hbm_to_vmem [thread:$0]  %s113_s1, 2048, %s115_s20, [#allocation12], %s5320_s18, %s5320_s18, %s5321_s3  }
  0x21   :  { %s5322_s22 = smov [#allocation16]   ;;  %s157_s24 = sshll.u32 %s6623_s14, 4  ;;  %s158_s24 = int_to_ptr.hbm [resolvable:$true] %s157_s24 }
  0x22   :  { %s144_s23 = sshll.u32 %s5322_s22, 4  ;;  %s5323_s25 = smov [#allocation17]   ;;  %s145_s23 = int_to_ptr.vmem [resolvable:$true] %s144_s23 }
  0x23   :  { %150 = dma.hbm_to_vmem [thread:$0]  %s143_s21, 1024, %s145_s23, [#allocation15], %s5311_s26, %s5311_s26, %s5312_s27  }
  0x24   :  { %s159_s2 = sshll.u32 %s5323_s25, 4  ;;  %s160_s2 = int_to_ptr.vmem [resolvable:$true] %s159_s2 }
  0x25   :  { %165 = dma.hbm_to_vmem [thread:$0]  %s158_s24, 1024, %s160_s2, [#allocation18], %s5311_s26, %s5311_s26, %s5312_s27  }
  0x26   :  { %5292 = dma.done.wait [#allocation3], 256  }
  0x27   :  { %5293 = vsyncadd [#allocation3], 4294967040 }
  0x28   :  { %5294 = dma.done.wait [#allocation6], 3456  }
  0x29   :  { %5295 = vsyncadd [#allocation6], 4294963840 }
  0x2a   :  { %5296 = dma.done.wait [#allocation9], 1072  }
  0x2b   :  { %5297 = vsyncadd [#allocation9], 4294966224 }
  0x2c   :  { %5298 = dma.done.wait [#allocation12], 3072  }
  0x2d   :  { %5299 = vsyncadd [#allocation12], 4294964224 }
  0x2e   :  { %5300 = dma.done.wait [#allocation15], 2048  }
  0x2f   :  { %5301 = vsyncadd [#allocation15], 4294965248 }
  0x30   :  { %5302 = dma.done.wait [#allocation18], 1024  }
  0x31   :  { %5303 = vsyncadd [#allocation18], 4294966272  ;;  %v4587_v0 = vld [vmem:[#allocation7 + $0xa8] sm:$0xf]  ;;  %v4879_v1 = vld [vmem:[#allocation7 + $0xb0] sm:$0xf0] }
  0x32   :  { %v4878_v2 = vld [vmem:[#allocation7 + $0xac] sm:$0xf]  ;;  %v4588_v3 = vor.u32 %v4879_v1, %v4587_v0  ;;  %v4589_v4 = vld [vmem:[#allocation7 + $0xb4] sm:$0xf0]  ;;  %v4575_v5 = vld [vmem:[#allocation7 + $0x90] sm:$0xf] }
  0x33   :  { %v4876_v6 = vld [vmem:[#allocation7 + $0x98] sm:$0xf0]  ;;  %v4592_v7 = vor.u32 %v4878_v2, %v4589_v4  ;;  %v4875_v8 = vld [vmem:[#allocation7 + $0x94] sm:$0xf]  ;;  %v4577_v9 = vld [vmem:[#allocation7 + $0x9c] sm:$0xf0] }
  0x34   :  { %505 = vmatpush.bf16.msra.mxu0 %v4588_v3  ;;  %v4576_v10 = vor.u32 %v4876_v6, %v4575_v5  ;;  %v4580_v11 = vor.u32 %v4875_v8, %v4577_v9  ;;  %v4563_v12 = vld [vmem:[#allocation7 + $0x78] sm:$0xf]  ;;  %v4873_v13 = vld [vmem:[#allocation7 + $0x80] sm:$0xf0]  ;;  %v4872_v14 = vld [vmem:[#allocation7 + $0x7c] sm:$0xf] }
  0x35   :  { %519 = vmatpush.bf16.msra.mxu1 %v4592_v7  ;;  %v4565_v15 = vld [vmem:[#allocation7 + $0x84] sm:$0xf0]  ;;  %v4564_v16 = vor.u32 %v4873_v13, %v4563_v12  ;;  %v4551_v18 = vld [vmem:[#allocation7 + $0x60] sm:$0xf]  ;;  %v4870_v19 = vld [vmem:[#allocation7 + $0x68] sm:$0xf0] }
  0x36   :  { %v4568_v17 = vor.u32 %v4872_v14, %v4565_v15  ;;  %vm218_vm0 = vcmask 1047556   ;;  %v5324_v20 = vmov 1983009808   ;;  %v4869_v22 = vld [vmem:[#allocation7 + $0x64] sm:$0xf]  ;;  %v4552_v27 = vor.u32 %v4870_v19, %v4551_v18  ;;  %s5326_s12 = smov 96  }
  0x37   :  { %v221_v21 = vunpack.c.l.s4 %v5324_v20  ;;  %v4553_v23 = vld [vmem:[#allocation7 + $0x6c] sm:$0xf0]  ;;  %v4539_v24 = vld [vmem:[#allocation7 + $0x48] sm:$0xf]  ;;  %v4867_v25 = vld [vmem:[#allocation7 + $0x50] sm:$0xf0] }
  0x38   :  { %506 = vmatpush.bf16.msra.mxu0 %v4576_v10  ;;  %v209_v26 = vld [vmem:[#allocation2] sm:$0x3]  ;;  %v4866_v28 = vld [vmem:[#allocation7 + $0x4c] sm:$0xf]  ;;  %v210_v30 = vld [vmem:[#allocation2 + $0x2] sm:$0x3]  ;;  %v4556_v33 = vor.u32 %v4869_v22, %v4553_v23  ;;  %v4540_v44 = vor.u32 %v4867_v25, %v4539_v24 }
  0x39   :  { %520 = vmatpush.bf16.msra.mxu1 %v4580_v11  ;;  %v4541_v29 = vld [vmem:[#allocation7 + $0x54] sm:$0xf0]  ;;  %v211_v31 = vld [vmem:[#allocation2 + $0x4] sm:$0x3]  ;;  %v212_v32 = vld [vmem:[#allocation2 + $0x6] sm:$0x3]  ;;  %v5464_v37 = vunpack.c.0.s8 %v221_v21 }
  0x3a   :  { %v213_v34 = vld [vmem:[#allocation2 + $0x8] sm:$0x3]  ;;  %v214_v35 = vld [vmem:[#allocation2 + $0xa] sm:$0x3]  ;;  %v215_v36 = vld [vmem:[#allocation2 + $0xc] sm:$0x3]  ;;  %v4544_v56 = vor.u32 %v4866_v28, %v4541_v29 }
  0x3b   :  { %v216_v38 = vld [vmem:[#allocation2 + $0xe] sm:$0x3]  ;;  %v217_v39 = vrot.slane %v211_v31, 4  ;;  %v224_v40 = vrot.slane %v212_v32, 4  ;;  %v230_v41 = vrot.slane %v215_v36, 4  ;;  %vm1272_vm1 = vcmask 261120  }
  0x3c   :  { %507 = vmatpush.bf16.msra.mxu0 %v4564_v16  ;;  %v5325_v42 = vmov 1934713408   ;;  %v4527_v45 = vld [vmem:[#allocation7 + $0x30] sm:$0xf]  ;;  %v236_v46 = vrot.slane %v216_v38, 4  ;;  %vm1425_vm2 = vcmask 64512  }
  0x3d   :  { %521 = vmatpush.bf16.msra.mxu1 %v4568_v17  ;;  %v245_v43 = vunpack.c.l.s4 %v5325_v42  ;;  %v4595_v47 = vld [vmem:[#allocation7 + $0xb0] sm:$0xf]  ;;  %v4880_v48 = vld [vmem:[#allocation7 + $0xb8] sm:$0xf0]  ;;  %v219_v50 = vsel %vm218_vm0, %v217_v39, %v209_v26  ;;  %v225_v51 = vsel %vm218_vm0, %v224_v40, %v210_v30  ;;  %v231_v52 = vsel %vm218_vm0, %v230_v41, %v213_v34  ;;  %v4583_v54 = vld [vmem:[#allocation7 + $0x98] sm:$0xf] }
  0x3e   :  { %v4864_v49 = vld [vmem:[#allocation7 + $0x38] sm:$0xf0]  ;;  %v4596_v53 = vor.u32 %v4880_v48, %v4595_v47  ;;  %v4877_v55 = vld [vmem:[#allocation7 + $0xa0] sm:$0xf0]  ;;  %v4863_v57 = vld [vmem:[#allocation7 + $0x34] sm:$0xf]  ;;  %v223_v59 = vperm.slane %v219_v50, %v5464_v37  ;;  %v229_v60 = vperm.slane %v225_v51, %v5464_v37  ;;  %v237_v61 = vsel %vm218_vm0, %v236_v46, %v214_v35 }
  0x3f   :  { %v4529_v58 = vld [vmem:[#allocation7 + $0x3c] sm:$0xf0]  ;;  %v235_v63 = vperm.slane %v231_v52, %v5464_v37  ;;  %v241_v0 = vperm.slane %v237_v61, %v5464_v37  ;;  %v5474_v1 = vunpack.c.0.s8 %v245_v43  ;;  %v4584_v2 = vor.u32 %v4877_v55, %v4583_v54  ;;  %v4874_v3 = vld [vmem:[#allocation7 + $0x88] sm:$0xf0]  ;;  %v4515_v8 = vld [vmem:[#allocation7 + $0x18] sm:$0xf] }
  0x40   :  { %508 = vmatpush.bf16.msra.mxu0 %v4552_v27  ;;  %v4571_v62 = vld [vmem:[#allocation7 + $0x80] sm:$0xf]  ;;  %533 = vmatpush.bf16.msra.mxu2 %v4596_v53  ;;  %v242_v4 = vrot.slane %v229_v60, 4  ;;  %v4528_v5 = vor.u32 %v4864_v49, %v4527_v45  ;;  %v4532_v7 = vor.u32 %v4863_v57, %v4529_v58  ;;  %v4861_v9 = vld [vmem:[#allocation7 + $0x20] sm:$0xf0]  ;;  %vm1525_vm3 = vcmask 1043456  }
  0x41   :  { %522 = vmatpush.bf16.msra.mxu1 %v4556_v33  ;;  %v248_v6 = vrot.slane %v241_v0, 4  ;;  %v4860_v11 = vld [vmem:[#allocation7 + $0x1c] sm:$0xf]  ;;  %v4517_v12 = vld [vmem:[#allocation7 + $0x24] sm:$0xf0]  ;;  %v4572_v15 = vor.u32 %v4874_v3, %v4571_v62  ;;  %v4516_v19 = vor.u32 %v4861_v9, %v4515_v8  ;;  %vm1932_vm4 = vcmask 523264  }
  0x42   :  { %v243_v10 = vsel %vm218_vm0, %v242_v4, %v223_v59  ;;  %v4559_v17 = vld [vmem:[#allocation7 + $0x68] sm:$0xf]  ;;  %v4871_v18 = vld [vmem:[#allocation7 + $0x70] sm:$0xf0]  ;;  %v4520_v21 = vor.u32 %v4860_v11, %v4517_v12  ;;  %v4503_v22 = vld [vmem:[#allocation7] sm:$0xf] }
  0x43   :  { %v247_v13 = vperm.slane %v243_v10, %v5474_v1  ;;  %v249_v14 = vsel %vm218_vm0, %v248_v6, %v235_v63  ;;  %v4858_v23 = vld [vmem:[#allocation7 + $0x8] sm:$0xf0]  ;;  %v4857_v25 = vld [vmem:[#allocation7 + $0x4] sm:$0xf]  ;;  %v4505_v26 = vld [vmem:[#allocation7 + $0xc] sm:$0xf0]  ;;  %v4560_v27 = vor.u32 %v4871_v18, %v4559_v17 }
  0x44   :  { %509 = vmatpush.bf16.msra.mxu0 %v4540_v44  ;;  %534 = vmatpush.bf16.msra.mxu2 %v4584_v2  ;;  %v253_v16 = vperm.slane %v249_v14, %v5474_v1  ;;  %v4504_v28 = vor.u32 %v4858_v23, %v4503_v22  ;;  %v4508_v31 = vor.u32 %v4857_v25, %v4505_v26  ;;  %v4547_v33 = vld [vmem:[#allocation7 + $0x50] sm:$0xf]  ;;  %v4868_v34 = vld [vmem:[#allocation7 + $0x58] sm:$0xf0]  ;;  %v4535_v36 = vld [vmem:[#allocation7 + $0x38] sm:$0xf] }
  0x45   :  { %523 = vmatpush.bf16.msra.mxu1 %v4544_v56  ;;  %v256_v20 = vrot.slane %v247_v13, 4  ;;  %v4548_v35 = vor.u32 %v4868_v34, %v4547_v33  ;;  %v4865_v38 = vld [vmem:[#allocation7 + $0x40] sm:$0xf0]  ;;  %v4523_v40 = vld [vmem:[#allocation7 + $0x20] sm:$0xf]  ;;  %vm1935_vm5 = vcmask 785408  }
  0x46   :  { %v254_v24 = vrot.slane %v253_v16, 4  ;;  %v4536_v39 = vor.u32 %v4865_v38, %v4535_v36  ;;  %v4862_v41 = vld [vmem:[#allocation7 + $0x28] sm:$0xf0]  ;;  %v4511_v43 = vld [vmem:[#allocation7 + $0x8] sm:$0xf]  ;;  %vm2885_vm6 = vcmask 1041408  }
  0x47   :  { %v5484_v30 = vsel %vm218_vm0, %v253_v16, %v256_v20  ;;  %v4524_v42 = vor.u32 %v4862_v41, %v4523_v40  ;;  %v4859_v44 = vld [vmem:[#allocation7 + $0x10] sm:$0xf0]  ;;  %v5488_v46 = vld [vmem:[#allocation8] sm:$0x7]  ;;  %vm2889_vm7 = vcmask 1043458   ;;  %vm3708_vm8 = vcmask 1045504  }
  0x48   :  { %510 = vmatpush.bf16.msra.mxu0 %v4528_v5  ;;  %535 = vmatpush.bf16.msra.mxu2 %v4572_v15  ;;  %v5481_v29 = vsel %vm218_vm0, %v254_v24, %v247_v13  ;;  %v4512_v45 = vor.u32 %v4859_v44, %v4511_v43  ;;  %v371_v47 = vperm.slane %v5488_v46, 0  ;;  %v372_v48 = vperm.slane %v5488_v46, 1  ;;  %s4483_s3 = sshll.u32 %s6625_s16, 4  ;;  %s4484_s3 = int_to_ptr.hbm [resolvable:$true] %s4483_s3 }
  0x49   :  { %524 = vmatpush.bf16.msra.mxu1 %v4532_v7  ;;  %v336_v32 = vpack.c.bf16 %v5484_v30, %v5481_v29  ;;  %v373_v25 = vperm.slane %v5488_v46, 2  ;;  %vm3601_vm9 = vcmask 97280  }
  0x4c   :  { %511 = vmatpush.bf16.msra.mxu0 %v4516_v19  ;;  %536 = vmatpush.bf16.msra.mxu2 %v4560_v27 }
  0x4d   :  { %525 = vmatpush.bf16.msra.mxu1 %v4520_v21 }
  0x50   :  { %512 = vmatpush.bf16.msra.mxu0 %v4504_v28  ;;  %537 = vmatpush.bf16.msra.mxu2 %v4548_v35 }
  0x51   :  { %526 = vmatpush.bf16.msra.mxu1 %v4508_v31 }
  0x53   :  { %513 = vmatmul.bf16.vlgmr.msra.gmra.mxu0 %v336_v32 }
  0x54   :  { %527 = vmatmul.bf16.vlgmr.msra.gmra.mxu1 %v336_v32  ;;  %538 = vmatpush.bf16.msra.mxu2 %v4536_v39 }
  0x58   :  { %539 = vmatpush.bf16.msra.mxu2 %v4524_v42 }
  0x5c   :  { %540 = vmatpush.bf16.msra.mxu2 %v4512_v45 }
  0x5f   :  { %541 = vmatmul.bf16.vlgmr.msra.gmra.mxu2 %v336_v32 }
  0xd0   :  { %v514_v49 = vpop.f32.mrf.mxu0 }
  0xd1   :  { %v515_v50 = vadd.f32 %v514_v49, %v371_v47  ;;  %v528_v51 = vpop.f32.mrf.mxu1 }
  0xd2   :  { %v529_v52 = vadd.f32 %v528_v51, %v372_v48 }
  0xd4   :  { %v547_v53 = vpack.c.bf16 %v529_v52, %v515_v50 }
  0xd6   :  { %561 = vrot.lane.b32.xlu1 %v547_v53, %s5307_s29  ;;  %553 = vrot.lane.b32.xlu0 %v547_v53, %s5326_s12  ;;  %v794_v7 = vrot.slane %v547_v53, 4  ;;  %v568_v11 = vshrl.u32 %v547_v53, 16 }
  0xd8   :  { %v516_v54 = vpop.f32.mrf.mxu0  ;;  %v805_v19 = vshrl.u32 %v794_v7, 16 }
  0xd9   :  { %v517_v55 = vadd.f32 %v516_v54, %v371_v47  ;;  %v530_v56 = vpop.f32.mrf.mxu1 }
  0xda   :  { %v531_v57 = vadd.f32 %v530_v56, %v372_v48 }
  0xdc   :  { %v549_v58 = vpack.c.bf16 %v531_v57, %v517_v55 }
  0xde   :  { %559 = vrot.lane.b32.xlu2 %v549_v58, %s5311_s26  ;;  %555 = vrot.lane.b32.xlu1 %v549_v58, %s5326_s12  ;;  %v795_v15 = vrot.slane %v549_v58, 4  ;;  %v580_v24 = vshrl.u32 %v549_v58, 16 }
  0xdf   :  { %557 = vrot.lane.b32.xlu0 %v547_v53, %s5311_s26 }
  0xe0   :  { %v817_v32 = vshrl.u32 %v795_v15, 16 }
  0xe2   :  { %v542_v26 = vpop.f32.mrf.mxu2 }
  0xe3   :  { %v543_v36 = vadd.f32 %v542_v26, %v373_v25 }
  0xe5   :  { %v5524_v48 = vpack.c.bf16 %v543_v36, %v543_v36 }
  0xe6   :  { %563 = vrot.lane.b32.xlu2 %v549_v58, %s5307_s29 }
  0xe7   :  { %1032 = vrot.lane.b32.xlu1 %v5524_v48, %s5326_s12  ;;  %1036 = vrot.lane.b32.xlu0 %v5524_v48, %s5311_s26 }
 0x138   :  { %v560_v59 = vpop.permute.xlu2 %559 }
 0x139   :  { %v799_v62 = vrot.slane %v560_v59, 4  ;;  %v586_v2 = vshrl.u32 %v560_v59, 16 }
 0x13b   :  { %v823_v3 = vshrl.u32 %v799_v62, 16 }
 0x140   :  { %v564_v60 = vpop.permute.xlu2 %563 }
 0x141   :  { %v801_v61 = vrot.slane %v564_v60, 4  ;;  %v587_v63 = vshrl.u32 %v564_v60, 16  ;;  %v585_v4 = vpack.i.b16 %v564_v60, %v560_v59 }
 0x143   :  { %v824_v0 = vshrl.u32 %v801_v61, 16  ;;  %v588_v5 = vpack.i.b16 %v587_v63, %v586_v2  ;;  %v822_v6 = vpack.i.b16 %v801_v61, %v799_v62  ;;  %v651_v16 = vperm.slane %v585_v4, %v5464_v37 }
 0x145   :  { %v825_v8 = vpack.i.b16 %v824_v0, %v823_v3  ;;  %v677_v17 = vperm.slane %v588_v5, %v5464_v37  ;;  %v5503_v18 = vperm.slane %v822_v6, %v5464_v37  ;;  %v652_v33 = vrot.slane %v651_v16, 4 }
 0x147   :  { %v5506_v20 = vperm.slane %v825_v8, %v5464_v37  ;;  %v678_v34 = vrot.slane %v677_v17, 4  ;;  %v888_v35 = vrot.slane %v5503_v18, 4 }
 0x148   :  { %v5498_v9 = vpop.permute.xlu1 %561  ;;  %v554_v10 = vpop.permute.xlu0 %553 }
 0x149   :  { %v567_v12 = vpack.i.b16 %v554_v10, %v547_v53  ;;  %v569_v13 = vshrl.u32 %v554_v10, 16  ;;  %v796_v14 = vrot.slane %v554_v10, 4  ;;  %v800_v27 = vrot.slane %v5498_v9, 4 }
 0x14a   :  { %v914_v38 = vrot.slane %v5506_v20, 4  ;;  %v575_v39 = vshrl.u32 %v5498_v9, 16 }
 0x14b   :  { %v570_v21 = vpack.i.b16 %v569_v13, %v568_v11  ;;  %v804_v22 = vpack.i.b16 %v796_v14, %v794_v7  ;;  %v806_v23 = vshrl.u32 %v796_v14, 16  ;;  %v5511_v28 = vperm.slane %v567_v12, %v5464_v37 }
 0x14c   :  { %v5526_v49 = vshrl.u32 %v800_v27, 16 }
 0x14d   :  { %v807_v31 = vpack.i.b16 %v806_v23, %v805_v19  ;;  %v5519_v40 = vperm.slane %v570_v21, %v5464_v37  ;;  %v5522_v41 = vperm.slane %v804_v22, %v5464_v37  ;;  %v602_v50 = vrot.slane %v5511_v28, 4 }
 0x14f   :  { %v5530_v51 = vperm.slane %v807_v31, %v5464_v37  ;;  %v628_v57 = vrot.slane %v5519_v40, 4 }
 0x150   :  { %v556_v42 = vpop.permute.xlu1 %555 }
 0x151   :  { %v579_v43 = vpack.i.b16 %v556_v42, %v549_v58  ;;  %v581_v44 = vshrl.u32 %v556_v42, 16  ;;  %v797_v45 = vrot.slane %v556_v42, 4  ;;  %v558_v47 = vpop.permute.xlu0 %557  ;;  %v838_v58 = vrot.slane %v5522_v41, 4 }
 0x152   :  { %v574_v52 = vshrl.u32 %v558_v47, 16  ;;  %v573_v59 = vpack.i.b16 %v5498_v9, %v558_v47  ;;  %v798_v60 = vrot.slane %v558_v47, 4  ;;  %v864_v2 = vrot.slane %v5530_v51, 4 }
 0x153   :  { %v582_v53 = vpack.i.b16 %v581_v44, %v580_v24  ;;  %v646_v54 = vperm.slane %v579_v43, %v5464_v37  ;;  %v816_v55 = vpack.i.b16 %v797_v45, %v795_v15  ;;  %v818_v56 = vshrl.u32 %v797_v45, 16 }
 0x154   :  { %v576_v5 = vpack.i.b16 %v575_v39, %v574_v52  ;;  %v598_v13 = vperm.slane %v573_v59, %v5464_v37  ;;  %v810_v19 = vpack.i.b16 %v800_v27, %v798_v60  ;;  %v811_v21 = vshrl.u32 %v798_v60, 16 }
 0x155   :  { %v653_v61 = vsel %vm218_vm0, %v652_v33, %v646_v54  ;;  %v654_v62 = vrot.slane %v646_v54, 4  ;;  %v672_v63 = vperm.slane %v582_v53, %v5464_v37  ;;  %v819_v0 = vpack.i.b16 %v818_v56, %v817_v32 }
 0x156   :  { %v659_v3 = vperm.slane %v653_v61, %v5474_v1  ;;  %v882_v4 = vperm.slane %v816_v55, %v5464_v37  ;;  %v599_v27 = vrot.slane %v598_v13, 4 }
 0x157   :  { %v655_v6 = vsel %vm218_vm0, %v651_v16, %v654_v62  ;;  %v679_v7 = vsel %vm218_vm0, %v678_v34, %v672_v63  ;;  %v680_v8 = vrot.slane %v672_v63, 4  ;;  %v908_v9 = vperm.slane %v819_v0, %v5464_v37 }
 0x158   :  { %v663_v10 = vperm.slane %v655_v6, %v5474_v1  ;;  %v5550_v11 = vperm.slane %v679_v7, %v5474_v1  ;;  %v889_v12 = vsel %vm218_vm0, %v888_v35, %v882_v4  ;;  %v890_v15 = vrot.slane %v882_v4, 4 }
 0x159   :  { %v681_v14 = vsel %vm218_vm0, %v677_v17, %v680_v8  ;;  %v664_v16 = vrot.slane %v659_v3, 4  ;;  %v915_v24 = vsel %vm218_vm0, %v914_v38, %v908_v9  ;;  %v5561_v32 = vperm.slane %v889_v12, %v5474_v1 }
 0x15a   :  { %v666_v22 = vrot.slane %v663_v10, 4  ;;  %v689_v23 = vperm.slane %v681_v14, %v5474_v1  ;;  %v690_v26 = vrot.slane %v5550_v11, 4  ;;  %v891_v31 = vsel %vm218_vm0, %v5503_v18, %v890_v15 }
 0x15b   :  { %v916_v33 = vrot.slane %v908_v9, 4  ;;  %v603_v35 = vsel %vm218_vm0, %v598_v13, %v602_v50  ;;  %v899_v39 = vperm.slane %v891_v31, %v5474_v1  ;;  %v5571_v42 = vperm.slane %v915_v24, %v5474_v1 }
 0x15c   :  { %v667_v17 = vsel %vm218_vm0, 0, %v666_v22  ;;  %v5564_v34 = vrot.slane %v689_v23, 4  ;;  %v665_v18 = vsel %vm218_vm0, 0, %v664_v16  ;;  %v5577_v44 = vsel %vm218_vm0, %v666_v22, %v659_v3 }
 0x15d   :  { %v737_v36 = vrot.slane %v667_v17, 4  ;;  %v917_v38 = vsel %vm218_vm0, %v5506_v20, %v916_v33  ;;  %v691_v47 = vsel %vm218_vm0, 0, %v690_v26  ;;  %v900_v52 = vrot.slane %v5561_v32, 4 }
 0x15e   :  { %v693_v43 = vsel %vm218_vm0, 0, %v5564_v34  ;;  %v925_v45 = vperm.slane %v917_v38, %v5474_v1  ;;  %v902_v20 = vrot.slane %v899_v39, 4  ;;  %v601_v55 = vsel %vm218_vm0, %v599_v27, %v5511_v28 }
 0x15f   :  { %v738_v50 = vsel %vm218_vm0, %v737_v36, %v665_v18  ;;  %v756_v54 = vrot.slane %v693_v43, 4  ;;  %v611_v56 = vperm.slane %v603_v35, %v5474_v1  ;;  %v736_v59 = vperm.slane %v5577_v44, %v5464_v37 }
 0x160   :  { %v742_v53 = vperm.slane %v738_v50, %v5464_v37  ;;  %v926_v60 = vrot.slane %v5571_v42, 4  ;;  %v5591_v61 = vperm.slane %v601_v55, %v5474_v1  ;;  %v625_v62 = vperm.slane %v576_v5, %v5464_v37 }
 0x161   :  { %v903_v63 = vsel %vm218_vm0, 0, %v902_v20  ;;  %v928_v0 = vrot.slane %v925_v45, 4  ;;  %v5595_v3 = vrot.slane %v611_v56, 4  ;;  %v813_v4 = vpack.i.b16 %v5526_v49, %v811_v21 }
 0x162   :  { %v612_v28 = vrot.slane %v5591_v61, 4  ;;  %v626_v6 = vrot.slane %v625_v62, 4  ;;  %v629_v7 = vsel %vm218_vm0, %v625_v62, %v628_v57  ;;  %v835_v8 = vperm.slane %v810_v19, %v5464_v37 }
 0x163   :  { %v5603_v9 = vrot.slane %v742_v53, 4  ;;  %v5606_v5 = vsel %vm218_vm0, %v756_v54, %v691_v47  ;;  %v637_v10 = vperm.slane %v629_v7, %v5474_v1  ;;  %v861_v12 = vperm.slane %v813_v4, %v5464_v37 }
 0x164   :  { %v973_v13 = vrot.slane %v903_v63, 4  ;;  %v615_v49 = vsel %vm218_vm0, 0, %v5595_v3  ;;  %v627_v14 = vsel %vm218_vm0, %v626_v6, %v5519_v40  ;;  %v836_v15 = vrot.slane %v835_v8, 4 }
 0x165   :  { %v633_v57 = vperm.slane %v627_v14, %v5474_v1  ;;  %v640_v19 = vrot.slane %v637_v10, 4  ;;  %v839_v21 = vsel %vm218_vm0, %v835_v8, %v838_v58  ;;  %v862_v16 = vrot.slane %v861_v12, 4 }
 0x166   :  { %v613_v22 = vsel %vm218_vm0, 0, %v612_v28  ;;  %v837_v23 = vsel %vm218_vm0, %v836_v15, %v5522_v41  ;;  %v847_v24 = vperm.slane %v839_v21, %v5474_v1  ;;  %v865_v40 = vsel %vm218_vm0, %v861_v12, %v864_v2 }
 0x167   :  { %v641_v26 = vsel %vm218_vm0, 0, %v640_v19  ;;  %v699_v31 = vrot.slane %v615_v49, 4  ;;  %v843_v33 = vperm.slane %v837_v23, %v5474_v1  ;;  %v863_v58 = vsel %vm218_vm0, %v862_v16, %v5530_v51 }
 0x168   :  { %v850_v17 = vrot.slane %v847_v24, 4  ;;  %v869_v27 = vperm.slane %v863_v58, %v5474_v1  ;;  %v873_v35 = vperm.slane %v865_v40, %v5474_v1  ;;  %v901_v41 = vsel %vm218_vm0, 0, %v900_v52 }
 0x169   :  { %v638_v36 = vrot.slane %v633_v57, 4  ;;  %v718_v39 = vrot.slane %v641_v26, 4  ;;  %v848_v38 = vrot.slane %v843_v33, 4  ;;  %v927_v2 = vsel %vm218_vm0, 0, %v926_v60 }
 0x16a   :  { %v851_v18 = vsel %vm218_vm0, 0, %v850_v17  ;;  %v876_v43 = vrot.slane %v873_v35, 4  ;;  %v874_v45 = vrot.slane %v869_v27, 4  ;;  %v930_v47 = vsel %vm218_vm0, %v850_v17, %v843_v33 }
 0x16b   :  { %v935_v50 = vrot.slane %v851_v18, 4  ;;  %v849_v51 = vsel %vm218_vm0, 0, %v848_v38  ;;  %v929_v53 = vsel %vm218_vm0, 0, %v928_v0  ;;  %v968_v54 = vsel %vm218_vm0, %v902_v20, %v5561_v32 }
 0x16c   :  { %v877_v52 = vsel %vm218_vm0, 0, %v876_v43  ;;  %v875_v55 = vsel %vm218_vm0, 0, %v874_v45  ;;  %v949_v56 = vsel %vm218_vm0, %v876_v43, %v869_v27  ;;  %v974_v60 = vsel %vm218_vm0, %v973_v13, %v901_v41 }
 0x16d   :  { %v934_v62 = vperm.slane %v930_v47, %v5464_v37  ;;  %v936_v63 = vsel %vm218_vm0, %v935_v50, %v849_v51  ;;  %v954_v4 = vrot.slane %v877_v52, 4  ;;  %v978_v28 = vperm.slane %v974_v60, %v5464_v37 }
 0x16e   :  { %v940_v6 = vperm.slane %v936_v63, %v5464_v37  ;;  %v972_v7 = vperm.slane %v968_v54, %v5464_v37  ;;  %v987_v32 = vsel %vm218_vm0, %v928_v0, %v5571_v42  ;;  %v992_v20 = vrot.slane %v929_v53, 4 }
 0x16f   :  { %v953_v8 = vperm.slane %v949_v56, %v5464_v37  ;;  %v955_v10 = vsel %vm218_vm0, %v954_v4, %v875_v55  ;;  %v979_v12 = vrot.slane %v978_v28, 4  ;;  %v639_v13 = vsel %vm218_vm0, 0, %v638_v36 }
 0x170   :  { %v941_v49 = vrot.slane %v940_v6, 4  ;;  %v959_v14 = vperm.slane %v955_v10, %v5464_v37  ;;  %v991_v15 = vperm.slane %v987_v32, %v5464_v37  ;;  %v993_v21 = vsel %vm218_vm0, %v992_v20, %v927_v2 }
 0x171   :  { %v980_v16 = vsel %vm218_vm0, %v979_v12, %v972_v7  ;;  %v997_v23 = vperm.slane %v993_v21, %v5464_v37  ;;  %v694_v42 = vsel %vm218_vm0, %v5595_v3, %v5591_v61  ;;  %v700_v0 = vsel %vm218_vm0, %v699_v31, %v613_v22 }
 0x172   :  { %v942_v24 = vsel %vm218_vm0, %v941_v49, %v934_v62  ;;  %v960_v40 = vrot.slane %v959_v14, 4  ;;  %v984_v26 = vperm.slane %v980_v16, %v5474_v1  ;;  %v704_v33 = vperm.slane %v700_v0, %v5464_v37  ;;  %v544_v16 = vpop.f32.mrf.mxu2 }
 0x173   :  { %v946_v58 = vperm.slane %v942_v24, %v5474_v1  ;;  %v998_v17 = vrot.slane %v997_v23, 4  ;;  %v713_v27 = vsel %vm218_vm0, %v640_v19, %v633_v57  ;;  %v719_v35 = vsel %vm218_vm0, %v718_v39, %v639_v13 }
 0x174   :  { %v961_v41 = vsel %vm218_vm0, %v960_v40, %v953_v8  ;;  %v985_v36 = vrot.slane %v984_v26, 4  ;;  %v698_v61 = vperm.slane %v694_v42, %v5464_v37  ;;  %v705_v3 = vrot.slane %v704_v33, 4 }
 0x175   :  { %v965_v22 = vperm.slane %v961_v41, %v5474_v1  ;;  %v999_v31 = vsel %vm218_vm0, %v998_v17, %v991_v15  ;;  %v947_v38 = vrot.slane %v946_v58, 4  ;;  %v723_v2 = vperm.slane %v719_v35, %v5464_v37 }
 0x176   :  { %v1003_v18 = vperm.slane %v999_v31, %v5474_v1  ;;  %v706_v57 = vsel %vm218_vm0, %v705_v3, %v698_v61  ;;  %v717_v19 = vperm.slane %v713_v27, %v5464_v37  ;;  %v1021_v45 = vshrl.u32 %v984_v26, 16 }
 0x177   :  { %v1008_v39 = vpack.i.b16 %v965_v22, %v946_v58  ;;  %v966_v43 = vrot.slane %v965_v22, 4  ;;  %v986_v47 = vsel %vm218_vm0, 0, %v985_v36  ;;  %v5678_v51 = vsel %vm218_vm0, 0, %v947_v38 }
 0x178   :  { %v1020_v50 = vpack.i.b16 %v1003_v18, %v984_v26  ;;  %v1022_v53 = vshrl.u32 %v1003_v18, 16  ;;  %v1004_v54 = vrot.slane %v1003_v18, 4  ;;  %v5683_v56 = vperm.slane %v706_v57, %v5474_v1 }
 0x179   :  { %v1277_v52 = vsel %vm1272_vm1, %v1008_v39, 0  ;;  %v967_v55 = vsel %vm218_vm0, 0, %v966_v43  ;;  %v724_v60 = vrot.slane %v723_v2, 4  ;;  %v1009_v28 = vshrl.u32 %v946_v58, 16 }
 0x17a   :  { %1286 = vmatpush.bf16.xpose.msra.mxu3 %v1277_v52  ;;  %v1296_v62 = vsel %vm1272_vm1, %v1020_v50, 0  ;;  %v1014_v63 = vpack.i.b16 %v967_v55, %v5678_v51  ;;  %v1023_v4 = vpack.i.b16 %v1022_v53, %v1021_v45  ;;  %v1005_v6 = vsel %vm218_vm0, 0, %v1004_v54 }
 0x17b   :  { %v725_v7 = vsel %vm218_vm0, %v724_v60, %v717_v19  ;;  %v1027_v32 = vshrl.u32 %v986_v47, 16  ;;  %v1010_v20 = vshrl.u32 %v965_v22, 16  ;;  %v1026_v12 = vpack.i.b16 %v1005_v6, %v986_v47 }
 0x17c   :  { %v1353_v8 = vsel %vm1272_vm1, %v1014_v63, 0  ;;  %v1334_v10 = vsel %vm1272_vm1, %v1023_v4, 0  ;;  %v729_v13 = vperm.slane %v725_v7, %v5474_v1  ;;  %v1028_v49 = vshrl.u32 %v1005_v6, 16 }
 0x17d   :  { %1362 = vmatpush.bf16.xpose.msrb.mxu1 %v1353_v8  ;;  %1343 = vmatpush.bf16.xpose.msrb.mxu2 %v1334_v10  ;;  %v1011_v14 = vpack.i.b16 %v1010_v20, %v1009_v28  ;;  %v711_v15 = vrot.slane %v5683_v56, 4  ;;  %v744_v21 = vsel %vm218_vm0, %v5603_v9, %v736_v59  ;;  %v1372_v23 = vsel %vm1272_vm1, %v1026_v12, 0 }
 0x17e   :  { %v730_v42 = vrot.slane %v729_v13, 4  ;;  %v751_v0 = vsel %vm218_vm0, %v5564_v34, %v5550_v11  ;;  %v772_v24 = vpack.i.b16 %v729_v13, %v5683_v56  ;;  %v1029_v40 = vpack.i.b16 %v1028_v49, %v1027_v32 }
 0x17f   :  { %v748_v26 = vperm.slane %v744_v21, %v5474_v1  ;;  %v761_v44 = vperm.slane %v5606_v5, %v5464_v37  ;;  %v545_v59 = vadd.f32 %v544_v16, %v373_v25  ;;  %v1315_v11 = vsel %vm1272_vm1, %v1011_v14, 0 }
 0x180   :  { %v731_v33 = vsel %vm218_vm0, 0, %v730_v42  ;;  %v1410_v9 = vsel %vm1272_vm1, %v1029_v40, 0  ;;  %v712_v34 = vsel %vm218_vm0, 0, %v711_v15  ;;  %v755_v58 = vperm.slane %v751_v0, %v5464_v37 }
 0x181   :  { %4597 = vmatmul.msk.bf16.vlgmr.msra.gmra.mxu3 %vm1272_vm1, %v772_v24  ;;  %1419 = vmatpush.bf16.xpose.msrb.mxu0 %v1410_v9  ;;  %v778_v17 = vpack.i.b16 %v731_v33, %v712_v34  ;;  %v762_v27 = vrot.slane %v761_v44, 4  ;;  %v5714_v35 = vpack.c.bf16 %v545_v59, %v545_v59  ;;  %v749_v5 = vrot.slane %v748_v26, 4  ;;  %v5752_v44 = vpop.permute.xlu0 %1036 }
 0x182   :  { %1305 = vmatpush.bf16.xpose.msrb.mxu3 %v1296_v62  ;;  %v785_v41 = vshrl.u32 %v748_v26, 16  ;;  %v1016_v22 = vshrl.u32 %v967_v55, 16  ;;  %v1015_v57 = vshrl.u32 %v5678_v51, 16  ;;  %v774_v50 = vshrl.u32 %v729_v13, 16 }
 0x183   :  { %v763_v46 = vsel %vm218_vm0, %v762_v27, %v755_v58  ;;  %1034 = vrot.lane.b32.xlu2 %v5714_v35, %s5326_s12  ;;  %v750_v61 = vsel %vm218_vm0, 0, %v749_v5  ;;  %v773_v53 = vshrl.u32 %v5683_v56, 16  ;;  %v780_v51 = vshrl.u32 %v731_v33, 16 }
 0x184   :  { %4601 = vmatmul.msk.bf16.vlgmr.msrb.gmra.mxu1 %vm1272_vm1, %v778_v17  ;;  %v767_v25 = vperm.slane %v763_v46, %v5474_v1  ;;  %v791_v2 = vshrl.u32 %v750_v61, 16  ;;  %v1017_v39 = vpack.i.b16 %v1016_v22, %v1015_v57  ;;  %v779_v52 = vshrl.u32 %v712_v34, 16 }
 0x185   :  { %1381 = vmatpush.bf16.xpose.msra.mxu2 %v1372_v23  ;;  %v775_v54 = vpack.i.b16 %v774_v50, %v773_v53 }
 0x186   :  { %v786_v36 = vshrl.u32 %v767_v25, 16  ;;  %v768_v3 = vrot.slane %v767_v25, 4  ;;  %v784_v43 = vpack.i.b16 %v767_v25, %v748_v26  ;;  %v1391_v45 = vsel %vm1272_vm1, %v1017_v39, 0 }
 0x187   :  { %v781_v55 = vpack.i.b16 %v780_v51, %v779_v52 }
 0x188   :  { %v787_v31 = vpack.i.b16 %v786_v36, %v785_v41  ;;  %v769_v38 = vsel %vm218_vm0, 0, %v768_v3 }
 0x189   :  { %v792_v18 = vshrl.u32 %v769_v38, 16  ;;  %v790_v47 = vpack.i.b16 %v769_v38, %v750_v61  ;;  %v5758_v61 = vpop.permute.xlu1 %1032 }
 0x18a   :  { %1324 = vmatpush.bf16.xpose.msra.mxu3 %v1315_v11  ;;  %4600 = vmatmul.msk.bf16.vlgmr.msrb.gmra.mxu2 %vm1272_vm1, %v787_v31 }
 0x18b   :  { %v793_v19 = vpack.i.b16 %v792_v18, %v791_v2 }
 0x18d   :  { %4604 = vmatmul.msk.bf16.vlgmr.msrb.gmra.mxu0 %vm1272_vm1, %v793_v19 }
 0x191   :  { %4598 = vmatmul.msk.bf16.vlgmr.msrb.gmra.mxu3 %vm1272_vm1, %v784_v43 }
 0x192   :  { %1400 = vmatpush.bf16.xpose.msrb.mxu3 %v1391_v45 }
 0x19a   :  { %4602 = vmatmul.msk.bf16.vlgmr.msra.gmra.mxu2 %vm1272_vm1, %v790_v47  ;;  %v1059_v47 = vshrl.u32 %v5714_v35, 16 }
 0x1a1   :  { %4599 = vmatmul.msk.bf16.vlgmr.msra.gmra.mxu3 %vm1272_vm1, %v775_v54 }
 0x1b1   :  { %4603 = vmatmul.msk.bf16.vlgmr.msrb.gmra.mxu3 %vm1272_vm1, %v781_v55 }
 0x1dd   :  { %v1035_v26 = vpop.permute.xlu2 %1034 }
 0x1de   :  { %v1060_v50 = vshrl.u32 %v1035_v26, 16  ;;  %v1058_v54 = vpack.i.b16 %v1035_v26, %v5714_v35 }
 0x1e0   :  { %v1061_v52 = vpack.i.b16 %v1060_v50, %v1059_v47 }
 0x201   :  { %v1364_v60 = vpop.f32.mrf.mxu1 }
 0x202   :  { %v1438_v62 = vsel %vm1425_vm2, %v1364_v60, -inf }
 0x203   :  { %1439 = vmax.xlane.f32.xlu2 %v1438_v62 }
 0x204   :  { %v1288_v63 = vpop.f32.mrf.mxu3 }
 0x205   :  { %v1426_v28 = vsel %vm1425_vm2, %v1288_v63, -inf }
 0x209   :  { %v1366_v4 = vpop.f32.mrf.mxu1 }
 0x20a   :  { %v5734_v6 = vpop.f32.mrf.mxu0 }
 0x20b   :  { %1427 = vmax.xlane.f32.xlu2 %v1426_v28  ;;  %v1447_v56 = vsel %vm1425_vm2, %v5734_v6, -inf }
 0x20c   :  { %v1290_v7 = vpop.f32.mrf.mxu3  ;;  %1448 = vmax.xlane.f32.xlu0 %v1447_v56 }
 0x20d   :  { %v1345_v32 = vpop.f32.mrf.mxu2 }
 0x20e   :  { %v1435_v20 = vsel %vm1425_vm2, %v1345_v32, -inf }
 0x212   :  { %v1423_v8 = vpop.f32.mrf.mxu0 }
 0x213   :  { %1436 = vmax.xlane.f32.xlu2 %v1435_v20 }
 0x214   :  { %v1307_v10 = vpop.f32.mrf.mxu3 }
 0x215   :  { %v1429_v12 = vsel %vm1425_vm2, %v1307_v10, -inf  ;;  %v1347_v13 = vpop.f32.mrf.mxu2 }
 0x216   :  { %1430 = vmax.xlane.f32.xlu0 %v1429_v12 }
 0x21c   :  { %v1309_v49 = vpop.f32.mrf.mxu3 }
 0x21d   :  { %v1383_v14 = vpop.f32.mrf.mxu2 }
 0x21e   :  { %v1441_v15 = vsel %vm1425_vm2, %v1383_v14, -inf }
 0x21f   :  { %1442 = vmax.xlane.f32.xlu0 %v1441_v15 }
 0x224   :  { %v1326_v21 = vpop.f32.mrf.mxu3 }
 0x225   :  { %v1432_v16 = vsel %vm1425_vm2, %v1326_v21, -inf  ;;  %v1385_v23 = vpop.f32.mrf.mxu2 }
 0x226   :  { %1433 = vmax.xlane.f32.xlu1 %v1432_v16 }
 0x22b   :  { %1042 = vrot.lane.b32.xlu2 %v5714_v35, %s5307_s29 }
 0x22c   :  { %v1328_v42 = vpop.f32.mrf.mxu3 }
 0x233   :  { %1038 = vrot.lane.b32.xlu0 %v5714_v35, %s5311_s26  ;;  %v1150_v35 = vperm.slane %v1061_v52, %v5464_v37 }
 0x234   :  { %v5746_v0 = vpop.f32.mrf.mxu3 }
 0x235   :  { %v1444_v24 = vsel %vm1425_vm2, %v5746_v0, -inf  ;;  %v1158_v15 = vrot.slane %v1150_v35, 4 }
 0x236   :  { %1445 = vmax.xlane.f32.xlu1 %v1444_v24 }
 0x23c   :  { %v1404_v40 = vpop.f32.mrf.mxu3 }
 0x24f   :  { %1040 = vrot.lane.b32.xlu1 %v5524_v48, %s5307_s29 }
 0x276   :  { %v1440_v33 = vpop.xlane.xlu2 %1439 }
 0x277   :  { %v1454_v22 = vsub.f32 %v1364_v60, %v1440_v33 }
 0x279   :  { %v1466_v38 = vmul.f32 1.442695, %v1454_v22 }
 0x27e   :  { %v1428_v59 = vpop.xlane.xlu2 %1427 }
 0x27f   :  { %v1450_v9 = vsub.f32 %v1288_v63, %v1428_v59  ;;  %v1449_v11 = vpop.xlane.xlu0 %1448  ;;  %v1124_v63 = vperm.slane %v1058_v54, %v5464_v37 }
 0x280   :  { %v1457_v60 = vsub.f32 %v5734_v6, %v1449_v11 }
 0x281   :  { %v1458_v34 = vmul.f32 1.442695, %v1450_v9  ;;  %v1132_v6 = vrot.slane %v1124_v63, 4 }
 0x282   :  { %v1472_v8 = vmul.f32 1.442695, %v1457_v60 }
 0x283   :  { %4964 = vpow2.f32 %v1458_v34 }
 0x286   :  { %v1437_v17 = vpop.xlane.xlu2 %1436 }
 0x287   :  { %v1453_v25 = vsub.f32 %v1345_v32, %v1437_v17 }
 0x289   :  { %v5754_v58 = vpop.eup %4964  ;;  %v1431_v27 = vpop.xlane.xlu0 %1430  ;;  %v1464_v36 = vmul.f32 1.442695, %v1453_v25 }
 0x28a   :  { %v1451_v5 = vsub.f32 %v1307_v10, %v1431_v27  ;;  %v1474_v46 = vsel %vm1425_vm2, %v5754_v58, 0.0 }
 0x28b   :  { %1475 = vadd.xlane.f32.xlu2 %v1474_v46 }
 0x28c   :  { %v1460_v41 = vmul.f32 1.442695, %v1451_v5 }
 0x28e   :  { %4966 = vpow2.f32 %v1460_v41  ;;  %v1043_v62 = vpop.permute.xlu2 %1042 }
 0x28f   :  { %4968 = vpow2.f32 %v1464_v36  ;;  %v1066_v7 = vshrl.u32 %v1043_v62, 16 }
 0x290   :  { %4970 = vpow2.f32 %v1466_v38 }
 0x292   :  { %v1443_v2 = vpop.xlane.xlu0 %1442 }
 0x293   :  { %v1455_v39 = vsub.f32 %v1383_v14, %v1443_v2 }
 0x294   :  { %v5760_v3 = vpop.eup %4966 }
 0x295   :  { %v1477_v31 = vsel %vm1425_vm2, %v5760_v3, 0.0  ;;  %v5764_v57 = vpop.eup %4968  ;;  %v1468_v53 = vmul.f32 1.442695, %v1455_v39 }
 0x296   :  { %1478 = vadd.xlane.f32.xlu1 %v1477_v31  ;;  %v1483_v45 = vsel %vm1425_vm2, %v5764_v57, 0.0  ;;  %v5770_v51 = vpop.eup %4970 }
 0x297   :  { %v1486_v28 = vsel %vm1425_vm2, %v5770_v51, 0.0 }
 0x299   :  { %v1434_v18 = vpop.xlane.xlu1 %1433 }
 0x29a   :  { %v1452_v19 = vsub.f32 %v1326_v21, %v1434_v18 }
 0x29c   :  { %v1462_v43 = vmul.f32 1.442695, %v1452_v19 }
 0x29e   :  { %4972 = vpow2.f32 %v1462_v43  ;;  %1484 = vadd.xlane.f32.xlu1 %v1483_v45 }
 0x29f   :  { %4974 = vpow2.f32 %v1468_v53 }
 0x2a0   :  { %4976 = vpow2.f32 %v1472_v8  ;;  %v1046_v8 = vpack.i.b16 %v5758_v61, %v5524_v48 }
 0x2a4   :  { %v5772_v55 = vpop.eup %4972 }
 0x2a5   :  { %v1480_v4 = vsel %vm1425_vm2, %v5772_v55, 0.0  ;;  %v1039_v56 = vpop.permute.xlu0 %1038  ;;  %v5782_v49 = vpop.eup %4974 }
 0x2a6   :  { %1481 = vadd.xlane.f32.xlu0 %v1480_v4  ;;  %1487 = vadd.xlane.f32.xlu1 %v1486_v28  ;;  %v1064_v32 = vpack.i.b16 %v1043_v62, %v1039_v56  ;;  %v1065_v20 = vshrl.u32 %v1039_v56, 16  ;;  %v1489_v59 = vsel %vm1425_vm2, %v5782_v49, 0.0  ;;  %v5797_v41 = vpop.eup %4976  ;;  %v1047_v62 = vshrl.u32 %v5524_v48, 16 }
 0x2a7   :  { %v1495_v47 = vsel %vm1425_vm2, %v5797_v41, 0.0 }
 0x2a8   :  { %v1067_v10 = vpack.i.b16 %v1066_v7, %v1065_v20  ;;  %v1129_v12 = vperm.slane %v1064_v32, %v5464_v37 }
 0x2a9   :  { %v1446_v13 = vpop.xlane.xlu1 %1445 }
 0x2aa   :  { %v1456_v14 = vsub.f32 %v5746_v0, %v1446_v13  ;;  %v1130_v21 = vrot.slane %v1129_v12, 4  ;;  %v1133_v16 = vsel %vm218_vm0, %v1129_v12, %v1132_v6  ;;  %v1155_v23 = vperm.slane %v1067_v10, %v5464_v37 }
 0x2ab   :  { %v1141_v42 = vperm.slane %v1133_v16, %v5474_v1 }
 0x2ac   :  { %v1470_v24 = vmul.f32 1.442695, %v1456_v14  ;;  %v1131_v40 = vsel %vm218_vm0, %v1130_v21, %v1124_v63  ;;  %v1156_v26 = vrot.slane %v1155_v23, 4  ;;  %v1159_v33 = vsel %vm218_vm0, %v1155_v23, %v1158_v15 }
 0x2ad   :  { %v1137_v0 = vperm.slane %v1131_v40, %v5474_v1  ;;  %v1144_v9 = vrot.slane %v1141_v42, 4  ;;  %v1167_v11 = vperm.slane %v1159_v33, %v5474_v1  ;;  %v1048_v63 = vshrl.u32 %v5758_v61, 16 }
 0x2ae   :  { %4978 = vpow2.f32 %v1470_v24  ;;  %1490 = vadd.xlane.f32.xlu0 %v1489_v59  ;;  %v1157_v34 = vsel %vm218_vm0, %v1156_v26, %v1150_v35  ;;  %v1072_v42 = vperm.slane %v1046_v8, %v5464_v37  ;;  %v1053_v61 = vshrl.u32 %v5752_v44, 16 }
 0x2af   :  { %v1142_v17 = vrot.slane %v1137_v0, 4  ;;  %v1145_v27 = vsel %vm218_vm0, 0, %v1144_v9  ;;  %v1163_v5 = vperm.slane %v1157_v34, %v5474_v1  ;;  %v1170_v46 = vrot.slane %v1167_v11, 4 }
 0x2b0   :  { %v1215_v25 = vrot.slane %v1145_v27, 4  ;;  %v1210_v38 = vsel %vm218_vm0, %v1144_v9, %v1137_v0  ;;  %v1049_v6 = vpack.i.b16 %v1048_v63, %v1047_v62 }
 0x2b1   :  { %v1143_v36 = vsel %vm218_vm0, 0, %v1142_v17  ;;  %v1168_v22 = vrot.slane %v1163_v5, 4  ;;  %v1171_v31 = vsel %vm218_vm0, 0, %v1170_v46  ;;  %v1229_v45 = vsel %vm218_vm0, %v1170_v46, %v1163_v5 }
 0x2b2   :  { %v1216_v2 = vsel %vm218_vm0, %v1215_v25, %v1143_v36  ;;  %v1234_v18 = vrot.slane %v1171_v31, 4  ;;  %v1214_v54 = vperm.slane %v1210_v38, %v5464_v37  ;;  %v1233_v28 = vperm.slane %v1229_v45, %v5464_v37 }
 0x2b3   :  { %v1169_v39 = vsel %vm218_vm0, 0, %v1168_v22  ;;  %v1220_v43 = vperm.slane %v1216_v2, %v5464_v37  ;;  %v1098_v48 = vperm.slane %v1049_v6, %v5464_v37  ;;  %v1080_v17 = vrot.slane %v1072_v42, 4 }
 0x2b4   :  { %v5803_v19 = vpop.eup %4978  ;;  %v1235_v53 = vsel %vm218_vm0, %v1234_v18, %v1169_v39 }
 0x2b5   :  { %v1492_v50 = vsel %vm1425_vm2, %v5803_v19, 0.0  ;;  %v1221_v52 = vrot.slane %v1220_v43, 4  ;;  %v1239_v60 = vperm.slane %v1235_v53, %v5464_v37  ;;  %v1106_v25 = vrot.slane %v1098_v48, 4 }
 0x2b6   :  { %1496 = vadd.xlane.f32.xlu0 %v1495_v47  ;;  %1493 = vadd.xlane.f32.xlu2 %v1492_v50 }
 0x2b7   :  { %v1222_v4 = vsel %vm218_vm0, %v1221_v52, %v1214_v54  ;;  %v1240_v56 = vrot.slane %v1239_v60, 4 }
 0x2b8   :  { %v1226_v35 = vperm.slane %v1222_v4, %v5474_v1 }
 0x2b9   :  { %v1241_v7 = vsel %vm218_vm0, %v1240_v56, %v1233_v28 }
 0x2ba   :  { %v1245_v32 = vperm.slane %v1241_v7, %v5474_v1  ;;  %v1227_v20 = vrot.slane %v1226_v35, 4  ;;  %v1263_v10 = vshrl.u32 %v1226_v35, 16 }
 0x2bc   :  { %v1262_v12 = vpack.i.b16 %v1245_v32, %v1226_v35  ;;  %v1264_v13 = vshrl.u32 %v1245_v32, 16  ;;  %v1228_v14 = vsel %vm218_vm0, 0, %v1227_v20  ;;  %v1246_v15 = vrot.slane %v1245_v32, 4 }
 0x2bd   :  { %v1269_v40 = vshrl.u32 %v1228_v14, 16 }
 0x2be   :  { %v1546_v21 = vsel %vm1525_vm3, %v1262_v12, 0  ;;  %v1265_v16 = vpack.i.b16 %v1264_v13, %v1263_v10  ;;  %v1247_v23 = vsel %vm218_vm0, 0, %v1246_v15 }
 0x2bf   :  { %1555 = vmatpush.bf16.msrb.mxu2 %v1546_v21  ;;  %v1268_v24 = vpack.i.b16 %v1247_v23, %v1228_v14  ;;  %v1270_v26 = vshrl.u32 %v1247_v23, 16 }
 0x2c0   :  { %v1584_v33 = vsel %vm1525_vm3, %v1265_v16, 0 }
 0x2c1   :  { %v1041_v59 = vpop.permute.xlu1 %1040  ;;  %1593 = vmatpush.bf16.msra.mxu0 %v1584_v33  ;;  %v1622_v11 = vsel %vm1525_vm3, %v1268_v24, 0  ;;  %v1271_v34 = vpack.i.b16 %v1270_v26, %v1269_v40 }
 0x2c2   :  { %v1052_v0 = vpack.i.b16 %v1041_v59, %v5752_v44  ;;  %v1054_v9 = vshrl.u32 %v1041_v59, 16 }
 0x2c3   :  { %1631 = vmatpush.bf16.msra.mxu2 %v1622_v11  ;;  %v1660_v46 = vsel %vm1525_vm3, %v1271_v34, 0 }
 0x2c4   :  { %v1055_v27 = vpack.i.b16 %v1054_v9, %v1053_v61  ;;  %v1077_v5 = vperm.slane %v1052_v0, %v5464_v37 }
 0x2c5   :  { %1669 = vmatpush.bf16.msrb.mxu0 %v1660_v46 }
 0x2c6   :  { %v1078_v36 = vrot.slane %v1077_v5, 4  ;;  %v1081_v22 = vsel %vm218_vm0, %v1077_v5, %v1080_v17  ;;  %v1103_v31 = vperm.slane %v1055_v27, %v5464_v37 }
 0x2c7   :  { %v1089_v44 = vperm.slane %v1081_v22, %v5474_v1 }
 0x2c8   :  { %v1079_v38 = vsel %vm218_vm0, %v1078_v36, %v1072_v42  ;;  %v1104_v2 = vrot.slane %v1103_v31, 4  ;;  %v1107_v18 = vsel %vm218_vm0, %v1103_v31, %v1106_v25 }
 0x2c9   :  { %v1085_v39 = vperm.slane %v1079_v38, %v5474_v1  ;;  %v1092_v43 = vrot.slane %v1089_v44, 4  ;;  %v1115_v45 = vperm.slane %v1107_v18, %v5474_v1 }
 0x2ca   :  { %v1105_v47 = vsel %vm218_vm0, %v1104_v2, %v1098_v48 }
 0x2cb   :  { %v1090_v50 = vrot.slane %v1085_v39, 4  ;;  %v1093_v53 = vsel %vm218_vm0, 0, %v1092_v43  ;;  %v1111_v54 = vperm.slane %v1105_v47, %v5474_v1  ;;  %v1118_v52 = vrot.slane %v1115_v45, 4  ;;  %v4737_v45 = vld [vmem:[#allocation13 + $0x78] sm:$0xf0] }
 0x2cc   :  { %v1177_v60 = vrot.slane %v1093_v53, 4  ;;  %v1172_v28 = vsel %vm218_vm0, %v1092_v43, %v1085_v39  ;;  %v4911_v43 = vld [vmem:[#allocation13 + $0x74] sm:$0xf] }
 0x2cd   :  { %v1091_v62 = vsel %vm218_vm0, 0, %v1090_v50  ;;  %v1116_v63 = vrot.slane %v1111_v54, 4  ;;  %v1119_v4 = vsel %vm218_vm0, 0, %v1118_v52  ;;  %v1191_v20 = vsel %vm218_vm0, %v1118_v52, %v1111_v54 }
 0x2ce   :  { %v1178_v56 = vsel %vm218_vm0, %v1177_v60, %v1091_v62  ;;  %v1196_v35 = vrot.slane %v1119_v4, 4  ;;  %v1176_v6 = vperm.slane %v1172_v28, %v5464_v37  ;;  %v1195_v14 = vperm.slane %v1191_v20, %v5464_v37  ;;  %v4912_v60 = vld [vmem:[#allocation13 + $0x74] sm:$0xf0] }
 0x2cf   :  { %v1117_v7 = vsel %vm218_vm0, 0, %v1116_v63  ;;  %v1182_v32 = vperm.slane %v1178_v56, %v5464_v37  ;;  %v4740_v54 = vor.u32 %v4911_v43, %v4737_v45  ;;  %v261_v45 = vld [vmem:[#allocation5 + $0x6] sm:$0x3] }
 0x2d0   :  { %v1197_v8 = vsel %vm218_vm0, %v1196_v35, %v1117_v7  ;;  %v4727_v7 = vld [vmem:[#allocation13 + $0x60] sm:$0xf] }
 0x2d1   :  { %v1183_v10 = vrot.slane %v1182_v32, 4  ;;  %v1201_v12 = vperm.slane %v1197_v8, %v5464_v37  ;;  %v4910_v32 = vld [vmem:[#allocation13 + $0x64] sm:$0xf0] }
 0x2d2   :  { %v4728_v8 = vor.u32 %v4910_v32, %v4727_v7  ;;  %v4898_v7 = vld [vmem:[#allocation13 + $0x4] sm:$0xf0]  ;;  %v4899_v32 = vld [vmem:[#allocation13 + $0x14] sm:$0xf] }
 0x2d3   :  { %v1184_v13 = vsel %vm218_vm0, %v1183_v10, %v1176_v6  ;;  %v1202_v15 = vrot.slane %v1201_v12, 4 }
 0x2d4   :  { %v1188_v21 = vperm.slane %v1184_v13, %v5474_v1 }
 0x2d5   :  { %v1203_v16 = vsel %vm218_vm0, %v1202_v15, %v1195_v14 }
 0x2d6   :  { %v1207_v23 = vperm.slane %v1203_v16, %v5474_v1  ;;  %v1189_v42 = vrot.slane %v1188_v21, 4  ;;  %v1251_v24 = vshrl.u32 %v1188_v21, 16 }
 0x2d8   :  { %v1250_v40 = vpack.i.b16 %v1207_v23, %v1188_v21  ;;  %v1252_v26 = vshrl.u32 %v1207_v23, 16  ;;  %v1190_v48 = vsel %vm218_vm0, 0, %v1189_v42  ;;  %v1208_v61 = vrot.slane %v1207_v23, 4  ;;  %v4908_v42 = vld [vmem:[#allocation13 + $0x54] sm:$0xf0] }
 0x2d9   :  { %v1257_v11 = vshrl.u32 %v1190_v48, 16 }
 0x2da   :  { %v1527_v33 = vsel %vm1525_vm3, %v1250_v40, 0  ;;  %v1253_v59 = vpack.i.b16 %v1252_v26, %v1251_v24  ;;  %v1209_v0 = vsel %vm218_vm0, 0, %v1208_v61  ;;  %v4909_v24 = vld [vmem:[#allocation13 + $0x64] sm:$0xf]  ;;  %v4729_v26 = vld [vmem:[#allocation13 + $0x68] sm:$0xf0] }
 0x2db   :  { %1536 = vmatpush.bf16.msra.mxu1 %v1527_v33  ;;  %v1256_v9 = vpack.i.b16 %v1209_v0, %v1190_v48  ;;  %v1258_v34 = vshrl.u32 %v1209_v0, 16  ;;  %v4711_v48 = vld [vmem:[#allocation13 + $0x40] sm:$0xf]  ;;  %v4906_v61 = vld [vmem:[#allocation13 + $0x44] sm:$0xf0]  ;;  %v4732_v33 = vor.u32 %v4909_v24, %v4729_v26 }
 0x2dc   :  { %v1565_v17 = vsel %vm1525_vm3, %v1253_v59, 0  ;;  %v4907_v59 = vld [vmem:[#allocation13 + $0x54] sm:$0xf]  ;;  %v4721_v0 = vld [vmem:[#allocation13 + $0x58] sm:$0xf0] }
 0x2dd   :  { %1574 = vmatpush.bf16.msra.mxu3 %v1565_v17  ;;  %v1603_v27 = vsel %vm1525_vm3, %v1256_v9, 0  ;;  %v1259_v5 = vpack.i.b16 %v1258_v34, %v1257_v11  ;;  %v4703_v9 = vld [vmem:[#allocation13 + $0x30] sm:$0xf]  ;;  %v4904_v11 = vld [vmem:[#allocation13 + $0x34] sm:$0xf0] }
 0x2de   :  { %v4905_v34 = vld [vmem:[#allocation13 + $0x44] sm:$0xf]  ;;  %v4713_v17 = vld [vmem:[#allocation13 + $0x48] sm:$0xf0] }
 0x2df   :  { %1612 = vmatpush.bf16.msrb.mxu1 %v1603_v27  ;;  %v1641_v46 = vsel %vm1525_vm3, %v1259_v5, 0  ;;  %v4704_v27 = vor.u32 %v4904_v11, %v4703_v9  ;;  %v4716_v5 = vor.u32 %v4905_v34, %v4713_v17  ;;  %v4897_v26 = vld [vmem:[#allocation13 + $0x4] sm:$0xf] }
 0x2e1   :  { %1650 = vmatpush.bf16.msrb.mxu3 %v1641_v46  ;;  %v4695_v46 = vld [vmem:[#allocation13 + $0x20] sm:$0xf] }
 0x2fe   :  { %v1476_v25 = vpop.xlane.xlu2 %1475 }
 0x2ff   :  { %4980 = vrcp.f32 %v1476_v25  ;;  %v4902_v25 = vld [vmem:[#allocation13 + $0x24] sm:$0xf0] }
 0x305   :  { %v4981_v36 = vpop.eup %4980 }
 0x306   :  { %v1506_v22 = vmul.f32 %v4981_v36, %v5754_v58  ;;  %v4903_v36 = vld [vmem:[#allocation13 + $0x34] sm:$0xf] }
 0x308   :  { %v1514_v31 = vpack.c.bf16 %v1506_v22, %v1506_v22  ;;  %v4705_v22 = vld [vmem:[#allocation13 + $0x38] sm:$0xf0] }
 0x309   :  { %v1479_v44 = vpop.xlane.xlu1 %1478 }
 0x30a   :  { %4982 = vrcp.f32 %v1479_v44  ;;  %4605 = vmatmul.msk.bf16.vlgmr.msra.gmra.mxu1 %vm1425_vm2, %v1514_v31  ;;  %v4696_v31 = vor.u32 %v4902_v25, %v4695_v46  ;;  %v4708_v44 = vor.u32 %v4903_v36, %v4705_v22 }
 0x310   :  { %v4983_v38 = vpop.eup %4982 }
 0x311   :  { %v1507_v2 = vmul.f32 %v4983_v38, %v5760_v3  ;;  %v1485_v18 = vpop.xlane.xlu1 %1484  ;;  %v4735_v3 = vld [vmem:[#allocation13 + $0x70] sm:$0xf] }
 0x312   :  { %4984 = vrcp.f32 %v1485_v18  ;;  %v4687_v38 = vld [vmem:[#allocation13 + $0x10] sm:$0xf] }
 0x313   :  { %v1515_v39 = vpack.c.bf16 %v1507_v2, %v1507_v2  ;;  %v4900_v2 = vld [vmem:[#allocation13 + $0x14] sm:$0xf0] }
 0x314   :  { %v4688_v18 = vor.u32 %v4900_v2, %v4687_v38 }
 0x315   :  { %4606 = vmatmul.msk.bf16.vlgmr.msrb.gmra.mxu2 %vm1425_vm2, %v1515_v39  ;;  %v265_v39 = vld [vmem:[#allocation5 + $0xe] sm:$0x3] }
 0x316   :  { %v288_v43 = vrot.slane %v265_v39, 4 }
 0x318   :  { %v4985_v47 = vpop.eup %4984 }
 0x319   :  { %v1509_v50 = vmul.f32 %v4985_v47, %v5764_v57  ;;  %v1482_v53 = vpop.xlane.xlu0 %1481  ;;  %v1488_v58 = vpop.xlane.xlu1 %1487  ;;  %v4736_v57 = vor.u32 %v4912_v60, %v4735_v3  ;;  %v263_v47 = vld [vmem:[#allocation5 + $0xa] sm:$0x3]  ;;  %v260_v3 = vld [vmem:[#allocation5 + $0x4] sm:$0x3]  ;;  %v262_v60 = vld [vmem:[#allocation5 + $0x8] sm:$0x3] }
 0x31a   :  { %4986 = vrcp.f32 %v1482_v53  ;;  %v276_v53 = vrot.slane %v261_v45, 4 }
 0x31b   :  { %v1517_v52 = vpack.c.bf16 %v1509_v50, %v1509_v50  ;;  %4988 = vrcp.f32 %v1488_v58  ;;  %v264_v50 = vld [vmem:[#allocation5 + $0xc] sm:$0x3] }
 0x31c   :  { %v282_v58 = vrot.slane %v264_v50, 4 }
 0x31d   :  { %4608 = vmatmul.msk.bf16.vlgmr.msra.gmra.mxu0 %vm1425_vm2, %v1517_v52  ;;  %v259_v52 = vld [vmem:[#allocation5 + $0x2] sm:$0x3] }
 0x31e   :  { %2245 = vmatpush.bf16.msra.mxu0 %v4740_v54  ;;  %v289_v54 = vsel %vm218_vm0, %v288_v43, %v263_v47 }
 0x320   :  { %v4987_v62 = vpop.eup %4986 }
 0x321   :  { %v4989_v63 = vpop.eup %4988  ;;  %v1508_v4 = vmul.f32 %v4987_v62, %v5772_v55  ;;  %v1491_v28 = vpop.xlane.xlu0 %1490  ;;  %v4901_v62 = vld [vmem:[#allocation13 + $0x24] sm:$0xf] }
 0x322   :  { %v1510_v56 = vmul.f32 %v4989_v63, %v5770_v51  ;;  %4990 = vrcp.f32 %v1491_v28  ;;  %2246 = vmatpush.bf16.msra.mxu0 %v4732_v33  ;;  %v4697_v63 = vld [vmem:[#allocation13 + $0x28] sm:$0xf0]  ;;  %v277_v28 = vsel %vm218_vm0, %v276_v53, %v259_v52 }
 0x323   :  { %v1516_v35 = vpack.c.bf16 %v1508_v4, %v1508_v4  ;;  %v4679_v4 = vld [vmem:[#allocation13] sm:$0xf] }
 0x324   :  { %v1518_v20 = vpack.c.bf16 %v1510_v56, %v1510_v56  ;;  %v283_v56 = vsel %vm218_vm0, %v282_v58, %v262_v60 }
 0x325   :  { %4607 = vmatmul.msk.bf16.vlgmr.msra.gmra.mxu3 %vm1425_vm2, %v1516_v35  ;;  %v4700_v35 = vor.u32 %v4901_v62, %v4697_v63 }
 0x326   :  { %4609 = vmatmul.msk.bf16.vlgmr.msrb.gmra.mxu1 %vm1425_vm2, %v1518_v20  ;;  %2227 = vmatpush.bf16.msra.mxu3 %v4736_v57  ;;  %v293_v57 = vperm.slane %v289_v54, %v5464_v37  ;;  %v4689_v20 = vld [vmem:[#allocation13 + $0x18] sm:$0xf0] }
 0x328   :  { %v4991_v6 = vpop.eup %4990 }
 0x329   :  { %v1511_v10 = vmul.f32 %v4991_v6, %v5782_v49  ;;  %v1497_v12 = vpop.xlane.xlu0 %1496  ;;  %v1494_v55 = vpop.xlane.xlu2 %1493  ;;  %v4719_v49 = vld [vmem:[#allocation13 + $0x50] sm:$0xf]  ;;  %v4680_v6 = vor.u32 %v4898_v7, %v4679_v4 }
 0x32a   :  { %4992 = vrcp.f32 %v1497_v12  ;;  %2228 = vmatpush.bf16.msra.mxu3 %v4728_v8  ;;  %v4720_v40 = vor.u32 %v4908_v42, %v4719_v49  ;;  %v281_v8 = vperm.slane %v277_v28, %v5464_v37  ;;  %v266_v12 = vld [vmem:[#allocation5 + $0x10] sm:$0x3]  ;;  %v300_v49 = vrot.slane %v293_v57, 4 }
 0x32b   :  { %v1519_v51 = vpack.c.bf16 %v1511_v10, %v1511_v10  ;;  %4994 = vrcp.f32 %v1494_v55  ;;  %v258_v10 = vld [vmem:[#allocation5] sm:$0x3]  ;;  %v267_v55 = vld [vmem:[#allocation5 + $0x12] sm:$0x3] }
 0x32d   :  { %4610 = vmatmul.msk.bf16.vlgmr.msra.gmra.mxu2 %vm1425_vm2, %v1519_v51  ;;  %v287_v51 = vperm.slane %v283_v56, %v5464_v37 }
 0x32e   :  { %2229 = vmatpush.bf16.msra.mxu3 %v4720_v40 }
 0x32f   :  { %v301_v33 = vsel %vm218_vm0, %v300_v49, %v287_v51 }
 0x330   :  { %v4993_v13 = vpop.eup %4992 }
 0x331   :  { %v4995_v14 = vpop.eup %4994  ;;  %v1513_v15 = vmul.f32 %v4993_v13, %v5797_v41  ;;  %v4712_v41 = vor.u32 %v4906_v61, %v4711_v48  ;;  %v4692_v13 = vor.u32 %v4899_v32, %v4689_v20  ;;  %v4681_v48 = vld [vmem:[#allocation13 + $0x8] sm:$0xf0] }
 0x332   :  { %v1512_v21 = vmul.f32 %v4995_v14, %v5803_v19  ;;  %v4724_v19 = vor.u32 %v4907_v59, %v4721_v0  ;;  %v268_v14 = vld [vmem:[#allocation5 + $0x14] sm:$0x3]  ;;  %v4684_v34 = vor.u32 %v4897_v26, %v4681_v48 }
 0x333   :  { %v1521_v16 = vpack.c.bf16 %v1513_v15, %v1513_v15  ;;  %2230 = vmatpush.bf16.msra.mxu3 %v4712_v41  ;;  %v269_v15 = vld [vmem:[#allocation5 + $0x16] sm:$0x3]  ;;  %v310_v42 = vrot.slane %v268_v14, 4  ;;  %v305_v41 = vperm.slane %v301_v33, %v5474_v1 }
 0x334   :  { %v1520_v23 = vpack.c.bf16 %v1512_v21, %v1512_v21  ;;  %2247 = vmatpush.bf16.msra.mxu0 %v4724_v19  ;;  %v270_v21 = vrot.slane %v260_v3, 4  ;;  %v316_v24 = vrot.slane %v269_v15, 4 }
 0x335   :  { %4612 = vmatmul.msk.bf16.vlgmr.msrb.gmra.mxu0 %vm1425_vm2, %v1521_v16  ;;  %v311_v59 = vsel %vm218_vm0, %v310_v42, %v266_v12 }
 0x336   :  { %4611 = vmatmul.msk.bf16.vlgmr.msrb.gmra.mxu3 %vm1425_vm2, %v1520_v23  ;;  %v294_v23 = vrot.slane %v281_v8, 4  ;;  %v271_v40 = vsel %vm218_vm0, %v270_v21, %v258_v10  ;;  %v317_v0 = vsel %vm218_vm0, %v316_v24, %v267_v55  ;;  %v315_v19 = vperm.slane %v311_v59, %v5464_v37 }
 0x337   :  { %2231 = vmatpush.bf16.msra.mxu3 %v4704_v27  ;;  %v275_v61 = vperm.slane %v271_v40, %v5464_v37  ;;  %v321_v9 = vperm.slane %v317_v0, %v5464_v37  ;;  %v306_v27 = vrot.slane %v305_v41, 4 }
 0x338   :  { %2248 = vmatpush.bf16.msra.mxu0 %v4716_v5 }
 0x339   :  { %v295_v11 = vsel %vm218_vm0, %v294_v23, %v275_v61  ;;  %v322_v5 = vrot.slane %v321_v9, 4 }
 0x33a   :  { %v299_v17 = vperm.slane %v295_v11, %v5474_v1 }
 0x33b   :  { %2232 = vmatpush.bf16.msra.mxu3 %v4696_v31  ;;  %v323_v36 = vsel %vm218_vm0, %v322_v5, %v315_v19 }
 0x33c   :  { %2249 = vmatpush.bf16.msra.mxu0 %v4708_v44  ;;  %v307_v46 = vsel %vm218_vm0, %v306_v27, %v299_v17  ;;  %v308_v25 = vrot.slane %v299_v17, 4  ;;  %v327_v31 = vperm.slane %v323_v36, %v5474_v1 }
 0x33d   :  { %v334_v44 = vrot.slane %v307_v46, 4  ;;  %2106 = vst [vmem:[#allocation1] ss:$2 sm:$0xff] %v307_v46 }
 0x33e   :  { %v309_v38 = vsel %vm218_vm0, %v305_v41, %v308_v25  ;;  %2110 = vst [vmem:[#allocation1 + $0x10] ss:$2 sm:$0xff] %v327_v31  ;;  %v328_v53 = vrot.slane %v327_v31, 4 }
 0x33f   :  { %2233 = vmatpush.bf16.msra.mxu3 %v4688_v18  ;;  %2108 = vst [vmem:[#allocation1 + $0x1] ss:$2 sm:$0xff] %v334_v44  ;;  %v335_v58 = vrot.slane %v309_v38, 4 }
 0x340   :  { %2250 = vmatpush.bf16.msra.mxu0 %v4700_v35  ;;  %2112 = vst [vmem:[#allocation1 + $0x11] ss:$2 sm:$0xff] %v309_v38  ;;  %v329_v52 = vsel %vm218_vm0, 0.0, %v328_v53 }
 0x341   :  { %2114 = vst [vmem:[#allocation1 + $0x20] ss:$2 sm:$0xff] %v335_v58 }
 0x342   :  { %2116 = vst [vmem:[#allocation1 + $0x21] ss:$2 sm:$0xff] %v329_v52 }
 0x343   :  { %2234 = vmatpush.bf16.msra.mxu3 %v4680_v6 }
 0x344   :  { %2251 = vmatpush.bf16.msra.mxu0 %v4692_v13 }
 0x346   :  { %v2117_v18 = vld.sshfl [vmem:[#allocation1] sm:$0xff pattern:$0x75316420] }
 0x347   :  { %v2118_v43 = vld.sshfl [vmem:[#allocation1 + $0x10] sm:$0xff pattern:$0x75316420] }
 0x348   :  { %2252 = vmatpush.bf16.msra.mxu0 %v4684_v34  ;;  %v2123_v45 = vpack.c.bf16 %v2118_v43, %v2117_v18 }
 0x349   :  { %v2119_v28 = vld.sshfl [vmem:[#allocation1 + $0x20] sm:$0xff pattern:$0x75316420] }
 0x34a   :  { %2235 = vmatmul.bf16.vlgmr.msra.gmra.mxu3 %v2123_v45  ;;  %v2124_v56 = vpack.c.bf16 %v2119_v28, %v2119_v28 }
 0x34b   :  { %2253 = vmatmul.bf16.vlgmr.msra.gmra.mxu0 %v2123_v45 }
 0x35a   :  { %2240 = vmatmul.bf16.gmra.mxu3 %v2124_v56 }
 0x35b   :  { %2258 = vmatmul.bf16.gmra.mxu0 %v2124_v56 }
 0x387   :  { %v1538_v16 = vpop.f32.mrf.mxu1 }
 0x388   :  { %v1675_v32 = vpack.c.bf16 %v1538_v16, %v1538_v16 }
 0x38a   :  { %v1686_v14 = vshrl.u32 %v1675_v32, 16 }
 0x38f   :  { %v1540_v22 = vpop.f32.mrf.mxu1 }
 0x398   :  { %v1557_v2 = vpop.f32.mrf.mxu2 }
 0x399   :  { %v1676_v62 = vpack.c.bf16 %v1557_v2, %v1557_v2 }
 0x39a   :  { %v1595_v39 = vpop.f32.mrf.mxu0 }
 0x39b   :  { %v1678_v3 = vpack.c.bf16 %v1595_v39, %v1595_v39  ;;  %v1698_v57 = vshrl.u32 %v1676_v62, 16 }
 0x39d   :  { %v1699_v4 = vshrl.u32 %v1678_v3, 16  ;;  %v1697_v35 = vpack.i.b16 %v1678_v3, %v1676_v62 }
 0x39f   :  { %v1700_v20 = vpack.i.b16 %v1699_v4, %v1698_v57  ;;  %v1763_v55 = vperm.slane %v1697_v35, %v5464_v37 }
 0x3a0   :  { %v1559_v47 = vpop.f32.mrf.mxu2 }
 0x3a1   :  { %v1789_v15 = vperm.slane %v1700_v20, %v5464_v37  ;;  %v1771_v24 = vrot.slane %v1763_v55, 4 }
 0x3a2   :  { %v1597_v50 = vpop.f32.mrf.mxu0 }
 0x3a3   :  { %v1614_v54 = vpop.f32.mrf.mxu1  ;;  %v1797_v48 = vrot.slane %v1789_v15, 4 }
 0x3a4   :  { %v1679_v61 = vpack.c.bf16 %v1614_v54, %v1614_v54 }
 0x3a6   :  { %v1692_v38 = vshrl.u32 %v1679_v61, 16 }
 0x3a8   :  { %v1576_v60 = vpop.f32.mrf.mxu3 }
 0x3a9   :  { %v1677_v7 = vpack.c.bf16 %v1576_v60, %v1576_v60 }
 0x3ab   :  { %v1616_v63 = vpop.f32.mrf.mxu1  ;;  %v1687_v51 = vshrl.u32 %v1677_v7, 16  ;;  %v1685_v21 = vpack.i.b16 %v1677_v7, %v1675_v32 }
 0x3ad   :  { %v1688_v40 = vpack.i.b16 %v1687_v51, %v1686_v14  ;;  %v1711_v59 = vperm.slane %v1685_v21, %v5464_v37 }
 0x3af   :  { %v1737_v27 = vperm.slane %v1688_v40, %v5464_v37  ;;  %v1719_v2 = vrot.slane %v1711_v59, 4 }
 0x3b0   :  { %v1578_v8 = vpop.f32.mrf.mxu3  ;;  %v1633_v6 = vpop.f32.mrf.mxu2 }
 0x3b1   :  { %v1680_v10 = vpack.c.bf16 %v1633_v6, %v1633_v6  ;;  %v1745_v53 = vrot.slane %v1737_v27, 4 }
 0x3b2   :  { %v1671_v12 = vpop.f32.mrf.mxu0 }
 0x3b3   :  { %v1682_v13 = vpack.c.bf16 %v1671_v12, %v1671_v12  ;;  %v1704_v23 = vshrl.u32 %v1680_v10, 16 }
 0x3b5   :  { %v1703_v49 = vpack.i.b16 %v1682_v13, %v1680_v10  ;;  %v1705_v42 = vshrl.u32 %v1682_v13, 16 }
 0x3b7   :  { %v1706_v26 = vpack.i.b16 %v1705_v42, %v1704_v23  ;;  %v1768_v16 = vperm.slane %v1703_v49, %v5464_v37 }
 0x3b8   :  { %v1635_v33 = vpop.f32.mrf.mxu2 }
 0x3b9   :  { %v1769_v0 = vrot.slane %v1768_v16, 4  ;;  %v1772_v41 = vsel %vm218_vm0, %v1768_v16, %v1771_v24  ;;  %v1794_v19 = vperm.slane %v1706_v26, %v5464_v37  ;;  %v1652_v9 = vpop.f32.mrf.mxu3 }
 0x3ba   :  { %v1780_v11 = vperm.slane %v1772_v41, %v5474_v1  ;;  %v1681_v34 = vpack.c.bf16 %v1652_v9, %v1652_v9  ;;  %v1673_v17 = vpop.f32.mrf.mxu0 }
 0x3bb   :  { %v1770_v5 = vsel %vm218_vm0, %v1769_v0, %v1763_v55  ;;  %v1795_v46 = vrot.slane %v1794_v19, 4  ;;  %v1798_v25 = vsel %vm218_vm0, %v1794_v19, %v1797_v48 }
 0x3bc   :  { %v1776_v36 = vperm.slane %v1770_v5, %v5474_v1  ;;  %v1783_v22 = vrot.slane %v1780_v11, 4  ;;  %v1806_v31 = vperm.slane %v1798_v25, %v5474_v1  ;;  %v1691_v44 = vpack.i.b16 %v1681_v34, %v1679_v61 }
 0x3bd   :  { %v1796_v18 = vsel %vm218_vm0, %v1795_v46, %v1789_v15  ;;  %v1693_v39 = vshrl.u32 %v1681_v34, 16 }
 0x3be   :  { %v1781_v43 = vrot.slane %v1776_v36, 4  ;;  %v1784_v45 = vsel %vm218_vm0, 0, %v1783_v22  ;;  %v1802_v47 = vperm.slane %v1796_v18, %v5474_v1  ;;  %v1809_v50 = vrot.slane %v1806_v31, 4 }
 0x3bf   :  { %v1854_v58 = vrot.slane %v1784_v45, 4  ;;  %v1694_v54 = vpack.i.b16 %v1693_v39, %v1692_v38  ;;  %v1716_v52 = vperm.slane %v1691_v44, %v5464_v37  ;;  %v1849_v63 = vsel %vm218_vm0, %v1783_v22, %v1776_v36 }
 0x3c0   :  { %v1782_v3 = vsel %vm218_vm0, 0, %v1781_v43  ;;  %v1807_v60 = vrot.slane %v1802_v47, 4  ;;  %v1810_v62 = vsel %vm218_vm0, 0, %v1809_v50  ;;  %v1853_v15 = vperm.slane %v1849_v63, %v5464_v37 }
 0x3c1   :  { %v1855_v4 = vsel %vm218_vm0, %v1854_v58, %v1782_v3  ;;  %v1873_v28 = vrot.slane %v1810_v62, 4  ;;  %v1717_v56 = vrot.slane %v1716_v52, 4  ;;  %v1720_v57 = vsel %vm218_vm0, %v1716_v52, %v1719_v2  ;;  %v1654_v35 = vpop.f32.mrf.mxu3 }
 0x3c2   :  { %v1808_v7 = vsel %vm218_vm0, 0, %v1807_v60  ;;  %v1728_v32 = vperm.slane %v1720_v57, %v5474_v1  ;;  %v1742_v20 = vperm.slane %v1694_v54, %v5464_v37  ;;  %v1859_v8 = vperm.slane %v1855_v4, %v5464_v37 }
 0x3c3   :  { %v1718_v6 = vsel %vm218_vm0, %v1717_v56, %v1711_v59  ;;  %v1874_v10 = vsel %vm218_vm0, %v1873_v28, %v1808_v7  ;;  %v1868_v40 = vsel %vm218_vm0, %v1809_v50, %v1802_v47 }
 0x3c4   :  { %v1724_v12 = vperm.slane %v1718_v6, %v5474_v1  ;;  %v1731_v55 = vrot.slane %v1728_v32, 4  ;;  %v1743_v51 = vrot.slane %v1742_v20, 4  ;;  %v1746_v13 = vsel %vm218_vm0, %v1742_v20, %v1745_v53 }
 0x3c5   :  { %v1754_v14 = vperm.slane %v1746_v13, %v5474_v1  ;;  %v1860_v21 = vrot.slane %v1859_v8, 4  ;;  %v1878_v23 = vperm.slane %v1874_v10, %v5464_v37  ;;  %v1872_v11 = vperm.slane %v1868_v40, %v5464_v37 }
 0x3c6   :  { %v1729_v49 = vrot.slane %v1724_v12, 4  ;;  %v1732_v42 = vsel %vm218_vm0, 0, %v1731_v55  ;;  %v1744_v24 = vsel %vm218_vm0, %v1743_v51, %v1737_v27  ;;  %v1811_v33 = vsel %vm218_vm0, %v1731_v55, %v1724_v12 }
 0x3c7   :  { %v1750_v26 = vperm.slane %v1744_v24, %v5474_v1  ;;  %v1757_v16 = vrot.slane %v1754_v14, 4  ;;  %v1816_v48 = vrot.slane %v1732_v42, 4  ;;  %v1861_v59 = vsel %vm218_vm0, %v1860_v21, %v1853_v15 }
 0x3c8   :  { %v1730_v61 = vsel %vm218_vm0, 0, %v1729_v49  ;;  %v1879_v0 = vrot.slane %v1878_v23, 4  ;;  %v1865_v27 = vperm.slane %v1861_v59, %v5474_v1  ;;  %v1815_v46 = vperm.slane %v1811_v33, %v5464_v37  ;;  %v4888_v33 = vld [vmem:[#allocation10 + $0x38] sm:$0xff]  ;;  %v4887_v59 = vld [vmem:[#allocation10 + $0x30] sm:$0xff] }
 0x3c9   :  { %v1755_v41 = vrot.slane %v1750_v26, 4  ;;  %v1758_v19 = vsel %vm218_vm0, 0, %v1757_v16  ;;  %v1817_v9 = vsel %vm218_vm0, %v1816_v48, %v1730_v61  ;;  %v1830_v22 = vsel %vm218_vm0, %v1757_v16, %v1750_v26  ;;  %2007 = vmatpush.bf16.msra.mxu1 %v4888_v33 }
 0x3ca   :  { %v1835_v34 = vrot.slane %v1758_v19, 4  ;;  %v1821_v17 = vperm.slane %v1817_v9, %v5464_v37  ;;  %v1880_v25 = vsel %vm218_vm0, %v1879_v0, %v1872_v11  ;;  %v1866_v18 = vrot.slane %v1865_v27, 4  ;;  %v2141_v0 = vld [vmem:[%s6618_s9] sm:$0x3]  ;;  %v2254_v19 = vpop.f32.mrf.mxu0 }
 0x3cb   :  { %v1756_v5 = vsel %vm218_vm0, 0, %v1755_v41  ;;  %v1884_v44 = vperm.slane %v1880_v25, %v5474_v1  ;;  %v1834_v47 = vperm.slane %v1830_v22, %v5464_v37  ;;  %v1902_v60 = vshrl.u32 %v1865_v27, 16  ;;  %v4886_v41 = vld [vmem:[#allocation10 + $0x28] sm:$0xff]  ;;  %v4883_v22 = vld [vmem:[#allocation10 + $0x10] sm:$0xff] }
 0x3cc   :  { %v1822_v36 = vrot.slane %v1821_v17, 4  ;;  %v1836_v31 = vsel %vm218_vm0, %v1835_v34, %v1756_v5  ;;  %v1867_v62 = vsel %vm218_vm0, 0, %v1866_v18  ;;  %v2144_v9 = vperm.slane %v2141_v0, 1  ;;  %v4885_v34 = vld [vmem:[#allocation10 + $0x20] sm:$0xff] }
 0x3cd   :  { %v1840_v38 = vperm.slane %v1836_v31, %v5464_v37  ;;  %v1885_v39 = vrot.slane %v1884_v44, 4  ;;  %v1901_v43 = vpack.i.b16 %v1884_v44, %v1865_v27  ;;  %v1903_v53 = vshrl.u32 %v1884_v44, 16  ;;  %2008 = vmatpush.bf16.msra.mxu1 %v4887_v59  ;;  %v2236_v27 = vpop.f32.mrf.mxu3 }
 0x3ce   :  { %v1823_v2 = vsel %vm218_vm0, %v1822_v36, %v1815_v46  ;;  %v1908_v32 = vshrl.u32 %v1867_v62, 16  ;;  %v2143_v11 = vperm.slane %v2141_v0, 0  ;;  %v2255_v17 = vadd.f32 %v2254_v19, %v2144_v9  ;;  %v4884_v46 = vld [vmem:[#allocation10 + $0x18] sm:$0xff] }
 0x3cf   :  { %v1827_v45 = vperm.slane %v1823_v2, %v5474_v1  ;;  %v1841_v50 = vrot.slane %v1840_v38, 4  ;;  %v1886_v58 = vsel %vm218_vm0, 0, %v1885_v39  ;;  %v1904_v57 = vpack.i.b16 %v1903_v53, %v1902_v60  ;;  %v4882_v2 = vld [vmem:[#allocation10 + $0x8] sm:$0xff] }
 0x3d0   :  { %v1909_v4 = vshrl.u32 %v1886_v58, 16  ;;  %v1907_v7 = vpack.i.b16 %v1886_v58, %v1867_v62  ;;  %v5963_v12 = vunpack.c.l.b16 %v1901_v43  ;;  %v2237_v5 = vadd.f32 %v2236_v27, %v2143_v11  ;;  %v4881_v43 = vld [vmem:[#allocation10] sm:$0xff] }
 0x3d1   :  { %v1842_v54 = vsel %vm218_vm0, %v1841_v50, %v1834_v47  ;;  %v1828_v52 = vrot.slane %v1827_v45, 4  ;;  %v1890_v28 = vshrl.u32 %v1827_v45, 16  ;;  %v1915_v21 = vunpack.c.l.b16 %v1904_v57  ;;  %2009 = vmatpush.bf16.msra.mxu1 %v4886_v41 }
 0x3d2   :  { %v1846_v3 = vperm.slane %v1842_v54, %v5474_v1  ;;  %v1910_v13 = vpack.i.b16 %v1909_v4, %v1908_v32  ;;  %v1920_v49 = vunpack.c.l.b16 %v1907_v7  ;;  %v5975_v25 = vpack.c.bf16 %v2255_v17, %v2237_v5  ;;  %v2256_v36 = vpop.f32.mrf.mxu0 }
 0x3d3   :  { %v1829_v63 = vsel %vm218_vm0, 0, %v1828_v52  ;;  %v2257_v31 = vadd.f32 %v2256_v36, %v2144_v9 }
 0x3d4   :  { %v1891_v56 = vshrl.u32 %v1846_v3, 16  ;;  %v1847_v35 = vrot.slane %v1846_v3, 4  ;;  %v1889_v20 = vpack.i.b16 %v1846_v3, %v1827_v45  ;;  %v1896_v10 = vshrl.u32 %v1829_v63, 16 }
 0x3d5   :  { %v1925_v48 = vunpack.c.l.b16 %v1910_v13  ;;  %2010 = vmatpush.bf16.msra.mxu1 %v4885_v34  ;;  %v2238_v44 = vpop.f32.mrf.mxu3 }
 0x3d6   :  { %v1892_v8 = vpack.i.b16 %v1891_v56, %v1890_v28  ;;  %v1848_v6 = vsel %vm218_vm0, 0, %v1847_v35  ;;  %v5965_v14 = vunpack.c.l.b16 %v1889_v20  ;;  %v2239_v38 = vadd.f32 %v2238_v44, %v2143_v11 }
 0x3d7   :  { %v1895_v55 = vpack.i.b16 %v1848_v6, %v1829_v63  ;;  %v1897_v51 = vshrl.u32 %v1848_v6, 16  ;;  %v2534_v56 = vshrl.u32 %v5975_v25, 16  ;;  %v2959_v20 = vrot.slane %v5975_v25, 4 }
 0x3d8   :  { %v1914_v15 = vunpack.c.l.b16 %v1892_v8  ;;  %v1913_v24 = vpack.c.b16 %v5963_v12, %v5965_v14  ;;  %v5981_v18 = vpack.c.bf16 %v2257_v31, %v2239_v38 }
 0x3d9   :  { %v1919_v23 = vunpack.c.l.b16 %v1895_v55  ;;  %v1898_v42 = vpack.i.b16 %v1897_v51, %v1896_v10  ;;  %2011 = vmatpush.bf16.msra.mxu1 %v4884_v46 }
 0x3da   :  { %v1916_v40 = vpack.c.b16 %v1915_v21, %v1914_v15  ;;  %v2259_v39 = vpop.f32.mrf.mxu0  ;;  %v2974_v21 = vshrl.u32 %v2959_v20, 16 }
 0x3db   :  { %v1921_v26 = vpack.c.b16 %v1920_v49, %v1919_v23  ;;  %v1924_v16 = vunpack.c.l.b16 %v1898_v42  ;;  %v2260_v45 = vadd.f32 %v2259_v39, %v2144_v9 }
 0x3dc   :  { %1917 = vrot.lane.b32.xlu2 %v1916_v40, %s5307_s29 }
 0x3dd   :  { %1922 = vrot.lane.b32.xlu1 %v1921_v26, %s5311_s26  ;;  %v1926_v61 = vpack.c.b16 %v1925_v48, %v1924_v16  ;;  %2012 = vmatpush.bf16.msra.mxu1 %v4883_v22  ;;  %v2241_v47 = vpop.f32.mrf.mxu3 }
 0x3de   :  { %v2242_v50 = vadd.f32 %v2241_v47, %v2143_v11 }
 0x3df   :  { %1927 = vrot.lane.b32.xlu0 %v1926_v61, %s5326_s12 }
 0x3e0   :  { %v5991_v58 = vpack.c.bf16 %v2260_v45, %v2242_v50 }
 0x3e1   :  { %2013 = vmatpush.bf16.msra.mxu1 %v4882_v2 }
 0x3e2   :  { %v2261_v53 = vpop.f32.mrf.mxu0 }
 0x3e4   :  { %2513 = vrot.lane.b32.xlu2 %v5975_v25, %s5326_s12 }
 0x3e5   :  { %2519 = vrot.lane.b32.xlu1 %v5975_v25, %s5311_s26  ;;  %2014 = vmatpush.bf16.msra.mxu1 %v4881_v43  ;;  %v2243_v54 = vpop.f32.mrf.mxu3 }
 0x3e7   :  { %2515 = vrot.lane.b32.xlu0 %v5981_v18, %s5326_s12 }
 0x3ec   :  { %2525 = vrot.lane.b32.xlu2 %v5975_v25, %s5307_s29 }
 0x3ed   :  { %2527 = vrot.lane.b32.xlu1 %v5981_v18, %s5307_s29 }
 0x3ef   :  { %2521 = vrot.lane.b32.xlu0 %v5981_v18, %s5311_s26 }
 0x3f4   :  { %2517 = vrot.lane.b32.xlu2 %v5991_v58, %s5326_s12 }
 0x3f5   :  { %2529 = vrot.lane.b32.xlu1 %v5991_v58, %s5307_s29 }
 0x3f7   :  { %2523 = vrot.lane.b32.xlu0 %v5991_v58, %s5311_s26 }
 0x436   :  { %v1918_v52 = vpop.permute.xlu2 %1917 }
 0x437   :  { %v1931_v3 = vsel %vm1272_vm1, %v1913_v24, %v1918_v52 }
 0x43e   :  { %v2514_v28 = vpop.permute.xlu2 %2513 }
 0x43f   :  { %v2535_v57 = vshrl.u32 %v2514_v28, 16  ;;  %v2533_v35 = vpack.i.b16 %v2514_v28, %v5975_v25  ;;  %v2962_v10 = vrot.slane %v2514_v28, 4  ;;  %v2546_v28 = vshrl.u32 %v5981_v18, 16 }
 0x441   :  { %v2536_v7 = vpack.i.b16 %v2535_v57, %v2534_v56  ;;  %v2571_v32 = vperm.slane %v2533_v35, %v5464_v37  ;;  %v2975_v49 = vshrl.u32 %v2962_v10, 16  ;;  %v2973_v33 = vpack.i.b16 %v2962_v10, %v2959_v20 }
 0x443   :  { %v2597_v6 = vperm.slane %v2536_v7, %v5464_v37  ;;  %v2579_v51 = vrot.slane %v2571_v32, 4  ;;  %v2976_v19 = vpack.i.b16 %v2975_v49, %v2974_v21  ;;  %v3011_v36 = vperm.slane %v2973_v33, %v5464_v37 }
 0x445   :  { %v2605_v23 = vrot.slane %v2597_v6, 4  ;;  %v3037_v38 = vperm.slane %v2976_v19, %v5464_v37  ;;  %v3019_v47 = vrot.slane %v3011_v36, 4 }
 0x446   :  { %v2526_v8 = vpop.permute.xlu2 %2525 }
 0x447   :  { %v2541_v12 = vshrl.u32 %v2526_v8, 16  ;;  %v2968_v26 = vrot.slane %v2526_v8, 4  ;;  %v3045_v52 = vrot.slane %v3037_v38, 4 }
 0x449   :  { %v2981_v41 = vshrl.u32 %v2968_v26, 16 }
 0x44f   :  { %v1923_v60 = vpop.permute.xlu1 %1922 }
 0x450   :  { %v1934_v62 = vsel %vm1932_vm4, %v1931_v3, %v1923_v60 }
 0x451   :  { %v1928_v63 = vpop.permute.xlu0 %1927 }
 0x452   :  { %v1937_v4 = vsel %vm1935_vm5, %v1934_v62, %v1928_v63 }
 0x453   :  { %2015 = vmatmul.bf16.vlgmr.msra.gmra.mxu1 %v1937_v4 }
 0x457   :  { %v2520_v55 = vpop.permute.xlu1 %2519 }
 0x458   :  { %v2540_v13 = vshrl.u32 %v2520_v55, 16  ;;  %v2965_v14 = vrot.slane %v2520_v55, 4  ;;  %v2539_v15 = vpack.i.b16 %v2526_v8, %v2520_v55 }
 0x45a   :  { %v2542_v42 = vpack.i.b16 %v2541_v12, %v2540_v13  ;;  %v2576_v24 = vperm.slane %v2539_v15, %v5464_v37  ;;  %v2980_v40 = vshrl.u32 %v2965_v14, 16  ;;  %v2979_v0 = vpack.i.b16 %v2968_v26, %v2965_v14 }
 0x45c   :  { %v2577_v16 = vrot.slane %v2576_v24, 4  ;;  %v2580_v48 = vsel %vm218_vm0, %v2576_v24, %v2579_v51  ;;  %v2602_v61 = vperm.slane %v2542_v42, %v5464_v37  ;;  %v2982_v46 = vpack.i.b16 %v2981_v41, %v2980_v40 }
 0x45d   :  { %v2588_v59 = vperm.slane %v2580_v48, %v5474_v1  ;;  %v3016_v63 = vperm.slane %v2979_v0, %v5464_v37 }
 0x45e   :  { %v2578_v9 = vsel %vm218_vm0, %v2577_v16, %v2571_v32  ;;  %v2603_v11 = vrot.slane %v2602_v61, 4  ;;  %v2606_v34 = vsel %vm218_vm0, %v2602_v61, %v2605_v23  ;;  %v3042_v4 = vperm.slane %v2982_v46, %v5464_v37 }
 0x45f   :  { %v2584_v17 = vperm.slane %v2578_v9, %v5474_v1  ;;  %v2591_v27 = vrot.slane %v2588_v59, 4  ;;  %v2614_v5 = vperm.slane %v2606_v34, %v5474_v1  ;;  %v3017_v32 = vrot.slane %v3016_v63, 4 }
 0x460   :  { %v2604_v25 = vsel %vm218_vm0, %v2603_v11, %v2597_v6  ;;  %v3020_v20 = vsel %vm218_vm0, %v3016_v63, %v3019_v47  ;;  %v3043_v8 = vrot.slane %v3042_v4, 4  ;;  %v6034_v6 = vpop.permute.xlu0 %2515  ;;  %v3046_v51 = vsel %vm218_vm0, %v3042_v4, %v3045_v52  ;;  %v6071_v4 = vpop.permute.xlu1 %2527 }
 0x461   :  { %v2589_v22 = vrot.slane %v2584_v17, 4  ;;  %v2610_v31 = vperm.slane %v2604_v25, %v5474_v1  ;;  %v2617_v44 = vrot.slane %v2614_v5, 4  ;;  %v2592_v2 = vsel %vm218_vm0, 0, %v2591_v27 }
 0x462   :  { %v2723_v50 = vsel %vm218_vm0, %v2591_v27, %v2584_v17  ;;  %v2728_v53 = vrot.slane %v2592_v2, 4  ;;  %v3028_v55 = vperm.slane %v3020_v20, %v5474_v1  ;;  %v2545_v13 = vpack.i.b16 %v6034_v6, %v5981_v18 }
 0x463   :  { %v2615_v39 = vrot.slane %v2610_v31, 4  ;;  %v2590_v43 = vsel %vm218_vm0, 0, %v2589_v22  ;;  %v2618_v45 = vsel %vm218_vm0, 0, %v2617_v44  ;;  %v2742_v54 = vsel %vm218_vm0, %v2617_v44, %v2610_v31 }
 0x464   :  { %v2729_v60 = vsel %vm218_vm0, %v2728_v53, %v2590_v43  ;;  %v2747_v62 = vrot.slane %v2618_v45, 4  ;;  %v2727_v56 = vperm.slane %v2723_v50, %v5464_v37  ;;  %v2746_v35 = vperm.slane %v2742_v54, %v5464_v37 }
 0x465   :  { %v2616_v3 = vsel %vm218_vm0, 0, %v2615_v39  ;;  %v2733_v57 = vperm.slane %v2729_v60, %v5464_v37  ;;  %v3018_v14 = vsel %vm218_vm0, %v3017_v32, %v3011_v36  ;;  %v3044_v15 = vsel %vm218_vm0, %v3043_v8, %v3037_v38 }
 0x466   :  { %v2748_v7 = vsel %vm218_vm0, %v2747_v62, %v2616_v3  ;;  %v3054_v21 = vperm.slane %v3046_v51, %v5474_v1  ;;  %v3024_v42 = vperm.slane %v3018_v14, %v5474_v1  ;;  %v3031_v24 = vrot.slane %v3028_v55, 4 }
 0x467   :  { %v2734_v10 = vrot.slane %v2733_v57, 4  ;;  %v2752_v12 = vperm.slane %v2748_v7, %v5464_v37  ;;  %v2547_v40 = vshrl.u32 %v6034_v6, 16  ;;  %v3050_v16 = vperm.slane %v3044_v15, %v5474_v1 }
 0x468   :  { %v3057_v48 = vrot.slane %v3054_v21, 4  ;;  %v3029_v33 = vrot.slane %v3024_v42, 4  ;;  %v3032_v59 = vsel %vm218_vm0, 0, %v3031_v24  ;;  %v3163_v0 = vsel %vm218_vm0, %v3031_v24, %v3024_v42  ;;  %v6069_v63 = vpop.permute.xlu0 %2521 }
 0x469   :  { %v2735_v23 = vsel %vm218_vm0, %v2734_v10, %v2727_v56  ;;  %v2753_v49 = vrot.slane %v2752_v12, 4  ;;  %v3055_v11 = vrot.slane %v3050_v16, 4  ;;  %v3167_v27 = vperm.slane %v3163_v0, %v5464_v37 }
 0x46a   :  { %v2739_v26 = vperm.slane %v2735_v23, %v5474_v1  ;;  %v3030_v34 = vsel %vm218_vm0, 0, %v3029_v33  ;;  %v3058_v17 = vsel %vm218_vm0, 0, %v3057_v48  ;;  %v3168_v5 = vrot.slane %v3032_v59, 4 }
 0x46b   :  { %v2754_v61 = vsel %vm218_vm0, %v2753_v49, %v2746_v35  ;;  %v3056_v44 = vsel %vm218_vm0, 0, %v3055_v11  ;;  %v3182_v2 = vsel %vm218_vm0, %v3057_v48, %v3050_v16  ;;  %v2623_v50 = vperm.slane %v2545_v13, %v5464_v37 }
 0x46c   :  { %v2740_v41 = vrot.slane %v2739_v26, 4  ;;  %v2758_v19 = vperm.slane %v2754_v61, %v5474_v1  ;;  %v2840_v9 = vshrl.u32 %v2739_v26, 16  ;;  %v3169_v38 = vsel %vm218_vm0, %v3168_v5, %v3030_v34 }
 0x46d   :  { %v3173_v47 = vperm.slane %v3169_v38, %v5464_v37  ;;  %v3187_v52 = vrot.slane %v3058_v17, 4  ;;  %v2551_v7 = vpack.i.b16 %v6071_v4, %v6069_v63  ;;  %v2548_v32 = vpack.i.b16 %v2547_v40, %v2546_v28 }
 0x46e   :  { %v2741_v46 = vsel %vm218_vm0, 0, %v2740_v41  ;;  %v2759_v25 = vrot.slane %v2758_v19, 4  ;;  %v2839_v36 = vpack.i.b16 %v2758_v19, %v2739_v26  ;;  %v2841_v22 = vshrl.u32 %v2758_v19, 16 }
 0x46f   :  { %v2846_v31 = vshrl.u32 %v2741_v46, 16  ;;  %v3174_v62 = vrot.slane %v3173_v47, 4  ;;  %v3188_v35 = vsel %vm218_vm0, %v3187_v52, %v3056_v44  ;;  %v3186_v8 = vperm.slane %v3182_v2, %v5464_v37 }
 0x470   :  { %v2760_v39 = vsel %vm218_vm0, 0, %v2759_v25  ;;  %v6061_v43 = vpack.i.b16 %v2841_v22, %v2840_v9  ;;  %v2873_v45 = vrot.slane %v2839_v36, 2  ;;  %v3192_v10 = vperm.slane %v3188_v35, %v5464_v37 }
 0x471   :  { %v6065_v53 = vpack.i.b16 %v2760_v39, %v2741_v46  ;;  %v2847_v54 = vshrl.u32 %v2760_v39, 16  ;;  %v3175_v20 = vsel %vm218_vm0, %v3174_v62, %v3167_v27  ;;  %v2960_v12 = vrot.slane %v5981_v18, 4 }
 0x472   :  { %v2888_v3 = vsel %vm2885_vm6, %v2839_v36, %v2873_v45  ;;  %v2890_v60 = vsel %vm2889_vm7, %v2839_v36, %v2873_v45  ;;  %v2631_v55 = vrot.slane %v2623_v50, 4  ;;  %v2552_v51 = vshrl.u32 %v6069_v63, 16 }
 0x473   :  { %v6073_v56 = vpack.i.b16 %v2847_v54, %v2846_v31  ;;  %v2892_v57 = vrot.slane %v2890_v60, 2  ;;  %3397 = vst [vmem:[#allocation1] ss:$4 sm:$0xff] %v2888_v3  ;;  %v2963_v13 = vrot.slane %v6034_v6, 4  ;;  %v3179_v14 = vperm.slane %v3175_v20, %v5474_v1 }
 0x474   :  { %v3193_v15 = vrot.slane %v3192_v10, 4  ;;  %v2553_v21 = vshrl.u32 %v6071_v4, 16  ;;  %v2628_v28 = vperm.slane %v2551_v7, %v5464_v37  ;;  %v2649_v23 = vperm.slane %v2548_v32, %v5464_v37 }
 0x475   :  { %3400 = vst [vmem:[#allocation1 + $0x1] ss:$4 sm:$0xff] %v2892_v57  ;;  %v3180_v49 = vrot.slane %v3179_v14, 4  ;;  %v3280_v24 = vshrl.u32 %v3179_v14, 16  ;;  %v2986_v6 = vshrl.u32 %v2960_v12, 16  ;;  %v2985_v48 = vpack.i.b16 %v2963_v13, %v2960_v12 }
 0x476   :  { %v3194_v42 = vsel %vm218_vm0, %v3193_v15, %v3186_v8  ;;  %v2554_v40 = vpack.i.b16 %v2553_v21, %v2552_v51  ;;  %v2629_v26 = vrot.slane %v2628_v28, 4  ;;  %v2632_v16 = vsel %vm218_vm0, %v2628_v28, %v2631_v55 }
 0x477   :  { %v3198_v18 = vperm.slane %v3194_v42, %v5474_v1  ;;  %v2987_v61 = vshrl.u32 %v2963_v13, 16  ;;  %v2640_v33 = vperm.slane %v2632_v16, %v5474_v1  ;;  %v3181_v59 = vsel %vm218_vm0, 0, %v3180_v49 }
 0x478   :  { %v2657_v9 = vrot.slane %v2649_v23, 4  ;;  %v3286_v11 = vshrl.u32 %v3181_v59, 16  ;;  %v2630_v34 = vsel %vm218_vm0, %v2629_v26, %v2623_v50  ;;  %v2654_v17 = vperm.slane %v2554_v40, %v5464_v37 }
 0x479   :  { %v3199_v0 = vrot.slane %v3198_v18, 4  ;;  %v6095_v41 = vpack.i.b16 %v3198_v18, %v3179_v14  ;;  %v3281_v19 = vshrl.u32 %v3198_v18, 16  ;;  %v2636_v46 = vperm.slane %v2630_v34, %v5474_v1 }
 0x47a   :  { %v2643_v25 = vrot.slane %v2640_v33, 4  ;;  %v2988_v36 = vpack.i.b16 %v2987_v61, %v2986_v6  ;;  %v2655_v44 = vrot.slane %v2654_v17, 4  ;;  %v2966_v39 = vrot.slane %v6069_v63, 4 }
 0x47b   :  { %v3200_v27 = vsel %vm218_vm0, 0, %v3199_v0  ;;  %v6100_v5 = vpack.i.b16 %v3281_v19, %v3280_v24  ;;  %v2641_v38 = vrot.slane %v2636_v46, 4  ;;  %v2658_v50 = vsel %vm218_vm0, %v2654_v17, %v2657_v9 }
 0x47c   :  { %v6103_v22 = vpack.i.b16 %v3200_v27, %v3181_v59  ;;  %v3287_v31 = vshrl.u32 %v3200_v27, 16  ;;  %v2656_v45 = vsel %vm218_vm0, %v2655_v44, %v2649_v23  ;;  %v2644_v47 = vsel %vm218_vm0, 0, %v2643_v25 }
 0x47d   :  { %v3063_v54 = vperm.slane %v2985_v48, %v5464_v37  ;;  %v3089_v52 = vperm.slane %v2988_v36, %v5464_v37  ;;  %v2969_v3 = vrot.slane %v6071_v4, 4  ;;  %v2642_v60 = vsel %vm218_vm0, 0, %v2641_v38 }
 0x47e   :  { %v6105_v2 = vpack.i.b16 %v3287_v31, %v3286_v11  ;;  %v2662_v62 = vperm.slane %v2656_v45, %v5474_v1  ;;  %v2666_v57 = vperm.slane %v2658_v50, %v5474_v1  ;;  %v2992_v35 = vshrl.u32 %v2966_v39, 16 }
 0x47f   :  { %v2761_v63 = vsel %vm218_vm0, %v2643_v25, %v2636_v46  ;;  %v2766_v7 = vrot.slane %v2644_v47, 4  ;;  %v2991_v8 = vpack.i.b16 %v2969_v3, %v2966_v39  ;;  %v3071_v10 = vrot.slane %v3063_v54, 4 }
 0x480   :  { %v2667_v32 = vrot.slane %v2662_v62, 4  ;;  %v2669_v20 = vrot.slane %v2666_v57, 4  ;;  %v3097_v12 = vrot.slane %v3089_v52, 4  ;;  %v2993_v51 = vshrl.u32 %v2969_v3, 16 }
 0x481   :  { %v2767_v55 = vsel %vm218_vm0, %v2766_v7, %v2642_v60  ;;  %v2765_v14 = vperm.slane %v2761_v63, %v5464_v37  ;;  %v3068_v49 = vperm.slane %v2991_v8, %v5464_v37 }
 0x482   :  { %v2668_v4 = vsel %vm218_vm0, 0, %v2667_v32  ;;  %v2670_v13 = vsel %vm218_vm0, 0, %v2669_v20  ;;  %v2771_v15 = vperm.slane %v2767_v55, %v5464_v37  ;;  %v2780_v21 = vsel %vm218_vm0, %v2669_v20, %v2662_v62  ;;  %v4896_v32 = vld [vmem:[#allocation11 + $0x38] sm:$0xff] }
 0x483   :  { %v2785_v28 = vrot.slane %v2670_v13, 4  ;;  %v2994_v23 = vpack.i.b16 %v2993_v51, %v2992_v35  ;;  %v3069_v18 = vrot.slane %v3068_v49, 4  ;;  %v3072_v40 = vsel %vm218_vm0, %v3068_v49, %v3071_v10  ;;  %2092 = vmatpush.bf16.msrb.mxu2 %v4896_v32 }
 0x484   :  { %v2772_v42 = vrot.slane %v2771_v15, 4  ;;  %v2784_v6 = vperm.slane %v2780_v21, %v5464_v37  ;;  %v3080_v61 = vperm.slane %v3072_v40, %v5474_v1 }
 0x485   :  { %v2786_v24 = vsel %vm218_vm0, %v2785_v28, %v2668_v4  ;;  %v3094_v26 = vperm.slane %v2994_v23, %v5464_v37  ;;  %v3070_v59 = vsel %vm218_vm0, %v3069_v18, %v3063_v54  ;;  %v6161_v4 = vpop.permute.xlu2 %2517  ;;  %v2558_v23 = vshrl.u32 %v5991_v58, 16 }
 0x486   :  { %v2773_v16 = vsel %vm218_vm0, %v2772_v42, %v2765_v14  ;;  %v2790_v48 = vperm.slane %v2786_v24, %v5464_v37  ;;  %v3076_v11 = vperm.slane %v3070_v59, %v5474_v1  ;;  %v3083_v34 = vrot.slane %v3080_v61, 4  ;;  %v4895_v42 = vld [vmem:[#allocation11 + $0x30] sm:$0xff] }
 0x487   :  { %v6133_v33 = vperm.slane %v2773_v16, %v5474_v1  ;;  %v3095_v0 = vrot.slane %v3094_v26, 4  ;;  %v3098_v19 = vsel %vm218_vm0, %v3094_v26, %v3097_v12  ;;  %v2557_v49 = vpack.i.b16 %v6161_v4, %v5991_v58  ;;  %v6175_v16 = vpop.permute.xlu0 %2523  ;;  %2093 = vmatpush.bf16.msrb.mxu2 %v4895_v42 }
 0x488   :  { %v2791_v9 = vrot.slane %v2790_v48, 4  ;;  %v3106_v17 = vperm.slane %v3098_v19, %v5474_v1  ;;  %v3081_v36 = vrot.slane %v3076_v11, 4  ;;  %v3084_v31 = vsel %vm218_vm0, 0, %v3083_v34  ;;  %v4894_v19 = vld [vmem:[#allocation11 + $0x28] sm:$0xff] }
 0x489   :  { %v2778_v27 = vrot.slane %v6133_v33, 4  ;;  %v3096_v46 = vsel %vm218_vm0, %v3095_v0, %v3089_v52  ;;  %v3201_v47 = vsel %vm218_vm0, %v3083_v34, %v3076_v11  ;;  %v3206_v35 = vrot.slane %v3084_v31, 4  ;;  %v6179_v0 = vpop.permute.xlu1 %2529 }
 0x48a   :  { %v2792_v25 = vsel %vm218_vm0, %v2791_v9, %v2784_v6  ;;  %v3102_v44 = vperm.slane %v3096_v46, %v5474_v1  ;;  %v3109_v45 = vrot.slane %v3106_v17, 4  ;;  %v3082_v60 = vsel %vm218_vm0, 0, %v3081_v36 }
 0x48b   :  { %v2779_v38 = vsel %vm218_vm0, 0, %v2778_v27  ;;  %v6146_v39 = vperm.slane %v2792_v25, %v5474_v1  ;;  %v3207_v55 = vsel %vm218_vm0, %v3206_v35, %v3082_v60  ;;  %v3205_v14 = vperm.slane %v3201_v47, %v5464_v37  ;;  %2094 = vmatpush.bf16.msrb.mxu2 %v4894_v19 }
 0x48c   :  { %v2858_v50 = vshrl.u32 %v2779_v38, 16  ;;  %v3107_v54 = vrot.slane %v3102_v44, 4  ;;  %v3110_v62 = vsel %vm218_vm0, 0, %v3109_v45  ;;  %v3220_v63 = vsel %vm218_vm0, %v3109_v45, %v3102_v44 }
 0x48d   :  { %v2797_v3 = vrot.slane %v6146_v39, 4  ;;  %v2851_v52 = vpack.i.b16 %v6146_v39, %v6133_v33  ;;  %v3225_v7 = vrot.slane %v3110_v62, 4  ;;  %v3211_v15 = vperm.slane %v3207_v55, %v5464_v37 }
 0x48e   :  { %v3108_v57 = vsel %vm218_vm0, 0, %v3107_v54  ;;  %v3224_v40 = vperm.slane %v3220_v63, %v5464_v37  ;;  %v2559_v26 = vshrl.u32 %v6161_v4, 16  ;;  %v2675_v34 = vperm.slane %v2557_v49, %v5464_v37  ;;  %v4893_v54 = vld [vmem:[#allocation11 + $0x20] sm:$0xff] }
 0x48f   :  { %v2798_v20 = vsel %vm218_vm0, 0, %v2797_v3  ;;  %v2874_v8 = vrot.slane %v2851_v52, 2  ;;  %v3226_v51 = vsel %vm218_vm0, %v3225_v7, %v3108_v57  ;;  %v3212_v18 = vrot.slane %v3211_v15, 4  ;;  %2095 = vmatpush.bf16.msrb.mxu2 %v4893_v54 }
 0x490   :  { %v6157_v10 = vpack.i.b16 %v2798_v20, %v2779_v38  ;;  %v2859_v12 = vshrl.u32 %v2798_v20, 16  ;;  %v3230_v28 = vperm.slane %v3226_v51, %v5464_v37  ;;  %v2560_v11 = vpack.i.b16 %v2559_v26, %v2558_v23 }
 0x491   :  { %v2895_v13 = vsel %vm2885_vm6, %v2851_v52, %v2874_v8  ;;  %v2896_v24 = vsel %vm2889_vm7, %v2851_v52, %v2874_v8  ;;  %v3213_v6 = vsel %vm218_vm0, %v3212_v18, %v3205_v14  ;;  %v2564_v17 = vshrl.u32 %v6175_v16, 16 }
 0x492   :  { %v6166_v21 = vpack.i.b16 %v2859_v12, %v2858_v50  ;;  %3402 = vst [vmem:[#allocation1 + $0x2] ss:$4 sm:$0xff] %v2895_v13  ;;  %v3231_v48 = vrot.slane %v3230_v28, 4  ;;  %v2898_v61 = vrot.slane %v2896_v24, 2  ;;  %v3217_v59 = vperm.slane %v3213_v6, %v5474_v1  ;;  %v4892_v12 = vld [vmem:[#allocation11 + $0x18] sm:$0xff]  ;;  %v4891_v24 = vld [vmem:[#allocation11 + $0x10] sm:$0xff] }
 0x493   :  { %v2563_v31 = vpack.i.b16 %v6179_v0, %v6175_v16  ;;  %v2565_v44 = vshrl.u32 %v6179_v0, 16  ;;  %v2683_v52 = vrot.slane %v2675_v34, 4  ;;  %v2701_v60 = vperm.slane %v2560_v11, %v5464_v37  ;;  %2096 = vmatpush.bf16.msrb.mxu2 %v4892_v12  ;;  %v4890_v11 = vld [vmem:[#allocation11 + $0x8] sm:$0xff] }
 0x494   :  { %v3232_v9 = vsel %vm218_vm0, %v3231_v48, %v3224_v40  ;;  %v3218_v27 = vrot.slane %v3217_v59, 4  ;;  %v3292_v25 = vshrl.u32 %v3217_v59, 16 }
 0x495   :  { %v3236_v46 = vperm.slane %v3232_v9, %v5474_v1  ;;  %v2566_v62 = vpack.i.b16 %v2565_v44, %v2564_v17  ;;  %v2680_v63 = vperm.slane %v2563_v31, %v5464_v37  ;;  %v2709_v51 = vrot.slane %v2701_v60, 4 }
 0x496   :  { %v3219_v38 = vsel %vm218_vm0, 0, %v3218_v27 }
 0x497   :  { %v3237_v45 = vrot.slane %v3236_v46, 4  ;;  %v6191_v47 = vpack.i.b16 %v3236_v46, %v3217_v59  ;;  %v3293_v50 = vshrl.u32 %v3236_v46, 16  ;;  %v3298_v3 = vshrl.u32 %v3219_v38, 16  ;;  %2097 = vmatpush.bf16.msrb.mxu2 %v4891_v24 }
 0x498   :  { %v2681_v20 = vrot.slane %v2680_v63, 4  ;;  %v2706_v8 = vperm.slane %v2566_v62, %v5464_v37  ;;  %v2684_v13 = vsel %vm218_vm0, %v2680_v63, %v2683_v52  ;;  %v4889_v52 = vld [vmem:[#allocation11] sm:$0xff] }
 0x499   :  { %v6185_v36 = vld.sshfl [vmem:[#allocation1] sm:$0xff pattern:$0x73625140]  ;;  %v3238_v57 = vsel %vm218_vm0, 0, %v3237_v45  ;;  %v6195_v35 = vpack.i.b16 %v3293_v50, %v3292_v25  ;;  %v2692_v15 = vperm.slane %v2684_v13, %v5474_v1 }
 0x49a   :  { %3423 = vst [vmem:[#allocation1] ss:$4 sm:$0xff] %v2898_v61  ;;  %v6198_v7 = vpack.i.b16 %v3238_v57, %v3219_v38  ;;  %v3299_v32 = vshrl.u32 %v3238_v57, 16  ;;  %v2682_v14 = vsel %vm218_vm0, %v2681_v20, %v2675_v34  ;;  %v2707_v42 = vrot.slane %v2706_v8, 4  ;;  %v4959_v45 = vld [vmem:[%s6614_s5] ss:$0 sm:$0xff] }
 0x49b   :  { %v2688_v23 = vperm.slane %v2682_v14, %v5474_v1  ;;  %v2695_v49 = vrot.slane %v2692_v15, 4  ;;  %v2710_v18 = vsel %vm218_vm0, %v2706_v8, %v2709_v51  ;;  %2098 = vmatpush.bf16.msrb.mxu2 %v4890_v11 }
 0x49c   :  { %v6201_v55 = vpack.i.b16 %v3299_v32, %v3298_v3  ;;  %v2708_v6 = vsel %vm218_vm0, %v2707_v42, %v2701_v60  ;;  %v2718_v61 = vperm.slane %v2710_v18, %v5474_v1  ;;  %v2853_v42 = vshrl.u32 %v6146_v39, 16 }
 0x49d   :  { %v2693_v40 = vrot.slane %v2688_v23, 4  ;;  %v2696_v26 = vsel %vm218_vm0, 0, %v2695_v49  ;;  %v2714_v48 = vperm.slane %v2708_v6, %v5474_v1  ;;  %v2799_v9 = vsel %vm218_vm0, %v2695_v49, %v2688_v23 }
 0x49e   :  { %v2804_v59 = vrot.slane %v2696_v26, 4  ;;  %v2721_v17 = vrot.slane %v2718_v61, 4  ;;  %v2803_v38 = vperm.slane %v2799_v9, %v5464_v37 }
 0x49f   :  { %v2694_v19 = vsel %vm218_vm0, 0, %v2693_v40  ;;  %v2719_v34 = vrot.slane %v2714_v48, 4  ;;  %2099 = vmatpush.bf16.msrb.mxu2 %v4889_v52  ;;  %v2876_v40 = vrot.slane %v6061_v43, 2 }
 0x4a0   :  { %v2805_v27 = vsel %vm218_vm0, %v2804_v59, %v2694_v19  ;;  %v2722_v44 = vsel %vm218_vm0, 0, %v2721_v17  ;;  %v2818_v54 = vsel %vm218_vm0, %v2721_v17, %v2714_v48  ;;  %v2964_v17 = vrot.slane %v6161_v4, 4 }
 0x4a1   :  { %v2809_v46 = vperm.slane %v2805_v27, %v5464_v37  ;;  %v2720_v31 = vsel %vm218_vm0, 0, %v2719_v34  ;;  %v2823_v3 = vrot.slane %v2722_v44, 4  ;;  %v2822_v63 = vperm.slane %v2818_v54, %v5464_v37 }
 0x4a2   :  { %v2908_v61 = vsel %vm2889_vm7, %v6061_v43, %v2876_v40  ;;  %v2961_v34 = vrot.slane %v5991_v58, 4 }
 0x4a3   :  { %v2810_v50 = vrot.slane %v2809_v46, 4  ;;  %v2824_v62 = vsel %vm218_vm0, %v2823_v3, %v2720_v31  ;;  %v2910_v39 = vrot.slane %v2908_v61, 2  ;;  %v2999_v31 = vshrl.u32 %v2964_v17, 16 }
 0x4a4   :  { %v2828_v32 = vperm.slane %v2824_v62, %v5464_v37  ;;  %v2879_v62 = vrot.slane %v6065_v53, 2 }
 0x4a5   :  { %v2811_v57 = vsel %vm218_vm0, %v2810_v50, %v2803_v38  ;;  %v2970_v38 = vrot.slane %v6179_v0, 4  ;;  %v2997_v50 = vpack.i.b16 %v2964_v17, %v2961_v34 }
 0x4a6   :  { %v2829_v8 = vrot.slane %v2828_v32, 4  ;;  %v2815_v51 = vperm.slane %v2811_v57, %v5474_v1 }
 0x4a7   :  { %v3005_v52 = vshrl.u32 %v2970_v38, 16 }
 0x4a8   :  { %v2830_v13 = vsel %vm218_vm0, %v2829_v8, %v2822_v63  ;;  %v2864_v6 = vshrl.u32 %v2815_v51, 16  ;;  %v2816_v57 = vrot.slane %v2815_v51, 4  ;;  %v2926_v8 = vsel %vm2889_vm7, %v6065_v53, %v2879_v62 }
 0x4a9   :  { %v2834_v15 = vperm.slane %v2830_v13, %v5474_v1 }
 0x4aa   :  { %v2817_v13 = vsel %vm218_vm0, 0, %v2816_v57 }
 0x4ab   :  { %v2863_v49 = vpack.i.b16 %v2834_v15, %v2815_v51  ;;  %v2865_v48 = vshrl.u32 %v2834_v15, 16  ;;  %v2835_v63 = vrot.slane %v2834_v15, 4  ;;  %v2925_v51 = vsel %vm2885_vm6, %v6065_v53, %v2879_v62 }
 0x4ac   :  { %v2883_v62 = vrot.slane %v6166_v21, 2 }
 0x4ad   :  { %v2866_v19 = vpack.i.b16 %v2865_v48, %v2864_v6 }
 0x4af   :  { %v2878_v27 = vrot.slane %v2866_v19, 2 }
 0x4b1   :  { %v2920_v44 = vsel %vm2889_vm7, %v2866_v19, %v2878_v27  ;;  %v2919_v58 = vsel %vm2885_vm6, %v2866_v19, %v2878_v27 }
 0x4b2   :  { %v2922_v54 = vrot.slane %v2920_v44, 2 }
 0x4d0   :  { %v2016_v28 = vpop.f32.mrf.mxu1 }
 0x4d1   :  { %v2017_v20 = vadd.f32 %v4959_v45, %v2016_v28  ;;  %v2852_v28 = vshrl.u32 %v6133_v33, 16  ;;  %v2907_v33 = vsel %vm2885_vm6, %v6061_v43, %v2876_v40  ;;  %v2967_v43 = vrot.slane %v6175_v16, 4 }
 0x4d2   :  { %v3115_v16 = vperm.slane %v2997_v50, %v5464_v37 }
 0x4d3   :  { %v6233_v14 = vadd.f32 %v2017_v20, %v5481_v29  ;;  %v2854_v26 = vpack.i.b16 %v2853_v42, %v2852_v28  ;;  %v3004_v4 = vshrl.u32 %v2967_v43, 16  ;;  %v3003_v32 = vpack.i.b16 %v2970_v38, %v2967_v43 }
 0x4d4   :  { %v3123_v15 = vrot.slane %v3115_v16, 4  ;;  %v2928_v42 = vrot.slane %v2926_v8, 2  ;;  %v2882_v38 = vrot.slane %v6073_v56, 2 }
 0x4d5   :  { %v2877_v59 = vrot.slane %v2854_v26, 2  ;;  %v3006_v20 = vpack.i.b16 %v3005_v52, %v3004_v4  ;;  %v3120_v28 = vperm.slane %v3003_v32, %v5464_v37 }
 0x4d6   :  { %v2944_v52 = vsel %vm2889_vm7, %v6073_v56, %v2882_v38 }
 0x4d7   :  { %v2913_v9 = vsel %vm2885_vm6, %v2854_v26, %v2877_v59  ;;  %v2914_v46 = vsel %vm2889_vm7, %v2854_v26, %v2877_v59  ;;  %v3121_v26 = vrot.slane %v3120_v28, 4  ;;  %v3124_v6 = vsel %vm218_vm0, %v3120_v28, %v3123_v15 }
 0x4d8   :  { %v2018_v25 = vpop.f32.mrf.mxu1  ;;  %v3407_v15 = vsel %vm1272_vm1, %v6185_v36, 0 }
 0x4d9   :  { %v2019_v60 = vadd.f32 %v4959_v45, %v2018_v25  ;;  %v2998_v25 = vshrl.u32 %v2961_v34, 16  ;;  %v2916_v45 = vrot.slane %v2914_v46, 2  ;;  %3416 = vmatpush.bf16.xpose.msrb.mxu1 %v3407_v15 }
 0x4db   :  { %v6228_v12 = vadd.f32 %v2019_v60, %v5484_v30  ;;  %v2875_v30 = vrot.slane %v2863_v49, 2  ;;  %v3000_v3 = vpack.i.b16 %v2999_v31, %v2998_v25 }
 0x4dd   :  { %v2023_v23 = vpack.c.bf16 %v6228_v12, %v6233_v14  ;;  %v2901_v24 = vsel %vm2885_vm6, %v2863_v49, %v2875_v30  ;;  %v2902_v18 = vsel %vm2889_vm7, %v2863_v49, %v2875_v30  ;;  %v3141_v0 = vperm.slane %v3000_v3, %v5464_v37 }
 0x4de   :  { %v2904_v29 = vrot.slane %v2902_v18, 2  ;;  %3425 = vst [vmem:[#allocation1 + $0x1] ss:$4 sm:$0xff] %v2901_v24  ;;  %v2880_v49 = vrot.slane %v6157_v10, 2  ;;  %v3146_v18 = vperm.slane %v3006_v20, %v5464_v37  ;;  %v2870_v3 = vshrl.u32 %v2817_v13, 16 }
 0x4df   :  { %2100 = vmatmul.bf16.vlgmr.msrb.gmra.mxu2 %v2023_v23  ;;  %v2836_v23 = vsel %vm218_vm0, 0, %v2835_v63  ;;  %v3149_v30 = vrot.slane %v3141_v0, 4  ;;  %v2946_v20 = vrot.slane %v2944_v52, 2  ;;  %v3316_v52 = vrot.slane %v6100_v5, 2 }
 0x4e0   :  { %3428 = vst [vmem:[#allocation1 + $0x2] ss:$4 sm:$0xff] %v2904_v29  ;;  %v2869_v24 = vpack.i.b16 %v2836_v23, %v2817_v13  ;;  %v2931_v40 = vsel %vm2885_vm6, %v6157_v10, %v2880_v49  ;;  %v3147_v61 = vrot.slane %v3146_v18, 4  ;;  %v2932_v59 = vsel %vm2889_vm7, %v6157_v10, %v2880_v49 }
 0x4e1   :  { %v3150_v53 = vsel %vm218_vm0, %v3146_v18, %v3149_v30  ;;  %v2934_v17 = vrot.slane %v2932_v59, 2  ;;  %v2871_v4 = vshrl.u32 %v2836_v23, 16  ;;  %v2949_v13 = vsel %vm2885_vm6, %v6166_v21, %v2883_v62 }
 0x4e2   :  { %v2881_v48 = vrot.slane %v2869_v24, 2  ;;  %v3158_v19 = vperm.slane %v3150_v53, %v5474_v1  ;;  %v3148_v34 = vsel %vm218_vm0, %v3147_v61, %v3141_v0  ;;  %v2943_v0 = vsel %vm2885_vm6, %v6073_v56, %v2882_v38 }
 0x4e3   :  { %v3154_v43 = vperm.slane %v3148_v34, %v5474_v1  ;;  %v2872_v8 = vpack.i.b16 %v2871_v4, %v2870_v3 }
 0x4e4   :  { %v2937_v25 = vsel %vm2885_vm6, %v2869_v24, %v2881_v48  ;;  %v3161_v10 = vrot.slane %v3158_v19, 4  ;;  %v3313_v19 = vrot.slane %v6095_v41, 2 }
 0x4e5   :  { %v2884_v30 = vrot.slane %v2872_v8, 2 }
 0x4e7   :  { %v6248_v11 = vld.sshfl [vmem:[#allocation1] sm:$0xff pattern:$0x73625140]  ;;  %v2955_v59 = vsel %vm2885_vm6, %v2872_v8, %v2884_v30 }
 0x4e8   :  { %3448 = vst [vmem:[#allocation1] ss:$4 sm:$0xff] %v2907_v33  ;;  %v3132_v33 = vperm.slane %v3124_v6, %v5474_v1 }
 0x4e9   :  { %3451 = vst [vmem:[#allocation1 + $0x1] ss:$4 sm:$0xff] %v2910_v39  ;;  %v3122_v39 = vsel %vm218_vm0, %v3121_v26, %v3115_v16 }
 0x4ea   :  { %3453 = vst [vmem:[#allocation1 + $0x2] ss:$4 sm:$0xff] %v2913_v9  ;;  %v2938_v9 = vsel %vm2889_vm7, %v2869_v24, %v2881_v48  ;;  %v3128_v27 = vperm.slane %v3122_v39, %v5474_v1  ;;  %v3135_v46 = vrot.slane %v3132_v33, 4  ;;  %v2956_v48 = vsel %vm2889_vm7, %v2872_v8, %v2884_v30 }
 0x4eb   :  { %v2940_v31 = vrot.slane %v2938_v9, 2  ;;  %v2958_v33 = vrot.slane %v2956_v48, 2  ;;  %v3319_v30 = vrot.slane %v6103_v22, 2 }
 0x4ec   :  { %v3136_v50 = vsel %vm218_vm0, 0, %v3135_v46 }
 0x4ed   :  { %v3244_v57 = vrot.slane %v3136_v50, 4 }
 0x4f1   :  { %v6257_v60 = vld.sshfl [vmem:[#allocation1] sm:$0xff pattern:$0x73625140] }
 0x4f2   :  { %3474 = vst [vmem:[#allocation1] ss:$4 sm:$0xff] %v2916_v45  ;;  %v3133_v45 = vrot.slane %v3128_v27, 4  ;;  %v3458_v56 = vsel %vm1272_vm1, %v6257_v60, 0  ;;  %v3258_v60 = vsel %vm218_vm0, %v3161_v10, %v3154_v43 }
 0x4f3   :  { %3476 = vst [vmem:[#allocation1 + $0x1] ss:$4 sm:$0xff] %v2919_v58  ;;  %v3159_v58 = vrot.slane %v3154_v43, 4  ;;  %3467 = vmatpush.bf16.xpose.msra.mxu1 %v3458_v56 }
 0x4f4   :  { %3479 = vst [vmem:[#allocation1 + $0x2] ss:$4 sm:$0xff] %v2922_v54  ;;  %v3162_v54 = vsel %vm218_vm0, 0, %v3161_v10  ;;  %v3134_v16 = vsel %vm218_vm0, 0, %v3133_v45 }
 0x4f5   :  { %v3263_v63 = vrot.slane %v3162_v54, 4  ;;  %v3160_v32 = vsel %vm218_vm0, 0, %v3159_v58  ;;  %v3245_v23 = vsel %vm218_vm0, %v3244_v57, %v3134_v16  ;;  %v3317_v16 = vrot.slane %v6195_v35, 2 }
 0x4f6   :  { %v3249_v36 = vperm.slane %v3245_v23, %v5464_v37 }
 0x4f7   :  { %v3264_v49 = vsel %vm218_vm0, %v3263_v63, %v3160_v32  ;;  %v3345_v32 = vsel %vm2885_vm6, %v6100_v5, %v3316_v52  ;;  %v3351_v8 = vsel %vm2885_vm6, %v6195_v35, %v3317_v16 }
 0x4f8   :  { %v3268_v26 = vperm.slane %v3264_v49, %v5464_v37  ;;  %v3250_v61 = vrot.slane %v3249_v36, 4 }
 0x4fa   :  { %v3269_v53 = vrot.slane %v3268_v26, 4  ;;  %v3320_v26 = vrot.slane %v6198_v7, 2 }
 0x4fb   :  { %v3480_v29 = vld.sshfl [vmem:[#allocation1] sm:$0xff pattern:$0x73625140] }
 0x4fc   :  { %3499 = vst [vmem:[#allocation1] ss:$4 sm:$0xff] %v2925_v51  ;;  %v3484_v18 = vsel %vm1272_vm1, %v3480_v29, 0  ;;  %v3369_v48 = vsel %vm2885_vm6, %v6198_v7, %v3320_v26 }
 0x4fd   :  { %3502 = vst [vmem:[#allocation1 + $0x1] ss:$4 sm:$0xff] %v2928_v42  ;;  %v3433_v42 = vsel %vm1272_vm1, %v6248_v11, 0  ;;  %v3239_v11 = vsel %vm218_vm0, %v3135_v46, %v3128_v27  ;;  %v3328_v46 = vsel %vm2889_vm7, %v6095_v41, %v3313_v19 }
 0x4fe   :  { %3504 = vst [vmem:[#allocation1 + $0x2] ss:$4 sm:$0xff] %v2931_v40  ;;  %v2950_v40 = vsel %vm2889_vm7, %v6166_v21, %v2883_v62  ;;  %3442 = vmatpush.bf16.xpose.msra.mxu2 %v3433_v42  ;;  %v3243_v29 = vperm.slane %v3239_v11, %v5464_v37  ;;  %v3262_v21 = vperm.slane %v3258_v60, %v5464_v37  ;;  %v3330_v43 = vrot.slane %v3328_v46, 2 }
 0x4ff   :  { %v2952_v6 = vrot.slane %v2950_v40, 2  ;;  %v3364_v40 = vsel %vm2889_vm7, %v6103_v22, %v3319_v30  ;;  %v3363_v11 = vsel %vm2885_vm6, %v6103_v22, %v3319_v30 }
 0x500   :  { %v3251_v9 = vsel %vm218_vm0, %v3250_v61, %v3243_v29  ;;  %v3270_v34 = vsel %vm218_vm0, %v3269_v53, %v3262_v21  ;;  %v3366_v60 = vrot.slane %v3364_v40, 2  ;;  %v3370_v21 = vsel %vm2889_vm7, %v6198_v7, %v3320_v26 }
 0x501   :  { %v3274_v27 = vperm.slane %v3270_v34, %v5474_v1  ;;  %v3323_v7 = vrot.slane %v6201_v55, 2 }
 0x503   :  { %v3305_v63 = vshrl.u32 %v3274_v27, 16 }
 0x505   :  { %v3505_v44 = vld.sshfl [vmem:[#allocation1] sm:$0xff pattern:$0x73625140] }
 0x506   :  { %3525 = vst [vmem:[#allocation1] ss:$4 sm:$0xff] %v2934_v17  ;;  %v3509_v28 = vsel %vm1272_vm1, %v3505_v44, 0  ;;  %3493 = vmatpush.bf16.xpose.msrb.mxu2 %v3484_v18  ;;  %v3255_v17 = vperm.slane %v3251_v9, %v5474_v1  ;;  %v3275_v18 = vrot.slane %v3274_v27, 4  ;;  %v3322_v9 = vrot.slane %v6105_v2, 2 }
 0x507   :  { %3527 = vst [vmem:[#allocation1 + $0x1] ss:$4 sm:$0xff] %v2937_v25  ;;  %3518 = vmatpush.bf16.xpose.msrb.mxu3 %v3509_v28  ;;  %v3314_v25 = vrot.slane %v6191_v47, 2 }
 0x508   :  { %3530 = vst [vmem:[#allocation1 + $0x2] ss:$4 sm:$0xff] %v2940_v31  ;;  %v3327_v31 = vsel %vm2885_vm6, %v6095_v41, %v3313_v19  ;;  %v3303_v10 = vpack.i.b16 %v3274_v27, %v3255_v17  ;;  %v3304_v57 = vshrl.u32 %v3255_v17, 16  ;;  %v3276_v36 = vsel %vm218_vm0, 0, %v3275_v18 }
 0x509   :  { %v3333_v44 = vsel %vm2885_vm6, %v6191_v47, %v3314_v25  ;;  %v3334_v50 = vsel %vm2889_vm7, %v6191_v47, %v3314_v25  ;;  %v3346_v47 = vsel %vm2889_vm7, %v6100_v5, %v3316_v52  ;;  %v3382_v27 = vsel %vm2889_vm7, %v6105_v2, %v3322_v9 }
 0x50a   :  { %v3315_v45 = vrot.slane %v3303_v10, 2  ;;  %v3336_v54 = vrot.slane %v3334_v50, 2  ;;  %v3381_v46 = vsel %vm2885_vm6, %v6105_v2, %v3322_v9  ;;  %v3384_v25 = vrot.slane %v3382_v27, 2 }
 0x50b   :  { %v3388_v50 = vsel %vm2889_vm7, %v6201_v55, %v3323_v7 }
 0x50c   :  { %v3340_v58 = vsel %vm2889_vm7, %v3303_v10, %v3315_v45  ;;  %v3339_v3 = vsel %vm2885_vm6, %v3303_v10, %v3315_v45  ;;  %v3387_v10 = vsel %vm2885_vm6, %v6201_v55, %v3323_v7 }
 0x50d   :  { %v3342_v41 = vrot.slane %v3340_v58, 2  ;;  %v4960_v58 = vld [vmem:[%s6616_s7] ss:$0 sm:$0xff] }
 0x50f   :  { %v3531_v51 = vld.sshfl [vmem:[#allocation1] sm:$0xff pattern:$0x73625140] }
 0x510   :  { %3550 = vst [vmem:[#allocation1] ss:$4 sm:$0xff] %v2943_v0  ;;  %v3535_v24 = vsel %vm1272_vm1, %v3531_v51, 0  ;;  %v3348_v0 = vrot.slane %v3346_v47, 2  ;;  %v3352_v51 = vsel %vm2889_vm7, %v6195_v35, %v3317_v16 }
 0x511   :  { %3553 = vst [vmem:[#allocation1 + $0x1] ss:$4 sm:$0xff] %v2946_v20  ;;  %3544 = vmatpush.bf16.xpose.msrb.mxu0 %v3535_v24  ;;  %v3306_v20 = vpack.i.b16 %v3305_v63, %v3304_v57  ;;  %v3354_v28 = vrot.slane %v3352_v51, 2  ;;  %v3256_v24 = vrot.slane %v3255_v17, 4  ;;  %v3311_v17 = vshrl.u32 %v3276_v36, 16 }
 0x512   :  { %3555 = vst [vmem:[#allocation1 + $0x2] ss:$4 sm:$0xff] %v2949_v13 }
 0x513   :  { %v3318_v49 = vrot.slane %v3306_v20, 2  ;;  %v3257_v35 = vsel %vm218_vm0, 0, %v3256_v24 }
 0x514   :  { %v3310_v34 = vshrl.u32 %v3257_v35, 16 }
 0x515   :  { %v3358_v15 = vsel %vm2889_vm7, %v3306_v20, %v3318_v49  ;;  %v3357_v5 = vsel %vm2885_vm6, %v3306_v20, %v3318_v49 }
 0x516   :  { %v3360_v42 = vrot.slane %v3358_v15, 2 }
 0x519   :  { %v6318_v39 = vld.sshfl [vmem:[#allocation1] sm:$0xff pattern:$0x73625140] }
 0x51a   :  { %3576 = vst [vmem:[#allocation1] ss:$4 sm:$0xff] %v2952_v6  ;;  %v3309_v6 = vpack.i.b16 %v3276_v36, %v3257_v35 }
 0x51b   :  { %3578 = vst [vmem:[#allocation1 + $0x1] ss:$4 sm:$0xff] %v2955_v59  ;;  %v3372_v59 = vrot.slane %v3370_v21, 2 }
 0x51c   :  { %3581 = vst [vmem:[#allocation1 + $0x2] ss:$4 sm:$0xff] %v2958_v33  ;;  %v3321_v61 = vrot.slane %v3309_v6, 2 }
 0x51e   :  { %v3376_v53 = vsel %vm2889_vm7, %v3309_v6, %v3321_v61  ;;  %v3375_v33 = vsel %vm2885_vm6, %v3309_v6, %v3321_v61 }
 0x51f   :  { %v3378_v22 = vrot.slane %v3376_v53, 2 }
 0x523   :  { %v6332_v38 = vld.sshfl [vmem:[#allocation1] sm:$0xff pattern:$0x73625140] }
 0x524   :  { %3698 = vst [vmem:[#allocation1] ss:$4 sm:$0xff] %v3327_v31  ;;  %v3312_v31 = vpack.i.b16 %v3311_v17, %v3310_v34 }
 0x525   :  { %3701 = vst [vmem:[#allocation1 + $0x1] ss:$4 sm:$0xff] %v3330_v43 }
 0x526   :  { %3703 = vst [vmem:[#allocation1 + $0x2] ss:$4 sm:$0xff] %v3333_v44  ;;  %v3324_v45 = vrot.slane %v3312_v31, 2 }
 0x528   :  { %v3394_v2 = vsel %vm2889_vm7, %v3312_v31, %v3324_v45 }
 0x529   :  { %v3396_v52 = vrot.slane %v3394_v2, 2 }
 0x52d   :  { %v3704_v4 = vld.sshfl [vmem:[#allocation1] sm:$0xff pattern:$0x73625140] }
 0x52e   :  { %3727 = vst [vmem:[#allocation1 + $0x1] ss:$4 sm:$0xff] %v3339_v3  ;;  %v3709_v62 = vsel %vm3708_vm8, %v3704_v4, 0  ;;  %v3390_v3 = vrot.slane %v3388_v50, 2  ;;  %v3393_v4 = vsel %vm2885_vm6, %v3312_v31, %v3324_v45 }
 0x52f   :  { %3725 = vst [vmem:[#allocation1] ss:$4 sm:$0xff] %v3336_v54  ;;  %3718 = vmatpush.bf16.msra.mxu3 %v3709_v62 }
 0x530   :  { %3730 = vst [vmem:[#allocation1 + $0x2] ss:$4 sm:$0xff] %v3342_v41 }
 0x537   :  { %v3731_v13 = vld.sshfl [vmem:[#allocation1] sm:$0xff pattern:$0x73625140] }
 0x538   :  { %v3735_v23 = vsel %vm3708_vm8, %v3731_v13, 0  ;;  %3750 = vst [vmem:[#allocation1] ss:$4 sm:$0xff] %v3345_v32 }
 0x539   :  { %3744 = vmatpush.bf16.msra.mxu0 %v3735_v23  ;;  %3753 = vst [vmem:[#allocation1 + $0x1] ss:$4 sm:$0xff] %v3348_v0 }
 0x53a   :  { %3755 = vst [vmem:[#allocation1 + $0x2] ss:$4 sm:$0xff] %v3351_v8 }
 0x541   :  { %v6352_v56 = vld.sshfl [vmem:[#allocation1] sm:$0xff pattern:$0x73625140] }
 0x542   :  { %3776 = vst [vmem:[#allocation1] ss:$4 sm:$0xff] %v3354_v28 }
 0x543   :  { %3778 = vst [vmem:[#allocation1 + $0x1] ss:$4 sm:$0xff] %v3357_v5 }
 0x544   :  { %3781 = vst [vmem:[#allocation1 + $0x2] ss:$4 sm:$0xff] %v3360_v42 }
 0x54b   :  { %v6364_v29 = vld.sshfl [vmem:[#allocation1] sm:$0xff pattern:$0x73625140] }
 0x54c   :  { %3801 = vst [vmem:[#allocation1] ss:$4 sm:$0xff] %v3363_v11 }
 0x54d   :  { %3804 = vst [vmem:[#allocation1 + $0x1] ss:$4 sm:$0xff] %v3366_v60 }
 0x54e   :  { %3806 = vst [vmem:[#allocation1 + $0x2] ss:$4 sm:$0xff] %v3369_v48 }
 0x555   :  { %v6370_v19 = vld.sshfl [vmem:[#allocation1] sm:$0xff pattern:$0x73625140] }
 0x556   :  { %3827 = vst [vmem:[#allocation1] ss:$4 sm:$0xff] %v3372_v59 }
 0x557   :  { %3829 = vst [vmem:[#allocation1 + $0x1] ss:$4 sm:$0xff] %v3375_v33 }
 0x558   :  { %3832 = vst [vmem:[#allocation1 + $0x2] ss:$4 sm:$0xff] %v3378_v22 }
 0x55f   :  { %v6380_v44 = vld.sshfl [vmem:[#allocation1] sm:$0xff pattern:$0x73625140] }
 0x560   :  { %3852 = vst [vmem:[#allocation1] ss:$4 sm:$0xff] %v3381_v46 }
 0x561   :  { %3855 = vst [vmem:[#allocation1 + $0x1] ss:$4 sm:$0xff] %v3384_v25 }
 0x562   :  { %v2101_v43 = vpop.f32.mrf.mxu2  ;;  %3857 = vst [vmem:[#allocation1 + $0x2] ss:$4 sm:$0xff] %v3387_v10 }
 0x563   :  { %v2102_v55 = vadd.f32 %v4960_v58, %v2101_v43 }
 0x565   :  { %v2263_v63 = vpack.c.bf16 %v2102_v55, %v2102_v55 }
 0x567   :  { %v2285_v30 = vshrl.u32 %v2263_v63, 16 }
 0x569   :  { %v6389_v57 = vld.sshfl [vmem:[#allocation1] sm:$0xff pattern:$0x73625140] }
 0x56a   :  { %v2103_v54 = vpop.f32.mrf.mxu2  ;;  %3878 = vst [vmem:[#allocation1] ss:$4 sm:$0xff] %v3390_v3 }
 0x56b   :  { %v2104_v41 = vadd.f32 %v4960_v58, %v2103_v54  ;;  %3880 = vst [vmem:[#allocation1 + $0x1] ss:$4 sm:$0xff] %v3393_v4 }
 0x56c   :  { %3883 = vst [vmem:[#allocation1 + $0x2] ss:$4 sm:$0xff] %v3396_v52 }
 0x56d   :  { %v2264_v62 = vpack.c.bf16 %v2104_v41, %v2104_v41 }
 0x56f   :  { %2280 = vrot.lane.b32.xlu1 %v2264_v62, %s5307_s29  ;;  %2276 = vrot.lane.b32.xlu0 %v2264_v62, %s5311_s26  ;;  %v2297_v0 = vshrl.u32 %v2264_v62, 16 }
 0x570   :  { %2272 = vrot.lane.b32.xlu2 %v2264_v62, %s5326_s12 }
 0x577   :  { %2278 = vrot.lane.b32.xlu1 %v2263_v63, %s5307_s29  ;;  %2274 = vrot.lane.b32.xlu0 %v2263_v63, %s5311_s26 }
 0x578   :  { %2270 = vrot.lane.b32.xlu2 %v2263_v63, %s5326_s12 }
 0x5ca   :  { %v2273_v47 = vpop.permute.xlu2 %2272 }
 0x5cb   :  { %v2298_v16 = vshrl.u32 %v2273_v47, 16  ;;  %v2296_v32 = vpack.i.b16 %v2273_v47, %v2264_v62 }
 0x5cd   :  { %v2299_v20 = vpack.i.b16 %v2298_v16, %v2297_v0  ;;  %v2362_v13 = vperm.slane %v2296_v32, %v5464_v37 }
 0x5cf   :  { %v2388_v15 = vperm.slane %v2299_v20, %v5464_v37  ;;  %v2370_v24 = vrot.slane %v2362_v13, 4 }
 0x5d1   :  { %v2396_v26 = vrot.slane %v2388_v15, 4 }
 0x5d2   :  { %v2271_v8 = vpop.permute.xlu2 %2270 }
 0x5d3   :  { %v2286_v23 = vshrl.u32 %v2271_v8, 16  ;;  %v2284_v18 = vpack.i.b16 %v2271_v8, %v2263_v63 }
 0x5d5   :  { %v2287_v36 = vpack.i.b16 %v2286_v23, %v2285_v30  ;;  %v2310_v61 = vperm.slane %v2284_v18, %v5464_v37 }
 0x5d7   :  { %v2336_v33 = vperm.slane %v2287_v36, %v5464_v37  ;;  %v2318_v41 = vrot.slane %v2310_v61, 4 }
 0x5d9   :  { %v2344_v55 = vrot.slane %v2336_v33, 4 }
 0x5e1   :  { %v2281_v49 = vpop.permute.xlu1 %2280  ;;  %v2277_v51 = vpop.permute.xlu0 %2276 }
 0x5e2   :  { %v2304_v28 = vshrl.u32 %v2281_v49, 16  ;;  %v2302_v5 = vpack.i.b16 %v2281_v49, %v2277_v51  ;;  %v2303_v42 = vshrl.u32 %v2277_v51, 16 }
 0x5e4   :  { %v2305_v40 = vpack.i.b16 %v2304_v28, %v2303_v42  ;;  %v2367_v35 = vperm.slane %v2302_v5, %v5464_v37 }
 0x5e6   :  { %v2368_v11 = vrot.slane %v2367_v35, 4  ;;  %v2371_v60 = vsel %vm218_vm0, %v2367_v35, %v2370_v24  ;;  %v2393_v6 = vperm.slane %v2305_v40, %v5464_v37 }
 0x5e7   :  { %v2379_v48 = vperm.slane %v2371_v60, %v5474_v1 }
 0x5e8   :  { %v2369_v21 = vsel %vm218_vm0, %v2368_v11, %v2362_v13  ;;  %v2394_v53 = vrot.slane %v2393_v6, 4  ;;  %v2397_v59 = vsel %vm218_vm0, %v2393_v6, %v2396_v26 }
 0x5e9   :  { %v2375_v22 = vperm.slane %v2369_v21, %v5474_v1  ;;  %v2382_v9 = vrot.slane %v2379_v48, 4  ;;  %v2405_v34 = vperm.slane %v2397_v59, %v5474_v1  ;;  %v2279_v17 = vpop.permute.xlu1 %2278  ;;  %v2275_v27 = vpop.permute.xlu0 %2274 }
 0x5ea   :  { %v2395_v7 = vsel %vm218_vm0, %v2394_v53, %v2388_v15  ;;  %v2292_v46 = vshrl.u32 %v2279_v17, 16  ;;  %v2290_v25 = vpack.i.b16 %v2279_v17, %v2275_v27  ;;  %v2291_v31 = vshrl.u32 %v2275_v27, 16 }
 0x5eb   :  { %v2380_v43 = vrot.slane %v2375_v22, 4  ;;  %v2383_v10 = vsel %vm218_vm0, 0, %v2382_v9  ;;  %v2401_v45 = vperm.slane %v2395_v7, %v5474_v1  ;;  %v2408_v50 = vrot.slane %v2405_v34, 4 }
 0x5ec   :  { %v2448_v58 = vsel %vm218_vm0, %v2382_v9, %v2375_v22  ;;  %v2453_v2 = vrot.slane %v2383_v10, 4  ;;  %v2293_v54 = vpack.i.b16 %v2292_v46, %v2291_v31  ;;  %v2315_v3 = vperm.slane %v2290_v25, %v5464_v37 }
 0x5ed   :  { %v2381_v4 = vsel %vm218_vm0, 0, %v2380_v43  ;;  %v2406_v52 = vrot.slane %v2401_v45, 4  ;;  %v2409_v62 = vsel %vm218_vm0, 0, %v2408_v50  ;;  %v2452_v0 = vperm.slane %v2448_v58, %v5464_v37 }
 0x5ee   :  { %v2454_v63 = vsel %vm218_vm0, %v2453_v2, %v2381_v4  ;;  %v2472_v47 = vrot.slane %v2409_v62, 4  ;;  %v2316_v16 = vrot.slane %v2315_v3, 4  ;;  %v2319_v8 = vsel %vm218_vm0, %v2315_v3, %v2318_v41 }
 0x5ef   :  { %v2407_v32 = vsel %vm218_vm0, 0, %v2406_v52  ;;  %v2458_v20 = vperm.slane %v2454_v63, %v5464_v37  ;;  %v2327_v49 = vperm.slane %v2319_v8, %v5474_v1  ;;  %v2341_v51 = vperm.slane %v2293_v54, %v5464_v37 }
 0x5f0   :  { %v2473_v13 = vsel %vm218_vm0, %v2472_v47, %v2407_v32  ;;  %v2317_v23 = vsel %vm218_vm0, %v2316_v16, %v2310_v61  ;;  %v2467_v28 = vsel %vm218_vm0, %v2408_v50, %v2401_v45  ;;  %v3586_v2 = vsel %vm1272_vm1, %v6332_v38, 0 }
 0x5f1   :  { %v2459_v15 = vrot.slane %v2458_v20, 4  ;;  %v2477_v5 = vperm.slane %v2473_v13, %v5464_v37  ;;  %v2323_v42 = vperm.slane %v2317_v23, %v5474_v1  ;;  %v2330_v30 = vrot.slane %v2327_v49, 4 }
 0x5f2   :  { %v2342_v24 = vrot.slane %v2341_v51, 4  ;;  %v2345_v18 = vsel %vm218_vm0, %v2341_v51, %v2344_v55  ;;  %v2471_v11 = vperm.slane %v2467_v28, %v5464_v37  ;;  %v3837_v38 = vsel %vm3708_vm8, %v6380_v44, 0 }
 0x5f3   :  { %v2478_v40 = vrot.slane %v2477_v5, 4  ;;  %v2328_v35 = vrot.slane %v2323_v42, 4  ;;  %v2353_v36 = vperm.slane %v2345_v18, %v5474_v1  ;;  %v2460_v26 = vsel %vm218_vm0, %v2459_v15, %v2452_v0 }
 0x5f4   :  { %v2331_v60 = vsel %vm218_vm0, 0, %v2330_v30  ;;  %v2343_v6 = vsel %vm218_vm0, %v2342_v24, %v2336_v33  ;;  %v2464_v48 = vperm.slane %v2460_v26, %v5474_v1  ;;  %v2410_v59 = vsel %vm218_vm0, %v2330_v30, %v2323_v42 }
 0x5f5   :  { %v2329_v61 = vsel %vm218_vm0, 0, %v2328_v35  ;;  %v2349_v21 = vperm.slane %v2343_v6, %v5474_v1  ;;  %v2356_v53 = vrot.slane %v2353_v36, 4  ;;  %v2415_v22 = vrot.slane %v2331_v60, 4  ;;  %v3884_v35 = vld.sshfl [vmem:[#allocation1] sm:$0xff pattern:$0x73625140] }
 0x5f6   :  { %v2479_v9 = vsel %vm218_vm0, %v2478_v40, %v2471_v11  ;;  %v2465_v7 = vrot.slane %v2464_v48, 4  ;;  %v2414_v45 = vperm.slane %v2410_v59, %v5464_v37  ;;  %v3560_v13 = vsel %vm1272_vm1, %v6318_v39, 0 }
 0x5f7   :  { %v2354_v34 = vrot.slane %v2349_v21, 4  ;;  %v2357_v17 = vsel %vm218_vm0, 0, %v2356_v53  ;;  %v2483_v27 = vperm.slane %v2479_v9, %v5474_v1  ;;  %v2416_v33 = vsel %vm218_vm0, %v2415_v22, %v2329_v61 }
 0x5f8   :  { %v2434_v46 = vrot.slane %v2357_v17, 4  ;;  %v2420_v31 = vperm.slane %v2416_v33, %v5464_v37  ;;  %v2429_v50 = vsel %vm218_vm0, %v2356_v53, %v2349_v21  ;;  %v2466_v41 = vsel %vm218_vm0, 0, %v2465_v7 }
 0x5f9   :  { %v2355_v25 = vsel %vm218_vm0, 0, %v2354_v34  ;;  %v2500_v43 = vpack.i.b16 %v2483_v27, %v2464_v48  ;;  %v2484_v10 = vrot.slane %v2483_v27, 4  ;;  %v2433_v62 = vperm.slane %v2429_v50, %v5464_v37 }
 0x5fa   :  { %v2435_v58 = vsel %vm218_vm0, %v2434_v46, %v2355_v25  ;;  %v2421_v54 = vrot.slane %v2420_v31, 4  ;;  %v2502_v51 = vshrl.u32 %v2483_v27, 16  ;;  %v3811_v15 = vsel %vm3708_vm8, %v6370_v19, 0 }
 0x5fb   :  { %v2439_v3 = vperm.slane %v2435_v58, %v5464_v37  ;;  %4742 = vmatmul.msk.bf16.vlgmr.msra.gmra.mxu2 %vm1272_vm1, %v2500_v43  ;;  %v2485_v4 = vsel %vm218_vm0, 0, %v2484_v10  ;;  %v2501_v28 = vshrl.u32 %v2464_v48, 16  ;;  %v3786_v39 = vsel %vm3708_vm8, %v6364_v29, 0 }
 0x5fc   :  { %3595 = vmatpush.bf16.xpose.msra.mxu2 %v3586_v2  ;;  %v2506_v52 = vpack.i.b16 %v2485_v4, %v2466_v41  ;;  %v2422_v63 = vsel %vm218_vm0, %v2421_v54, %v2414_v45  ;;  %v3760_v18 = vsel %vm3708_vm8, %v6352_v56, 0  ;;  %v2508_v40 = vshrl.u32 %v2485_v4, 16 }
 0x5fd   :  { %v2440_v55 = vrot.slane %v2439_v3, 4  ;;  %v2426_v47 = vperm.slane %v2422_v63, %v5474_v1  ;;  %v2503_v5 = vpack.i.b16 %v2502_v51, %v2501_v28  ;;  %v2507_v19 = vshrl.u32 %v2466_v41, 16 }
 0x5fe   :  { %4746 = vmatmul.msk.bf16.vlgmr.msrb.gmra.mxu0 %vm1272_vm1, %v2506_v52  ;;  %v3888_v26 = vsel %vm3708_vm8, %v3884_v35, 0  ;;  %v3862_v6 = vsel %vm3708_vm8, %v6389_v57, 0 }
 0x5ff   :  { %3846 = vmatpush.bf16.msrb.mxu0 %v3837_v38  ;;  %v2441_v16 = vsel %vm218_vm0, %v2440_v55, %v2433_v62  ;;  %v2427_v0 = vrot.slane %v2426_v47, 4  ;;  %v2489_v30 = vshrl.u32 %v2426_v47, 16  ;;  %v2509_v36 = vpack.i.b16 %v2508_v40, %v2507_v19 }
 0x600   :  { %v2445_v32 = vperm.slane %v2441_v16, %v5474_v1 }
 0x601   :  { %v2428_v23 = vsel %vm218_vm0, 0, %v2427_v0 }
 0x602   :  { %v2488_v20 = vpack.i.b16 %v2445_v32, %v2426_v47  ;;  %v2446_v8 = vrot.slane %v2445_v32, 4  ;;  %v2490_v42 = vshrl.u32 %v2445_v32, 16  ;;  %v2495_v11 = vshrl.u32 %v2428_v23, 16 }
 0x604   :  { %4741 = vmatmul.msk.bf16.vlgmr.msrb.gmra.mxu1 %vm1272_vm1, %v2488_v20  ;;  %v2447_v49 = vsel %vm218_vm0, 0, %v2446_v8  ;;  %v2491_v24 = vpack.i.b16 %v2490_v42, %v2489_v30 }
 0x605   :  { %3569 = vmatpush.bf16.xpose.msrb.mxu1 %v3560_v13  ;;  %v2494_v44 = vpack.i.b16 %v2447_v49, %v2428_v23  ;;  %v2496_v29 = vshrl.u32 %v2447_v49, 16 }
 0x607   :  { %4745 = vmatmul.msk.bf16.vlgmr.msrb.gmra.mxu3 %vm1272_vm1, %v2494_v44  ;;  %v2497_v60 = vpack.i.b16 %v2496_v29, %v2495_v11 }
 0x608   :  { %3820 = vmatpush.bf16.msrb.mxu3 %v3811_v15 }
 0x60b   :  { %4744 = vmatmul.msk.bf16.vlgmr.msrb.gmra.mxu2 %vm1272_vm1, %v2503_v5 }
 0x60c   :  { %3795 = vmatpush.bf16.msrb.mxu2 %v3786_v39 }
 0x614   :  { %4743 = vmatmul.msk.bf16.vlgmr.msra.gmra.mxu1 %vm1272_vm1, %v2491_v24 }
 0x615   :  { %3769 = vmatpush.bf16.msra.mxu1 %v3760_v18 }
 0x61b   :  { %4748 = vmatmul.msk.bf16.vlgmr.msra.gmra.mxu2 %vm1272_vm1, %v2509_v36 }
 0x61c   :  { %3897 = vmatpush.bf16.msra.mxu2 %v3888_v26 }
 0x624   :  { %4747 = vmatmul.msk.bf16.vlgmr.msrb.gmra.mxu1 %vm1272_vm1, %v2497_v60 }
 0x625   :  { %3871 = vmatpush.bf16.msrb.mxu1 %v3862_v6 }
 0x67b   :  { %v6480_v56 = vpop.f32.mrf.mxu0 }
 0x67c   :  { %v3617_v43 = vsel %vm3601_vm9, %v6480_v56, -inf }
 0x67e   :  { %v3444_v48 = vpop.f32.mrf.mxu2 }
 0x67f   :  { %v3605_v61 = vsel %vm3601_vm9, %v3444_v48, -inf }
 0x680   :  { %3606 = vmax.xlane.f32.xlu1 %v3605_v61 }
 0x681   :  { %v3418_v21 = vpop.f32.mrf.mxu1 }
 0x682   :  { %v3602_v53 = vsel %vm3601_vm9, %v3418_v21, -inf }
 0x683   :  { %3603 = vmax.xlane.f32.xlu2 %v3602_v53  ;;  %v3548_v59 = vpop.f32.mrf.mxu0 }
 0x686   :  { %v3446_v22 = vpop.f32.mrf.mxu2 }
 0x689   :  { %v3420_v9 = vpop.f32.mrf.mxu1 }
 0x68a   :  { %v3520_v34 = vpop.f32.mrf.mxu3 }
 0x68b   :  { %v3614_v25 = vsel %vm3601_vm9, %v3520_v34, -inf }
 0x68e   :  { %v3495_v17 = vpop.f32.mrf.mxu2 }
 0x68f   :  { %v3611_v27 = vsel %vm3601_vm9, %v3495_v17, -inf }
 0x690   :  { %3612 = vmax.xlane.f32.xlu0 %v3611_v27 }
 0x691   :  { %v3469_v57 = vpop.f32.mrf.mxu1 }
 0x692   :  { %v3522_v7 = vpop.f32.mrf.mxu3  ;;  %v3608_v33 = vsel %vm3601_vm9, %v3469_v57, -inf }
 0x693   :  { %3609 = vmax.xlane.f32.xlu2 %v3608_v33 }
 0x696   :  { %v3497_v46 = vpop.f32.mrf.mxu2 }
 0x698   :  { %3615 = vmax.xlane.f32.xlu0 %v3614_v25 }
 0x699   :  { %v3471_v31 = vpop.f32.mrf.mxu1 }
 0x69b   :  { %3618 = vmax.xlane.f32.xlu2 %v3617_v43 }
 0x69e   :  { %v3597_v10 = vpop.f32.mrf.mxu2 }
 0x69f   :  { %v3623_v45 = vsel %vm3601_vm9, %v3597_v10, -inf }
 0x6a0   :  { %3624 = vmax.xlane.f32.xlu1 %v3623_v45 }
 0x6a1   :  { %v3571_v50 = vpop.f32.mrf.mxu1 }
 0x6a2   :  { %v3620_v58 = vsel %vm3601_vm9, %v3571_v50, -inf }
 0x6a3   :  { %3621 = vmax.xlane.f32.xlu0 %v3620_v58 }
 0x6a6   :  { %v3599_v2 = vpop.f32.mrf.mxu2 }
 0x6a9   :  { %v3573_v54 = vpop.f32.mrf.mxu1 }
 0x6f3   :  { %v3607_v3 = vpop.xlane.xlu1 %3606 }
 0x6f4   :  { %v3627_v41 = vsub.f32 %v3444_v48, %v3607_v3 }
 0x6f6   :  { %v3636_v4 = vmul.f32 1.442695, %v3627_v41  ;;  %v3604_v52 = vpop.xlane.xlu2 %3603 }
 0x6f7   :  { %v3626_v62 = vsub.f32 %v3418_v21, %v3604_v52 }
 0x6f8   :  { %4996 = vpow2.f32 %v3636_v4 }
 0x6f9   :  { %v3634_v55 = vmul.f32 1.442695, %v3626_v62 }
 0x6fb   :  { %4998 = vpow2.f32 %v3634_v55 }
 0x6fe   :  { %v4997_v63 = vpop.eup %4996 }
 0x6ff   :  { %v3653_v38 = vsel %vm3601_vm9, %v4997_v63, 0.0 }
 0x700   :  { %3654 = vadd.xlane.f32.xlu0 %v3653_v38 }
 0x701   :  { %v4999_v47 = vpop.eup %4998 }
 0x702   :  { %v3650_v16 = vsel %vm3601_vm9, %v4999_v47, 0.0 }
 0x703   :  { %3651 = vadd.xlane.f32.xlu1 %v3650_v16  ;;  %v3613_v32 = vpop.xlane.xlu0 %3612 }
 0x704   :  { %v3629_v0 = vsub.f32 %v3495_v17, %v3613_v32 }
 0x706   :  { %v3640_v20 = vmul.f32 1.442695, %v3629_v0  ;;  %v3610_v8 = vpop.xlane.xlu2 %3609 }
 0x707   :  { %v3628_v13 = vsub.f32 %v3469_v57, %v3610_v8 }
 0x708   :  { %5000 = vpow2.f32 %v3640_v20 }
 0x709   :  { %v3638_v23 = vmul.f32 1.442695, %v3628_v13 }
 0x70b   :  { %5002 = vpow2.f32 %v3638_v23  ;;  %v3616_v49 = vpop.xlane.xlu0 %3615 }
 0x70c   :  { %v3630_v44 = vsub.f32 %v3520_v34, %v3616_v49 }
 0x70e   :  { %v5001_v51 = vpop.eup %5000  ;;  %v3642_v15 = vmul.f32 1.442695, %v3630_v44  ;;  %v3619_v28 = vpop.xlane.xlu2 %3618 }
 0x70f   :  { %v3631_v5 = vsub.f32 %v6480_v56, %v3619_v28  ;;  %v3659_v39 = vsel %vm3601_vm9, %v5001_v51, 0.0 }
 0x710   :  { %5004 = vpow2.f32 %v3642_v15  ;;  %3660 = vadd.xlane.f32.xlu2 %v3659_v39 }
 0x711   :  { %v5003_v42 = vpop.eup %5002  ;;  %v3644_v30 = vmul.f32 1.442695, %v3631_v5 }
 0x712   :  { %v3656_v24 = vsel %vm3601_vm9, %v5003_v42, 0.0 }
 0x713   :  { %5006 = vpow2.f32 %v3644_v30  ;;  %3657 = vadd.xlane.f32.xlu1 %v3656_v24  ;;  %v3625_v18 = vpop.xlane.xlu1 %3624 }
 0x714   :  { %v3633_v40 = vsub.f32 %v3597_v10, %v3625_v18 }
 0x716   :  { %v5005_v19 = vpop.eup %5004  ;;  %v3648_v35 = vmul.f32 1.442695, %v3633_v40  ;;  %v3622_v36 = vpop.xlane.xlu0 %3621 }
 0x717   :  { %v3632_v26 = vsub.f32 %v3571_v50, %v3622_v36  ;;  %v3662_v29 = vsel %vm3601_vm9, %v5005_v19, 0.0 }
 0x718   :  { %5008 = vpow2.f32 %v3648_v35  ;;  %3663 = vadd.xlane.f32.xlu2 %v3662_v29 }
 0x719   :  { %v5007_v11 = vpop.eup %5006  ;;  %v3646_v60 = vmul.f32 1.442695, %v3632_v26 }
 0x71a   :  { %v3665_v6 = vsel %vm3601_vm9, %v5007_v11, 0.0 }
 0x71b   :  { %5010 = vpow2.f32 %v3646_v60  ;;  %3666 = vadd.xlane.f32.xlu1 %v3665_v6 }
 0x71e   :  { %v5009_v56 = vpop.eup %5008 }
 0x71f   :  { %v3671_v48 = vsel %vm3601_vm9, %v5009_v56, 0.0 }
 0x720   :  { %3672 = vadd.xlane.f32.xlu0 %v3671_v48 }
 0x721   :  { %v5011_v61 = vpop.eup %5010 }
 0x722   :  { %v3668_v21 = vsel %vm3601_vm9, %v5011_v61, 0.0 }
 0x723   :  { %3669 = vadd.xlane.f32.xlu2 %v3668_v21 }
 0x773   :  { %v3655_v53 = vpop.xlane.xlu0 %3654 }
 0x774   :  { %5012 = vrcp.f32 %v3655_v53 }
 0x776   :  { %v3652_v59 = vpop.xlane.xlu1 %3651 }
 0x777   :  { %5014 = vrcp.f32 %v3652_v59 }
 0x77a   :  { %v5013_v22 = vpop.eup %5012 }
 0x77b   :  { %v3683_v9 = vmul.f32 %v5013_v22, %v4997_v63 }
 0x77d   :  { %v5015_v34 = vpop.eup %5014  ;;  %v3691_v17 = vpack.c.bf16 %v3683_v9, %v3683_v9 }
 0x77e   :  { %v3682_v27 = vmul.f32 %v5015_v34, %v4999_v47 }
 0x77f   :  { %4750 = vmatmul.msk.bf16.vlgmr.msra.gmra.mxu0 %vm3601_vm9, %v3691_v17 }
 0x780   :  { %v3690_v57 = vpack.c.bf16 %v3682_v27, %v3682_v27 }
 0x782   :  { %4749 = vmatmul.msk.bf16.vlgmr.msra.gmra.mxu3 %vm3601_vm9, %v3690_v57 }
 0x783   :  { %v3661_v7 = vpop.xlane.xlu2 %3660 }
 0x784   :  { %5016 = vrcp.f32 %v3661_v7 }
 0x786   :  { %v3658_v33 = vpop.xlane.xlu1 %3657 }
 0x787   :  { %5018 = vrcp.f32 %v3658_v33 }
 0x78a   :  { %v5017_v46 = vpop.eup %5016 }
 0x78b   :  { %v3685_v25 = vmul.f32 %v5017_v46, %v5001_v51  ;;  %v3664_v31 = vpop.xlane.xlu2 %3663 }
 0x78c   :  { %5020 = vrcp.f32 %v3664_v31 }
 0x78d   :  { %v5019_v43 = vpop.eup %5018  ;;  %v3693_v10 = vpack.c.bf16 %v3685_v25, %v3685_v25 }
 0x78e   :  { %v3684_v45 = vmul.f32 %v5019_v43, %v5003_v42  ;;  %v3667_v50 = vpop.xlane.xlu1 %3666 }
 0x78f   :  { %5022 = vrcp.f32 %v3667_v50  ;;  %4752 = vmatmul.msk.bf16.vlgmr.msrb.gmra.mxu2 %vm3601_vm9, %v3693_v10 }
 0x790   :  { %v3692_v58 = vpack.c.bf16 %v3684_v45, %v3684_v45 }
 0x792   :  { %v5021_v2 = vpop.eup %5020  ;;  %4751 = vmatmul.msk.bf16.vlgmr.msra.gmra.mxu1 %vm3601_vm9, %v3692_v58 }
 0x793   :  { %v3686_v54 = vmul.f32 %v5021_v2, %v5005_v19  ;;  %v3673_v3 = vpop.xlane.xlu0 %3672 }
 0x794   :  { %5024 = vrcp.f32 %v3673_v3 }
 0x795   :  { %v5023_v41 = vpop.eup %5022  ;;  %v3694_v4 = vpack.c.bf16 %v3686_v54, %v3686_v54 }
 0x796   :  { %v3687_v52 = vmul.f32 %v5023_v41, %v5007_v11  ;;  %v3670_v62 = vpop.xlane.xlu2 %3669 }
 0x797   :  { %5026 = vrcp.f32 %v3670_v62  ;;  %4753 = vmatmul.msk.bf16.vlgmr.msrb.gmra.mxu3 %vm3601_vm9, %v3694_v4 }
 0x798   :  { %v3695_v55 = vpack.c.bf16 %v3687_v52, %v3687_v52 }
 0x79a   :  { %v5025_v63 = vpop.eup %5024  ;;  %4754 = vmatmul.msk.bf16.vlgmr.msrb.gmra.mxu0 %vm3601_vm9, %v3695_v55 }
 0x79b   :  { %v3689_v38 = vmul.f32 %v5025_v63, %v5009_v56 }
 0x79d   :  { %v5027_v47 = vpop.eup %5026  ;;  %v3697_v16 = vpack.c.bf16 %v3689_v38, %v3689_v38 }
 0x79e   :  { %v3688_v32 = vmul.f32 %v5027_v47, %v5011_v61 }
 0x79f   :  { %4756 = vmatmul.msk.bf16.vlgmr.msra.gmra.mxu2 %vm3601_vm9, %v3697_v16 }
 0x7a0   :  { %v3696_v0 = vpack.c.bf16 %v3688_v32, %v3688_v32 }
 0x7a2   :  { %4755 = vmatmul.msk.bf16.vlgmr.msrb.gmra.mxu1 %vm3601_vm9, %v3696_v0 }
 0x7fc   :  { %v3746_v20 = vpop.f32.mrf.mxu0 }
 0x7fd   :  { %v3904_v19 = vpack.c.bf16 %v3746_v20, %v3746_v20 }
 0x7ff   :  { %v3926_v48 = vshrl.u32 %v3904_v19, 16 }
 0x804   :  { %v3748_v8 = vpop.f32.mrf.mxu0 }
 0x805   :  { %v3720_v13 = vpop.f32.mrf.mxu3 }
 0x806   :  { %v3903_v5 = vpack.c.bf16 %v3720_v13, %v3720_v13 }
 0x808   :  { %v3914_v18 = vshrl.u32 %v3903_v5, 16 }
 0x80d   :  { %v3722_v23 = vpop.f32.mrf.mxu3 }
 0x80e   :  { %v4920_v23 = vld [vmem:[#allocation14 + $0x38] sm:$0xff] }
 0x80f   :  { %v3771_v49 = vpop.f32.mrf.mxu1  ;;  %4233 = vmatpush.bf16.msra.mxu3 %v4920_v23 }
 0x810   :  { %v3905_v51 = vpack.c.bf16 %v3771_v49, %v3771_v49 }
 0x812   :  { %v3797_v44 = vpop.f32.mrf.mxu2  ;;  %v3915_v39 = vshrl.u32 %v3905_v51, 16  ;;  %v3913_v40 = vpack.i.b16 %v3905_v51, %v3903_v5 }
 0x813   :  { %v3906_v24 = vpack.c.bf16 %v3797_v44, %v3797_v44 }
 0x814   :  { %v3916_v35 = vpack.i.b16 %v3915_v39, %v3914_v18  ;;  %v3939_v60 = vperm.slane %v3913_v40, %v5464_v37 }
 0x815   :  { %v3925_v26 = vpack.i.b16 %v3906_v24, %v3904_v19  ;;  %v3927_v6 = vshrl.u32 %v3906_v24, 16 }
 0x816   :  { %v3965_v21 = vperm.slane %v3916_v35, %v5464_v37  ;;  %v3947_v57 = vrot.slane %v3939_v60, 4 }
 0x817   :  { %v3773_v15 = vpop.f32.mrf.mxu1  ;;  %v3848_v28 = vpop.f32.mrf.mxu0  ;;  %v3991_v17 = vperm.slane %v3925_v26, %v5464_v37  ;;  %v3928_v7 = vpack.i.b16 %v3927_v6, %v3926_v48 }
 0x818   :  { %v3908_v61 = vpack.c.bf16 %v3848_v28, %v3848_v28  ;;  %v3973_v10 = vrot.slane %v3965_v21, 4 }
 0x819   :  { %v3999_v2 = vrot.slane %v3991_v17, 4  ;;  %v4017_v52 = vperm.slane %v3928_v7, %v5464_v37 }
 0x81a   :  { %v3799_v42 = vpop.f32.mrf.mxu2  ;;  %v3822_v30 = vpop.f32.mrf.mxu3  ;;  %v3932_v25 = vshrl.u32 %v3908_v61, 16 }
 0x81b   :  { %v3907_v36 = vpack.c.bf16 %v3822_v30, %v3822_v30  ;;  %v4025_v28 = vrot.slane %v4017_v52, 4  ;;  %v4919_v30 = vld [vmem:[#allocation14 + $0x30] sm:$0xff] }
 0x81c   :  { %4234 = vmatpush.bf16.msra.mxu3 %v4919_v30 }
 0x81d   :  { %v3920_v53 = vshrl.u32 %v3907_v36, 16 }
 0x81f   :  { %v3850_v29 = vpop.f32.mrf.mxu0  ;;  %v3873_v11 = vpop.f32.mrf.mxu1 }
 0x820   :  { %v3909_v56 = vpack.c.bf16 %v3873_v11, %v3873_v11 }
 0x822   :  { %v3919_v59 = vpack.i.b16 %v3909_v56, %v3907_v36  ;;  %v3921_v22 = vshrl.u32 %v3909_v56, 16  ;;  %v3824_v9 = vpop.f32.mrf.mxu3  ;;  %v3899_v34 = vpop.f32.mrf.mxu2 }
 0x823   :  { %v3910_v27 = vpack.c.bf16 %v3899_v34, %v3899_v34 }
 0x824   :  { %v3922_v33 = vpack.i.b16 %v3921_v22, %v3920_v53  ;;  %v3944_v46 = vperm.slane %v3919_v59, %v5464_v37 }
 0x825   :  { %v3931_v31 = vpack.i.b16 %v3910_v27, %v3908_v61  ;;  %v3933_v43 = vshrl.u32 %v3910_v27, 16 }
 0x826   :  { %v3945_v45 = vrot.slane %v3944_v46, 4  ;;  %v3948_v50 = vsel %vm218_vm0, %v3944_v46, %v3947_v57  ;;  %v3970_v58 = vperm.slane %v3922_v33, %v5464_v37 }
 0x827   :  { %v3956_v54 = vperm.slane %v3948_v50, %v5474_v1  ;;  %v3934_v3 = vpack.i.b16 %v3933_v43, %v3932_v25  ;;  %v3996_v41 = vperm.slane %v3931_v31, %v5464_v37  ;;  %v3875_v4 = vpop.f32.mrf.mxu1 }
 0x828   :  { %v3946_v62 = vsel %vm218_vm0, %v3945_v45, %v3939_v60  ;;  %v3971_v55 = vrot.slane %v3970_v58, 4  ;;  %v3974_v63 = vsel %vm218_vm0, %v3970_v58, %v3973_v10 }
 0x829   :  { %v3952_v38 = vperm.slane %v3946_v62, %v5474_v1  ;;  %v3959_v47 = vrot.slane %v3956_v54, 4  ;;  %v3982_v16 = vperm.slane %v3974_v63, %v5474_v1  ;;  %v3997_v32 = vrot.slane %v3996_v41, 4 }
 0x82a   :  { %v3972_v0 = vsel %vm218_vm0, %v3971_v55, %v3965_v21  ;;  %v4000_v20 = vsel %vm218_vm0, %v3996_v41, %v3999_v2  ;;  %v4022_v8 = vperm.slane %v3934_v3, %v5464_v37  ;;  %v3901_v13 = vpop.f32.mrf.mxu2 }
 0x82b   :  { %v3957_v49 = vrot.slane %v3952_v38, 4  ;;  %v3960_v44 = vsel %vm218_vm0, 0, %v3959_v47  ;;  %v3978_v51 = vperm.slane %v3972_v0, %v5474_v1  ;;  %v3985_v15 = vrot.slane %v3982_v16, 4 }
 0x82c   :  { %v4044_v5 = vrot.slane %v3960_v44, 4  ;;  %v3998_v39 = vsel %vm218_vm0, %v3997_v32, %v3991_v17  ;;  %v4008_v42 = vperm.slane %v4000_v20, %v5474_v1  ;;  %v4023_v29 = vrot.slane %v4022_v8, 4 }
 0x82d   :  { %v3958_v24 = vsel %vm218_vm0, 0, %v3957_v49  ;;  %v3983_v18 = vrot.slane %v3978_v51, 4  ;;  %v3986_v40 = vsel %vm218_vm0, 0, %v3985_v15  ;;  %v4004_v19 = vperm.slane %v3998_v39, %v5474_v1 }
 0x82e   :  { %v4045_v35 = vsel %vm218_vm0, %v4044_v5, %v3958_v24  ;;  %v4063_v36 = vrot.slane %v3986_v40, 4  ;;  %v4011_v26 = vrot.slane %v4008_v42, 4  ;;  %v4039_v60 = vsel %vm218_vm0, %v3959_v47, %v3952_v38 }
 0x82f   :  { %v3984_v11 = vsel %vm218_vm0, 0, %v3983_v18  ;;  %v4009_v6 = vrot.slane %v4004_v19, 4  ;;  %v4026_v56 = vsel %vm218_vm0, %v4022_v8, %v4025_v28  ;;  %v4024_v61 = vsel %vm218_vm0, %v4023_v29, %v4017_v52 }
 0x830   :  { %v4012_v48 = vsel %vm218_vm0, 0, %v4011_v26  ;;  %v4034_v21 = vperm.slane %v4026_v56, %v5474_v1  ;;  %v4030_v59 = vperm.slane %v4024_v61, %v5474_v1  ;;  %v4049_v9 = vperm.slane %v4045_v35, %v5464_v37 }
 0x831   :  { %v4010_v53 = vsel %vm218_vm0, 0, %v4009_v6  ;;  %v4082_v22 = vrot.slane %v4012_v48, 4  ;;  %v4077_v17 = vsel %vm218_vm0, %v4011_v26, %v4004_v19  ;;  %v4043_v27 = vperm.slane %v4039_v60, %v5464_v37 }
 0x832   :  { %v4037_v34 = vrot.slane %v4034_v21, 4  ;;  %v4064_v57 = vsel %vm218_vm0, %v4063_v36, %v3984_v11  ;;  %v4035_v7 = vrot.slane %v4030_v59, 4  ;;  %v4050_v46 = vrot.slane %v4049_v9, 4 }
 0x833   :  { %v4083_v33 = vsel %vm218_vm0, %v4082_v22, %v4010_v53  ;;  %v4058_v25 = vsel %vm218_vm0, %v3985_v15, %v3978_v51  ;;  %v4068_v43 = vperm.slane %v4064_v57, %v5464_v37  ;;  %v4081_v2 = vperm.slane %v4077_v17, %v5464_v37 }
 0x834   :  { %v4038_v31 = vsel %vm218_vm0, 0, %v4037_v34  ;;  %v4087_v10 = vperm.slane %v4083_v33, %v5464_v37  ;;  %v4036_v45 = vsel %vm218_vm0, 0, %v4035_v7  ;;  %v4051_v58 = vsel %vm218_vm0, %v4050_v46, %v4043_v27  ;;  %v4918_v46 = vld [vmem:[#allocation14 + $0x28] sm:$0xff] }
 0x835   :  { %v4101_v50 = vrot.slane %v4038_v31, 4  ;;  %v4055_v54 = vperm.slane %v4051_v58, %v5474_v1  ;;  %v4062_v3 = vperm.slane %v4058_v25, %v5464_v37  ;;  %v4069_v41 = vrot.slane %v4068_v43, 4  ;;  %4235 = vmatpush.bf16.msra.mxu3 %v4918_v46  ;;  %v4917_v25 = vld [vmem:[#allocation14 + $0x20] sm:$0xff]  ;;  %v4916_v31 = vld [vmem:[#allocation14 + $0x18] sm:$0xff]  ;;  %v4915_v43 = vld [vmem:[#allocation14 + $0x10] sm:$0xff] }
 0x836   :  { %v4088_v4 = vrot.slane %v4087_v10, 4  ;;  %v4096_v52 = vsel %vm218_vm0, %v4037_v34, %v4030_v59  ;;  %v4914_v10 = vld [vmem:[#allocation14 + $0x8] sm:$0xff]  ;;  %v4927_v58 = vld [vmem:[#allocation16 + $0x30] sm:$0xff] }
 0x837   :  { %v4102_v62 = vsel %vm218_vm0, %v4101_v50, %v4036_v45  ;;  %v4070_v55 = vsel %vm218_vm0, %v4069_v41, %v4062_v3  ;;  %v4056_v32 = vrot.slane %v4055_v54, 4  ;;  %v4100_v0 = vperm.slane %v4096_v52, %v5464_v37  ;;  %v4913_v45 = vld [vmem:[#allocation14] sm:$0xff]  ;;  %v4928_v50 = vld [vmem:[#allocation16 + $0x38] sm:$0xff] }
 0x838   :  { %v4089_v63 = vsel %vm218_vm0, %v4088_v4, %v4081_v2  ;;  %v4106_v38 = vperm.slane %v4102_v62, %v5464_v37  ;;  %v4074_v47 = vperm.slane %v4070_v55, %v5474_v1  ;;  %v4118_v15 = vshrl.u32 %v4055_v54, 16  ;;  %4318 = vmatpush.bf16.msra.mxu0 %v4928_v50  ;;  %v4926_v2 = vld [vmem:[#allocation16 + $0x28] sm:$0xff] }
 0x839   :  { %v4093_v16 = vperm.slane %v4089_v63, %v5474_v1  ;;  %v4057_v28 = vsel %vm218_vm0, 0, %v4056_v32  ;;  %4236 = vmatpush.bf16.msra.mxu3 %v4917_v25  ;;  %v4924_v63 = vld [vmem:[#allocation16 + $0x18] sm:$0xff] }
 0x83a   :  { %v4107_v20 = vrot.slane %v4106_v38, 4  ;;  %v4119_v8 = vshrl.u32 %v4074_v47, 16  ;;  %v4075_v13 = vrot.slane %v4074_v47, 4  ;;  %v4117_v44 = vpack.i.b16 %v4074_v47, %v4055_v54  ;;  %v4925_v54 = vld [vmem:[#allocation16 + $0x20] sm:$0xff]  ;;  %v4923_v38 = vld [vmem:[#allocation16 + $0x10] sm:$0xff]  ;;  %v4922_v47 = vld [vmem:[#allocation16 + $0x8] sm:$0xff] }
 0x83b   :  { %v4094_v49 = vrot.slane %v4093_v16, 4  ;;  %v4130_v24 = vshrl.u32 %v4093_v16, 16  ;;  %v4124_v35 = vshrl.u32 %v4057_v28, 16  ;;  %v4936_v32 = vld [vmem:[#allocation17 + $0x38] sm:$0xff] }
 0x83c   :  { %v4108_v23 = vsel %vm218_vm0, %v4107_v20, %v4100_v0  ;;  %v4076_v5 = vsel %vm218_vm0, 0, %v4075_v13  ;;  %v4120_v30 = vpack.i.b16 %v4119_v8, %v4118_v15  ;;  %v4139_v60 = vunpack.c.l.b16 %v4117_v44  ;;  %4319 = vmatpush.bf16.msra.mxu0 %v4927_v58  ;;  %4401 = vmatpush.bf16.msra.mxu1 %v4936_v32  ;;  %v4935_v0 = vld [vmem:[#allocation17 + $0x30] sm:$0xff]  ;;  %v4934_v20 = vld [vmem:[#allocation17 + $0x28] sm:$0xff]  ;;  %v4933_v8 = vld [vmem:[#allocation17 + $0x20] sm:$0xff] }
 0x83d   :  { %v4112_v51 = vperm.slane %v4108_v23, %v5474_v1  ;;  %v4095_v39 = vsel %vm218_vm0, 0, %v4094_v49  ;;  %v4125_v42 = vshrl.u32 %v4076_v5, 16  ;;  %v4123_v19 = vpack.i.b16 %v4076_v5, %v4057_v28  ;;  %4237 = vmatpush.bf16.msra.mxu3 %v4916_v31  ;;  %v4932_v13 = vld [vmem:[#allocation17 + $0x18] sm:$0xff]  ;;  %v4961_v49 = vld [vmem:[%s6620_s11] ss:$0 sm:$0xff] }
 0x83e   :  { %v4136_v11 = vshrl.u32 %v4095_v39, 16  ;;  %v4142_v21 = vunpack.c.l.b16 %v4120_v30  ;;  %v4930_v30 = vld [vmem:[#allocation17 + $0x8] sm:$0xff] }
 0x83f   :  { %v4131_v18 = vshrl.u32 %v4112_v51, 16  ;;  %v4113_v40 = vrot.slane %v4112_v51, 4  ;;  %v4129_v36 = vpack.i.b16 %v4112_v51, %v4093_v16  ;;  %v4126_v48 = vpack.i.b16 %v4125_v42, %v4124_v35  ;;  %v4921_v16 = vld [vmem:[#allocation16] sm:$0xff]  ;;  %v4931_v42 = vld [vmem:[#allocation17 + $0x10] sm:$0xff] }
 0x840   :  { %v4147_v59 = vunpack.c.l.b16 %v4123_v19  ;;  %4320 = vmatpush.bf16.msra.mxu0 %v4926_v2  ;;  %4402 = vmatpush.bf16.msra.mxu1 %v4935_v0 }
 0x841   :  { %v4132_v26 = vpack.i.b16 %v4131_v18, %v4130_v24  ;;  %v4114_v29 = vsel %vm218_vm0, 0, %v4113_v40  ;;  %v4140_v61 = vunpack.c.l.b16 %v4129_v36  ;;  %v4152_v57 = vunpack.c.l.b16 %v4126_v48  ;;  %4238 = vmatpush.bf16.msra.mxu3 %v4915_v43  ;;  %v4929_v24 = vld [vmem:[#allocation17] sm:$0xff]  ;;  %v4962_v40 = vld [vmem:[%s6622_s13] ss:$0 sm:$0xff]  ;;  %s5327_s13 = smov [#allocation19]  }
 0x842   :  { %v4135_v6 = vpack.i.b16 %v4114_v29, %v4095_v39  ;;  %v4137_v56 = vshrl.u32 %v4114_v29, 16 }
 0x843   :  { %v4143_v53 = vunpack.c.l.b16 %v4132_v26  ;;  %v4141_v34 = vpack.c.b16 %v4140_v61, %v4139_v60 }
 0x844   :  { %v4148_v22 = vunpack.c.l.b16 %v4135_v6  ;;  %v4138_v9 = vpack.i.b16 %v4137_v56, %v4136_v11  ;;  %4321 = vmatpush.bf16.msra.mxu0 %v4925_v54  ;;  %4403 = vmatpush.bf16.msra.mxu1 %v4934_v20 }
 0x845   :  { %v4144_v17 = vpack.c.b16 %v4143_v53, %v4142_v21  ;;  %4239 = vmatpush.bf16.msra.mxu3 %v4914_v10 }
 0x846   :  { %v4149_v27 = vpack.c.b16 %v4148_v22, %v4147_v59  ;;  %v4153_v7 = vunpack.c.l.b16 %v4138_v9 }
 0x847   :  { %4145 = vrot.lane.b32.xlu0 %v4144_v17, %s5307_s29 }
 0x848   :  { %4150 = vrot.lane.b32.xlu1 %v4149_v27, %s5311_s26  ;;  %v4154_v33 = vpack.c.b16 %v4153_v7, %v4152_v57  ;;  %4322 = vmatpush.bf16.msra.mxu0 %v4924_v63 }
 0x849   :  { %4240 = vmatpush.bf16.msra.mxu3 %v4913_v45  ;;  %4404 = vmatpush.bf16.msra.mxu1 %v4933_v8 }
 0x84a   :  { %4155 = vrot.lane.b32.xlu2 %v4154_v33, %s5326_s12 }
 0x84c   :  { %4323 = vmatpush.bf16.msra.mxu0 %v4923_v38 }
 0x84d   :  { %4405 = vmatpush.bf16.msra.mxu1 %v4932_v13 }
 0x850   :  { %4324 = vmatpush.bf16.msra.mxu0 %v4922_v47 }
 0x851   :  { %4406 = vmatpush.bf16.msra.mxu1 %v4931_v42 }
 0x854   :  { %4325 = vmatpush.bf16.msra.mxu0 %v4921_v16 }
 0x855   :  { %4407 = vmatpush.bf16.msra.mxu1 %v4930_v30 }
 0x859   :  { %4408 = vmatpush.bf16.msra.mxu1 %v4929_v24 }
 0x8a4   :  { %v4156_v52 = vpop.permute.xlu2 %4155 }
 0x8b9   :  { %v4146_v3 = vpop.permute.xlu0 %4145 }
 0x8ba   :  { %v4159_v41 = vsel %vm1272_vm1, %v4141_v34, %v4146_v3  ;;  %v4151_v4 = vpop.permute.xlu1 %4150 }
 0x8bb   :  { %v4161_v62 = vsel %vm1932_vm4, %v4159_v41, %v4151_v4 }
 0x8bc   :  { %v4163_v55 = vsel %vm1935_vm5, %v4161_v62, %v4156_v52 }
 0x8bd   :  { %4241 = vmatmul.bf16.vlgmr.msra.gmra.mxu3 %v4163_v55 }
 0x940   :  { %v4242_v23 = vpop.f32.mrf.mxu3 }
 0x941   :  { %v4243_v44 = vadd.f32 %v4961_v49, %v4242_v23 }
 0x943   :  { %v4247_v28 = vadd.f32 %v4243_v44, %v6233_v14 }
 0x948   :  { %v4244_v51 = vpop.f32.mrf.mxu3 }
 0x949   :  { %v4245_v15 = vadd.f32 %v4961_v49, %v4244_v51 }
 0x94b   :  { %v4248_v5 = vadd.f32 %v4245_v15, %v6228_v12  ;;  %v4963_v12 = vld [vmem:[%s6624_s15] ss:$0 sm:$0xff]  ;;  %s4481_s15 = sshll.u32 %s5327_s13, 4  ;;  %s4482_s15 = int_to_ptr.vmem [resolvable:$true] %s4481_s15 }
 0x94d   :  { %v4249_v39 = vpack.c.bf16 %v4248_v5, %v4247_v28 }
 0x94f   :  { %4326 = vmatmul.bf16.vlgmr.msra.gmra.mxu0 %v4249_v39 }
 0x9cc   :  { %v4327_v18 = vpop.f32.mrf.mxu0 }
 0x9cd   :  { %v4328_v35 = vadd.f32 %v4962_v40, %v4327_v18 }
 0x9d4   :  { %v4329_v19 = vpop.f32.mrf.mxu0 }
 0x9d5   :  { %v4330_v36 = vadd.f32 %v4962_v40, %v4329_v19 }
 0x9d7   :  { %v4332_v26 = vpack.c.bf16 %v4330_v36, %v4328_v35 }
 0x9d9   :  { %4409 = vmatmul.bf16.vlgmr.msra.gmra.mxu1 %v4332_v26 }
 0xa56   :  { %v4410_v14 = vpop.f32.mrf.mxu1 }
 0xa57   :  { %v4411_v29 = vadd.f32 %v4963_v12, %v4410_v14 }
 0xa59   :  { %v4415_v11 = vadd.f32 %v4411_v29, %v4247_v28 }
 0xa5b   :  { %v4417_v60 = vrot.slane %v4415_v11, 4  ;;  %v4422_v48 = vperm.slane %v4415_v11, %v5464_v37 }
 0xa5d   :  { %v4418_v56 = vsel %vm218_vm0, 0.0, %v4417_v60  ;;  %v4439_v59 = vrot.slane %v4422_v48, 4 }
 0xa5e   :  { %v4412_v6 = vpop.f32.mrf.mxu1  ;;  %v4426_v53 = vperm.slane %v4418_v56, %v5464_v37 }
 0xa5f   :  { %v4413_v61 = vadd.f32 %v4963_v12, %v4412_v6 }
 0xa60   :  { %v4451_v57 = vrot.slane %v4426_v53, 4 }
 0xa61   :  { %v4416_v21 = vadd.f32 %v4413_v61, %v4248_v5 }
 0xa63   :  { %v4427_v22 = vrot.slane %v4416_v21, 4  ;;  %v4432_v9 = vperm.slane %v4416_v21, %v5464_v37 }
 0xa65   :  { %v4428_v34 = vsel %vm218_vm0, 0.0, %v4427_v22  ;;  %v4437_v17 = vrot.slane %v4432_v9, 4  ;;  %v4440_v27 = vsel %vm218_vm0, %v4432_v9, %v4439_v59 }
 0xa66   :  { %v4436_v7 = vperm.slane %v4428_v34, %v5464_v37  ;;  %v4448_v33 = vperm.slane %v4440_v27, %v5474_v1  ;;  %4854 = vst.sshfl [vmem:[#allocation19 + $0x4] sm:$0x11 pattern:$0x73516240] %v4440_v27 }
 0xa67   :  { %v4438_v46 = vsel %vm218_vm0, %v4437_v17, %v4422_v48 }
 0xa68   :  { %v4444_v25 = vperm.slane %v4438_v46, %v5474_v1  ;;  %v4449_v31 = vrot.slane %v4436_v7, 4  ;;  %v4452_v43 = vsel %vm218_vm0, %v4436_v7, %v4451_v57  ;;  %v4463_v10 = vrot.slane %v4448_v33, 4  ;;  %4853 = vst.sshfl [vmem:[#allocation19] sm:$0x11 pattern:$0x73516240] %v4438_v46 }
 0xa69   :  { %v4460_v45 = vperm.slane %v4452_v43, %v5474_v1  ;;  %4856 = vst.sshfl [vmem:[#allocation19 + $0xc] sm:$0x11 pattern:$0x73516240] %v4452_v43 }
 0xa6a   :  { %v4450_v50 = vsel %vm218_vm0, %v4449_v31, %v4426_v53  ;;  %v4461_v58 = vrot.slane %v4444_v25, 4  ;;  %v4464_v37 = vsel %vm218_vm0, 0.0, %v4463_v10 }
 0xa6b   :  { %v4456_v2 = vperm.slane %v4450_v50, %v5474_v1  ;;  %v4467_v54 = vrot.slane %v4460_v45, 4  ;;  %4472 = vst [vmem:[#allocation19 + $0x6] sm:$0x3] %v4464_v37 }
 0xa6c   :  { %v4462_v3 = vsel %vm218_vm0, 0.0, %v4461_v58  ;;  %4855 = vst.sshfl [vmem:[#allocation19 + $0x8] sm:$0x11 pattern:$0x73516240] %v4450_v50 }
 0xa6d   :  { %v4465_v41 = vrot.slane %v4456_v2, 4  ;;  %v4468_v4 = vsel %vm218_vm0, 0.0, %v4467_v54  ;;  %4470 = vst [vmem:[#allocation19 + $0x2] sm:$0x3] %v4462_v3 }
 0xa6e   :  { %4476 = vst [vmem:[#allocation19 + $0xe] sm:$0x3] %v4468_v4 }
 0xa6f   :  { %v4466_v1 = vsel %vm218_vm0, 0.0, %v4465_v41 }
 0xa70   :  { %4474 = vst [vmem:[#allocation19 + $0xa] sm:$0x3] %v4466_v1 }
 0xa71   :  { %4489 = dma.vmem_to_hbm [thread:$0]  %s4482_s15, 256, %s4484_s3, [#allocation4], %s5307_s29, %s5307_s29, %s5308_s30  }
 0xa72   :  { %5304 = dma.done.wait [#allocation4], 256  }
 0xa73   :  { %5305 = vsyncadd [#allocation4], 4294967040 }
 0xa74   :  { %4494 = vsyncpa [#allocation3], 1 }
 0xa75   :  { %4495 = vsyncpa [#allocation6], 1 }
 0xa76   :  { %4496 = vsyncpa [#allocation9], 1 }
 0xa77   :  { %4497 = vsyncpa [#allocation12], 1 }
 0xa78   :  { %4498 = vsyncpa [#allocation15], 1 }
 0xa79   :  { %4499 = vsyncpa [#allocation18], 1 }
 0xa7a   :  { %4500 = vsyncpa [#allocation4], 1 }

// kernel: tpu_custom_call.1
= control target key start
LH: loop header
LB: loop body
LE: loop exit
PB: predicated region body
PF: predicated region fallthrough
CT: control target
= control target key end

     0   :  { %s6609_s0 = inlined_call_operand.hbm [shape: f32[8,2,128], index: 0, kind: input, shape index: {}]   ;;  %s6610_s1 = inlined_call_operand.hbm [shape: f32[12,2,128], index: 1, kind: input, shape index: {}]   ;;  %s6611_s2 = inlined_call_operand.hbm [shape: bf16[128,384], index: 2, kind: input, shape index: {}]   ;;  %s6612_s3 = inlined_call_operand.hbm [shape: f32[1,384], index: 3, kind: input, shape index: {}]   ;;  %s6613_s4 = inlined_call_operand.hbm [shape: bf16[128,128], index: 4, kind: input, shape index: {}]   ;;  %s6614_s5 = inlined_call_operand.vmem [shape: f32[1,128], index: 5, kind: input, shape index: {}]   ;;  %s6615_s6 = inlined_call_operand.hbm [shape: bf16[128,128], index: 6, kind: input, shape index: {}]   ;;  %s6616_s7 = inlined_call_operand.vmem [shape: f32[1,128], index: 7, kind: input, shape index: {}]   ;;  %s6617_s8 = inlined_call_operand.hbm [shape: bf16[128,256], index: 8, kind: input, shape index: {}]   ;;  %s6618_s9 = inlined_call_operand.vmem [shape: f32[1,256], index: 9, kind: input, shape index: {}]   ;;  %s6619_s10 = inlined_call_operand.hbm [shape: bf16[128,128], index: 10, kind: input, shape index: {}]   ;;  %s6620_s11 = inlined_call_operand.vmem [shape: f32[1,128], index: 11, kind: input, shape index: {}]   ;;  %s6621_s12 = inlined_call_operand.hbm [shape: bf16[128,128], index: 12, kind: input, shape index: {}]   ;;  %s6622_s13 = inlined_call_operand.vmem [shape: f32[1,128], index: 13, kind: input, shape index: {}]   ;;  %s6623_s14 = inlined_call_operand.hbm [shape: bf16[128,128], index: 14, kind: input, shape index: {}]   ;;  %s6624_s15 = inlined_call_operand.vmem [shape: f32[1,128], index: 15, kind: input, shape index: {}]   ;;  %s6625_s16 = inlined_call_operand.hbm [shape: f32[8,2,128], index: 16, kind: output, shape index: {}]  }
   0x1   :  { %6626 = sst [smem:[#allocation27_spill]] %s6609_s0 }
   0x2   :  { %21 = vsyncpa [#allocation3], 0 }
   0x3   :  { %22 = vsyncpa [#allocation6], 0 }
   0x4   :  { %23 = vsyncpa [#allocation9], 0 }
   0x5   :  { %24 = vsyncpa [#allocation12], 0 }
   0x6   :  { %25 = vsyncpa [#allocation15], 0 }
   0x7   :  { %26 = vsyncpa [#allocation18], 0 }
   0x8   :  { %27 = vsyncpa [#allocation4], 0  ;;  %s45_s23 = sshll.u32 %s6610_s1, 4  ;;  %s5306_s24 = smov [#allocation5]   ;;  %s46_s23 = int_to_ptr.hbm [resolvable:$true] %s45_s23 }
   0x9   :  { %s47_s25 = sshll.u32 %s5306_s24, 4  ;;  %s72_s28 = sshll.u32 %s6612_s3, 4  ;;  %s48_s25 = int_to_ptr.vmem [resolvable:$true] %s47_s25  ;;  %s73_s28 = int_to_ptr.hbm [resolvable:$true] %s72_s28 }
   0xa   :  { %s5307_s29 = smov 32   ;;  %s5308_s30 = smov 2  }
   0xb   :  { %53 = dma.hbm_to_vmem [thread:$0]  %s46_s23, 384, %s48_s25, [#allocation6], %s5307_s29, %s5307_s29, %s5308_s30  }
   0xc   :  { %s5309_s0 = smov [#allocation8]   ;;  %s97_s19 = sshll.u32 %s6615_s6, 4  ;;  %s98_s19 = int_to_ptr.hbm [resolvable:$true] %s97_s19 }
   0xd   :  { %s74_s17 = sshll.u32 %s5309_s0, 4  ;;  %s5310_s20 = smov [#allocation11]   ;;  %s75_s17 = int_to_ptr.vmem [resolvable:$true] %s74_s17 }
   0xe   :  { %77 = dma.hbm_to_vmem [thread:$0]  %s73_s28, 48, %s75_s17, [#allocation9]  }
   0xf   :  { %s99_s21 = sshll.u32 %s5310_s20, 4  ;;  %s127_s24 = sshll.u32 %s6619_s10, 4  ;;  %s100_s21 = int_to_ptr.vmem [resolvable:$true] %s99_s21  ;;  %s128_s24 = int_to_ptr.hbm [resolvable:$true] %s127_s24 }
  0x10   :  { %s5311_s26 = smov 64   ;;  %s5312_s27 = smov 4  }
  0x11   :  { %105 = dma.hbm_to_vmem [thread:$0]  %s98_s19, 1024, %s100_s21, [#allocation12], %s5311_s26, %s5311_s26, %s5312_s27  }
  0x12   :  { %s5313_s23 = smov [#allocation14]   ;;  %s6627_s6 = sld [smem:[#allocation27_spill]] }
  0x13   :  { %s129_s25 = sshll.u32 %s5313_s23, 4  ;;  %s58_s18 = sshll.u32 %s6611_s2, 4  ;;  %s130_s25 = int_to_ptr.vmem [resolvable:$true] %s129_s25  ;;  %s59_s18 = int_to_ptr.hbm [resolvable:$true] %s58_s18 }
  0x14   :  { %135 = dma.hbm_to_vmem [thread:$0]  %s128_s24, 1024, %s130_s25, [#allocation15], %s5311_s26, %s5311_s26, %s5312_s27  }
  0x15   :  { %s5314_s20 = smov [#allocation2]   ;;  %s5315_s19 = smov [#allocation7]  }
  0x16   :  { %s34_s3 = sshll.u32 %s5314_s20, 4  ;;  %s60_s21 = sshll.u32 %s5315_s19, 4  ;;  %s35_s3 = int_to_ptr.vmem [resolvable:$true] %s34_s3  ;;  %s61_s21 = int_to_ptr.vmem [resolvable:$true] %s60_s21 }
  0x17   :  { %s5316_s22 = smov 192   ;;  %s5317_s23 = smov 12  }
  0x18   :  { %s32_s17 = sshll.u32 %s6627_s6, 4  ;;  %s82_s25 = sshll.u32 %s6613_s4, 4  ;;  %s33_s17 = int_to_ptr.hbm [resolvable:$true] %s32_s17  ;;  %s83_s25 = int_to_ptr.hbm [resolvable:$true] %s82_s25 }
  0x19   :  { %40 = dma.hbm_to_vmem [thread:$0]  %s33_s17, 256, %s35_s3, [#allocation3], %s5307_s29, %s5307_s29, %s5308_s30  }
  0x1a   :  { %66 = dma.hbm_to_vmem [thread:$0]  %s59_s18, 3072, %s61_s21, [#allocation6], %s5316_s22, %s5316_s22, %s5317_s23  }
  0x1b   :  { %s5318_s2 = smov [#allocation10]   ;;  %s112_s1 = sshll.u32 %s6617_s8, 4  ;;  %s113_s1 = int_to_ptr.hbm [resolvable:$true] %s112_s1 }
  0x1c   :  { %s84_s0 = sshll.u32 %s5318_s2, 4  ;;  %s5319_s17 = smov [#allocation13]   ;;  %s85_s0 = int_to_ptr.vmem [resolvable:$true] %s84_s0 }
  0x1d   :  { %90 = dma.hbm_to_vmem [thread:$0]  %s83_s25, 1024, %s85_s0, [#allocation9], %s5311_s26, %s5311_s26, %s5312_s27  }
  0x1e   :  { %s114_s20 = sshll.u32 %s5319_s17, 4  ;;  %s5320_s18 = smov 128   ;;  %s115_s20 = int_to_ptr.vmem [resolvable:$true] %s114_s20 }
  0x1f   :  { %s5321_s3 = smov 8   ;;  %s142_s21 = sshll.u32 %s6621_s12, 4  ;;  %s143_s21 = int_to_ptr.hbm [resolvable:$true] %s142_s21 }
  0x20   :  { %120 = dma.hbm_to_vmem [thread:$0]  %s113_s1, 2048, %s115_s20, [#allocation12], %s5320_s18, %s5320_s18, %s5321_s3  }
  0x21   :  { %s5322_s22 = smov [#allocation16]   ;;  %s157_s24 = sshll.u32 %s6623_s14, 4  ;;  %s158_s24 = int_to_ptr.hbm [resolvable:$true] %s157_s24 }
  0x22   :  { %s144_s23 = sshll.u32 %s5322_s22, 4  ;;  %s5323_s25 = smov [#allocation17]   ;;  %s145_s23 = int_to_ptr.vmem [resolvable:$true] %s144_s23 }
  0x23   :  { %150 = dma.hbm_to_vmem [thread:$0]  %s143_s21, 1024, %s145_s23, [#allocation15], %s5311_s26, %s5311_s26, %s5312_s27  }
  0x24   :  { %s159_s2 = sshll.u32 %s5323_s25, 4  ;;  %s160_s2 = int_to_ptr.vmem [resolvable:$true] %s159_s2 }
  0x25   :  { %165 = dma.hbm_to_vmem [thread:$0]  %s158_s24, 1024, %s160_s2, [#allocation18], %s5311_s26, %s5311_s26, %s5312_s27  }
  0x26   :  { %5292 = dma.done.wait [#allocation3], 256  }
  0x27   :  { %5293 = vsyncadd [#allocation3], 4294967040 }
  0x28   :  { %5294 = dma.done.wait [#allocation6], 3456  }
  0x29   :  { %5295 = vsyncadd [#allocation6], 4294963840 }
  0x2a   :  { %5296 = dma.done.wait [#allocation9], 1072  }
  0x2b   :  { %5297 = vsyncadd [#allocation9], 4294966224 }
  0x2c   :  { %5298 = dma.done.wait [#allocation12], 3072  }
  0x2d   :  { %5299 = vsyncadd [#allocation12], 4294964224 }
  0x2e   :  { %5300 = dma.done.wait [#allocation15], 2048  }
  0x2f   :  { %5301 = vsyncadd [#allocation15], 4294965248 }
  0x30   :  { %5302 = dma.done.wait [#allocation18], 1024  }
  0x31   :  { %5303 = vsyncadd [#allocation18], 4294966272  ;;  %v4587_v0 = vld [vmem:[#allocation7 + $0xa8] sm:$0xf]  ;;  %v4879_v1 = vld [vmem:[#allocation7 + $0xb0] sm:$0xf0] }
  0x32   :  { %v4878_v2 = vld [vmem:[#allocation7 + $0xac] sm:$0xf]  ;;  %v4588_v3 = vor.u32 %v4879_v1, %v4587_v0  ;;  %v4589_v4 = vld [vmem:[#allocation7 + $0xb4] sm:$0xf0]  ;;  %v4575_v5 = vld [vmem:[#allocation7 + $0x90] sm:$0xf] }
  0x33   :  { %v4876_v6 = vld [vmem:[#allocation7 + $0x98] sm:$0xf0]  ;;  %v4592_v7 = vor.u32 %v4878_v2, %v4589_v4  ;;  %v4875_v8 = vld [vmem:[#allocation7 + $0x94] sm:$0xf]  ;;  %v4577_v9 = vld [vmem:[#allocation7 + $0x9c] sm:$0xf0] }
  0x34   :  { %505 = vmatpush.bf16.msra.mxu0 %v4588_v3  ;;  %v4576_v10 = vor.u32 %v4876_v6, %v4575_v5  ;;  %v4580_v11 = vor.u32 %v4875_v8, %v4577_v9  ;;  %v4563_v12 = vld [vmem:[#allocation7 + $0x78] sm:$0xf]  ;;  %v4873_v13 = vld [vmem:[#allocation7 + $0x80] sm:$0xf0]  ;;  %v4872_v14 = vld [vmem:[#allocation7 + $0x7c] sm:$0xf] }
  0x35   :  { %519 = vmatpush.bf16.msra.mxu1 %v4592_v7  ;;  %v4565_v15 = vld [vmem:[#allocation7 + $0x84] sm:$0xf0]  ;;  %v4564_v16 = vor.u32 %v4873_v13, %v4563_v12  ;;  %v4551_v18 = vld [vmem:[#allocation7 + $0x60] sm:$0xf]  ;;  %v4870_v19 = vld [vmem:[#allocation7 + $0x68] sm:$0xf0] }
  0x36   :  { %v4568_v17 = vor.u32 %v4872_v14, %v4565_v15  ;;  %vm218_vm0 = vcmask 1047556   ;;  %v5324_v20 = vmov 1983009808   ;;  %v4869_v22 = vld [vmem:[#allocation7 + $0x64] sm:$0xf]  ;;  %v4552_v27 = vor.u32 %v4870_v19, %v4551_v18  ;;  %s5326_s12 = smov 96  }
  0x37   :  { %v221_v21 = vunpack.c.l.s4 %v5324_v20  ;;  %v4553_v23 = vld [vmem:[#allocation7 + $0x6c] sm:$0xf0]  ;;  %v4539_v24 = vld [vmem:[#allocation7 + $0x48] sm:$0xf]  ;;  %v4867_v25 = vld [vmem:[#allocation7 + $0x50] sm:$0xf0] }
  0x38   :  { %506 = vmatpush.bf16.msra.mxu0 %v4576_v10  ;;  %v209_v26 = vld [vmem:[#allocation2] sm:$0x3]  ;;  %v4866_v28 = vld [vmem:[#allocation7 + $0x4c] sm:$0xf]  ;;  %v210_v30 = vld [vmem:[#allocation2 + $0x2] sm:$0x3]  ;;  %v4556_v33 = vor.u32 %v4869_v22, %v4553_v23  ;;  %v4540_v44 = vor.u32 %v4867_v25, %v4539_v24 }
  0x39   :  { %520 = vmatpush.bf16.msra.mxu1 %v4580_v11  ;;  %v4541_v29 = vld [vmem:[#allocation7 + $0x54] sm:$0xf0]  ;;  %v211_v31 = vld [vmem:[#allocation2 + $0x4] sm:$0x3]  ;;  %v212_v32 = vld [vmem:[#allocation2 + $0x6] sm:$0x3]  ;;  %v5464_v37 = vunpack.c.0.s8 %v221_v21 }
  0x3a   :  { %v213_v34 = vld [vmem:[#allocation2 + $0x8] sm:$0x3]  ;;  %v214_v35 = vld [vmem:[#allocation2 + $0xa] sm:$0x3]  ;;  %v215_v36 = vld [vmem:[#allocation2 + $0xc] sm:$0x3]  ;;  %v4544_v56 = vor.u32 %v4866_v28, %v4541_v29 }
  0x3b   :  { %v216_v38 = vld [vmem:[#allocation2 + $0xe] sm:$0x3]  ;;  %v217_v39 = vrot.slane %v211_v31, 4  ;;  %v224_v40 = vrot.slane %v212_v32, 4  ;;  %v230_v41 = vrot.slane %v215_v36, 4  ;;  %vm1272_vm1 = vcmask 261120  }
  0x3c   :  { %507 = vmatpush.bf16.msra.mxu0 %v4564_v16  ;;  %v5325_v42 = vmov 1934713408   ;;  %v4527_v45 = vld [vmem:[#allocation7 + $0x30] sm:$0xf]  ;;  %v236_v46 = vrot.slane %v216_v38, 4  ;;  %vm1425_vm2 = vcmask 64512  }
  0x3d   :  { %521 = vmatpush.bf16.msra.mxu1 %v4568_v17  ;;  %v245_v43 = vunpack.c.l.s4 %v5325_v42  ;;  %v4595_v47 = vld [vmem:[#allocation7 + $0xb0] sm:$0xf]  ;;  %v4880_v48 = vld [vmem:[#allocation7 + $0xb8] sm:$0xf0]  ;;  %v219_v50 = vsel %vm218_vm0, %v217_v39, %v209_v26  ;;  %v225_v51 = vsel %vm218_vm0, %v224_v40, %v210_v30  ;;  %v231_v52 = vsel %vm218_vm0, %v230_v41, %v213_v34  ;;  %v4583_v54 = vld [vmem:[#allocation7 + $0x98] sm:$0xf] }
  0x3e   :  { %v4864_v49 = vld [vmem:[#allocation7 + $0x38] sm:$0xf0]  ;;  %v4596_v53 = vor.u32 %v4880_v48, %v4595_v47  ;;  %v4877_v55 = vld [vmem:[#allocation7 + $0xa0] sm:$0xf0]  ;;  %v4863_v57 = vld [vmem:[#allocation7 + $0x34] sm:$0xf]  ;;  %v223_v59 = vperm.slane %v219_v50, %v5464_v37  ;;  %v229_v60 = vperm.slane %v225_v51, %v5464_v37  ;;  %v237_v61 = vsel %vm218_vm0, %v236_v46, %v214_v35 }
  0x3f   :  { %v4529_v58 = vld [vmem:[#allocation7 + $0x3c] sm:$0xf0]  ;;  %v235_v63 = vperm.slane %v231_v52, %v5464_v37  ;;  %v241_v0 = vperm.slane %v237_v61, %v5464_v37  ;;  %v5474_v1 = vunpack.c.0.s8 %v245_v43  ;;  %v4584_v2 = vor.u32 %v4877_v55, %v4583_v54  ;;  %v4874_v3 = vld [vmem:[#allocation7 + $0x88] sm:$0xf0]  ;;  %v4515_v8 = vld [vmem:[#allocation7 + $0x18] sm:$0xf] }
  0x40   :  { %508 = vmatpush.bf16.msra.mxu0 %v4552_v27  ;;  %v4571_v62 = vld [vmem:[#allocation7 + $0x80] sm:$0xf]  ;;  %533 = vmatpush.bf16.msra.mxu2 %v4596_v53  ;;  %v242_v4 = vrot.slane %v229_v60, 4  ;;  %v4528_v5 = vor.u32 %v4864_v49, %v4527_v45  ;;  %v4532_v7 = vor.u32 %v4863_v57, %v4529_v58  ;;  %v4861_v9 = vld [vmem:[#allocation7 + $0x20] sm:$0xf0]  ;;  %vm1525_vm3 = vcmask 1043456  }
  0x41   :  { %522 = vmatpush.bf16.msra.mxu1 %v4556_v33  ;;  %v248_v6 = vrot.slane %v241_v0, 4  ;;  %v4860_v11 = vld [vmem:[#allocation7 + $0x1c] sm:$0xf]  ;;  %v4517_v12 = vld [vmem:[#allocation7 + $0x24] sm:$0xf0]  ;;  %v4572_v15 = vor.u32 %v4874_v3, %v4571_v62  ;;  %v4516_v19 = vor.u32 %v4861_v9, %v4515_v8  ;;  %vm1932_vm4 = vcmask 523264  }
  0x42   :  { %v243_v10 = vsel %vm218_vm0, %v242_v4, %v223_v59  ;;  %v4559_v17 = vld [vmem:[#allocation7 + $0x68] sm:$0xf]  ;;  %v4871_v18 = vld [vmem:[#allocation7 + $0x70] sm:$0xf0]  ;;  %v4520_v21 = vor.u32 %v4860_v11, %v4517_v12  ;;  %v4503_v22 = vld [vmem:[#allocation7] sm:$0xf] }
  0x43   :  { %v247_v13 = vperm.slane %v243_v10, %v5474_v1  ;;  %v249_v14 = vsel %vm218_vm0, %v248_v6, %v235_v63  ;;  %v4858_v23 = vld [vmem:[#allocation7 + $0x8] sm:$0xf0]  ;;  %v4857_v25 = vld [vmem:[#allocation7 + $0x4] sm:$0xf]  ;;  %v4505_v26 = vld [vmem:[#allocation7 + $0xc] sm:$0xf0]  ;;  %v4560_v27 = vor.u32 %v4871_v18, %v4559_v17 }
  0x44   :  { %509 = vmatpush.bf16.msra.mxu0 %v4540_v44  ;;  %534 = vmatpush.bf16.msra.mxu2 %v4584_v2  ;;  %v253_v16 = vperm.slane %v249_v14, %v5474_v1  ;;  %v4504_v28 = vor.u32 %v4858_v23, %v4503_v22  ;;  %v4508_v31 = vor.u32 %v4857_v25, %v4505_v26  ;;  %v4547_v33 = vld [vmem:[#allocation7 + $0x50] sm:$0xf]  ;;  %v4868_v34 = vld [vmem:[#allocation7 + $0x58] sm:$0xf0]  ;;  %v4535_v36 = vld [vmem:[#allocation7 + $0x38] sm:$0xf] }
  0x45   :  { %523 = vmatpush.bf16.msra.mxu1 %v4544_v56  ;;  %v256_v20 = vrot.slane %v247_v13, 4  ;;  %v4548_v35 = vor.u32 %v4868_v34, %v4547_v33  ;;  %v4865_v38 = vld [vmem:[#allocation7 + $0x40] sm:$0xf0]  ;;  %v4523_v40 = vld [vmem:[#allocation7 + $0x20] sm:$0xf]  ;;  %vm1935_vm5 = vcmask 785408  }
  0x46   :  { %v254_v24 = vrot.slane %v253_v16, 4  ;;  %v4536_v39 = vor.u32 %v4865_v38, %v4535_v36  ;;  %v4862_v41 = vld [vmem:[#allocation7 + $0x28] sm:$0xf0]  ;;  %v4511_v43 = vld [vmem:[#allocation7 + $0x8] sm:$0xf]  ;;  %vm2885_vm6 = vcmask 1041408  }
  0x47   :  { %v5484_v30 = vsel %vm218_vm0, %v253_v16, %v256_v20  ;;  %v4524_v42 = vor.u32 %v4862_v41, %v4523_v40  ;;  %v4859_v44 = vld [vmem:[#allocation7 + $0x10] sm:$0xf0]  ;;  %v5488_v46 = vld [vmem:[#allocation8] sm:$0x7]  ;;  %vm2889_vm7 = vcmask 1043458   ;;  %vm3708_vm8 = vcmask 1045504  }
  0x48   :  { %510 = vmatpush.bf16.msra.mxu0 %v4528_v5  ;;  %535 = vmatpush.bf16.msra.mxu2 %v4572_v15  ;;  %v5481_v29 = vsel %vm218_vm0, %v254_v24, %v247_v13  ;;  %v4512_v45 = vor.u32 %v4859_v44, %v4511_v43  ;;  %v371_v47 = vperm.slane %v5488_v46, 0  ;;  %v372_v48 = vperm.slane %v5488_v46, 1  ;;  %s4483_s3 = sshll.u32 %s6625_s16, 4  ;;  %s4484_s3 = int_to_ptr.hbm [resolvable:$true] %s4483_s3 }
  0x49   :  { %524 = vmatpush.bf16.msra.mxu1 %v4532_v7  ;;  %v336_v32 = vpack.c.bf16 %v5484_v30, %v5481_v29  ;;  %v373_v25 = vperm.slane %v5488_v46, 2  ;;  %vm3601_vm9 = vcmask 97280  }
  0x4c   :  { %511 = vmatpush.bf16.msra.mxu0 %v4516_v19  ;;  %536 = vmatpush.bf16.msra.mxu2 %v4560_v27 }
  0x4d   :  { %525 = vmatpush.bf16.msra.mxu1 %v4520_v21 }
  0x50   :  { %512 = vmatpush.bf16.msra.mxu0 %v4504_v28  ;;  %537 = vmatpush.bf16.msra.mxu2 %v4548_v35 }
  0x51   :  { %526 = vmatpush.bf16.msra.mxu1 %v4508_v31 }
  0x53   :  { %513 = vmatmul.bf16.vlgmr.msra.gmra.mxu0 %v336_v32 }
  0x54   :  { %527 = vmatmul.bf16.vlgmr.msra.gmra.mxu1 %v336_v32  ;;  %538 = vmatpush.bf16.msra.mxu2 %v4536_v39 }
  0x58   :  { %539 = vmatpush.bf16.msra.mxu2 %v4524_v42 }
  0x5c   :  { %540 = vmatpush.bf16.msra.mxu2 %v4512_v45 }
  0x5f   :  { %541 = vmatmul.bf16.vlgmr.msra.gmra.mxu2 %v336_v32 }
  0xd0   :  { %v514_v49 = vpop.f32.mrf.mxu0 }
  0xd1   :  { %v515_v50 = vadd.f32 %v514_v49, %v371_v47  ;;  %v528_v51 = vpop.f32.mrf.mxu1 }
  0xd2   :  { %v529_v52 = vadd.f32 %v528_v51, %v372_v48 }
  0xd4   :  { %v547_v53 = vpack.c.bf16 %v529_v52, %v515_v50 }
  0xd6   :  { %561 = vrot.lane.b32.xlu1 %v547_v53, %s5307_s29  ;;  %553 = vrot.lane.b32.xlu0 %v547_v53, %s5326_s12  ;;  %v794_v7 = vrot.slane %v547_v53, 4  ;;  %v568_v11 = vshrl.u32 %v547_v53, 16 }
  0xd8   :  { %v516_v54 = vpop.f32.mrf.mxu0  ;;  %v805_v19 = vshrl.u32 %v794_v7, 16 }
  0xd9   :  { %v517_v55 = vadd.f32 %v516_v54, %v371_v47  ;;  %v530_v56 = vpop.f32.mrf.mxu1 }
  0xda   :  { %v531_v57 = vadd.f32 %v530_v56, %v372_v48 }
  0xdc   :  { %v549_v58 = vpack.c.bf16 %v531_v57, %v517_v55 }
  0xde   :  { %559 = vrot.lane.b32.xlu2 %v549_v58, %s5311_s26  ;;  %555 = vrot.lane.b32.xlu1 %v549_v58, %s5326_s12  ;;  %v795_v15 = vrot.slane %v549_v58, 4  ;;  %v580_v24 = vshrl.u32 %v549_v58, 16 }
  0xdf   :  { %557 = vrot.lane.b32.xlu0 %v547_v53, %s5311_s26 }
  0xe0   :  { %v817_v32 = vshrl.u32 %v795_v15, 16 }
  0xe2   :  { %v542_v26 = vpop.f32.mrf.mxu2 }
  0xe3   :  { %v543_v36 = vadd.f32 %v542_v26, %v373_v25 }
  0xe5   :  { %v5524_v48 = vpack.c.bf16 %v543_v36, %v543_v36 }
  0xe6   :  { %563 = vrot.lane.b32.xlu2 %v549_v58, %s5307_s29 }
  0xe7   :  { %1032 = vrot.lane.b32.xlu1 %v5524_v48, %s5326_s12  ;;  %1036 = vrot.lane.b32.xlu0 %v5524_v48, %s5311_s26 }
 0x138   :  { %v560_v59 = vpop.permute.xlu2 %559 }
 0x139   :  { %v799_v62 = vrot.slane %v560_v59, 4  ;;  %v586_v2 = vshrl.u32 %v560_v59, 16 }
 0x13b   :  { %v823_v3 = vshrl.u32 %v799_v62, 16 }
 0x140   :  { %v564_v60 = vpop.permute.xlu2 %563 }
 0x141   :  { %v801_v61 = vrot.slane %v564_v60, 4  ;;  %v587_v63 = vshrl.u32 %v564_v60, 16  ;;  %v585_v4 = vpack.i.b16 %v564_v60, %v560_v59 }
 0x143   :  { %v824_v0 = vshrl.u32 %v801_v61, 16  ;;  %v588_v5 = vpack.i.b16 %v587_v63, %v586_v2  ;;  %v822_v6 = vpack.i.b16 %v801_v61, %v799_v62  ;;  %v651_v16 = vperm.slane %v585_v4, %v5464_v37 }
 0x145   :  { %v825_v8 = vpack.i.b16 %v824_v0, %v823_v3  ;;  %v677_v17 = vperm.slane %v588_v5, %v5464_v37  ;;  %v5503_v18 = vperm.slane %v822_v6, %v5464_v37  ;;  %v652_v33 = vrot.slane %v651_v16, 4 }
 0x147   :  { %v5506_v20 = vperm.slane %v825_v8, %v5464_v37  ;;  %v678_v34 = vrot.slane %v677_v17, 4  ;;  %v888_v35 = vrot.slane %v5503_v18, 4 }
 0x148   :  { %v5498_v9 = vpop.permute.xlu1 %561  ;;  %v554_v10 = vpop.permute.xlu0 %553 }
 0x149   :  { %v567_v12 = vpack.i.b16 %v554_v10, %v547_v53  ;;  %v569_v13 = vshrl.u32 %v554_v10, 16  ;;  %v796_v14 = vrot.slane %v554_v10, 4  ;;  %v800_v27 = vrot.slane %v5498_v9, 4 }
 0x14a   :  { %v914_v38 = vrot.slane %v5506_v20, 4  ;;  %v575_v39 = vshrl.u32 %v5498_v9, 16 }
 0x14b   :  { %v570_v21 = vpack.i.b16 %v569_v13, %v568_v11  ;;  %v804_v22 = vpack.i.b16 %v796_v14, %v794_v7  ;;  %v806_v23 = vshrl.u32 %v796_v14, 16  ;;  %v5511_v28 = vperm.slane %v567_v12, %v5464_v37 }
 0x14c   :  { %v5526_v49 = vshrl.u32 %v800_v27, 16 }
 0x14d   :  { %v807_v31 = vpack.i.b16 %v806_v23, %v805_v19  ;;  %v5519_v40 = vperm.slane %v570_v21, %v5464_v37  ;;  %v5522_v41 = vperm.slane %v804_v22, %v5464_v37  ;;  %v602_v50 = vrot.slane %v5511_v28, 4 }
 0x14f   :  { %v5530_v51 = vperm.slane %v807_v31, %v5464_v37  ;;  %v628_v57 = vrot.slane %v5519_v40, 4 }
 0x150   :  { %v556_v42 = vpop.permute.xlu1 %555 }
 0x151   :  { %v579_v43 = vpack.i.b16 %v556_v42, %v549_v58  ;;  %v581_v44 = vshrl.u32 %v556_v42, 16  ;;  %v797_v45 = vrot.slane %v556_v42, 4  ;;  %v558_v47 = vpop.permute.xlu0 %557  ;;  %v838_v58 = vrot.slane %v5522_v41, 4 }
 0x152   :  { %v574_v52 = vshrl.u32 %v558_v47, 16  ;;  %v573_v59 = vpack.i.b16 %v5498_v9, %v558_v47  ;;  %v798_v60 = vrot.slane %v558_v47, 4  ;;  %v864_v2 = vrot.slane %v5530_v51, 4 }
 0x153   :  { %v582_v53 = vpack.i.b16 %v581_v44, %v580_v24  ;;  %v646_v54 = vperm.slane %v579_v43, %v5464_v37  ;;  %v816_v55 = vpack.i.b16 %v797_v45, %v795_v15  ;;  %v818_v56 = vshrl.u32 %v797_v45, 16 }
 0x154   :  { %v576_v5 = vpack.i.b16 %v575_v39, %v574_v52  ;;  %v598_v13 = vperm.slane %v573_v59, %v5464_v37  ;;  %v810_v19 = vpack.i.b16 %v800_v27, %v798_v60  ;;  %v811_v21 = vshrl.u32 %v798_v60, 16 }
 0x155   :  { %v653_v61 = vsel %vm218_vm0, %v652_v33, %v646_v54  ;;  %v654_v62 = vrot.slane %v646_v54, 4  ;;  %v672_v63 = vperm.slane %v582_v53, %v5464_v37  ;;  %v819_v0 = vpack.i.b16 %v818_v56, %v817_v32 }
 0x156   :  { %v659_v3 = vperm.slane %v653_v61, %v5474_v1  ;;  %v882_v4 = vperm.slane %v816_v55, %v5464_v37  ;;  %v599_v27 = vrot.slane %v598_v13, 4 }
 0x157   :  { %v655_v6 = vsel %vm218_vm0, %v651_v16, %v654_v62  ;;  %v679_v7 = vsel %vm218_vm0, %v678_v34, %v672_v63  ;;  %v680_v8 = vrot.slane %v672_v63, 4  ;;  %v908_v9 = vperm.slane %v819_v0, %v5464_v37 }
 0x158   :  { %v663_v10 = vperm.slane %v655_v6, %v5474_v1  ;;  %v5550_v11 = vperm.slane %v679_v7, %v5474_v1  ;;  %v889_v12 = vsel %vm218_vm0, %v888_v35, %v882_v4  ;;  %v890_v15 = vrot.slane %v882_v4, 4 }
 0x159   :  { %v681_v14 = vsel %vm218_vm0, %v677_v17, %v680_v8  ;;  %v664_v16 = vrot.slane %v659_v3, 4  ;;  %v915_v24 = vsel %vm218_vm0, %v914_v38, %v908_v9  ;;  %v5561_v32 = vperm.slane %v889_v12, %v5474_v1 }
 0x15a   :  { %v666_v22 = vrot.slane %v663_v10, 4  ;;  %v689_v23 = vperm.slane %v681_v14, %v5474_v1  ;;  %v690_v26 = vrot.slane %v5550_v11, 4  ;;  %v891_v31 = vsel %vm218_vm0, %v5503_v18, %v890_v15 }
 0x15b   :  { %v916_v33 = vrot.slane %v908_v9, 4  ;;  %v603_v35 = vsel %vm218_vm0, %v598_v13, %v602_v50  ;;  %v899_v39 = vperm.slane %v891_v31, %v5474_v1  ;;  %v5571_v42 = vperm.slane %v915_v24, %v5474_v1 }
 0x15c   :  { %v667_v17 = vsel %vm218_vm0, 0, %v666_v22  ;;  %v5564_v34 = vrot.slane %v689_v23, 4  ;;  %v665_v18 = vsel %vm218_vm0, 0, %v664_v16  ;;  %v5577_v44 = vsel %vm218_vm0, %v666_v22, %v659_v3 }
 0x15d   :  { %v737_v36 = vrot.slane %v667_v17, 4  ;;  %v917_v38 = vsel %vm218_vm0, %v5506_v20, %v916_v33  ;;  %v691_v47 = vsel %vm218_vm0, 0, %v690_v26  ;;  %v900_v52 = vrot.slane %v5561_v32, 4 }
 0x15e   :  { %v693_v43 = vsel %vm218_vm0, 0, %v5564_v34  ;;  %v925_v45 = vperm.slane %v917_v38, %v5474_v1  ;;  %v902_v20 = vrot.slane %v899_v39, 4  ;;  %v601_v55 = vsel %vm218_vm0, %v599_v27, %v5511_v28 }
 0x15f   :  { %v738_v50 = vsel %vm218_vm0, %v737_v36, %v665_v18  ;;  %v756_v54 = vrot.slane %v693_v43, 4  ;;  %v611_v56 = vperm.slane %v603_v35, %v5474_v1  ;;  %v736_v59 = vperm.slane %v5577_v44, %v5464_v37 }
 0x160   :  { %v742_v53 = vperm.slane %v738_v50, %v5464_v37  ;;  %v926_v60 = vrot.slane %v5571_v42, 4  ;;  %v5591_v61 = vperm.slane %v601_v55, %v5474_v1  ;;  %v625_v62 = vperm.slane %v576_v5, %v5464_v37 }
 0x161   :  { %v903_v63 = vsel %vm218_vm0, 0, %v902_v20  ;;  %v928_v0 = vrot.slane %v925_v45, 4  ;;  %v5595_v3 = vrot.slane %v611_v56, 4  ;;  %v813_v4 = vpack.i.b16 %v5526_v49, %v811_v21 }
 0x162   :  { %v612_v28 = vrot.slane %v5591_v61, 4  ;;  %v626_v6 = vrot.slane %v625_v62, 4  ;;  %v629_v7 = vsel %vm218_vm0, %v625_v62, %v628_v57  ;;  %v835_v8 = vperm.slane %v810_v19, %v5464_v37 }
 0x163   :  { %v5603_v9 = vrot.slane %v742_v53, 4  ;;  %v5606_v5 = vsel %vm218_vm0, %v756_v54, %v691_v47  ;;  %v637_v10 = vperm.slane %v629_v7, %v5474_v1  ;;  %v861_v12 = vperm.slane %v813_v4, %v5464_v37 }
 0x164   :  { %v973_v13 = vrot.slane %v903_v63, 4  ;;  %v615_v49 = vsel %vm218_vm0, 0, %v5595_v3  ;;  %v627_v14 = vsel %vm218_vm0, %v626_v6, %v5519_v40  ;;  %v836_v15 = vrot.slane %v835_v8, 4 }
 0x165   :  { %v633_v57 = vperm.slane %v627_v14, %v5474_v1  ;;  %v640_v19 = vrot.slane %v637_v10, 4  ;;  %v839_v21 = vsel %vm218_vm0, %v835_v8, %v838_v58  ;;  %v862_v16 = vrot.slane %v861_v12, 4 }
 0x166   :  { %v613_v22 = vsel %vm218_vm0, 0, %v612_v28  ;;  %v837_v23 = vsel %vm218_vm0, %v836_v15, %v5522_v41  ;;  %v847_v24 = vperm.slane %v839_v21, %v5474_v1  ;;  %v865_v40 = vsel %vm218_vm0, %v861_v12, %v864_v2 }
 0x167   :  { %v641_v26 = vsel %vm218_vm0, 0, %v640_v19  ;;  %v699_v31 = vrot.slane %v615_v49, 4  ;;  %v843_v33 = vperm.slane %v837_v23, %v5474_v1  ;;  %v863_v58 = vsel %vm218_vm0, %v862_v16, %v5530_v51 }
 0x168   :  { %v850_v17 = vrot.slane %v847_v24, 4  ;;  %v869_v27 = vperm.slane %v863_v58, %v5474_v1  ;;  %v873_v35 = vperm.slane %v865_v40, %v5474_v1  ;;  %v901_v41 = vsel %vm218_vm0, 0, %v900_v52 }
 0x169   :  { %v638_v36 = vrot.slane %v633_v57, 4  ;;  %v718_v39 = vrot.slane %v641_v26, 4  ;;  %v848_v38 = vrot.slane %v843_v33, 4  ;;  %v927_v2 = vsel %vm218_vm0, 0, %v926_v60 }
 0x16a   :  { %v851_v18 = vsel %vm218_vm0, 0, %v850_v17  ;;  %v876_v43 = vrot.slane %v873_v35, 4  ;;  %v874_v45 = vrot.slane %v869_v27, 4  ;;  %v930_v47 = vsel %vm218_vm0, %v850_v17, %v843_v33 }
 0x16b   :  { %v935_v50 = vrot.slane %v851_v18, 4  ;;  %v849_v51 = vsel %vm218_vm0, 0, %v848_v38  ;;  %v929_v53 = vsel %vm218_vm0, 0, %v928_v0  ;;  %v968_v54 = vsel %vm218_vm0, %v902_v20, %v5561_v32 }
 0x16c   :  { %v877_v52 = vsel %vm218_vm0, 0, %v876_v43  ;;  %v875_v55 = vsel %vm218_vm0, 0, %v874_v45  ;;  %v949_v56 = vsel %vm218_vm0, %v876_v43, %v869_v27  ;;  %v974_v60 = vsel %vm218_vm0, %v973_v13, %v901_v41 }
 0x16d   :  { %v934_v62 = vperm.slane %v930_v47, %v5464_v37  ;;  %v936_v63 = vsel %vm218_vm0, %v935_v50, %v849_v51  ;;  %v954_v4 = vrot.slane %v877_v52, 4  ;;  %v978_v28 = vperm.slane %v974_v60, %v5464_v37 }
 0x16e   :  { %v940_v6 = vperm.slane %v936_v63, %v5464_v37  ;;  %v972_v7 = vperm.slane %v968_v54, %v5464_v37  ;;  %v987_v32 = vsel %vm218_vm0, %v928_v0, %v5571_v42  ;;  %v992_v20 = vrot.slane %v929_v53, 4 }
 0x16f   :  { %v953_v8 = vperm.slane %v949_v56, %v5464_v37  ;;  %v955_v10 = vsel %vm218_vm0, %v954_v4, %v875_v55  ;;  %v979_v12 = vrot.slane %v978_v28, 4  ;;  %v639_v13 = vsel %vm218_vm0, 0, %v638_v36 }
 0x170   :  { %v941_v49 = vrot.slane %v940_v6, 4  ;;  %v959_v14 = vperm.slane %v955_v10, %v5464_v37  ;;  %v991_v15 = vperm.slane %v987_v32, %v5464_v37  ;;  %v993_v21 = vsel %vm218_vm0, %v992_v20, %v927_v2 }
 0x171   :  { %v980_v16 = vsel %vm218_vm0, %v979_v12, %v972_v7  ;;  %v997_v23 = vperm.slane %v993_v21, %v5464_v37  ;;  %v694_v42 = vsel %vm218_vm0, %v5595_v3, %v5591_v61  ;;  %v700_v0 = vsel %vm218_vm0, %v699_v31, %v613_v22 }
 0x172   :  { %v942_v24 = vsel %vm218_vm0, %v941_v49, %v934_v62  ;;  %v960_v40 = vrot.slane %v959_v14, 4  ;;  %v984_v26 = vperm.slane %v980_v16, %v5474_v1  ;;  %v704_v33 = vperm.slane %v700_v0, %v5464_v37  ;;  %v544_v16 = vpop.f32.mrf.mxu2 }
 0x173   :  { %v946_v58 = vperm.slane %v942_v24, %v5474_v1  ;;  %v998_v17 = vrot.slane %v997_v23, 4  ;;  %v713_v27 = vsel %vm218_vm0, %v640_v19, %v633_v57  ;;  %v719_v35 = vsel %vm218_vm0, %v718_v39, %v639_v13 }
 0x174   :  { %v961_v41 = vsel %vm218_vm0, %v960_v40, %v953_v8  ;;  %v985_v36 = vrot.slane %v984_v26, 4  ;;  %v698_v61 = vperm.slane %v694_v42, %v5464_v37  ;;  %v705_v3 = vrot.slane %v704_v33, 4 }
 0x175   :  { %v965_v22 = vperm.slane %v961_v41, %v5474_v1  ;;  %v999_v31 = vsel %vm218_vm0, %v998_v17, %v991_v15  ;;  %v947_v38 = vrot.slane %v946_v58, 4  ;;  %v723_v2 = vperm.slane %v719_v35, %v5464_v37 }
 0x176   :  { %v1003_v18 = vperm.slane %v999_v31, %v5474_v1  ;;  %v706_v57 = vsel %vm218_vm0, %v705_v3, %v698_v61  ;;  %v717_v19 = vperm.slane %v713_v27, %v5464_v37  ;;  %v1021_v45 = vshrl.u32 %v984_v26, 16 }
 0x177   :  { %v1008_v39 = vpack.i.b16 %v965_v22, %v946_v58  ;;  %v966_v43 = vrot.slane %v965_v22, 4  ;;  %v986_v47 = vsel %vm218_vm0, 0, %v985_v36  ;;  %v5678_v51 = vsel %vm218_vm0, 0, %v947_v38 }
 0x178   :  { %v1020_v50 = vpack.i.b16 %v1003_v18, %v984_v26  ;;  %v1022_v53 = vshrl.u32 %v1003_v18, 16  ;;  %v1004_v54 = vrot.slane %v1003_v18, 4  ;;  %v5683_v56 = vperm.slane %v706_v57, %v5474_v1 }
 0x179   :  { %v1277_v52 = vsel %vm1272_vm1, %v1008_v39, 0  ;;  %v967_v55 = vsel %vm218_vm0, 0, %v966_v43  ;;  %v724_v60 = vrot.slane %v723_v2, 4  ;;  %v1009_v28 = vshrl.u32 %v946_v58, 16 }
 0x17a   :  { %1286 = vmatpush.bf16.xpose.msra.mxu3 %v1277_v52  ;;  %v1296_v62 = vsel %vm1272_vm1, %v1020_v50, 0  ;;  %v1014_v63 = vpack.i.b16 %v967_v55, %v5678_v51  ;;  %v1023_v4 = vpack.i.b16 %v1022_v53, %v1021_v45  ;;  %v1005_v6 = vsel %vm218_vm0, 0, %v1004_v54 }
 0x17b   :  { %v725_v7 = vsel %vm218_vm0, %v724_v60, %v717_v19  ;;  %v1027_v32 = vshrl.u32 %v986_v47, 16  ;;  %v1010_v20 = vshrl.u32 %v965_v22, 16  ;;  %v1026_v12 = vpack.i.b16 %v1005_v6, %v986_v47 }
 0x17c   :  { %v1353_v8 = vsel %vm1272_vm1, %v1014_v63, 0  ;;  %v1334_v10 = vsel %vm1272_vm1, %v1023_v4, 0  ;;  %v729_v13 = vperm.slane %v725_v7, %v5474_v1  ;;  %v1028_v49 = vshrl.u32 %v1005_v6, 16 }
 0x17d   :  { %1362 = vmatpush.bf16.xpose.msrb.mxu1 %v1353_v8  ;;  %1343 = vmatpush.bf16.xpose.msrb.mxu2 %v1334_v10  ;;  %v1011_v14 = vpack.i.b16 %v1010_v20, %v1009_v28  ;;  %v711_v15 = vrot.slane %v5683_v56, 4  ;;  %v744_v21 = vsel %vm218_vm0, %v5603_v9, %v736_v59  ;;  %v1372_v23 = vsel %vm1272_vm1, %v1026_v12, 0 }
 0x17e   :  { %v730_v42 = vrot.slane %v729_v13, 4  ;;  %v751_v0 = vsel %vm218_vm0, %v5564_v34, %v5550_v11  ;;  %v772_v24 = vpack.i.b16 %v729_v13, %v5683_v56  ;;  %v1029_v40 = vpack.i.b16 %v1028_v49, %v1027_v32 }
 0x17f   :  { %v748_v26 = vperm.slane %v744_v21, %v5474_v1  ;;  %v761_v44 = vperm.slane %v5606_v5, %v5464_v37  ;;  %v545_v59 = vadd.f32 %v544_v16, %v373_v25  ;;  %v1315_v11 = vsel %vm1272_vm1, %v1011_v14, 0 }
 0x180   :  { %v731_v33 = vsel %vm218_vm0, 0, %v730_v42  ;;  %v1410_v9 = vsel %vm1272_vm1, %v1029_v40, 0  ;;  %v712_v34 = vsel %vm218_vm0, 0, %v711_v15  ;;  %v755_v58 = vperm.slane %v751_v0, %v5464_v37 }
 0x181   :  { %4597 = vmatmul.msk.bf16.vlgmr.msra.gmra.mxu3 %vm1272_vm1, %v772_v24  ;;  %1419 = vmatpush.bf16.xpose.msrb.mxu0 %v1410_v9  ;;  %v778_v17 = vpack.i.b16 %v731_v33, %v712_v34  ;;  %v762_v27 = vrot.slane %v761_v44, 4  ;;  %v5714_v35 = vpack.c.bf16 %v545_v59, %v545_v59  ;;  %v749_v5 = vrot.slane %v748_v26, 4  ;;  %v5752_v44 = vpop.permute.xlu0 %1036 }
 0x182   :  { %1305 = vmatpush.bf16.xpose.msrb.mxu3 %v1296_v62  ;;  %v785_v41 = vshrl.u32 %v748_v26, 16  ;;  %v1016_v22 = vshrl.u32 %v967_v55, 16  ;;  %v1015_v57 = vshrl.u32 %v5678_v51, 16  ;;  %v774_v50 = vshrl.u32 %v729_v13, 16 }
 0x183   :  { %v763_v46 = vsel %vm218_vm0, %v762_v27, %v755_v58  ;;  %1034 = vrot.lane.b32.xlu2 %v5714_v35, %s5326_s12  ;;  %v750_v61 = vsel %vm218_vm0, 0, %v749_v5  ;;  %v773_v53 = vshrl.u32 %v5683_v56, 16  ;;  %v780_v51 = vshrl.u32 %v731_v33, 16 }
 0x184   :  { %4601 = vmatmul.msk.bf16.vlgmr.msrb.gmra.mxu1 %vm1272_vm1, %v778_v17  ;;  %v767_v25 = vperm.slane %v763_v46, %v5474_v1  ;;  %v791_v2 = vshrl.u32 %v750_v61, 16  ;;  %v1017_v39 = vpack.i.b16 %v1016_v22, %v1015_v57  ;;  %v779_v52 = vshrl.u32 %v712_v34, 16 }
 0x185   :  { %1381 = vmatpush.bf16.xpose.msra.mxu2 %v1372_v23  ;;  %v775_v54 = vpack.i.b16 %v774_v50, %v773_v53 }
 0x186   :  { %v786_v36 = vshrl.u32 %v767_v25, 16  ;;  %v768_v3 = vrot.slane %v767_v25, 4  ;;  %v784_v43 = vpack.i.b16 %v767_v25, %v748_v26  ;;  %v1391_v45 = vsel %vm1272_vm1, %v1017_v39, 0 }
 0x187   :  { %v781_v55 = vpack.i.b16 %v780_v51, %v779_v52 }
 0x188   :  { %v787_v31 = vpack.i.b16 %v786_v36, %v785_v41  ;;  %v769_v38 = vsel %vm218_vm0, 0, %v768_v3 }
 0x189   :  { %v792_v18 = vshrl.u32 %v769_v38, 16  ;;  %v790_v47 = vpack.i.b16 %v769_v38, %v750_v61  ;;  %v5758_v61 = vpop.permute.xlu1 %1032 }
 0x18a   :  { %1324 = vmatpush.bf16.xpose.msra.mxu3 %v1315_v11  ;;  %4600 = vmatmul.msk.bf16.vlgmr.msrb.gmra.mxu2 %vm1272_vm1, %v787_v31 }
 0x18b   :  { %v793_v19 = vpack.i.b16 %v792_v18, %v791_v2 }
 0x18d   :  { %4604 = vmatmul.msk.bf16.vlgmr.msrb.gmra.mxu0 %vm1272_vm1, %v793_v19 }
 0x191   :  { %4598 = vmatmul.msk.bf16.vlgmr.msrb.gmra.mxu3 %vm1272_vm1, %v784_v43 }
 0x192   :  { %1400 = vmatpush.bf16.xpose.msrb.mxu3 %v1391_v45 }
 0x19a   :  { %4602 = vmatmul.msk.bf16.vlgmr.msra.gmra.mxu2 %vm1272_vm1, %v790_v47  ;;  %v1059_v47 = vshrl.u32 %v5714_v35, 16 }
 0x1a1   :  { %4599 = vmatmul.msk.bf16.vlgmr.msra.gmra.mxu3 %vm1272_vm1, %v775_v54 }
 0x1b1   :  { %4603 = vmatmul.msk.bf16.vlgmr.msrb.gmra.mxu3 %vm1272_vm1, %v781_v55 }
 0x1dd   :  { %v1035_v26 = vpop.permute.xlu2 %1034 }
 0x1de   :  { %v1060_v50 = vshrl.u32 %v1035_v26, 16  ;;  %v1058_v54 = vpack.i.b16 %v1035_v26, %v5714_v35 }
 0x1e0   :  { %v1061_v52 = vpack.i.b16 %v1060_v50, %v1059_v47 }
 0x201   :  { %v1364_v60 = vpop.f32.mrf.mxu1 }
 0x202   :  { %v1438_v62 = vsel %vm1425_vm2, %v1364_v60, -inf }
 0x203   :  { %1439 = vmax.xlane.f32.xlu2 %v1438_v62 }
 0x204   :  { %v1288_v63 = vpop.f32.mrf.mxu3 }
 0x205   :  { %v1426_v28 = vsel %vm1425_vm2, %v1288_v63, -inf }
 0x209   :  { %v1366_v4 = vpop.f32.mrf.mxu1 }
 0x20a   :  { %v5734_v6 = vpop.f32.mrf.mxu0 }
 0x20b   :  { %1427 = vmax.xlane.f32.xlu2 %v1426_v28  ;;  %v1447_v56 = vsel %vm1425_vm2, %v5734_v6, -inf }
 0x20c   :  { %v1290_v7 = vpop.f32.mrf.mxu3  ;;  %1448 = vmax.xlane.f32.xlu0 %v1447_v56 }
 0x20d   :  { %v1345_v32 = vpop.f32.mrf.mxu2 }
 0x20e   :  { %v1435_v20 = vsel %vm1425_vm2, %v1345_v32, -inf }
 0x212   :  { %v1423_v8 = vpop.f32.mrf.mxu0 }
 0x213   :  { %1436 = vmax.xlane.f32.xlu2 %v1435_v20 }
 0x214   :  { %v1307_v10 = vpop.f32.mrf.mxu3 }
 0x215   :  { %v1429_v12 = vsel %vm1425_vm2, %v1307_v10, -inf  ;;  %v1347_v13 = vpop.f32.mrf.mxu2 }
 0x216   :  { %1430 = vmax.xlane.f32.xlu0 %v1429_v12 }
 0x21c   :  { %v1309_v49 = vpop.f32.mrf.mxu3 }
 0x21d   :  { %v1383_v14 = vpop.f32.mrf.mxu2 }
 0x21e   :  { %v1441_v15 = vsel %vm1425_vm2, %v1383_v14, -inf }
 0x21f   :  { %1442 = vmax.xlane.f32.xlu0 %v1441_v15 }
 0x224   :  { %v1326_v21 = vpop.f32.mrf.mxu3 }
 0x225   :  { %v1432_v16 = vsel %vm1425_vm2, %v1326_v21, -inf  ;;  %v1385_v23 = vpop.f32.mrf.mxu2 }
 0x226   :  { %1433 = vmax.xlane.f32.xlu1 %v1432_v16 }
 0x22b   :  { %1042 = vrot.lane.b32.xlu2 %v5714_v35, %s5307_s29 }
 0x22c   :  { %v1328_v42 = vpop.f32.mrf.mxu3 }
 0x233   :  { %1038 = vrot.lane.b32.xlu0 %v5714_v35, %s5311_s26  ;;  %v1150_v35 = vperm.slane %v1061_v52, %v5464_v37 }
 0x234   :  { %v5746_v0 = vpop.f32.mrf.mxu3 }
 0x235   :  { %v1444_v24 = vsel %vm1425_vm2, %v5746_v0, -inf  ;;  %v1158_v15 = vrot.slane %v1150_v35, 4 }
 0x236   :  { %1445 = vmax.xlane.f32.xlu1 %v1444_v24 }
 0x23c   :  { %v1404_v40 = vpop.f32.mrf.mxu3 }
 0x24f   :  { %1040 = vrot.lane.b32.xlu1 %v5524_v48, %s5307_s29 }
 0x276   :  { %v1440_v33 = vpop.xlane.xlu2 %1439 }
 0x277   :  { %v1454_v22 = vsub.f32 %v1364_v60, %v1440_v33 }
 0x279   :  { %v1466_v38 = vmul.f32 1.442695, %v1454_v22 }
 0x27e   :  { %v1428_v59 = vpop.xlane.xlu2 %1427 }
 0x27f   :  { %v1450_v9 = vsub.f32 %v1288_v63, %v1428_v59  ;;  %v1449_v11 = vpop.xlane.xlu0 %1448  ;;  %v1124_v63 = vperm.slane %v1058_v54, %v5464_v37 }
 0x280   :  { %v1457_v60 = vsub.f32 %v5734_v6, %v1449_v11 }
 0x281   :  { %v1458_v34 = vmul.f32 1.442695, %v1450_v9  ;;  %v1132_v6 = vrot.slane %v1124_v63, 4 }
 0x282   :  { %v1472_v8 = vmul.f32 1.442695, %v1457_v60 }
 0x283   :  { %4964 = vpow2.f32 %v1458_v34 }
 0x286   :  { %v1437_v17 = vpop.xlane.xlu2 %1436 }
 0x287   :  { %v1453_v25 = vsub.f32 %v1345_v32, %v1437_v17 }
 0x289   :  { %v5754_v58 = vpop.eup %4964  ;;  %v1431_v27 = vpop.xlane.xlu0 %1430  ;;  %v1464_v36 = vmul.f32 1.442695, %v1453_v25 }
 0x28a   :  { %v1451_v5 = vsub.f32 %v1307_v10, %v1431_v27  ;;  %v1474_v46 = vsel %vm1425_vm2, %v5754_v58, 0.0 }
 0x28b   :  { %1475 = vadd.xlane.f32.xlu2 %v1474_v46 }
 0x28c   :  { %v1460_v41 = vmul.f32 1.442695, %v1451_v5 }
 0x28e   :  { %4966 = vpow2.f32 %v1460_v41  ;;  %v1043_v62 = vpop.permute.xlu2 %1042 }
 0x28f   :  { %4968 = vpow2.f32 %v1464_v36  ;;  %v1066_v7 = vshrl.u32 %v1043_v62, 16 }
 0x290   :  { %4970 = vpow2.f32 %v1466_v38 }
 0x292   :  { %v1443_v2 = vpop.xlane.xlu0 %1442 }
 0x293   :  { %v1455_v39 = vsub.f32 %v1383_v14, %v1443_v2 }
 0x294   :  { %v5760_v3 = vpop.eup %4966 }
 0x295   :  { %v1477_v31 = vsel %vm1425_vm2, %v5760_v3, 0.0  ;;  %v5764_v57 = vpop.eup %4968  ;;  %v1468_v53 = vmul.f32 1.442695, %v1455_v39 }
 0x296   :  { %1478 = vadd.xlane.f32.xlu1 %v1477_v31  ;;  %v1483_v45 = vsel %vm1425_vm2, %v5764_v57, 0.0  ;;  %v5770_v51 = vpop.eup %4970 }
 0x297   :  { %v1486_v28 = vsel %vm1425_vm2, %v5770_v51, 0.0 }
 0x299   :  { %v1434_v18 = vpop.xlane.xlu1 %1433 }
 0x29a   :  { %v1452_v19 = vsub.f32 %v1326_v21, %v1434_v18 }
 0x29c   :  { %v1462_v43 = vmul.f32 1.442695, %v1452_v19 }
 0x29e   :  { %4972 = vpow2.f32 %v1462_v43  ;;  %1484 = vadd.xlane.f32.xlu1 %v1483_v45 }
 0x29f   :  { %4974 = vpow2.f32 %v1468_v53 }
 0x2a0   :  { %4976 = vpow2.f32 %v1472_v8  ;;  %v1046_v8 = vpack.i.b16 %v5758_v61, %v5524_v48 }
 0x2a4   :  { %v5772_v55 = vpop.eup %4972 }
 0x2a5   :  { %v1480_v4 = vsel %vm1425_vm2, %v5772_v55, 0.0  ;;  %v1039_v56 = vpop.permute.xlu0 %1038  ;;  %v5782_v49 = vpop.eup %4974 }
 0x2a6   :  { %1481 = vadd.xlane.f32.xlu0 %v1480_v4  ;;  %1487 = vadd.xlane.f32.xlu1 %v1486_v28  ;;  %v1064_v32 = vpack.i.b16 %v1043_v62, %v1039_v56  ;;  %v1065_v20 = vshrl.u32 %v1039_v56, 16  ;;  %v1489_v59 = vsel %vm1425_vm2, %v5782_v49, 0.0  ;;  %v5797_v41 = vpop.eup %4976  ;;  %v1047_v62 = vshrl.u32 %v5524_v48, 16 }
 0x2a7   :  { %v1495_v47 = vsel %vm1425_vm2, %v5797_v41, 0.0 }
 0x2a8   :  { %v1067_v10 = vpack.i.b16 %v1066_v7, %v1065_v20  ;;  %v1129_v12 = vperm.slane %v1064_v32, %v5464_v37 }
 0x2a9   :  { %v1446_v13 = vpop.xlane.xlu1 %1445 }
 0x2aa   :  { %v1456_v14 = vsub.f32 %v5746_v0, %v1446_v13  ;;  %v1130_v21 = vrot.slane %v1129_v12, 4  ;;  %v1133_v16 = vsel %vm218_vm0, %v1129_v12, %v1132_v6  ;;  %v1155_v23 = vperm.slane %v1067_v10, %v5464_v37 }
 0x2ab   :  { %v1141_v42 = vperm.slane %v1133_v16, %v5474_v1 }
 0x2ac   :  { %v1470_v24 = vmul.f32 1.442695, %v1456_v14  ;;  %v1131_v40 = vsel %vm218_vm0, %v1130_v21, %v1124_v63  ;;  %v1156_v26 = vrot.slane %v1155_v23, 4  ;;  %v1159_v33 = vsel %vm218_vm0, %v1155_v23, %v1158_v15 }
 0x2ad   :  { %v1137_v0 = vperm.slane %v1131_v40, %v5474_v1  ;;  %v1144_v9 = vrot.slane %v1141_v42, 4  ;;  %v1167_v11 = vperm.slane %v1159_v33, %v5474_v1  ;;  %v1048_v63 = vshrl.u32 %v5758_v61, 16 }
 0x2ae   :  { %4978 = vpow2.f32 %v1470_v24  ;;  %1490 = vadd.xlane.f32.xlu0 %v1489_v59  ;;  %v1157_v34 = vsel %vm218_vm0, %v1156_v26, %v1150_v35  ;;  %v1072_v42 = vperm.slane %v1046_v8, %v5464_v37  ;;  %v1053_v61 = vshrl.u32 %v5752_v44, 16 }
 0x2af   :  { %v1142_v17 = vrot.slane %v1137_v0, 4  ;;  %v1145_v27 = vsel %vm218_vm0, 0, %v1144_v9  ;;  %v1163_v5 = vperm.slane %v1157_v34, %v5474_v1  ;;  %v1170_v46 = vrot.slane %v1167_v11, 4 }
 0x2b0   :  { %v1215_v25 = vrot.slane %v1145_v27, 4  ;;  %v1210_v38 = vsel %vm218_vm0, %v1144_v9, %v1137_v0  ;;  %v1049_v6 = vpack.i.b16 %v1048_v63, %v1047_v62 }
 0x2b1   :  { %v1143_v36 = vsel %vm218_vm0, 0, %v1142_v17  ;;  %v1168_v22 = vrot.slane %v1163_v5, 4  ;;  %v1171_v31 = vsel %vm218_vm0, 0, %v1170_v46  ;;  %v1229_v45 = vsel %vm218_vm0, %v1170_v46, %v1163_v5 }
 0x2b2   :  { %v1216_v2 = vsel %vm218_vm0, %v1215_v25, %v1143_v36  ;;  %v1234_v18 = vrot.slane %v1171_v31, 4  ;;  %v1214_v54 = vperm.slane %v1210_v38, %v5464_v37  ;;  %v1233_v28 = vperm.slane %v1229_v45, %v5464_v37 }
 0x2b3   :  { %v1169_v39 = vsel %vm218_vm0, 0, %v1168_v22  ;;  %v1220_v43 = vperm.slane %v1216_v2, %v5464_v37  ;;  %v1098_v48 = vperm.slane %v1049_v6, %v5464_v37  ;;  %v1080_v17 = vrot.slane %v1072_v42, 4 }
 0x2b4   :  { %v5803_v19 = vpop.eup %4978  ;;  %v1235_v53 = vsel %vm218_vm0, %v1234_v18, %v1169_v39 }
 0x2b5   :  { %v1492_v50 = vsel %vm1425_vm2, %v5803_v19, 0.0  ;;  %v1221_v52 = vrot.slane %v1220_v43, 4  ;;  %v1239_v60 = vperm.slane %v1235_v53, %v5464_v37  ;;  %v1106_v25 = vrot.slane %v1098_v48, 4 }
 0x2b6   :  { %1496 = vadd.xlane.f32.xlu0 %v1495_v47  ;;  %1493 = vadd.xlane.f32.xlu2 %v1492_v50 }
 0x2b7   :  { %v1222_v4 = vsel %vm218_vm0, %v1221_v52, %v1214_v54  ;;  %v1240_v56 = vrot.slane %v1239_v60, 4 }
 0x2b8   :  { %v1226_v35 = vperm.slane %v1222_v4, %v5474_v1 }
 0x2b9   :  { %v1241_v7 = vsel %vm218_vm0, %v1240_v56, %v1233_v28 }
 0x2ba   :  { %v1245_v32 = vperm.slane %v1241_v7, %v5474_v1  ;;  %v1227_v20 = vrot.slane %v1226_v35, 4  ;;  %v1263_v10 = vshrl.u32 %v1226_v35, 16 }
 0x2bc   :  { %v1262_v12 = vpack.i.b16 %v1245_v32, %v1226_v35  ;;  %v1264_v13 = vshrl.u32 %v1245_v32, 16  ;;  %v1228_v14 = vsel %vm218_vm0, 0, %v1227_v20  ;;  %v1246_v15 = vrot.slane %v1245_v32, 4 }
 0x2bd   :  { %v1269_v40 = vshrl.u32 %v1228_v14, 16 }
 0x2be   :  { %v1546_v21 = vsel %vm1525_vm3, %v1262_v12, 0  ;;  %v1265_v16 = vpack.i.b16 %v1264_v13, %v1263_v10  ;;  %v1247_v23 = vsel %vm218_vm0, 0, %v1246_v15 }
 0x2bf   :  { %1555 = vmatpush.bf16.msrb.mxu2 %v1546_v21  ;;  %v1268_v24 = vpack.i.b16 %v1247_v23, %v1228_v14  ;;  %v1270_v26 = vshrl.u32 %v1247_v23, 16 }
 0x2c0   :  { %v1584_v33 = vsel %vm1525_vm3, %v1265_v16, 0 }
 0x2c1   :  { %v1041_v59 = vpop.permute.xlu1 %1040  ;;  %1593 = vmatpush.bf16.msra.mxu0 %v1584_v33  ;;  %v1622_v11 = vsel %vm1525_vm3, %v1268_v24, 0  ;;  %v1271_v34 = vpack.i.b16 %v1270_v26, %v1269_v40 }
 0x2c2   :  { %v1052_v0 = vpack.i.b16 %v1041_v59, %v5752_v44  ;;  %v1054_v9 = vshrl.u32 %v1041_v59, 16 }
 0x2c3   :  { %1631 = vmatpush.bf16.msra.mxu2 %v1622_v11  ;;  %v1660_v46 = vsel %vm1525_vm3, %v1271_v34, 0 }
 0x2c4   :  { %v1055_v27 = vpack.i.b16 %v1054_v9, %v1053_v61  ;;  %v1077_v5 = vperm.slane %v1052_v0, %v5464_v37 }
 0x2c5   :  { %1669 = vmatpush.bf16.msrb.mxu0 %v1660_v46 }
 0x2c6   :  { %v1078_v36 = vrot.slane %v1077_v5, 4  ;;  %v1081_v22 = vsel %vm218_vm0, %v1077_v5, %v1080_v17  ;;  %v1103_v31 = vperm.slane %v1055_v27, %v5464_v37 }
 0x2c7   :  { %v1089_v44 = vperm.slane %v1081_v22, %v5474_v1 }
 0x2c8   :  { %v1079_v38 = vsel %vm218_vm0, %v1078_v36, %v1072_v42  ;;  %v1104_v2 = vrot.slane %v1103_v31, 4  ;;  %v1107_v18 = vsel %vm218_vm0, %v1103_v31, %v1106_v25 }
 0x2c9   :  { %v1085_v39 = vperm.slane %v1079_v38, %v5474_v1  ;;  %v1092_v43 = vrot.slane %v1089_v44, 4  ;;  %v1115_v45 = vperm.slane %v1107_v18, %v5474_v1 }
 0x2ca   :  { %v1105_v47 = vsel %vm218_vm0, %v1104_v2, %v1098_v48 }
 0x2cb   :  { %v1090_v50 = vrot.slane %v1085_v39, 4  ;;  %v1093_v53 = vsel %vm218_vm0, 0, %v1092_v43  ;;  %v1111_v54 = vperm.slane %v1105_v47, %v5474_v1  ;;  %v1118_v52 = vrot.slane %v1115_v45, 4  ;;  %v4737_v45 = vld [vmem:[#allocation13 + $0x78] sm:$0xf0] }
 0x2cc   :  { %v1177_v60 = vrot.slane %v1093_v53, 4  ;;  %v1172_v28 = vsel %vm218_vm0, %v1092_v43, %v1085_v39  ;;  %v4911_v43 = vld [vmem:[#allocation13 + $0x74] sm:$0xf] }
 0x2cd   :  { %v1091_v62 = vsel %vm218_vm0, 0, %v1090_v50  ;;  %v1116_v63 = vrot.slane %v1111_v54, 4  ;;  %v1119_v4 = vsel %vm218_vm0, 0, %v1118_v52  ;;  %v1191_v20 = vsel %vm218_vm0, %v1118_v52, %v1111_v54 }
 0x2ce   :  { %v1178_v56 = vsel %vm218_vm0, %v1177_v60, %v1091_v62  ;;  %v1196_v35 = vrot.slane %v1119_v4, 4  ;;  %v1176_v6 = vperm.slane %v1172_v28, %v5464_v37  ;;  %v1195_v14 = vperm.slane %v1191_v20, %v5464_v37  ;;  %v4912_v60 = vld [vmem:[#allocation13 + $0x74] sm:$0xf0] }
 0x2cf   :  { %v1117_v7 = vsel %vm218_vm0, 0, %v1116_v63  ;;  %v1182_v32 = vperm.slane %v1178_v56, %v5464_v37  ;;  %v4740_v54 = vor.u32 %v4911_v43, %v4737_v45  ;;  %v261_v45 = vld [vmem:[#allocation5 + $0x6] sm:$0x3] }
 0x2d0   :  { %v1197_v8 = vsel %vm218_vm0, %v1196_v35, %v1117_v7  ;;  %v4727_v7 = vld [vmem:[#allocation13 + $0x60] sm:$0xf] }
 0x2d1   :  { %v1183_v10 = vrot.slane %v1182_v32, 4  ;;  %v1201_v12 = vperm.slane %v1197_v8, %v5464_v37  ;;  %v4910_v32 = vld [vmem:[#allocation13 + $0x64] sm:$0xf0] }
 0x2d2   :  { %v4728_v8 = vor.u32 %v4910_v32, %v4727_v7  ;;  %v4898_v7 = vld [vmem:[#allocation13 + $0x4] sm:$0xf0]  ;;  %v4899_v32 = vld [vmem:[#allocation13 + $0x14] sm:$0xf] }
 0x2d3   :  { %v1184_v13 = vsel %vm218_vm0, %v1183_v10, %v1176_v6  ;;  %v1202_v15 = vrot.slane %v1201_v12, 4 }
 0x2d4   :  { %v1188_v21 = vperm.slane %v1184_v13, %v5474_v1 }
 0x2d5   :  { %v1203_v16 = vsel %vm218_vm0, %v1202_v15, %v1195_v14 }
 0x2d6   :  { %v1207_v23 = vperm.slane %v1203_v16, %v5474_v1  ;;  %v1189_v42 = vrot.slane %v1188_v21, 4  ;;  %v1251_v24 = vshrl.u32 %v1188_v21, 16 }
 0x2d8   :  { %v1250_v40 = vpack.i.b16 %v1207_v23, %v1188_v21  ;;  %v1252_v26 = vshrl.u32 %v1207_v23, 16  ;;  %v1190_v48 = vsel %vm218_vm0, 0, %v1189_v42  ;;  %v1208_v61 = vrot.slane %v1207_v23, 4  ;;  %v4908_v42 = vld [vmem:[#allocation13 + $0x54] sm:$0xf0] }
 0x2d9   :  { %v1257_v11 = vshrl.u32 %v1190_v48, 16 }
 0x2da   :  { %v1527_v33 = vsel %vm1525_vm3, %v1250_v40, 0  ;;  %v1253_v59 = vpack.i.b16 %v1252_v26, %v1251_v24  ;;  %v1209_v0 = vsel %vm218_vm0, 0, %v1208_v61  ;;  %v4909_v24 = vld [vmem:[#allocation13 + $0x64] sm:$0xf]  ;;  %v4729_v26 = vld [vmem:[#allocation13 + $0x68] sm:$0xf0] }
 0x2db   :  { %1536 = vmatpush.bf16.msra.mxu1 %v1527_v33  ;;  %v1256_v9 = vpack.i.b16 %v1209_v0, %v1190_v48  ;;  %v1258_v34 = vshrl.u32 %v1209_v0, 16  ;;  %v4711_v48 = vld [vmem:[#allocation13 + $0x40] sm:$0xf]  ;;  %v4906_v61 = vld [vmem:[#allocation13 + $0x44] sm:$0xf0]  ;;  %v4732_v33 = vor.u32 %v4909_v24, %v4729_v26 }
 0x2dc   :  { %v1565_v17 = vsel %vm1525_vm3, %v1253_v59, 0  ;;  %v4907_v59 = vld [vmem:[#allocation13 + $0x54] sm:$0xf]  ;;  %v4721_v0 = vld [vmem:[#allocation13 + $0x58] sm:$0xf0] }
 0x2dd   :  { %1574 = vmatpush.bf16.msra.mxu3 %v1565_v17  ;;  %v1603_v27 = vsel %vm1525_vm3, %v1256_v9, 0  ;;  %v1259_v5 = vpack.i.b16 %v1258_v34, %v1257_v11  ;;  %v4703_v9 = vld [vmem:[#allocation13 + $0x30] sm:$0xf]  ;;  %v4904_v11 = vld [vmem:[#allocation13 + $0x34] sm:$0xf0] }
 0x2de   :  { %v4905_v34 = vld [vmem:[#allocation13 + $0x44] sm:$0xf]  ;;  %v4713_v17 = vld [vmem:[#allocation13 + $0x48] sm:$0xf0] }
 0x2df   :  { %1612 = vmatpush.bf16.msrb.mxu1 %v1603_v27  ;;  %v1641_v46 = vsel %vm1525_vm3, %v1259_v5, 0  ;;  %v4704_v27 = vor.u32 %v4904_v11, %v4703_v9  ;;  %v4716_v5 = vor.u32 %v4905_v34, %v4713_v17  ;;  %v4897_v26 = vld [vmem:[#allocation13 + $0x4] sm:$0xf] }
 0x2e1   :  { %1650 = vmatpush.bf16.msrb.mxu3 %v1641_v46  ;;  %v4695_v46 = vld [vmem:[#allocation13 + $0x20] sm:$0xf] }
 0x2fe   :  { %v1476_v25 = vpop.xlane.xlu2 %1475 }
 0x2ff   :  { %4980 = vrcp.f32 %v1476_v25  ;;  %v4902_v25 = vld [vmem:[#allocation13 + $0x24] sm:$0xf0] }
 0x305   :  { %v4981_v36 = vpop.eup %4980 }
 0x306   :  { %v1506_v22 = vmul.f32 %v4981_v36, %v5754_v58  ;;  %v4903_v36 = vld [vmem:[#allocation13 + $0x34] sm:$0xf] }
 0x308   :  { %v1514_v31 = vpack.c.bf16 %v1506_v22, %v1506_v22  ;;  %v4705_v22 = vld [vmem:[#allocation13 + $0x38] sm:$0xf0] }
 0x309   :  { %v1479_v44 = vpop.xlane.xlu1 %1478 }
 0x30a   :  { %4982 = vrcp.f32 %v1479_v44  ;;  %4605 = vmatmul.msk.bf16.vlgmr.msra.gmra.mxu1 %vm1425_vm2, %v1514_v31  ;;  %v4696_v31 = vor.u32 %v4902_v25, %v4695_v46  ;;  %v4708_v44 = vor.u32 %v4903_v36, %v4705_v22 }
 0x310   :  { %v4983_v38 = vpop.eup %4982 }
 0x311   :  { %v1507_v2 = vmul.f32 %v4983_v38, %v5760_v3  ;;  %v1485_v18 = vpop.xlane.xlu1 %1484  ;;  %v4735_v3 = vld [vmem:[#allocation13 + $0x70] sm:$0xf] }
 0x312   :  { %4984 = vrcp.f32 %v1485_v18  ;;  %v4687_v38 = vld [vmem:[#allocation13 + $0x10] sm:$0xf] }
 0x313   :  { %v1515_v39 = vpack.c.bf16 %v1507_v2, %v1507_v2  ;;  %v4900_v2 = vld [vmem:[#allocation13 + $0x14] sm:$0xf0] }
 0x314   :  { %v4688_v18 = vor.u32 %v4900_v2, %v4687_v38 }
 0x315   :  { %4606 = vmatmul.msk.bf16.vlgmr.msrb.gmra.mxu2 %vm1425_vm2, %v1515_v39  ;;  %v265_v39 = vld [vmem:[#allocation5 + $0xe] sm:$0x3] }
 0x316   :  { %v288_v43 = vrot.slane %v265_v39, 4 }
 0x318   :  { %v4985_v47 = vpop.eup %4984 }
 0x319   :  { %v1509_v50 = vmul.f32 %v4985_v47, %v5764_v57  ;;  %v1482_v53 = vpop.xlane.xlu0 %1481  ;;  %v1488_v58 = vpop.xlane.xlu1 %1487  ;;  %v4736_v57 = vor.u32 %v4912_v60, %v4735_v3  ;;  %v263_v47 = vld [vmem:[#allocation5 + $0xa] sm:$0x3]  ;;  %v260_v3 = vld [vmem:[#allocation5 + $0x4] sm:$0x3]  ;;  %v262_v60 = vld [vmem:[#allocation5 + $0x8] sm:$0x3] }
 0x31a   :  { %4986 = vrcp.f32 %v1482_v53  ;;  %v276_v53 = vrot.slane %v261_v45, 4 }
 0x31b   :  { %v1517_v52 = vpack.c.bf16 %v1509_v50, %v1509_v50  ;;  %4988 = vrcp.f32 %v1488_v58  ;;  %v264_v50 = vld [vmem:[#allocation5 + $0xc] sm:$0x3] }
 0x31c   :  { %v282_v58 = vrot.slane %v264_v50, 4 }
 0x31d   :  { %4608 = vmatmul.msk.bf16.vlgmr.msra.gmra.mxu0 %vm1425_vm2, %v1517_v52  ;;  %v259_v52 = vld [vmem:[#allocation5 + $0x2] sm:$0x3] }
 0x31e   :  { %2245 = vmatpush.bf16.msra.mxu0 %v4740_v54  ;;  %v289_v54 = vsel %vm218_vm0, %v288_v43, %v263_v47 }
 0x320   :  { %v4987_v62 = vpop.eup %4986 }
 0x321   :  { %v4989_v63 = vpop.eup %4988  ;;  %v1508_v4 = vmul.f32 %v4987_v62, %v5772_v55  ;;  %v1491_v28 = vpop.xlane.xlu0 %1490  ;;  %v4901_v62 = vld [vmem:[#allocation13 + $0x24] sm:$0xf] }
 0x322   :  { %v1510_v56 = vmul.f32 %v4989_v63, %v5770_v51  ;;  %4990 = vrcp.f32 %v1491_v28  ;;  %2246 = vmatpush.bf16.msra.mxu0 %v4732_v33  ;;  %v4697_v63 = vld [vmem:[#allocation13 + $0x28] sm:$0xf0]  ;;  %v277_v28 = vsel %vm218_vm0, %v276_v53, %v259_v52 }
 0x323   :  { %v1516_v35 = vpack.c.bf16 %v1508_v4, %v1508_v4  ;;  %v4679_v4 = vld [vmem:[#allocation13] sm:$0xf] }
 0x324   :  { %v1518_v20 = vpack.c.bf16 %v1510_v56, %v1510_v56  ;;  %v283_v56 = vsel %vm218_vm0, %v282_v58, %v262_v60 }
 0x325   :  { %4607 = vmatmul.msk.bf16.vlgmr.msra.gmra.mxu3 %vm1425_vm2, %v1516_v35  ;;  %v4700_v35 = vor.u32 %v4901_v62, %v4697_v63 }
 0x326   :  { %4609 = vmatmul.msk.bf16.vlgmr.msrb.gmra.mxu1 %vm1425_vm2, %v1518_v20  ;;  %2227 = vmatpush.bf16.msra.mxu3 %v4736_v57  ;;  %v293_v57 = vperm.slane %v289_v54, %v5464_v37  ;;  %v4689_v20 = vld [vmem:[#allocation13 + $0x18] sm:$0xf0] }
 0x328   :  { %v4991_v6 = vpop.eup %4990 }
 0x329   :  { %v1511_v10 = vmul.f32 %v4991_v6, %v5782_v49  ;;  %v1497_v12 = vpop.xlane.xlu0 %1496  ;;  %v1494_v55 = vpop.xlane.xlu2 %1493  ;;  %v4719_v49 = vld [vmem:[#allocation13 + $0x50] sm:$0xf]  ;;  %v4680_v6 = vor.u32 %v4898_v7, %v4679_v4 }
 0x32a   :  { %4992 = vrcp.f32 %v1497_v12  ;;  %2228 = vmatpush.bf16.msra.mxu3 %v4728_v8  ;;  %v4720_v40 = vor.u32 %v4908_v42, %v4719_v49  ;;  %v281_v8 = vperm.slane %v277_v28, %v5464_v37  ;;  %v266_v12 = vld [vmem:[#allocation5 + $0x10] sm:$0x3]  ;;  %v300_v49 = vrot.slane %v293_v57, 4 }
 0x32b   :  { %v1519_v51 = vpack.c.bf16 %v1511_v10, %v1511_v10  ;;  %4994 = vrcp.f32 %v1494_v55  ;;  %v258_v10 = vld [vmem:[#allocation5] sm:$0x3]  ;;  %v267_v55 = vld [vmem:[#allocation5 + $0x12] sm:$0x3] }
 0x32d   :  { %4610 = vmatmul.msk.bf16.vlgmr.msra.gmra.mxu2 %vm1425_vm2, %v1519_v51  ;;  %v287_v51 = vperm.slane %v283_v56, %v5464_v37 }
 0x32e   :  { %2229 = vmatpush.bf16.msra.mxu3 %v4720_v40 }
 0x32f   :  { %v301_v33 = vsel %vm218_vm0, %v300_v49, %v287_v51 }
 0x330   :  { %v4993_v13 = vpop.eup %4992 }
 0x331   :  { %v4995_v14 = vpop.eup %4994  ;;  %v1513_v15 = vmul.f32 %v4993_v13, %v5797_v41  ;;  %v4712_v41 = vor.u32 %v4906_v61, %v4711_v48  ;;  %v4692_v13 = vor.u32 %v4899_v32, %v4689_v20  ;;  %v4681_v48 = vld [vmem:[#allocation13 + $0x8] sm:$0xf0] }
 0x332   :  { %v1512_v21 = vmul.f32 %v4995_v14, %v5803_v19  ;;  %v4724_v19 = vor.u32 %v4907_v59, %v4721_v0  ;;  %v268_v14 = vld [vmem:[#allocation5 + $0x14] sm:$0x3]  ;;  %v4684_v34 = vor.u32 %v4897_v26, %v4681_v48 }
 0x333   :  { %v1521_v16 = vpack.c.bf16 %v1513_v15, %v1513_v15  ;;  %2230 = vmatpush.bf16.msra.mxu3 %v4712_v41  ;;  %v269_v15 = vld [vmem:[#allocation5 + $0x16] sm:$0x3]  ;;  %v310_v42 = vrot.slane %v268_v14, 4  ;;  %v305_v41 = vperm.slane %v301_v33, %v5474_v1 }
 0x334   :  { %v1520_v23 = vpack.c.bf16 %v1512_v21, %v1512_v21  ;;  %2247 = vmatpush.bf16.msra.mxu0 %v4724_v19  ;;  %v270_v21 = vrot.slane %v260_v3, 4  ;;  %v316_v24 = vrot.slane %v269_v15, 4 }
 0x335   :  { %4612 = vmatmul.msk.bf16.vlgmr.msrb.gmra.mxu0 %vm1425_vm2, %v1521_v16  ;;  %v311_v59 = vsel %vm218_vm0, %v310_v42, %v266_v12 }
 0x336   :  { %4611 = vmatmul.msk.bf16.vlgmr.msrb.gmra.mxu3 %vm1425_vm2, %v1520_v23  ;;  %v294_v23 = vrot.slane %v281_v8, 4  ;;  %v271_v40 = vsel %vm218_vm0, %v270_v21, %v258_v10  ;;  %v317_v0 = vsel %vm218_vm0, %v316_v24, %v267_v55  ;;  %v315_v19 = vperm.slane %v311_v59, %v5464_v37 }
 0x337   :  { %2231 = vmatpush.bf16.msra.mxu3 %v4704_v27  ;;  %v275_v61 = vperm.slane %v271_v40, %v5464_v37  ;;  %v321_v9 = vperm.slane %v317_v0, %v5464_v37  ;;  %v306_v27 = vrot.slane %v305_v41, 4 }
 0x338   :  { %2248 = vmatpush.bf16.msra.mxu0 %v4716_v5 }
 0x339   :  { %v295_v11 = vsel %vm218_vm0, %v294_v23, %v275_v61  ;;  %v322_v5 = vrot.slane %v321_v9, 4 }
 0x33a   :  { %v299_v17 = vperm.slane %v295_v11, %v5474_v1 }
 0x33b   :  { %2232 = vmatpush.bf16.msra.mxu3 %v4696_v31  ;;  %v323_v36 = vsel %vm218_vm0, %v322_v5, %v315_v19 }
 0x33c   :  { %2249 = vmatpush.bf16.msra.mxu0 %v4708_v44  ;;  %v307_v46 = vsel %vm218_vm0, %v306_v27, %v299_v17  ;;  %v308_v25 = vrot.slane %v299_v17, 4  ;;  %v327_v31 = vperm.slane %v323_v36, %v5474_v1 }
 0x33d   :  { %v334_v44 = vrot.slane %v307_v46, 4  ;;  %2106 = vst [vmem:[#allocation1] ss:$2 sm:$0xff] %v307_v46 }
 0x33e   :  { %v309_v38 = vsel %vm218_vm0, %v305_v41, %v308_v25  ;;  %2110 = vst [vmem:[#allocation1 + $0x10] ss:$2 sm:$0xff] %v327_v31  ;;  %v328_v53 = vrot.slane %v327_v31, 4 }
 0x33f   :  { %2233 = vmatpush.bf16.msra.mxu3 %v4688_v18  ;;  %2108 = vst [vmem:[#allocation1 + $0x1] ss:$2 sm:$0xff] %v334_v44  ;;  %v335_v58 = vrot.slane %v309_v38, 4 }
 0x340   :  { %2250 = vmatpush.bf16.msra.mxu0 %v4700_v35  ;;  %2112 = vst [vmem:[#allocation1 + $0x11] ss:$2 sm:$0xff] %v309_v38  ;;  %v329_v52 = vsel %vm218_vm0, 0.0, %v328_v53 }
 0x341   :  { %2114 = vst [vmem:[#allocation1 + $0x20] ss:$2 sm:$0xff] %v335_v58 }
 0x342   :  { %2116 = vst [vmem:[#allocation1 + $0x21] ss:$2 sm:$0xff] %v329_v52 }
 0x343   :  { %2234 = vmatpush.bf16.msra.mxu3 %v4680_v6 }
 0x344   :  { %2251 = vmatpush.bf16.msra.mxu0 %v4692_v13 }
 0x346   :  { %v2117_v18 = vld.sshfl [vmem:[#allocation1] sm:$0xff pattern:$0x75316420] }
 0x347   :  { %v2118_v43 = vld.sshfl [vmem:[#allocation1 + $0x10] sm:$0xff pattern:$0x75316420] }
 0x348   :  { %2252 = vmatpush.bf16.msra.mxu0 %v4684_v34  ;;  %v2123_v45 = vpack.c.bf16 %v2118_v43, %v2117_v18 }
 0x349   :  { %v2119_v28 = vld.sshfl [vmem:[#allocation1 + $0x20] sm:$0xff pattern:$0x75316420] }
 0x34a   :  { %2235 = vmatmul.bf16.vlgmr.msra.gmra.mxu3 %v2123_v45  ;;  %v2124_v56 = vpack.c.bf16 %v2119_v28, %v2119_v28 }
 0x34b   :  { %2253 = vmatmul.bf16.vlgmr.msra.gmra.mxu0 %v2123_v45 }
 0x35a   :  { %2240 = vmatmul.bf16.gmra.mxu3 %v2124_v56 }
 0x35b   :  { %2258 = vmatmul.bf16.gmra.mxu0 %v2124_v56 }
 0x387   :  { %v1538_v16 = vpop.f32.mrf.mxu1 }
 0x388   :  { %v1675_v32 = vpack.c.bf16 %v1538_v16, %v1538_v16 }
 0x38a   :  { %v1686_v14 = vshrl.u32 %v1675_v32, 16 }
 0x38f   :  { %v1540_v22 = vpop.f32.mrf.mxu1 }
 0x398   :  { %v1557_v2 = vpop.f32.mrf.mxu2 }
 0x399   :  { %v1676_v62 = vpack.c.bf16 %v1557_v2, %v1557_v2 }
 0x39a   :  { %v1595_v39 = vpop.f32.mrf.mxu0 }
 0x39b   :  { %v1678_v3 = vpack.c.bf16 %v1595_v39, %v1595_v39  ;;  %v1698_v57 = vshrl.u32 %v1676_v62, 16 }
 0x39d   :  { %v1699_v4 = vshrl.u32 %v1678_v3, 16  ;;  %v1697_v35 = vpack.i.b16 %v1678_v3, %v1676_v62 }
 0x39f   :  { %v1700_v20 = vpack.i.b16 %v1699_v4, %v1698_v57  ;;  %v1763_v55 = vperm.slane %v1697_v35, %v5464_v37 }
 0x3a0   :  { %v1559_v47 = vpop.f32.mrf.mxu2 }
 0x3a1   :  { %v1789_v15 = vperm.slane %v1700_v20, %v5464_v37  ;;  %v1771_v24 = vrot.slane %v1763_v55, 4 }
 0x3a2   :  { %v1597_v50 = vpop.f32.mrf.mxu0 }
 0x3a3   :  { %v1614_v54 = vpop.f32.mrf.mxu1  ;;  %v1797_v48 = vrot.slane %v1789_v15, 4 }
 0x3a4   :  { %v1679_v61 = vpack.c.bf16 %v1614_v54, %v1614_v54 }
 0x3a6   :  { %v1692_v38 = vshrl.u32 %v1679_v61, 16 }
 0x3a8   :  { %v1576_v60 = vpop.f32.mrf.mxu3 }
 0x3a9   :  { %v1677_v7 = vpack.c.bf16 %v1576_v60, %v1576_v60 }
 0x3ab   :  { %v1616_v63 = vpop.f32.mrf.mxu1  ;;  %v1687_v51 = vshrl.u32 %v1677_v7, 16  ;;  %v1685_v21 = vpack.i.b16 %v1677_v7, %v1675_v32 }
 0x3ad   :  { %v1688_v40 = vpack.i.b16 %v1687_v51, %v1686_v14  ;;  %v1711_v59 = vperm.slane %v1685_v21, %v5464_v37 }
 0x3af   :  { %v1737_v27 = vperm.slane %v1688_v40, %v5464_v37  ;;  %v1719_v2 = vrot.slane %v1711_v59, 4 }
 0x3b0   :  { %v1578_v8 = vpop.f32.mrf.mxu3  ;;  %v1633_v6 = vpop.f32.mrf.mxu2 }
 0x3b1   :  { %v1680_v10 = vpack.c.bf16 %v1633_v6, %v1633_v6  ;;  %v1745_v53 = vrot.slane %v1737_v27, 4 }
 0x3b2   :  { %v1671_v12 = vpop.f32.mrf.mxu0 }
 0x3b3   :  { %v1682_v13 = vpack.c.bf16 %v1671_v12, %v1671_v12  ;;  %v1704_v23 = vshrl.u32 %v1680_v10, 16 }
 0x3b5   :  { %v1703_v49 = vpack.i.b16 %v1682_v13, %v1680_v10  ;;  %v1705_v42 = vshrl.u32 %v1682_v13, 16 }
 0x3b7   :  { %v1706_v26 = vpack.i.b16 %v1705_v42, %v1704_v23  ;;  %v1768_v16 = vperm.slane %v1703_v49, %v5464_v37 }
 0x3b8   :  { %v1635_v33 = vpop.f32.mrf.mxu2 }
 0x3b9   :  { %v1769_v0 = vrot.slane %v1768_v16, 4  ;;  %v1772_v41 = vsel %vm218_vm0, %v1768_v16, %v1771_v24  ;;  %v1794_v19 = vperm.slane %v1706_v26, %v5464_v37  ;;  %v1652_v9 = vpop.f32.mrf.mxu3 }
 0x3ba   :  { %v1780_v11 = vperm.slane %v1772_v41, %v5474_v1  ;;  %v1681_v34 = vpack.c.bf16 %v1652_v9, %v1652_v9  ;;  %v1673_v17 = vpop.f32.mrf.mxu0 }
 0x3bb   :  { %v1770_v5 = vsel %vm218_vm0, %v1769_v0, %v1763_v55  ;;  %v1795_v46 = vrot.slane %v1794_v19, 4  ;;  %v1798_v25 = vsel %vm218_vm0, %v1794_v19, %v1797_v48 }
 0x3bc   :  { %v1776_v36 = vperm.slane %v1770_v5, %v5474_v1  ;;  %v1783_v22 = vrot.slane %v1780_v11, 4  ;;  %v1806_v31 = vperm.slane %v1798_v25, %v5474_v1  ;;  %v1691_v44 = vpack.i.b16 %v1681_v34, %v1679_v61 }
 0x3bd   :  { %v1796_v18 = vsel %vm218_vm0, %v1795_v46, %v1789_v15  ;;  %v1693_v39 = vshrl.u32 %v1681_v34, 16 }
 0x3be   :  { %v1781_v43 = vrot.slane %v1776_v36, 4  ;;  %v1784_v45 = vsel %vm218_vm0, 0, %v1783_v22  ;;  %v1802_v47 = vperm.slane %v1796_v18, %v5474_v1  ;;  %v1809_v50 = vrot.slane %v1806_v31, 4 }
 0x3bf   :  { %v1854_v58 = vrot.slane %v1784_v45, 4  ;;  %v1694_v54 = vpack.i.b16 %v1693_v39, %v1692_v38  ;;  %v1716_v52 = vperm.slane %v1691_v44, %v5464_v37  ;;  %v1849_v63 = vsel %vm218_vm0, %v1783_v22, %v1776_v36 }
 0x3c0   :  { %v1782_v3 = vsel %vm218_vm0, 0, %v1781_v43  ;;  %v1807_v60 = vrot.slane %v1802_v47, 4  ;;  %v1810_v62 = vsel %vm218_vm0, 0, %v1809_v50  ;;  %v1853_v15 = vperm.slane %v1849_v63, %v5464_v37 }
 0x3c1   :  { %v1855_v4 = vsel %vm218_vm0, %v1854_v58, %v1782_v3  ;;  %v1873_v28 = vrot.slane %v1810_v62, 4  ;;  %v1717_v56 = vrot.slane %v1716_v52, 4  ;;  %v1720_v57 = vsel %vm218_vm0, %v1716_v52, %v1719_v2  ;;  %v1654_v35 = vpop.f32.mrf.mxu3 }
 0x3c2   :  { %v1808_v7 = vsel %vm218_vm0, 0, %v1807_v60  ;;  %v1728_v32 = vperm.slane %v1720_v57, %v5474_v1  ;;  %v1742_v20 = vperm.slane %v1694_v54, %v5464_v37  ;;  %v1859_v8 = vperm.slane %v1855_v4, %v5464_v37 }
 0x3c3   :  { %v1718_v6 = vsel %vm218_vm0, %v1717_v56, %v1711_v59  ;;  %v1874_v10 = vsel %vm218_vm0, %v1873_v28, %v1808_v7  ;;  %v1868_v40 = vsel %vm218_vm0, %v1809_v50, %v1802_v47 }
 0x3c4   :  { %v1724_v12 = vperm.slane %v1718_v6, %v5474_v1  ;;  %v1731_v55 = vrot.slane %v1728_v32, 4  ;;  %v1743_v51 = vrot.slane %v1742_v20, 4  ;;  %v1746_v13 = vsel %vm218_vm0, %v1742_v20, %v1745_v53 }
 0x3c5   :  { %v1754_v14 = vperm.slane %v1746_v13, %v5474_v1  ;;  %v1860_v21 = vrot.slane %v1859_v8, 4  ;;  %v1878_v23 = vperm.slane %v1874_v10, %v5464_v37  ;;  %v1872_v11 = vperm.slane %v1868_v40, %v5464_v37 }
 0x3c6   :  { %v1729_v49 = vrot.slane %v1724_v12, 4  ;;  %v1732_v42 = vsel %vm218_vm0, 0, %v1731_v55  ;;  %v1744_v24 = vsel %vm218_vm0, %v1743_v51, %v1737_v27  ;;  %v1811_v33 = vsel %vm218_vm0, %v1731_v55, %v1724_v12 }
 0x3c7   :  { %v1750_v26 = vperm.slane %v1744_v24, %v5474_v1  ;;  %v1757_v16 = vrot.slane %v1754_v14, 4  ;;  %v1816_v48 = vrot.slane %v1732_v42, 4  ;;  %v1861_v59 = vsel %vm218_vm0, %v1860_v21, %v1853_v15 }
 0x3c8   :  { %v1730_v61 = vsel %vm218_vm0, 0, %v1729_v49  ;;  %v1879_v0 = vrot.slane %v1878_v23, 4  ;;  %v1865_v27 = vperm.slane %v1861_v59, %v5474_v1  ;;  %v1815_v46 = vperm.slane %v1811_v33, %v5464_v37  ;;  %v4888_v33 = vld [vmem:[#allocation10 + $0x38] sm:$0xff]  ;;  %v4887_v59 = vld [vmem:[#allocation10 + $0x30] sm:$0xff] }
 0x3c9   :  { %v1755_v41 = vrot.slane %v1750_v26, 4  ;;  %v1758_v19 = vsel %vm218_vm0, 0, %v1757_v16  ;;  %v1817_v9 = vsel %vm218_vm0, %v1816_v48, %v1730_v61  ;;  %v1830_v22 = vsel %vm218_vm0, %v1757_v16, %v1750_v26  ;;  %2007 = vmatpush.bf16.msra.mxu1 %v4888_v33 }
 0x3ca   :  { %v1835_v34 = vrot.slane %v1758_v19, 4  ;;  %v1821_v17 = vperm.slane %v1817_v9, %v5464_v37  ;;  %v1880_v25 = vsel %vm218_vm0, %v1879_v0, %v1872_v11  ;;  %v1866_v18 = vrot.slane %v1865_v27, 4  ;;  %v2141_v0 = vld [vmem:[%s6618_s9] sm:$0x3]  ;;  %v2254_v19 = vpop.f32.mrf.mxu0 }
 0x3cb   :  { %v1756_v5 = vsel %vm218_vm0, 0, %v1755_v41  ;;  %v1884_v44 = vperm.slane %v1880_v25, %v5474_v1  ;;  %v1834_v47 = vperm.slane %v1830_v22, %v5464_v37  ;;  %v1902_v60 = vshrl.u32 %v1865_v27, 16  ;;  %v4886_v41 = vld [vmem:[#allocation10 + $0x28] sm:$0xff]  ;;  %v4883_v22 = vld [vmem:[#allocation10 + $0x10] sm:$0xff] }
 0x3cc   :  { %v1822_v36 = vrot.slane %v1821_v17, 4  ;;  %v1836_v31 = vsel %vm218_vm0, %v1835_v34, %v1756_v5  ;;  %v1867_v62 = vsel %vm218_vm0, 0, %v1866_v18  ;;  %v2144_v9 = vperm.slane %v2141_v0, 1  ;;  %v4885_v34 = vld [vmem:[#allocation10 + $0x20] sm:$0xff] }
 0x3cd   :  { %v1840_v38 = vperm.slane %v1836_v31, %v5464_v37  ;;  %v1885_v39 = vrot.slane %v1884_v44, 4  ;;  %v1901_v43 = vpack.i.b16 %v1884_v44, %v1865_v27  ;;  %v1903_v53 = vshrl.u32 %v1884_v44, 16  ;;  %2008 = vmatpush.bf16.msra.mxu1 %v4887_v59  ;;  %v2236_v27 = vpop.f32.mrf.mxu3 }
 0x3ce   :  { %v1823_v2 = vsel %vm218_vm0, %v1822_v36, %v1815_v46  ;;  %v1908_v32 = vshrl.u32 %v1867_v62, 16  ;;  %v2143_v11 = vperm.slane %v2141_v0, 0  ;;  %v2255_v17 = vadd.f32 %v2254_v19, %v2144_v9  ;;  %v4884_v46 = vld [vmem:[#allocation10 + $0x18] sm:$0xff] }
 0x3cf   :  { %v1827_v45 = vperm.slane %v1823_v2, %v5474_v1  ;;  %v1841_v50 = vrot.slane %v1840_v38, 4  ;;  %v1886_v58 = vsel %vm218_vm0, 0, %v1885_v39  ;;  %v1904_v57 = vpack.i.b16 %v1903_v53, %v1902_v60  ;;  %v4882_v2 = vld [vmem:[#allocation10 + $0x8] sm:$0xff] }
 0x3d0   :  { %v1909_v4 = vshrl.u32 %v1886_v58, 16  ;;  %v1907_v7 = vpack.i.b16 %v1886_v58, %v1867_v62  ;;  %v5963_v12 = vunpack.c.l.b16 %v1901_v43  ;;  %v2237_v5 = vadd.f32 %v2236_v27, %v2143_v11  ;;  %v4881_v43 = vld [vmem:[#allocation10] sm:$0xff] }
 0x3d1   :  { %v1842_v54 = vsel %vm218_vm0, %v1841_v50, %v1834_v47  ;;  %v1828_v52 = vrot.slane %v1827_v45, 4  ;;  %v1890_v28 = vshrl.u32 %v1827_v45, 16  ;;  %v1915_v21 = vunpack.c.l.b16 %v1904_v57  ;;  %2009 = vmatpush.bf16.msra.mxu1 %v4886_v41 }
 0x3d2   :  { %v1846_v3 = vperm.slane %v1842_v54, %v5474_v1  ;;  %v1910_v13 = vpack.i.b16 %v1909_v4, %v1908_v32  ;;  %v1920_v49 = vunpack.c.l.b16 %v1907_v7  ;;  %v5975_v25 = vpack.c.bf16 %v2255_v17, %v2237_v5  ;;  %v2256_v36 = vpop.f32.mrf.mxu0 }
 0x3d3   :  { %v1829_v63 = vsel %vm218_vm0, 0, %v1828_v52  ;;  %v2257_v31 = vadd.f32 %v2256_v36, %v2144_v9 }
 0x3d4   :  { %v1891_v56 = vshrl.u32 %v1846_v3, 16  ;;  %v1847_v35 = vrot.slane %v1846_v3, 4  ;;  %v1889_v20 = vpack.i.b16 %v1846_v3, %v1827_v45  ;;  %v1896_v10 = vshrl.u32 %v1829_v63, 16 }
 0x3d5   :  { %v1925_v48 = vunpack.c.l.b16 %v1910_v13  ;;  %2010 = vmatpush.bf16.msra.mxu1 %v4885_v34  ;;  %v2238_v44 = vpop.f32.mrf.mxu3 }
 0x3d6   :  { %v1892_v8 = vpack.i.b16 %v1891_v56, %v1890_v28  ;;  %v1848_v6 = vsel %vm218_vm0, 0, %v1847_v35  ;;  %v5965_v14 = vunpack.c.l.b16 %v1889_v20  ;;  %v2239_v38 = vadd.f32 %v2238_v44, %v2143_v11 }
 0x3d7   :  { %v1895_v55 = vpack.i.b16 %v1848_v6, %v1829_v63  ;;  %v1897_v51 = vshrl.u32 %v1848_v6, 16  ;;  %v2534_v56 = vshrl.u32 %v5975_v25, 16  ;;  %v2959_v20 = vrot.slane %v5975_v25, 4 }
 0x3d8   :  { %v1914_v15 = vunpack.c.l.b16 %v1892_v8  ;;  %v1913_v24 = vpack.c.b16 %v5963_v12, %v5965_v14  ;;  %v5981_v18 = vpack.c.bf16 %v2257_v31, %v2239_v38 }
 0x3d9   :  { %v1919_v23 = vunpack.c.l.b16 %v1895_v55  ;;  %v1898_v42 = vpack.i.b16 %v1897_v51, %v1896_v10  ;;  %2011 = vmatpush.bf16.msra.mxu1 %v4884_v46 }
 0x3da   :  { %v1916_v40 = vpack.c.b16 %v1915_v21, %v1914_v15  ;;  %v2259_v39 = vpop.f32.mrf.mxu0  ;;  %v2974_v21 = vshrl.u32 %v2959_v20, 16 }
 0x3db   :  { %v1921_v26 = vpack.c.b16 %v1920_v49, %v1919_v23  ;;  %v1924_v16 = vunpack.c.l.b16 %v1898_v42  ;;  %v2260_v45 = vadd.f32 %v2259_v39, %v2144_v9 }
 0x3dc   :  { %1917 = vrot.lane.b32.xlu2 %v1916_v40, %s5307_s29 }
 0x3dd   :  { %1922 = vrot.lane.b32.xlu1 %v1921_v26, %s5311_s26  ;;  %v1926_v61 = vpack.c.b16 %v1925_v48, %v1924_v16  ;;  %2012 = vmatpush.bf16.msra.mxu1 %v4883_v22  ;;  %v2241_v47 = vpop.f32.mrf.mxu3 }
 0x3de   :  { %v2242_v50 = vadd.f32 %v2241_v47, %v2143_v11 }
 0x3df   :  { %1927 = vrot.lane.b32.xlu0 %v1926_v61, %s5326_s12 }
 0x3e0   :  { %v5991_v58 = vpack.c.bf16 %v2260_v45, %v2242_v50 }
 0x3e1   :  { %2013 = vmatpush.bf16.msra.mxu1 %v4882_v2 }
 0x3e2   :  { %v2261_v53 = vpop.f32.mrf.mxu0 }
 0x3e4   :  { %2513 = vrot.lane.b32.xlu2 %v5975_v25, %s5326_s12 }
 0x3e5   :  { %2519 = vrot.lane.b32.xlu1 %v5975_v25, %s5311_s26  ;;  %2014 = vmatpush.bf16.msra.mxu1 %v4881_v43  ;;  %v2243_v54 = vpop.f32.mrf.mxu3 }
 0x3e7   :  { %2515 = vrot.lane.b32.xlu0 %v5981_v18, %s5326_s12 }
 0x3ec   :  { %2525 = vrot.lane.b32.xlu2 %v5975_v25, %s5307_s29 }
 0x3ed   :  { %2527 = vrot.lane.b32.xlu1 %v5981_v18, %s5307_s29 }
 0x3ef   :  { %2521 = vrot.lane.b32.xlu0 %v5981_v18, %s5311_s26 }
 0x3f4   :  { %2517 = vrot.lane.b32.xlu2 %v5991_v58, %s5326_s12 }
 0x3f5   :  { %2529 = vrot.lane.b32.xlu1 %v5991_v58, %s5307_s29 }
 0x3f7   :  { %2523 = vrot.lane.b32.xlu0 %v5991_v58, %s5311_s26 }
 0x436   :  { %v1918_v52 = vpop.permute.xlu2 %1917 }
 0x437   :  { %v1931_v3 = vsel %vm1272_vm1, %v1913_v24, %v1918_v52 }
 0x43e   :  { %v2514_v28 = vpop.permute.xlu2 %2513 }
 0x43f   :  { %v2535_v57 = vshrl.u32 %v2514_v28, 16  ;;  %v2533_v35 = vpack.i.b16 %v2514_v28, %v5975_v25  ;;  %v2962_v10 = vrot.slane %v2514_v28, 4  ;;  %v2546_v28 = vshrl.u32 %v5981_v18, 16 }
 0x441   :  { %v2536_v7 = vpack.i.b16 %v2535_v57, %v2534_v56  ;;  %v2571_v32 = vperm.slane %v2533_v35, %v5464_v37  ;;  %v2975_v49 = vshrl.u32 %v2962_v10, 16  ;;  %v2973_v33 = vpack.i.b16 %v2962_v10, %v2959_v20 }
 0x443   :  { %v2597_v6 = vperm.slane %v2536_v7, %v5464_v37  ;;  %v2579_v51 = vrot.slane %v2571_v32, 4  ;;  %v2976_v19 = vpack.i.b16 %v2975_v49, %v2974_v21  ;;  %v3011_v36 = vperm.slane %v2973_v33, %v5464_v37 }
 0x445   :  { %v2605_v23 = vrot.slane %v2597_v6, 4  ;;  %v3037_v38 = vperm.slane %v2976_v19, %v5464_v37  ;;  %v3019_v47 = vrot.slane %v3011_v36, 4 }
 0x446   :  { %v2526_v8 = vpop.permute.xlu2 %2525 }
 0x447   :  { %v2541_v12 = vshrl.u32 %v2526_v8, 16  ;;  %v2968_v26 = vrot.slane %v2526_v8, 4  ;;  %v3045_v52 = vrot.slane %v3037_v38, 4 }
 0x449   :  { %v2981_v41 = vshrl.u32 %v2968_v26, 16 }
 0x44f   :  { %v1923_v60 = vpop.permute.xlu1 %1922 }
 0x450   :  { %v1934_v62 = vsel %vm1932_vm4, %v1931_v3, %v1923_v60 }
 0x451   :  { %v1928_v63 = vpop.permute.xlu0 %1927 }
 0x452   :  { %v1937_v4 = vsel %vm1935_vm5, %v1934_v62, %v1928_v63 }
 0x453   :  { %2015 = vmatmul.bf16.vlgmr.msra.gmra.mxu1 %v1937_v4 }
 0x457   :  { %v2520_v55 = vpop.permute.xlu1 %2519 }
 0x458   :  { %v2540_v13 = vshrl.u32 %v2520_v55, 16  ;;  %v2965_v14 = vrot.slane %v2520_v55, 4  ;;  %v2539_v15 = vpack.i.b16 %v2526_v8, %v2520_v55 }
 0x45a   :  { %v2542_v42 = vpack.i.b16 %v2541_v12, %v2540_v13  ;;  %v2576_v24 = vperm.slane %v2539_v15, %v5464_v37  ;;  %v2980_v40 = vshrl.u32 %v2965_v14, 16  ;;  %v2979_v0 = vpack.i.b16 %v2968_v26, %v2965_v14 }
 0x45c   :  { %v2577_v16 = vrot.slane %v2576_v24, 4  ;;  %v2580_v48 = vsel %vm218_vm0, %v2576_v24, %v2579_v51  ;;  %v2602_v61 = vperm.slane %v2542_v42, %v5464_v37  ;;  %v2982_v46 = vpack.i.b16 %v2981_v41, %v2980_v40 }
 0x45d   :  { %v2588_v59 = vperm.slane %v2580_v48, %v5474_v1  ;;  %v3016_v63 = vperm.slane %v2979_v0, %v5464_v37 }
 0x45e   :  { %v2578_v9 = vsel %vm218_vm0, %v2577_v16, %v2571_v32  ;;  %v2603_v11 = vrot.slane %v2602_v61, 4  ;;  %v2606_v34 = vsel %vm218_vm0, %v2602_v61, %v2605_v23  ;;  %v3042_v4 = vperm.slane %v2982_v46, %v5464_v37 }
 0x45f   :  { %v2584_v17 = vperm.slane %v2578_v9, %v5474_v1  ;;  %v2591_v27 = vrot.slane %v2588_v59, 4  ;;  %v2614_v5 = vperm.slane %v2606_v34, %v5474_v1  ;;  %v3017_v32 = vrot.slane %v3016_v63, 4 }
 0x460   :  { %v2604_v25 = vsel %vm218_vm0, %v2603_v11, %v2597_v6  ;;  %v3020_v20 = vsel %vm218_vm0, %v3016_v63, %v3019_v47  ;;  %v3043_v8 = vrot.slane %v3042_v4, 4  ;;  %v6034_v6 = vpop.permute.xlu0 %2515  ;;  %v3046_v51 = vsel %vm218_vm0, %v3042_v4, %v3045_v52  ;;  %v6071_v4 = vpop.permute.xlu1 %2527 }
 0x461   :  { %v2589_v22 = vrot.slane %v2584_v17, 4  ;;  %v2610_v31 = vperm.slane %v2604_v25, %v5474_v1  ;;  %v2617_v44 = vrot.slane %v2614_v5, 4  ;;  %v2592_v2 = vsel %vm218_vm0, 0, %v2591_v27 }
 0x462   :  { %v2723_v50 = vsel %vm218_vm0, %v2591_v27, %v2584_v17  ;;  %v2728_v53 = vrot.slane %v2592_v2, 4  ;;  %v3028_v55 = vperm.slane %v3020_v20, %v5474_v1  ;;  %v2545_v13 = vpack.i.b16 %v6034_v6, %v5981_v18 }
 0x463   :  { %v2615_v39 = vrot.slane %v2610_v31, 4  ;;  %v2590_v43 = vsel %vm218_vm0, 0, %v2589_v22  ;;  %v2618_v45 = vsel %vm218_vm0, 0, %v2617_v44  ;;  %v2742_v54 = vsel %vm218_vm0, %v2617_v44, %v2610_v31 }
 0x464   :  { %v2729_v60 = vsel %vm218_vm0, %v2728_v53, %v2590_v43  ;;  %v2747_v62 = vrot.slane %v2618_v45, 4  ;;  %v2727_v56 = vperm.slane %v2723_v50, %v5464_v37  ;;  %v2746_v35 = vperm.slane %v2742_v54, %v5464_v37 }
 0x465   :  { %v2616_v3 = vsel %vm218_vm0, 0, %v2615_v39  ;;  %v2733_v57 = vperm.slane %v2729_v60, %v5464_v37  ;;  %v3018_v14 = vsel %vm218_vm0, %v3017_v32, %v3011_v36  ;;  %v3044_v15 = vsel %vm218_vm0, %v3043_v8, %v3037_v38 }
 0x466   :  { %v2748_v7 = vsel %vm218_vm0, %v2747_v62, %v2616_v3  ;;  %v3054_v21 = vperm.slane %v3046_v51, %v5474_v1  ;;  %v3024_v42 = vperm.slane %v3018_v14, %v5474_v1  ;;  %v3031_v24 = vrot.slane %v3028_v55, 4 }
 0x467   :  { %v2734_v10 = vrot.slane %v2733_v57, 4  ;;  %v2752_v12 = vperm.slane %v2748_v7, %v5464_v37  ;;  %v2547_v40 = vshrl.u32 %v6034_v6, 16  ;;  %v3050_v16 = vperm.slane %v3044_v15, %v5474_v1 }
 0x468   :  { %v3057_v48 = vrot.slane %v3054_v21, 4  ;;  %v3029_v33 = vrot.slane %v3024_v42, 4  ;;  %v3032_v59 = vsel %vm218_vm0, 0, %v3031_v24  ;;  %v3163_v0 = vsel %vm218_vm0, %v3031_v24, %v3024_v42  ;;  %v6069_v63 = vpop.permute.xlu0 %2521 }
 0x469   :  { %v2735_v23 = vsel %vm218_vm0, %v2734_v10, %v2727_v56  ;;  %v2753_v49 = vrot.slane %v2752_v12, 4  ;;  %v3055_v11 = vrot.slane %v3050_v16, 4  ;;  %v3167_v27 = vperm.slane %v3163_v0, %v5464_v37 }
 0x46a   :  { %v2739_v26 = vperm.slane %v2735_v23, %v5474_v1  ;;  %v3030_v34 = vsel %vm218_vm0, 0, %v3029_v33  ;;  %v3058_v17 = vsel %vm218_vm0, 0, %v3057_v48  ;;  %v3168_v5 = vrot.slane %v3032_v59, 4 }
 0x46b   :  { %v2754_v61 = vsel %vm218_vm0, %v2753_v49, %v2746_v35  ;;  %v3056_v44 = vsel %vm218_vm0, 0, %v3055_v11  ;;  %v3182_v2 = vsel %vm218_vm0, %v3057_v48, %v3050_v16  ;;  %v2623_v50 = vperm.slane %v2545_v13, %v5464_v37 }
 0x46c   :  { %v2740_v41 = vrot.slane %v2739_v26, 4  ;;  %v2758_v19 = vperm.slane %v2754_v61, %v5474_v1  ;;  %v2840_v9 = vshrl.u32 %v2739_v26, 16  ;;  %v3169_v38 = vsel %vm218_vm0, %v3168_v5, %v3030_v34 }
 0x46d   :  { %v3173_v47 = vperm.slane %v3169_v38, %v5464_v37  ;;  %v3187_v52 = vrot.slane %v3058_v17, 4  ;;  %v2551_v7 = vpack.i.b16 %v6071_v4, %v6069_v63  ;;  %v2548_v32 = vpack.i.b16 %v2547_v40, %v2546_v28 }
 0x46e   :  { %v2741_v46 = vsel %vm218_vm0, 0, %v2740_v41  ;;  %v2759_v25 = vrot.slane %v2758_v19, 4  ;;  %v2839_v36 = vpack.i.b16 %v2758_v19, %v2739_v26  ;;  %v2841_v22 = vshrl.u32 %v2758_v19, 16 }
 0x46f   :  { %v2846_v31 = vshrl.u32 %v2741_v46, 16  ;;  %v3174_v62 = vrot.slane %v3173_v47, 4  ;;  %v3188_v35 = vsel %vm218_vm0, %v3187_v52, %v3056_v44  ;;  %v3186_v8 = vperm.slane %v3182_v2, %v5464_v37 }
 0x470   :  { %v2760_v39 = vsel %vm218_vm0, 0, %v2759_v25  ;;  %v6061_v43 = vpack.i.b16 %v2841_v22, %v2840_v9  ;;  %v2873_v45 = vrot.slane %v2839_v36, 2  ;;  %v3192_v10 = vperm.slane %v3188_v35, %v5464_v37 }
 0x471   :  { %v6065_v53 = vpack.i.b16 %v2760_v39, %v2741_v46  ;;  %v2847_v54 = vshrl.u32 %v2760_v39, 16  ;;  %v3175_v20 = vsel %vm218_vm0, %v3174_v62, %v3167_v27  ;;  %v2960_v12 = vrot.slane %v5981_v18, 4 }
 0x472   :  { %v2888_v3 = vsel %vm2885_vm6, %v2839_v36, %v2873_v45  ;;  %v2890_v60 = vsel %vm2889_vm7, %v2839_v36, %v2873_v45  ;;  %v2631_v55 = vrot.slane %v2623_v50, 4  ;;  %v2552_v51 = vshrl.u32 %v6069_v63, 16 }
 0x473   :  { %v6073_v56 = vpack.i.b16 %v2847_v54, %v2846_v31  ;;  %v2892_v57 = vrot.slane %v2890_v60, 2  ;;  %3397 = vst [vmem:[#allocation1] ss:$4 sm:$0xff] %v2888_v3  ;;  %v2963_v13 = vrot.slane %v6034_v6, 4  ;;  %v3179_v14 = vperm.slane %v3175_v20, %v5474_v1 }
 0x474   :  { %v3193_v15 = vrot.slane %v3192_v10, 4  ;;  %v2553_v21 = vshrl.u32 %v6071_v4, 16  ;;  %v2628_v28 = vperm.slane %v2551_v7, %v5464_v37  ;;  %v2649_v23 = vperm.slane %v2548_v32, %v5464_v37 }
 0x475   :  { %3400 = vst [vmem:[#allocation1 + $0x1] ss:$4 sm:$0xff] %v2892_v57  ;;  %v3180_v49 = vrot.slane %v3179_v14, 4  ;;  %v3280_v24 = vshrl.u32 %v3179_v14, 16  ;;  %v2986_v6 = vshrl.u32 %v2960_v12, 16  ;;  %v2985_v48 = vpack.i.b16 %v2963_v13, %v2960_v12 }
 0x476   :  { %v3194_v42 = vsel %vm218_vm0, %v3193_v15, %v3186_v8  ;;  %v2554_v40 = vpack.i.b16 %v2553_v21, %v2552_v51  ;;  %v2629_v26 = vrot.slane %v2628_v28, 4  ;;  %v2632_v16 = vsel %vm218_vm0, %v2628_v28, %v2631_v55 }
 0x477   :  { %v3198_v18 = vperm.slane %v3194_v42, %v5474_v1  ;;  %v2987_v61 = vshrl.u32 %v2963_v13, 16  ;;  %v2640_v33 = vperm.slane %v2632_v16, %v5474_v1  ;;  %v3181_v59 = vsel %vm218_vm0, 0, %v3180_v49 }
 0x478   :  { %v2657_v9 = vrot.slane %v2649_v23, 4  ;;  %v3286_v11 = vshrl.u32 %v3181_v59, 16  ;;  %v2630_v34 = vsel %vm218_vm0, %v2629_v26, %v2623_v50  ;;  %v2654_v17 = vperm.slane %v2554_v40, %v5464_v37 }
 0x479   :  { %v3199_v0 = vrot.slane %v3198_v18, 4  ;;  %v6095_v41 = vpack.i.b16 %v3198_v18, %v3179_v14  ;;  %v3281_v19 = vshrl.u32 %v3198_v18, 16  ;;  %v2636_v46 = vperm.slane %v2630_v34, %v5474_v1 }
 0x47a   :  { %v2643_v25 = vrot.slane %v2640_v33, 4  ;;  %v2988_v36 = vpack.i.b16 %v2987_v61, %v2986_v6  ;;  %v2655_v44 = vrot.slane %v2654_v17, 4  ;;  %v2966_v39 = vrot.slane %v6069_v63, 4 }
 0x47b   :  { %v3200_v27 = vsel %vm218_vm0, 0, %v3199_v0  ;;  %v6100_v5 = vpack.i.b16 %v3281_v19, %v3280_v24  ;;  %v2641_v38 = vrot.slane %v2636_v46, 4  ;;  %v2658_v50 = vsel %vm218_vm0, %v2654_v17, %v2657_v9 }
 0x47c   :  { %v6103_v22 = vpack.i.b16 %v3200_v27, %v3181_v59  ;;  %v3287_v31 = vshrl.u32 %v3200_v27, 16  ;;  %v2656_v45 = vsel %vm218_vm0, %v2655_v44, %v2649_v23  ;;  %v2644_v47 = vsel %vm218_vm0, 0, %v2643_v25 }
 0x47d   :  { %v3063_v54 = vperm.slane %v2985_v48, %v5464_v37  ;;  %v3089_v52 = vperm.slane %v2988_v36, %v5464_v37  ;;  %v2969_v3 = vrot.slane %v6071_v4, 4  ;;  %v2642_v60 = vsel %vm218_vm0, 0, %v2641_v38 }
 0x47e   :  { %v6105_v2 = vpack.i.b16 %v3287_v31, %v3286_v11  ;;  %v2662_v62 = vperm.slane %v2656_v45, %v5474_v1  ;;  %v2666_v57 = vperm.slane %v2658_v50, %v5474_v1  ;;  %v2992_v35 = vshrl.u32 %v2966_v39, 16 }
 0x47f   :  { %v2761_v63 = vsel %vm218_vm0, %v2643_v25, %v2636_v46  ;;  %v2766_v7 = vrot.slane %v2644_v47, 4  ;;  %v2991_v8 = vpack.i.b16 %v2969_v3, %v2966_v39  ;;  %v3071_v10 = vrot.slane %v3063_v54, 4 }
 0x480   :  { %v2667_v32 = vrot.slane %v2662_v62, 4  ;;  %v2669_v20 = vrot.slane %v2666_v57, 4  ;;  %v3097_v12 = vrot.slane %v3089_v52, 4  ;;  %v2993_v51 = vshrl.u32 %v2969_v3, 16 }
 0x481   :  { %v2767_v55 = vsel %vm218_vm0, %v2766_v7, %v2642_v60  ;;  %v2765_v14 = vperm.slane %v2761_v63, %v5464_v37  ;;  %v3068_v49 = vperm.slane %v2991_v8, %v5464_v37 }
 0x482   :  { %v2668_v4 = vsel %vm218_vm0, 0, %v2667_v32  ;;  %v2670_v13 = vsel %vm218_vm0, 0, %v2669_v20  ;;  %v2771_v15 = vperm.slane %v2767_v55, %v5464_v37  ;;  %v2780_v21 = vsel %vm218_vm0, %v2669_v20, %v2662_v62  ;;  %v4896_v32 = vld [vmem:[#allocation11 + $0x38] sm:$0xff] }
 0x483   :  { %v2785_v28 = vrot.slane %v2670_v13, 4  ;;  %v2994_v23 = vpack.i.b16 %v2993_v51, %v2992_v35  ;;  %v3069_v18 = vrot.slane %v3068_v49, 4  ;;  %v3072_v40 = vsel %vm218_vm0, %v3068_v49, %v3071_v10  ;;  %2092 = vmatpush.bf16.msrb.mxu2 %v4896_v32 }
 0x484   :  { %v2772_v42 = vrot.slane %v2771_v15, 4  ;;  %v2784_v6 = vperm.slane %v2780_v21, %v5464_v37  ;;  %v3080_v61 = vperm.slane %v3072_v40, %v5474_v1 }
 0x485   :  { %v2786_v24 = vsel %vm218_vm0, %v2785_v28, %v2668_v4  ;;  %v3094_v26 = vperm.slane %v2994_v23, %v5464_v37  ;;  %v3070_v59 = vsel %vm218_vm0, %v3069_v18, %v3063_v54  ;;  %v6161_v4 = vpop.permute.xlu2 %2517  ;;  %v2558_v23 = vshrl.u32 %v5991_v58, 16 }
 0x486   :  { %v2773_v16 = vsel %vm218_vm0, %v2772_v42, %v2765_v14  ;;  %v2790_v48 = vperm.slane %v2786_v24, %v5464_v37  ;;  %v3076_v11 = vperm.slane %v3070_v59, %v5474_v1  ;;  %v3083_v34 = vrot.slane %v3080_v61, 4  ;;  %v4895_v42 = vld [vmem:[#allocation11 + $0x30] sm:$0xff] }
 0x487   :  { %v6133_v33 = vperm.slane %v2773_v16, %v5474_v1  ;;  %v3095_v0 = vrot.slane %v3094_v26, 4  ;;  %v3098_v19 = vsel %vm218_vm0, %v3094_v26, %v3097_v12  ;;  %v2557_v49 = vpack.i.b16 %v6161_v4, %v5991_v58  ;;  %v6175_v16 = vpop.permute.xlu0 %2523  ;;  %2093 = vmatpush.bf16.msrb.mxu2 %v4895_v42 }
 0x488   :  { %v2791_v9 = vrot.slane %v2790_v48, 4  ;;  %v3106_v17 = vperm.slane %v3098_v19, %v5474_v1  ;;  %v3081_v36 = vrot.slane %v3076_v11, 4  ;;  %v3084_v31 = vsel %vm218_vm0, 0, %v3083_v34  ;;  %v4894_v19 = vld [vmem:[#allocation11 + $0x28] sm:$0xff] }
 0x489   :  { %v2778_v27 = vrot.slane %v6133_v33, 4  ;;  %v3096_v46 = vsel %vm218_vm0, %v3095_v0, %v3089_v52  ;;  %v3201_v47 = vsel %vm218_vm0, %v3083_v34, %v3076_v11  ;;  %v3206_v35 = vrot.slane %v3084_v31, 4  ;;  %v6179_v0 = vpop.permute.xlu1 %2529 }
 0x48a   :  { %v2792_v25 = vsel %vm218_vm0, %v2791_v9, %v2784_v6  ;;  %v3102_v44 = vperm.slane %v3096_v46, %v5474_v1  ;;  %v3109_v45 = vrot.slane %v3106_v17, 4  ;;  %v3082_v60 = vsel %vm218_vm0, 0, %v3081_v36 }
 0x48b   :  { %v2779_v38 = vsel %vm218_vm0, 0, %v2778_v27  ;;  %v6146_v39 = vperm.slane %v2792_v25, %v5474_v1  ;;  %v3207_v55 = vsel %vm218_vm0, %v3206_v35, %v3082_v60  ;;  %v3205_v14 = vperm.slane %v3201_v47, %v5464_v37  ;;  %2094 = vmatpush.bf16.msrb.mxu2 %v4894_v19 }
 0x48c   :  { %v2858_v50 = vshrl.u32 %v2779_v38, 16  ;;  %v3107_v54 = vrot.slane %v3102_v44, 4  ;;  %v3110_v62 = vsel %vm218_vm0, 0, %v3109_v45  ;;  %v3220_v63 = vsel %vm218_vm0, %v3109_v45, %v3102_v44 }
 0x48d   :  { %v2797_v3 = vrot.slane %v6146_v39, 4  ;;  %v2851_v52 = vpack.i.b16 %v6146_v39, %v6133_v33  ;;  %v3225_v7 = vrot.slane %v3110_v62, 4  ;;  %v3211_v15 = vperm.slane %v3207_v55, %v5464_v37 }
 0x48e   :  { %v3108_v57 = vsel %vm218_vm0, 0, %v3107_v54  ;;  %v3224_v40 = vperm.slane %v3220_v63, %v5464_v37  ;;  %v2559_v26 = vshrl.u32 %v6161_v4, 16  ;;  %v2675_v34 = vperm.slane %v2557_v49, %v5464_v37  ;;  %v4893_v54 = vld [vmem:[#allocation11 + $0x20] sm:$0xff] }
 0x48f   :  { %v2798_v20 = vsel %vm218_vm0, 0, %v2797_v3  ;;  %v2874_v8 = vrot.slane %v2851_v52, 2  ;;  %v3226_v51 = vsel %vm218_vm0, %v3225_v7, %v3108_v57  ;;  %v3212_v18 = vrot.slane %v3211_v15, 4  ;;  %2095 = vmatpush.bf16.msrb.mxu2 %v4893_v54 }
 0x490   :  { %v6157_v10 = vpack.i.b16 %v2798_v20, %v2779_v38  ;;  %v2859_v12 = vshrl.u32 %v2798_v20, 16  ;;  %v3230_v28 = vperm.slane %v3226_v51, %v5464_v37  ;;  %v2560_v11 = vpack.i.b16 %v2559_v26, %v2558_v23 }
 0x491   :  { %v2895_v13 = vsel %vm2885_vm6, %v2851_v52, %v2874_v8  ;;  %v2896_v24 = vsel %vm2889_vm7, %v2851_v52, %v2874_v8  ;;  %v3213_v6 = vsel %vm218_vm0, %v3212_v18, %v3205_v14  ;;  %v2564_v17 = vshrl.u32 %v6175_v16, 16 }
 0x492   :  { %v6166_v21 = vpack.i.b16 %v2859_v12, %v2858_v50  ;;  %3402 = vst [vmem:[#allocation1 + $0x2] ss:$4 sm:$0xff] %v2895_v13  ;;  %v3231_v48 = vrot.slane %v3230_v28, 4  ;;  %v2898_v61 = vrot.slane %v2896_v24, 2  ;;  %v3217_v59 = vperm.slane %v3213_v6, %v5474_v1  ;;  %v4892_v12 = vld [vmem:[#allocation11 + $0x18] sm:$0xff]  ;;  %v4891_v24 = vld [vmem:[#allocation11 + $0x10] sm:$0xff] }
 0x493   :  { %v2563_v31 = vpack.i.b16 %v6179_v0, %v6175_v16  ;;  %v2565_v44 = vshrl.u32 %v6179_v0, 16  ;;  %v2683_v52 = vrot.slane %v2675_v34, 4  ;;  %v2701_v60 = vperm.slane %v2560_v11, %v5464_v37  ;;  %2096 = vmatpush.bf16.msrb.mxu2 %v4892_v12  ;;  %v4890_v11 = vld [vmem:[#allocation11 + $0x8] sm:$0xff] }
 0x494   :  { %v3232_v9 = vsel %vm218_vm0, %v3231_v48, %v3224_v40  ;;  %v3218_v27 = vrot.slane %v3217_v59, 4  ;;  %v3292_v25 = vshrl.u32 %v3217_v59, 16 }
 0x495   :  { %v3236_v46 = vperm.slane %v3232_v9, %v5474_v1  ;;  %v2566_v62 = vpack.i.b16 %v2565_v44, %v2564_v17  ;;  %v2680_v63 = vperm.slane %v2563_v31, %v5464_v37  ;;  %v2709_v51 = vrot.slane %v2701_v60, 4 }
 0x496   :  { %v3219_v38 = vsel %vm218_vm0, 0, %v3218_v27 }
 0x497   :  { %v3237_v45 = vrot.slane %v3236_v46, 4  ;;  %v6191_v47 = vpack.i.b16 %v3236_v46, %v3217_v59  ;;  %v3293_v50 = vshrl.u32 %v3236_v46, 16  ;;  %v3298_v3 = vshrl.u32 %v3219_v38, 16  ;;  %2097 = vmatpush.bf16.msrb.mxu2 %v4891_v24 }
 0x498   :  { %v2681_v20 = vrot.slane %v2680_v63, 4  ;;  %v2706_v8 = vperm.slane %v2566_v62, %v5464_v37  ;;  %v2684_v13 = vsel %vm218_vm0, %v2680_v63, %v2683_v52  ;;  %v4889_v52 = vld [vmem:[#allocation11] sm:$0xff] }
 0x499   :  { %v6185_v36 = vld.sshfl [vmem:[#allocation1] sm:$0xff pattern:$0x73625140]  ;;  %v3238_v57 = vsel %vm218_vm0, 0, %v3237_v45  ;;  %v6195_v35 = vpack.i.b16 %v3293_v50, %v3292_v25  ;;  %v2692_v15 = vperm.slane %v2684_v13, %v5474_v1 }
 0x49a   :  { %3423 = vst [vmem:[#allocation1] ss:$4 sm:$0xff] %v2898_v61  ;;  %v6198_v7 = vpack.i.b16 %v3238_v57, %v3219_v38  ;;  %v3299_v32 = vshrl.u32 %v3238_v57, 16  ;;  %v2682_v14 = vsel %vm218_vm0, %v2681_v20, %v2675_v34  ;;  %v2707_v42 = vrot.slane %v2706_v8, 4  ;;  %v4959_v45 = vld [vmem:[%s6614_s5] ss:$0 sm:$0xff] }
 0x49b   :  { %v2688_v23 = vperm.slane %v2682_v14, %v5474_v1  ;;  %v2695_v49 = vrot.slane %v2692_v15, 4  ;;  %v2710_v18 = vsel %vm218_vm0, %v2706_v8, %v2709_v51  ;;  %2098 = vmatpush.bf16.msrb.mxu2 %v4890_v11 }
 0x49c   :  { %v6201_v55 = vpack.i.b16 %v3299_v32, %v3298_v3  ;;  %v2708_v6 = vsel %vm218_vm0, %v2707_v42, %v2701_v60  ;;  %v2718_v61 = vperm.slane %v2710_v18, %v5474_v1  ;;  %v2853_v42 = vshrl.u32 %v6146_v39, 16 }
 0x49d   :  { %v2693_v40 = vrot.slane %v2688_v23, 4  ;;  %v2696_v26 = vsel %vm218_vm0, 0, %v2695_v49  ;;  %v2714_v48 = vperm.slane %v2708_v6, %v5474_v1  ;;  %v2799_v9 = vsel %vm218_vm0, %v2695_v49, %v2688_v23 }
 0x49e   :  { %v2804_v59 = vrot.slane %v2696_v26, 4  ;;  %v2721_v17 = vrot.slane %v2718_v61, 4  ;;  %v2803_v38 = vperm.slane %v2799_v9, %v5464_v37 }
 0x49f   :  { %v2694_v19 = vsel %vm218_vm0, 0, %v2693_v40  ;;  %v2719_v34 = vrot.slane %v2714_v48, 4  ;;  %2099 = vmatpush.bf16.msrb.mxu2 %v4889_v52  ;;  %v2876_v40 = vrot.slane %v6061_v43, 2 }
 0x4a0   :  { %v2805_v27 = vsel %vm218_vm0, %v2804_v59, %v2694_v19  ;;  %v2722_v44 = vsel %vm218_vm0, 0, %v2721_v17  ;;  %v2818_v54 = vsel %vm218_vm0, %v2721_v17, %v2714_v48  ;;  %v2964_v17 = vrot.slane %v6161_v4, 4 }
 0x4a1   :  { %v2809_v46 = vperm.slane %v2805_v27, %v5464_v37  ;;  %v2720_v31 = vsel %vm218_vm0, 0, %v2719_v34  ;;  %v2823_v3 = vrot.slane %v2722_v44, 4  ;;  %v2822_v63 = vperm.slane %v2818_v54, %v5464_v37 }
 0x4a2   :  { %v2908_v61 = vsel %vm2889_vm7, %v6061_v43, %v2876_v40  ;;  %v2961_v34 = vrot.slane %v5991_v58, 4 }
 0x4a3   :  { %v2810_v50 = vrot.slane %v2809_v46, 4  ;;  %v2824_v62 = vsel %vm218_vm0, %v2823_v3, %v2720_v31  ;;  %v2910_v39 = vrot.slane %v2908_v61, 2  ;;  %v2999_v31 = vshrl.u32 %v2964_v17, 16 }
 0x4a4   :  { %v2828_v32 = vperm.slane %v2824_v62, %v5464_v37  ;;  %v2879_v62 = vrot.slane %v6065_v53, 2 }
 0x4a5   :  { %v2811_v57 = vsel %vm218_vm0, %v2810_v50, %v2803_v38  ;;  %v2970_v38 = vrot.slane %v6179_v0, 4  ;;  %v2997_v50 = vpack.i.b16 %v2964_v17, %v2961_v34 }
 0x4a6   :  { %v2829_v8 = vrot.slane %v2828_v32, 4  ;;  %v2815_v51 = vperm.slane %v2811_v57, %v5474_v1 }
 0x4a7   :  { %v3005_v52 = vshrl.u32 %v2970_v38, 16 }
 0x4a8   :  { %v2830_v13 = vsel %vm218_vm0, %v2829_v8, %v2822_v63  ;;  %v2864_v6 = vshrl.u32 %v2815_v51, 16  ;;  %v2816_v57 = vrot.slane %v2815_v51, 4  ;;  %v2926_v8 = vsel %vm2889_vm7, %v6065_v53, %v2879_v62 }
 0x4a9   :  { %v2834_v15 = vperm.slane %v2830_v13, %v5474_v1 }
 0x4aa   :  { %v2817_v13 = vsel %vm218_vm0, 0, %v2816_v57 }
 0x4ab   :  { %v2863_v49 = vpack.i.b16 %v2834_v15, %v2815_v51  ;;  %v2865_v48 = vshrl.u32 %v2834_v15, 16  ;;  %v2835_v63 = vrot.slane %v2834_v15, 4  ;;  %v2925_v51 = vsel %vm2885_vm6, %v6065_v53, %v2879_v62 }
 0x4ac   :  { %v2883_v62 = vrot.slane %v6166_v21, 2 }
 0x4ad   :  { %v2866_v19 = vpack.i.b16 %v2865_v48, %v2864_v6 }
 0x4af   :  { %v2878_v27 = vrot.slane %v2866_v19, 2 }
 0x4b1   :  { %v2920_v44 = vsel %vm2889_vm7, %v2866_v19, %v2878_v27  ;;  %v2919_v58 = vsel %vm2885_vm6, %v2866_v19, %v2878_v27 }
 0x4b2   :  { %v2922_v54 = vrot.slane %v2920_v44, 2 }
 0x4d0   :  { %v2016_v28 = vpop.f32.mrf.mxu1 }
 0x4d1   :  { %v2017_v20 = vadd.f32 %v4959_v45, %v2016_v28  ;;  %v2852_v28 = vshrl.u32 %v6133_v33, 16  ;;  %v2907_v33 = vsel %vm2885_vm6, %v6061_v43, %v2876_v40  ;;  %v2967_v43 = vrot.slane %v6175_v16, 4 }
 0x4d2   :  { %v3115_v16 = vperm.slane %v2997_v50, %v5464_v37 }
 0x4d3   :  { %v6233_v14 = vadd.f32 %v2017_v20, %v5481_v29  ;;  %v2854_v26 = vpack.i.b16 %v2853_v42, %v2852_v28  ;;  %v3004_v4 = vshrl.u32 %v2967_v43, 16  ;;  %v3003_v32 = vpack.i.b16 %v2970_v38, %v2967_v43 }
 0x4d4   :  { %v3123_v15 = vrot.slane %v3115_v16, 4  ;;  %v2928_v42 = vrot.slane %v2926_v8, 2  ;;  %v2882_v38 = vrot.slane %v6073_v56, 2 }
 0x4d5   :  { %v2877_v59 = vrot.slane %v2854_v26, 2  ;;  %v3006_v20 = vpack.i.b16 %v3005_v52, %v3004_v4  ;;  %v3120_v28 = vperm.slane %v3003_v32, %v5464_v37 }
 0x4d6   :  { %v2944_v52 = vsel %vm2889_vm7, %v6073_v56, %v2882_v38 }
 0x4d7   :  { %v2913_v9 = vsel %vm2885_vm6, %v2854_v26, %v2877_v59  ;;  %v2914_v46 = vsel %vm2889_vm7, %v2854_v26, %v2877_v59  ;;  %v3121_v26 = vrot.slane %v3120_v28, 4  ;;  %v3124_v6 = vsel %vm218_vm0, %v3120_v28, %v3123_v15 }
 0x4d8   :  { %v2018_v25 = vpop.f32.mrf.mxu1  ;;  %v3407_v15 = vsel %vm1272_vm1, %v6185_v36, 0 }
 0x4d9   :  { %v2019_v60 = vadd.f32 %v4959_v45, %v2018_v25  ;;  %v2998_v25 = vshrl.u32 %v2961_v34, 16  ;;  %v2916_v45 = vrot.slane %v2914_v46, 2  ;;  %3416 = vmatpush.bf16.xpose.msrb.mxu1 %v3407_v15 }
 0x4db   :  { %v6228_v12 = vadd.f32 %v2019_v60, %v5484_v30  ;;  %v2875_v30 = vrot.slane %v2863_v49, 2  ;;  %v3000_v3 = vpack.i.b16 %v2999_v31, %v2998_v25 }
 0x4dd   :  { %v2023_v23 = vpack.c.bf16 %v6228_v12, %v6233_v14  ;;  %v2901_v24 = vsel %vm2885_vm6, %v2863_v49, %v2875_v30  ;;  %v2902_v18 = vsel %vm2889_vm7, %v2863_v49, %v2875_v30  ;;  %v3141_v0 = vperm.slane %v3000_v3, %v5464_v37 }
 0x4de   :  { %v2904_v29 = vrot.slane %v2902_v18, 2  ;;  %3425 = vst [vmem:[#allocation1 + $0x1] ss:$4 sm:$0xff] %v2901_v24  ;;  %v2880_v49 = vrot.slane %v6157_v10, 2  ;;  %v3146_v18 = vperm.slane %v3006_v20, %v5464_v37  ;;  %v2870_v3 = vshrl.u32 %v2817_v13, 16 }
 0x4df   :  { %2100 = vmatmul.bf16.vlgmr.msrb.gmra.mxu2 %v2023_v23  ;;  %v2836_v23 = vsel %vm218_vm0, 0, %v2835_v63  ;;  %v3149_v30 = vrot.slane %v3141_v0, 4  ;;  %v2946_v20 = vrot.slane %v2944_v52, 2  ;;  %v3316_v52 = vrot.slane %v6100_v5, 2 }
 0x4e0   :  { %3428 = vst [vmem:[#allocation1 + $0x2] ss:$4 sm:$0xff] %v2904_v29  ;;  %v2869_v24 = vpack.i.b16 %v2836_v23, %v2817_v13  ;;  %v2931_v40 = vsel %vm2885_vm6, %v6157_v10, %v2880_v49  ;;  %v3147_v61 = vrot.slane %v3146_v18, 4  ;;  %v2932_v59 = vsel %vm2889_vm7, %v6157_v10, %v2880_v49 }
 0x4e1   :  { %v3150_v53 = vsel %vm218_vm0, %v3146_v18, %v3149_v30  ;;  %v2934_v17 = vrot.slane %v2932_v59, 2  ;;  %v2871_v4 = vshrl.u32 %v2836_v23, 16  ;;  %v2949_v13 = vsel %vm2885_vm6, %v6166_v21, %v2883_v62 }
 0x4e2   :  { %v2881_v48 = vrot.slane %v2869_v24, 2  ;;  %v3158_v19 = vperm.slane %v3150_v53, %v5474_v1  ;;  %v3148_v34 = vsel %vm218_vm0, %v3147_v61, %v3141_v0  ;;  %v2943_v0 = vsel %vm2885_vm6, %v6073_v56, %v2882_v38 }
 0x4e3   :  { %v3154_v43 = vperm.slane %v3148_v34, %v5474_v1  ;;  %v2872_v8 = vpack.i.b16 %v2871_v4, %v2870_v3 }
 0x4e4   :  { %v2937_v25 = vsel %vm2885_vm6, %v2869_v24, %v2881_v48  ;;  %v3161_v10 = vrot.slane %v3158_v19, 4  ;;  %v3313_v19 = vrot.slane %v6095_v41, 2 }
 0x4e5   :  { %v2884_v30 = vrot.slane %v2872_v8, 2 }
 0x4e7   :  { %v6248_v11 = vld.sshfl [vmem:[#allocation1] sm:$0xff pattern:$0x73625140]  ;;  %v2955_v59 = vsel %vm2885_vm6, %v2872_v8, %v2884_v30 }
 0x4e8   :  { %3448 = vst [vmem:[#allocation1] ss:$4 sm:$0xff] %v2907_v33  ;;  %v3132_v33 = vperm.slane %v3124_v6, %v5474_v1 }
 0x4e9   :  { %3451 = vst [vmem:[#allocation1 + $0x1] ss:$4 sm:$0xff] %v2910_v39  ;;  %v3122_v39 = vsel %vm218_vm0, %v3121_v26, %v3115_v16 }
 0x4ea   :  { %3453 = vst [vmem:[#allocation1 + $0x2] ss:$4 sm:$0xff] %v2913_v9  ;;  %v2938_v9 = vsel %vm2889_vm7, %v2869_v24, %v2881_v48  ;;  %v3128_v27 = vperm.slane %v3122_v39, %v5474_v1  ;;  %v3135_v46 = vrot.slane %v3132_v33, 4  ;;  %v2956_v48 = vsel %vm2889_vm7, %v2872_v8, %v2884_v30 }
 0x4eb   :  { %v2940_v31 = vrot.slane %v2938_v9, 2  ;;  %v2958_v33 = vrot.slane %v2956_v48, 2  ;;  %v3319_v30 = vrot.slane %v6103_v22, 2 }
 0x4ec   :  { %v3136_v50 = vsel %vm218_vm0, 0, %v3135_v46 }
 0x4ed   :  { %v3244_v57 = vrot.slane %v3136_v50, 4 }
 0x4f1   :  { %v6257_v60 = vld.sshfl [vmem:[#allocation1] sm:$0xff pattern:$0x73625140] }
 0x4f2   :  { %3474 = vst [vmem:[#allocation1] ss:$4 sm:$0xff] %v2916_v45  ;;  %v3133_v45 = vrot.slane %v3128_v27, 4  ;;  %v3458_v56 = vsel %vm1272_vm1, %v6257_v60, 0  ;;  %v3258_v60 = vsel %vm218_vm0, %v3161_v10, %v3154_v43 }
 0x4f3   :  { %3476 = vst [vmem:[#allocation1 + $0x1] ss:$4 sm:$0xff] %v2919_v58  ;;  %v3159_v58 = vrot.slane %v3154_v43, 4  ;;  %3467 = vmatpush.bf16.xpose.msra.mxu1 %v3458_v56 }
 0x4f4   :  { %3479 = vst [vmem:[#allocation1 + $0x2] ss:$4 sm:$0xff] %v2922_v54  ;;  %v3162_v54 = vsel %vm218_vm0, 0, %v3161_v10  ;;  %v3134_v16 = vsel %vm218_vm0, 0, %v3133_v45 }
 0x4f5   :  { %v3263_v63 = vrot.slane %v3162_v54, 4  ;;  %v3160_v32 = vsel %vm218_vm0, 0, %v3159_v58  ;;  %v3245_v23 = vsel %vm218_vm0, %v3244_v57, %v3134_v16  ;;  %v3317_v16 = vrot.slane %v6195_v35, 2 }
 0x4f6   :  { %v3249_v36 = vperm.slane %v3245_v23, %v5464_v37 }
 0x4f7   :  { %v3264_v49 = vsel %vm218_vm0, %v3263_v63, %v3160_v32  ;;  %v3345_v32 = vsel %vm2885_vm6, %v6100_v5, %v3316_v52  ;;  %v3351_v8 = vsel %vm2885_vm6, %v6195_v35, %v3317_v16 }
 0x4f8   :  { %v3268_v26 = vperm.slane %v3264_v49, %v5464_v37  ;;  %v3250_v61 = vrot.slane %v3249_v36, 4 }
 0x4fa   :  { %v3269_v53 = vrot.slane %v3268_v26, 4  ;;  %v3320_v26 = vrot.slane %v6198_v7, 2 }
 0x4fb   :  { %v3480_v29 = vld.sshfl [vmem:[#allocation1] sm:$0xff pattern:$0x73625140] }
 0x4fc   :  { %3499 = vst [vmem:[#allocation1] ss:$4 sm:$0xff] %v2925_v51  ;;  %v3484_v18 = vsel %vm1272_vm1, %v3480_v29, 0  ;;  %v3369_v48 = vsel %vm2885_vm6, %v6198_v7, %v3320_v26 }
 0x4fd   :  { %3502 = vst [vmem:[#allocation1 + $0x1] ss:$4 sm:$0xff] %v2928_v42  ;;  %v3433_v42 = vsel %vm1272_vm1, %v6248_v11, 0  ;;  %v3239_v11 = vsel %vm218_vm0, %v3135_v46, %v3128_v27  ;;  %v3328_v46 = vsel %vm2889_vm7, %v6095_v41, %v3313_v19 }
 0x4fe   :  { %3504 = vst [vmem:[#allocation1 + $0x2] ss:$4 sm:$0xff] %v2931_v40  ;;  %v2950_v40 = vsel %vm2889_vm7, %v6166_v21, %v2883_v62  ;;  %3442 = vmatpush.bf16.xpose.msra.mxu2 %v3433_v42  ;;  %v3243_v29 = vperm.slane %v3239_v11, %v5464_v37  ;;  %v3262_v21 = vperm.slane %v3258_v60, %v5464_v37  ;;  %v3330_v43 = vrot.slane %v3328_v46, 2 }
 0x4ff   :  { %v2952_v6 = vrot.slane %v2950_v40, 2  ;;  %v3364_v40 = vsel %vm2889_vm7, %v6103_v22, %v3319_v30  ;;  %v3363_v11 = vsel %vm2885_vm6, %v6103_v22, %v3319_v30 }
 0x500   :  { %v3251_v9 = vsel %vm218_vm0, %v3250_v61, %v3243_v29  ;;  %v3270_v34 = vsel %vm218_vm0, %v3269_v53, %v3262_v21  ;;  %v3366_v60 = vrot.slane %v3364_v40, 2  ;;  %v3370_v21 = vsel %vm2889_vm7, %v6198_v7, %v3320_v26 }
 0x501   :  { %v3274_v27 = vperm.slane %v3270_v34, %v5474_v1  ;;  %v3323_v7 = vrot.slane %v6201_v55, 2 }
 0x503   :  { %v3305_v63 = vshrl.u32 %v3274_v27, 16 }
 0x505   :  { %v3505_v44 = vld.sshfl [vmem:[#allocation1] sm:$0xff pattern:$0x73625140] }
 0x506   :  { %3525 = vst [vmem:[#allocation1] ss:$4 sm:$0xff] %v2934_v17  ;;  %v3509_v28 = vsel %vm1272_vm1, %v3505_v44, 0  ;;  %3493 = vmatpush.bf16.xpose.msrb.mxu2 %v3484_v18  ;;  %v3255_v17 = vperm.slane %v3251_v9, %v5474_v1  ;;  %v3275_v18 = vrot.slane %v3274_v27, 4  ;;  %v3322_v9 = vrot.slane %v6105_v2, 2 }
 0x507   :  { %3527 = vst [vmem:[#allocation1 + $0x1] ss:$4 sm:$0xff] %v2937_v25  ;;  %3518 = vmatpush.bf16.xpose.msrb.mxu3 %v3509_v28  ;;  %v3314_v25 = vrot.slane %v6191_v47, 2 }
 0x508   :  { %3530 = vst [vmem:[#allocation1 + $0x2] ss:$4 sm:$0xff] %v2940_v31  ;;  %v3327_v31 = vsel %vm2885_vm6, %v6095_v41, %v3313_v19  ;;  %v3303_v10 = vpack.i.b16 %v3274_v27, %v3255_v17  ;;  %v3304_v57 = vshrl.u32 %v3255_v17, 16  ;;  %v3276_v36 = vsel %vm218_vm0, 0, %v3275_v18 }
 0x509   :  { %v3333_v44 = vsel %vm2885_vm6, %v6191_v47, %v3314_v25  ;;  %v3334_v50 = vsel %vm2889_vm7, %v6191_v47, %v3314_v25  ;;  %v3346_v47 = vsel %vm2889_vm7, %v6100_v5, %v3316_v52  ;;  %v3382_v27 = vsel %vm2889_vm7, %v6105_v2, %v3322_v9 }
 0x50a   :  { %v3315_v45 = vrot.slane %v3303_v10, 2  ;;  %v3336_v54 = vrot.slane %v3334_v50, 2  ;;  %v3381_v46 = vsel %vm2885_vm6, %v6105_v2, %v3322_v9  ;;  %v3384_v25 = vrot.slane %v3382_v27, 2 }
 0x50b   :  { %v3388_v50 = vsel %vm2889_vm7, %v6201_v55, %v3323_v7 }
 0x50c   :  { %v3340_v58 = vsel %vm2889_vm7, %v3303_v10, %v3315_v45  ;;  %v3339_v3 = vsel %vm2885_vm6, %v3303_v10, %v3315_v45  ;;  %v3387_v10 = vsel %vm2885_vm6, %v6201_v55, %v3323_v7 }
 0x50d   :  { %v3342_v41 = vrot.slane %v3340_v58, 2  ;;  %v4960_v58 = vld [vmem:[%s6616_s7] ss:$0 sm:$0xff] }
 0x50f   :  { %v3531_v51 = vld.sshfl [vmem:[#allocation1] sm:$0xff pattern:$0x73625140] }
 0x510   :  { %3550 = vst [vmem:[#allocation1] ss:$4 sm:$0xff] %v2943_v0  ;;  %v3535_v24 = vsel %vm1272_vm1, %v3531_v51, 0  ;;  %v3348_v0 = vrot.slane %v3346_v47, 2  ;;  %v3352_v51 = vsel %vm2889_vm7, %v6195_v35, %v3317_v16 }
 0x511   :  { %3553 = vst [vmem:[#allocation1 + $0x1] ss:$4 sm:$0xff] %v2946_v20  ;;  %3544 = vmatpush.bf16.xpose.msrb.mxu0 %v3535_v24  ;;  %v3306_v20 = vpack.i.b16 %v3305_v63, %v3304_v57  ;;  %v3354_v28 = vrot.slane %v3352_v51, 2  ;;  %v3256_v24 = vrot.slane %v3255_v17, 4  ;;  %v3311_v17 = vshrl.u32 %v3276_v36, 16 }
 0x512   :  { %3555 = vst [vmem:[#allocation1 + $0x2] ss:$4 sm:$0xff] %v2949_v13 }
 0x513   :  { %v3318_v49 = vrot.slane %v3306_v20, 2  ;;  %v3257_v35 = vsel %vm218_vm0, 0, %v3256_v24 }
 0x514   :  { %v3310_v34 = vshrl.u32 %v3257_v35, 16 }
 0x515   :  { %v3358_v15 = vsel %vm2889_vm7, %v3306_v20, %v3318_v49  ;;  %v3357_v5 = vsel %vm2885_vm6, %v3306_v20, %v3318_v49 }
 0x516   :  { %v3360_v42 = vrot.slane %v3358_v15, 2 }
 0x519   :  { %v6318_v39 = vld.sshfl [vmem:[#allocation1] sm:$0xff pattern:$0x73625140] }
 0x51a   :  { %3576 = vst [vmem:[#allocation1] ss:$4 sm:$0xff] %v2952_v6  ;;  %v3309_v6 = vpack.i.b16 %v3276_v36, %v3257_v35 }
 0x51b   :  { %3578 = vst [vmem:[#allocation1 + $0x1] ss:$4 sm:$0xff] %v2955_v59  ;;  %v3372_v59 = vrot.slane %v3370_v21, 2 }
 0x51c   :  { %3581 = vst [vmem:[#allocation1 + $0x2] ss:$4 sm:$0xff] %v2958_v33  ;;  %v3321_v61 = vrot.slane %v3309_v6, 2 }
 0x51e   :  { %v3376_v53 = vsel %vm2889_vm7, %v3309_v6, %v3321_v61  ;;  %v3375_v33 = vsel %vm2885_vm6, %v3309_v6, %v3321_v61 }
 0x51f   :  { %v3378_v22 = vrot.slane %v3376_v53, 2 }
 0x523   :  { %v6332_v38 = vld.sshfl [vmem:[#allocation1] sm:$0xff pattern:$0x73625140] }
 0x524   :  { %3698 = vst [vmem:[#allocation1] ss:$4 sm:$0xff] %v3327_v31  ;;  %v3312_v31 = vpack.i.b16 %v3311_v17, %v3310_v34 }
 0x525   :  { %3701 = vst [vmem:[#allocation1 + $0x1] ss:$4 sm:$0xff] %v3330_v43 }
 0x526   :  { %3703 = vst [vmem:[#allocation1 + $0x2] ss:$4 sm:$0xff] %v3333_v44  ;;  %v3324_v45 = vrot.slane %v3312_v31, 2 }
 0x528   :  { %v3394_v2 = vsel %vm2889_vm7, %v3312_v31, %v3324_v45 }
 0x529   :  { %v3396_v52 = vrot.slane %v3394_v2, 2 }
 0x52d   :  { %v3704_v4 = vld.sshfl [vmem:[#allocation1] sm:$0xff pattern:$0x73625140] }
 0x52e   :  { %3727 = vst [vmem:[#allocation1 + $0x1] ss:$4 sm:$0xff] %v3339_v3  ;;  %v3709_v62 = vsel %vm3708_vm8, %v3704_v4, 0  ;;  %v3390_v3 = vrot.slane %v3388_v50, 2  ;;  %v3393_v4 = vsel %vm2885_vm6, %v3312_v31, %v3324_v45 }
 0x52f   :  { %3725 = vst [vmem:[#allocation1] ss:$4 sm:$0xff] %v3336_v54  ;;  %3718 = vmatpush.bf16.msra.mxu3 %v3709_v62 }
 0x530   :  { %3730 = vst [vmem:[#allocation1 + $0x2] ss:$4 sm:$0xff] %v3342_v41 }
 0x537   :  { %v3731_v13 = vld.sshfl [vmem:[#allocation1] sm:$0xff pattern:$0x73625140] }
 0x538   :  { %v3735_v23 = vsel %vm3708_vm8, %v3731_v13, 0  ;;  %3750 = vst [vmem:[#allocation1] ss:$4 sm:$0xff] %v3345_v32 }
 0x539   :  { %3744 = vmatpush.bf16.msra.mxu0 %v3735_v23  ;;  %3753 = vst [vmem:[#allocation1 + $0x1] ss:$4 sm:$0xff] %v3348_v0 }
 0x53a   :  { %3755 = vst [vmem:[#allocation1 + $0x2] ss:$4 sm:$0xff] %v3351_v8 }
 0x541   :  { %v6352_v56 = vld.sshfl [vmem:[#allocation1] sm:$0xff pattern:$0x73625140] }
 0x542   :  { %3776 = vst [vmem:[#allocation1] ss:$4 sm:$0xff] %v3354_v28 }
 0x543   :  { %3778 = vst [vmem:[#allocation1 + $0x1] ss:$4 sm:$0xff] %v3357_v5 }
 0x544   :  { %3781 = vst [vmem:[#allocation1 + $0x2] ss:$4 sm:$0xff] %v3360_v42 }
 0x54b   :  { %v6364_v29 = vld.sshfl [vmem:[#allocation1] sm:$0xff pattern:$0x73625140] }
 0x54c   :  { %3801 = vst [vmem:[#allocation1] ss:$4 sm:$0xff] %v3363_v11 }
 0x54d   :  { %3804 = vst [vmem:[#allocation1 + $0x1] ss:$4 sm:$0xff] %v3366_v60 }
 0x54e   :  { %3806 = vst [vmem:[#allocation1 + $0x2] ss:$4 sm:$0xff] %v3369_v48 }
 0x555   :  { %v6370_v19 = vld.sshfl [vmem:[#allocation1] sm:$0xff pattern:$0x73625140] }
 0x556   :  { %3827 = vst [vmem:[#allocation1] ss:$4 sm:$0xff] %v3372_v59 }
 0x557   :  { %3829 = vst [vmem:[#allocation1 + $0x1] ss:$4 sm:$0xff] %v3375_v33 }
 0x558   :  { %3832 = vst [vmem:[#allocation1 + $0x2] ss:$4 sm:$0xff] %v3378_v22 }
 0x55f   :  { %v6380_v44 = vld.sshfl [vmem:[#allocation1] sm:$0xff pattern:$0x73625140] }
 0x560   :  { %3852 = vst [vmem:[#allocation1] ss:$4 sm:$0xff] %v3381_v46 }
 0x561   :  { %3855 = vst [vmem:[#allocation1 + $0x1] ss:$4 sm:$0xff] %v3384_v25 }
 0x562   :  { %v2101_v43 = vpop.f32.mrf.mxu2  ;;  %3857 = vst [vmem:[#allocation1 + $0x2] ss:$4 sm:$0xff] %v3387_v10 }
 0x563   :  { %v2102_v55 = vadd.f32 %v4960_v58, %v2101_v43 }
 0x565   :  { %v2263_v63 = vpack.c.bf16 %v2102_v55, %v2102_v55 }
 0x567   :  { %v2285_v30 = vshrl.u32 %v2263_v63, 16 }
 0x569   :  { %v6389_v57 = vld.sshfl [vmem:[#allocation1] sm:$0xff pattern:$0x73625140] }
 0x56a   :  { %v2103_v54 = vpop.f32.mrf.mxu2  ;;  %3878 = vst [vmem:[#allocation1] ss:$4 sm:$0xff] %v3390_v3 }
 0x56b   :  { %v2104_v41 = vadd.f32 %v4960_v58, %v2103_v54  ;;  %3880 = vst [vmem:[#allocation1 + $0x1] ss:$4 sm:$0xff] %v3393_v4 }
 0x56c   :  { %3883 = vst [vmem:[#allocation1 + $0x2] ss:$4 sm:$0xff] %v3396_v52 }
 0x56d   :  { %v2264_v62 = vpack.c.bf16 %v2104_v41, %v2104_v41 }
 0x56f   :  { %2280 = vrot.lane.b32.xlu1 %v2264_v62, %s5307_s29  ;;  %2276 = vrot.lane.b32.xlu0 %v2264_v62, %s5311_s26  ;;  %v2297_v0 = vshrl.u32 %v2264_v62, 16 }
 0x570   :  { %2272 = vrot.lane.b32.xlu2 %v2264_v62, %s5326_s12 }
 0x577   :  { %2278 = vrot.lane.b32.xlu1 %v2263_v63, %s5307_s29  ;;  %2274 = vrot.lane.b32.xlu0 %v2263_v63, %s5311_s26 }
 0x578   :  { %2270 = vrot.lane.b32.xlu2 %v2263_v63, %s5326_s12 }
 0x5ca   :  { %v2273_v47 = vpop.permute.xlu2 %2272 }
 0x5cb   :  { %v2298_v16 = vshrl.u32 %v2273_v47, 16  ;;  %v2296_v32 = vpack.i.b16 %v2273_v47, %v2264_v62 }
 0x5cd   :  { %v2299_v20 = vpack.i.b16 %v2298_v16, %v2297_v0  ;;  %v2362_v13 = vperm.slane %v2296_v32, %v5464_v37 }
 0x5cf   :  { %v2388_v15 = vperm.slane %v2299_v20, %v5464_v37  ;;  %v2370_v24 = vrot.slane %v2362_v13, 4 }
 0x5d1   :  { %v2396_v26 = vrot.slane %v2388_v15, 4 }
 0x5d2   :  { %v2271_v8 = vpop.permute.xlu2 %2270 }
 0x5d3   :  { %v2286_v23 = vshrl.u32 %v2271_v8, 16  ;;  %v2284_v18 = vpack.i.b16 %v2271_v8, %v2263_v63 }
 0x5d5   :  { %v2287_v36 = vpack.i.b16 %v2286_v23, %v2285_v30  ;;  %v2310_v61 = vperm.slane %v2284_v18, %v5464_v37 }
 0x5d7   :  { %v2336_v33 = vperm.slane %v2287_v36, %v5464_v37  ;;  %v2318_v41 = vrot.slane %v2310_v61, 4 }
 0x5d9   :  { %v2344_v55 = vrot.slane %v2336_v33, 4 }
 0x5e1   :  { %v2281_v49 = vpop.permute.xlu1 %2280  ;;  %v2277_v51 = vpop.permute.xlu0 %2276 }
 0x5e2   :  { %v2304_v28 = vshrl.u32 %v2281_v49, 16  ;;  %v2302_v5 = vpack.i.b16 %v2281_v49, %v2277_v51  ;;  %v2303_v42 = vshrl.u32 %v2277_v51, 16 }
 0x5e4   :  { %v2305_v40 = vpack.i.b16 %v2304_v28, %v2303_v42  ;;  %v2367_v35 = vperm.slane %v2302_v5, %v5464_v37 }
 0x5e6   :  { %v2368_v11 = vrot.slane %v2367_v35, 4  ;;  %v2371_v60 = vsel %vm218_vm0, %v2367_v35, %v2370_v24  ;;  %v2393_v6 = vperm.slane %v2305_v40, %v5464_v37 }
 0x5e7   :  { %v2379_v48 = vperm.slane %v2371_v60, %v5474_v1 }
 0x5e8   :  { %v2369_v21 = vsel %vm218_vm0, %v2368_v11, %v2362_v13  ;;  %v2394_v53 = vrot.slane %v2393_v6, 4  ;;  %v2397_v59 = vsel %vm218_vm0, %v2393_v6, %v2396_v26 }
 0x5e9   :  { %v2375_v22 = vperm.slane %v2369_v21, %v5474_v1  ;;  %v2382_v9 = vrot.slane %v2379_v48, 4  ;;  %v2405_v34 = vperm.slane %v2397_v59, %v5474_v1  ;;  %v2279_v17 = vpop.permute.xlu1 %2278  ;;  %v2275_v27 = vpop.permute.xlu0 %2274 }
 0x5ea   :  { %v2395_v7 = vsel %vm218_vm0, %v2394_v53, %v2388_v15  ;;  %v2292_v46 = vshrl.u32 %v2279_v17, 16  ;;  %v2290_v25 = vpack.i.b16 %v2279_v17, %v2275_v27  ;;  %v2291_v31 = vshrl.u32 %v2275_v27, 16 }
 0x5eb   :  { %v2380_v43 = vrot.slane %v2375_v22, 4  ;;  %v2383_v10 = vsel %vm218_vm0, 0, %v2382_v9  ;;  %v2401_v45 = vperm.slane %v2395_v7, %v5474_v1  ;;  %v2408_v50 = vrot.slane %v2405_v34, 4 }
 0x5ec   :  { %v2448_v58 = vsel %vm218_vm0, %v2382_v9, %v2375_v22  ;;  %v2453_v2 = vrot.slane %v2383_v10, 4  ;;  %v2293_v54 = vpack.i.b16 %v2292_v46, %v2291_v31  ;;  %v2315_v3 = vperm.slane %v2290_v25, %v5464_v37 }
 0x5ed   :  { %v2381_v4 = vsel %vm218_vm0, 0, %v2380_v43  ;;  %v2406_v52 = vrot.slane %v2401_v45, 4  ;;  %v2409_v62 = vsel %vm218_vm0, 0, %v2408_v50  ;;  %v2452_v0 = vperm.slane %v2448_v58, %v5464_v37 }
 0x5ee   :  { %v2454_v63 = vsel %vm218_vm0, %v2453_v2, %v2381_v4  ;;  %v2472_v47 = vrot.slane %v2409_v62, 4  ;;  %v2316_v16 = vrot.slane %v2315_v3, 4  ;;  %v2319_v8 = vsel %vm218_vm0, %v2315_v3, %v2318_v41 }
 0x5ef   :  { %v2407_v32 = vsel %vm218_vm0, 0, %v2406_v52  ;;  %v2458_v20 = vperm.slane %v2454_v63, %v5464_v37  ;;  %v2327_v49 = vperm.slane %v2319_v8, %v5474_v1  ;;  %v2341_v51 = vperm.slane %v2293_v54, %v5464_v37 }
 0x5f0   :  { %v2473_v13 = vsel %vm218_vm0, %v2472_v47, %v2407_v32  ;;  %v2317_v23 = vsel %vm218_vm0, %v2316_v16, %v2310_v61  ;;  %v2467_v28 = vsel %vm218_vm0, %v2408_v50, %v2401_v45  ;;  %v3586_v2 = vsel %vm1272_vm1, %v6332_v38, 0 }
 0x5f1   :  { %v2459_v15 = vrot.slane %v2458_v20, 4  ;;  %v2477_v5 = vperm.slane %v2473_v13, %v5464_v37  ;;  %v2323_v42 = vperm.slane %v2317_v23, %v5474_v1  ;;  %v2330_v30 = vrot.slane %v2327_v49, 4 }
 0x5f2   :  { %v2342_v24 = vrot.slane %v2341_v51, 4  ;;  %v2345_v18 = vsel %vm218_vm0, %v2341_v51, %v2344_v55  ;;  %v2471_v11 = vperm.slane %v2467_v28, %v5464_v37  ;;  %v3837_v38 = vsel %vm3708_vm8, %v6380_v44, 0 }
 0x5f3   :  { %v2478_v40 = vrot.slane %v2477_v5, 4  ;;  %v2328_v35 = vrot.slane %v2323_v42, 4  ;;  %v2353_v36 = vperm.slane %v2345_v18, %v5474_v1  ;;  %v2460_v26 = vsel %vm218_vm0, %v2459_v15, %v2452_v0 }
 0x5f4   :  { %v2331_v60 = vsel %vm218_vm0, 0, %v2330_v30  ;;  %v2343_v6 = vsel %vm218_vm0, %v2342_v24, %v2336_v33  ;;  %v2464_v48 = vperm.slane %v2460_v26, %v5474_v1  ;;  %v2410_v59 = vsel %vm218_vm0, %v2330_v30, %v2323_v42 }
 0x5f5   :  { %v2329_v61 = vsel %vm218_vm0, 0, %v2328_v35  ;;  %v2349_v21 = vperm.slane %v2343_v6, %v5474_v1  ;;  %v2356_v53 = vrot.slane %v2353_v36, 4  ;;  %v2415_v22 = vrot.slane %v2331_v60, 4  ;;  %v3884_v35 = vld.sshfl [vmem:[#allocation1] sm:$0xff pattern:$0x73625140] }
 0x5f6   :  { %v2479_v9 = vsel %vm218_vm0, %v2478_v40, %v2471_v11  ;;  %v2465_v7 = vrot.slane %v2464_v48, 4  ;;  %v2414_v45 = vperm.slane %v2410_v59, %v5464_v37  ;;  %v3560_v13 = vsel %vm1272_vm1, %v6318_v39, 0 }
 0x5f7   :  { %v2354_v34 = vrot.slane %v2349_v21, 4  ;;  %v2357_v17 = vsel %vm218_vm0, 0, %v2356_v53  ;;  %v2483_v27 = vperm.slane %v2479_v9, %v5474_v1  ;;  %v2416_v33 = vsel %vm218_vm0, %v2415_v22, %v2329_v61 }
 0x5f8   :  { %v2434_v46 = vrot.slane %v2357_v17, 4  ;;  %v2420_v31 = vperm.slane %v2416_v33, %v5464_v37  ;;  %v2429_v50 = vsel %vm218_vm0, %v2356_v53, %v2349_v21  ;;  %v2466_v41 = vsel %vm218_vm0, 0, %v2465_v7 }
 0x5f9   :  { %v2355_v25 = vsel %vm218_vm0, 0, %v2354_v34  ;;  %v2500_v43 = vpack.i.b16 %v2483_v27, %v2464_v48  ;;  %v2484_v10 = vrot.slane %v2483_v27, 4  ;;  %v2433_v62 = vperm.slane %v2429_v50, %v5464_v37 }
 0x5fa   :  { %v2435_v58 = vsel %vm218_vm0, %v2434_v46, %v2355_v25  ;;  %v2421_v54 = vrot.slane %v2420_v31, 4  ;;  %v2502_v51 = vshrl.u32 %v2483_v27, 16  ;;  %v3811_v15 = vsel %vm3708_vm8, %v6370_v19, 0 }
 0x5fb   :  { %v2439_v3 = vperm.slane %v2435_v58, %v5464_v37  ;;  %4742 = vmatmul.msk.bf16.vlgmr.msra.gmra.mxu2 %vm1272_vm1, %v2500_v43  ;;  %v2485_v4 = vsel %vm218_vm0, 0, %v2484_v10  ;;  %v2501_v28 = vshrl.u32 %v2464_v48, 16  ;;  %v3786_v39 = vsel %vm3708_vm8, %v6364_v29, 0 }
 0x5fc   :  { %3595 = vmatpush.bf16.xpose.msra.mxu2 %v3586_v2  ;;  %v2506_v52 = vpack.i.b16 %v2485_v4, %v2466_v41  ;;  %v2422_v63 = vsel %vm218_vm0, %v2421_v54, %v2414_v45  ;;  %v3760_v18 = vsel %vm3708_vm8, %v6352_v56, 0  ;;  %v2508_v40 = vshrl.u32 %v2485_v4, 16 }
 0x5fd   :  { %v2440_v55 = vrot.slane %v2439_v3, 4  ;;  %v2426_v47 = vperm.slane %v2422_v63, %v5474_v1  ;;  %v2503_v5 = vpack.i.b16 %v2502_v51, %v2501_v28  ;;  %v2507_v19 = vshrl.u32 %v2466_v41, 16 }
 0x5fe   :  { %4746 = vmatmul.msk.bf16.vlgmr.msrb.gmra.mxu0 %vm1272_vm1, %v2506_v52  ;;  %v3888_v26 = vsel %vm3708_vm8, %v3884_v35, 0  ;;  %v3862_v6 = vsel %vm3708_vm8, %v6389_v57, 0 }
 0x5ff   :  { %3846 = vmatpush.bf16.msrb.mxu0 %v3837_v38  ;;  %v2441_v16 = vsel %vm218_vm0, %v2440_v55, %v2433_v62  ;;  %v2427_v0 = vrot.slane %v2426_v47, 4  ;;  %v2489_v30 = vshrl.u32 %v2426_v47, 16  ;;  %v2509_v36 = vpack.i.b16 %v2508_v40, %v2507_v19 }
 0x600   :  { %v2445_v32 = vperm.slane %v2441_v16, %v5474_v1 }
 0x601   :  { %v2428_v23 = vsel %vm218_vm0, 0, %v2427_v0 }
 0x602   :  { %v2488_v20 = vpack.i.b16 %v2445_v32, %v2426_v47  ;;  %v2446_v8 = vrot.slane %v2445_v32, 4  ;;  %v2490_v42 = vshrl.u32 %v2445_v32, 16  ;;  %v2495_v11 = vshrl.u32 %v2428_v23, 16 }
 0x604   :  { %4741 = vmatmul.msk.bf16.vlgmr.msrb.gmra.mxu1 %vm1272_vm1, %v2488_v20  ;;  %v2447_v49 = vsel %vm218_vm0, 0, %v2446_v8  ;;  %v2491_v24 = vpack.i.b16 %v2490_v42, %v2489_v30 }
 0x605   :  { %3569 = vmatpush.bf16.xpose.msrb.mxu1 %v3560_v13  ;;  %v2494_v44 = vpack.i.b16 %v2447_v49, %v2428_v23  ;;  %v2496_v29 = vshrl.u32 %v2447_v49, 16 }
 0x607   :  { %4745 = vmatmul.msk.bf16.vlgmr.msrb.gmra.mxu3 %vm1272_vm1, %v2494_v44  ;;  %v2497_v60 = vpack.i.b16 %v2496_v29, %v2495_v11 }
 0x608   :  { %3820 = vmatpush.bf16.msrb.mxu3 %v3811_v15 }
 0x60b   :  { %4744 = vmatmul.msk.bf16.vlgmr.msrb.gmra.mxu2 %vm1272_vm1, %v2503_v5 }
 0x60c   :  { %3795 = vmatpush.bf16.msrb.mxu2 %v3786_v39 }
 0x614   :  { %4743 = vmatmul.msk.bf16.vlgmr.msra.gmra.mxu1 %vm1272_vm1, %v2491_v24 }
 0x615   :  { %3769 = vmatpush.bf16.msra.mxu1 %v3760_v18 }
 0x61b   :  { %4748 = vmatmul.msk.bf16.vlgmr.msra.gmra.mxu2 %vm1272_vm1, %v2509_v36 }
 0x61c   :  { %3897 = vmatpush.bf16.msra.mxu2 %v3888_v26 }
 0x624   :  { %4747 = vmatmul.msk.bf16.vlgmr.msrb.gmra.mxu1 %vm1272_vm1, %v2497_v60 }
 0x625   :  { %3871 = vmatpush.bf16.msrb.mxu1 %v3862_v6 }
 0x67b   :  { %v6480_v56 = vpop.f32.mrf.mxu0 }
 0x67c   :  { %v3617_v43 = vsel %vm3601_vm9, %v6480_v56, -inf }
 0x67e   :  { %v3444_v48 = vpop.f32.mrf.mxu2 }
 0x67f   :  { %v3605_v61 = vsel %vm3601_vm9, %v3444_v48, -inf }
 0x680   :  { %3606 = vmax.xlane.f32.xlu1 %v3605_v61 }
 0x681   :  { %v3418_v21 = vpop.f32.mrf.mxu1 }
 0x682   :  { %v3602_v53 = vsel %vm3601_vm9, %v3418_v21, -inf }
 0x683   :  { %3603 = vmax.xlane.f32.xlu2 %v3602_v53  ;;  %v3548_v59 = vpop.f32.mrf.mxu0 }
 0x686   :  { %v3446_v22 = vpop.f32.mrf.mxu2 }
 0x689   :  { %v3420_v9 = vpop.f32.mrf.mxu1 }
 0x68a   :  { %v3520_v34 = vpop.f32.mrf.mxu3 }
 0x68b   :  { %v3614_v25 = vsel %vm3601_vm9, %v3520_v34, -inf }
 0x68e   :  { %v3495_v17 = vpop.f32.mrf.mxu2 }
 0x68f   :  { %v3611_v27 = vsel %vm3601_vm9, %v3495_v17, -inf }
 0x690   :  { %3612 = vmax.xlane.f32.xlu0 %v3611_v27 }
 0x691   :  { %v3469_v57 = vpop.f32.mrf.mxu1 }
 0x692   :  { %v3522_v7 = vpop.f32.mrf.mxu3  ;;  %v3608_v33 = vsel %vm3601_vm9, %v3469_v57, -inf }
 0x693   :  { %3609 = vmax.xlane.f32.xlu2 %v3608_v33 }
 0x696   :  { %v3497_v46 = vpop.f32.mrf.mxu2 }
 0x698   :  { %3615 = vmax.xlane.f32.xlu0 %v3614_v25 }
 0x699   :  { %v3471_v31 = vpop.f32.mrf.mxu1 }
 0x69b   :  { %3618 = vmax.xlane.f32.xlu2 %v3617_v43 }
 0x69e   :  { %v3597_v10 = vpop.f32.mrf.mxu2 }
 0x69f   :  { %v3623_v45 = vsel %vm3601_vm9, %v3597_v10, -inf }
 0x6a0   :  { %3624 = vmax.xlane.f32.xlu1 %v3623_v45 }
 0x6a1   :  { %v3571_v50 = vpop.f32.mrf.mxu1 }
 0x6a2   :  { %v3620_v58 = vsel %vm3601_vm9, %v3571_v50, -inf }
 0x6a3   :  { %3621 = vmax.xlane.f32.xlu0 %v3620_v58 }
 0x6a6   :  { %v3599_v2 = vpop.f32.mrf.mxu2 }
 0x6a9   :  { %v3573_v54 = vpop.f32.mrf.mxu1 }
 0x6f3   :  { %v3607_v3 = vpop.xlane.xlu1 %3606 }
 0x6f4   :  { %v3627_v41 = vsub.f32 %v3444_v48, %v3607_v3 }
 0x6f6   :  { %v3636_v4 = vmul.f32 1.442695, %v3627_v41  ;;  %v3604_v52 = vpop.xlane.xlu2 %3603 }
 0x6f7   :  { %v3626_v62 = vsub.f32 %v3418_v21, %v3604_v52 }
 0x6f8   :  { %4996 = vpow2.f32 %v3636_v4 }
 0x6f9   :  { %v3634_v55 = vmul.f32 1.442695, %v3626_v62 }
 0x6fb   :  { %4998 = vpow2.f32 %v3634_v55 }
 0x6fe   :  { %v4997_v63 = vpop.eup %4996 }
 0x6ff   :  { %v3653_v38 = vsel %vm3601_vm9, %v4997_v63, 0.0 }
 0x700   :  { %3654 = vadd.xlane.f32.xlu0 %v3653_v38 }
 0x701   :  { %v4999_v47 = vpop.eup %4998 }
 0x702   :  { %v3650_v16 = vsel %vm3601_vm9, %v4999_v47, 0.0 }
 0x703   :  { %3651 = vadd.xlane.f32.xlu1 %v3650_v16  ;;  %v3613_v32 = vpop.xlane.xlu0 %3612 }
 0x704   :  { %v3629_v0 = vsub.f32 %v3495_v17, %v3613_v32 }
 0x706   :  { %v3640_v20 = vmul.f32 1.442695, %v3629_v0  ;;  %v3610_v8 = vpop.xlane.xlu2 %3609 }
 0x707   :  { %v3628_v13 = vsub.f32 %v3469_v57, %v3610_v8 }
 0x708   :  { %5000 = vpow2.f32 %v3640_v20 }
 0x709   :  { %v3638_v23 = vmul.f32 1.442695, %v3628_v13 }
 0x70b   :  { %5002 = vpow2.f32 %v3638_v23  ;;  %v3616_v49 = vpop.xlane.xlu0 %3615 }
 0x70c   :  { %v3630_v44 = vsub.f32 %v3520_v34, %v3616_v49 }
 0x70e   :  { %v5001_v51 = vpop.eup %5000  ;;  %v3642_v15 = vmul.f32 1.442695, %v3630_v44  ;;  %v3619_v28 = vpop.xlane.xlu2 %3618 }
 0x70f   :  { %v3631_v5 = vsub.f32 %v6480_v56, %v3619_v28  ;;  %v3659_v39 = vsel %vm3601_vm9, %v5001_v51, 0.0 }
 0x710   :  { %5004 = vpow2.f32 %v3642_v15  ;;  %3660 = vadd.xlane.f32.xlu2 %v3659_v39 }
 0x711   :  { %v5003_v42 = vpop.eup %5002  ;;  %v3644_v30 = vmul.f32 1.442695, %v3631_v5 }
 0x712   :  { %v3656_v24 = vsel %vm3601_vm9, %v5003_v42, 0.0 }
 0x713   :  { %5006 = vpow2.f32 %v3644_v30  ;;  %3657 = vadd.xlane.f32.xlu1 %v3656_v24  ;;  %v3625_v18 = vpop.xlane.xlu1 %3624 }
 0x714   :  { %v3633_v40 = vsub.f32 %v3597_v10, %v3625_v18 }
 0x716   :  { %v5005_v19 = vpop.eup %5004  ;;  %v3648_v35 = vmul.f32 1.442695, %v3633_v40  ;;  %v3622_v36 = vpop.xlane.xlu0 %3621 }
 0x717   :  { %v3632_v26 = vsub.f32 %v3571_v50, %v3622_v36  ;;  %v3662_v29 = vsel %vm3601_vm9, %v5005_v19, 0.0 }
 0x718   :  { %5008 = vpow2.f32 %v3648_v35  ;;  %3663 = vadd.xlane.f32.xlu2 %v3662_v29 }
 0x719   :  { %v5007_v11 = vpop.eup %5006  ;;  %v3646_v60 = vmul.f32 1.442695, %v3632_v26 }
 0x71a   :  { %v3665_v6 = vsel %vm3601_vm9, %v5007_v11, 0.0 }
 0x71b   :  { %5010 = vpow2.f32 %v3646_v60  ;;  %3666 = vadd.xlane.f32.xlu1 %v3665_v6 }
 0x71e   :  { %v5009_v56 = vpop.eup %5008 }
 0x71f   :  { %v3671_v48 = vsel %vm3601_vm9, %v5009_v56, 0.0 }
 0x720   :  { %3672 = vadd.xlane.f32.xlu0 %v3671_v48 }
 0x721   :  { %v5011_v61 = vpop.eup %5010 }
 0x722   :  { %v3668_v21 = vsel %vm3601_vm9, %v5011_v61, 0.0 }
 0x723   :  { %3669 = vadd.xlane.f32.xlu2 %v3668_v21 }
 0x773   :  { %v3655_v53 = vpop.xlane.xlu0 %3654 }
 0x774   :  { %5012 = vrcp.f32 %v3655_v53 }
 0x776   :  { %v3652_v59 = vpop.xlane.xlu1 %3651 }
 0x777   :  { %5014 = vrcp.f32 %v3652_v59 }
 0x77a   :  { %v5013_v22 = vpop.eup %5012 }
 0x77b   :  { %v3683_v9 = vmul.f32 %v5013_v22, %v4997_v63 }
 0x77d   :  { %v5015_v34 = vpop.eup %5014  ;;  %v3691_v17 = vpack.c.bf16 %v3683_v9, %v3683_v9 }
 0x77e   :  { %v3682_v27 = vmul.f32 %v5015_v34, %v4999_v47 }
 0x77f   :  { %4750 = vmatmul.msk.bf16.vlgmr.msra.gmra.mxu0 %vm3601_vm9, %v3691_v17 }
 0x780   :  { %v3690_v57 = vpack.c.bf16 %v3682_v27, %v3682_v27 }
 0x782   :  { %4749 = vmatmul.msk.bf16.vlgmr.msra.gmra.mxu3 %vm3601_vm9, %v3690_v57 }
 0x783   :  { %v3661_v7 = vpop.xlane.xlu2 %3660 }
 0x784   :  { %5016 = vrcp.f32 %v3661_v7 }
 0x786   :  { %v3658_v33 = vpop.xlane.xlu1 %3657 }
 0x787   :  { %5018 = vrcp.f32 %v3658_v33 }
 0x78a   :  { %v5017_v46 = vpop.eup %5016 }
 0x78b   :  { %v3685_v25 = vmul.f32 %v5017_v46, %v5001_v51  ;;  %v3664_v31 = vpop.xlane.xlu2 %3663 }
 0x78c   :  { %5020 = vrcp.f32 %v3664_v31 }
 0x78d   :  { %v5019_v43 = vpop.eup %5018  ;;  %v3693_v10 = vpack.c.bf16 %v3685_v25, %v3685_v25 }
 0x78e   :  { %v3684_v45 = vmul.f32 %v5019_v43, %v5003_v42  ;;  %v3667_v50 = vpop.xlane.xlu1 %3666 }
 0x78f   :  { %5022 = vrcp.f32 %v3667_v50  ;;  %4752 = vmatmul.msk.bf16.vlgmr.msrb.gmra.mxu2 %vm3601_vm9, %v3693_v10 }
 0x790   :  { %v3692_v58 = vpack.c.bf16 %v3684_v45, %v3684_v45 }
 0x792   :  { %v5021_v2 = vpop.eup %5020  ;;  %4751 = vmatmul.msk.bf16.vlgmr.msra.gmra.mxu1 %vm3601_vm9, %v3692_v58 }
 0x793   :  { %v3686_v54 = vmul.f32 %v5021_v2, %v5005_v19  ;;  %v3673_v3 = vpop.xlane.xlu0 %3672 }
 0x794   :  { %5024 = vrcp.f32 %v3673_v3 }
 0x795   :  { %v5023_v41 = vpop.eup %5022  ;;  %v3694_v4 = vpack.c.bf16 %v3686_v54, %v3686_v54 }
 0x796   :  { %v3687_v52 = vmul.f32 %v5023_v41, %v5007_v11  ;;  %v3670_v62 = vpop.xlane.xlu2 %3669 }
 0x797   :  { %5026 = vrcp.f32 %v3670_v62  ;;  %4753 = vmatmul.msk.bf16.vlgmr.msrb.gmra.mxu3 %vm3601_vm9, %v3694_v4 }
 0x798   :  { %v3695_v55 = vpack.c.bf16 %v3687_v52, %v3687_v52 }
 0x79a   :  { %v5025_v63 = vpop.eup %5024  ;;  %4754 = vmatmul.msk.bf16.vlgmr.msrb.gmra.mxu0 %vm3601_vm9, %v3695_v55 }
 0x79b   :  { %v3689_v38 = vmul.f32 %v5025_v63, %v5009_v56 }
 0x79d   :  { %v5027_v47 = vpop.eup %5026  ;;  %v3697_v16 = vpack.c.bf16 %v3689_v38, %v3689_v38 }
 0x79e   :  { %v3688_v32 = vmul.f32 %v5027_v47, %v5011_v61 }
 0x79f   :  { %4756 = vmatmul.msk.bf16.vlgmr.msra.gmra.mxu2 %vm3601_vm9, %v3697_v16 }
 0x7a0   :  { %v3696_v0 = vpack.c.bf16 %v3688_v32, %v3688_v32 }
 0x7a2   :  { %4755 = vmatmul.msk.bf16.vlgmr.msrb.gmra.mxu1 %vm3601_vm9, %v3696_v0 }
 0x7fc   :  { %v3746_v20 = vpop.f32.mrf.mxu0 }
 0x7fd   :  { %v3904_v19 = vpack.c.bf16 %v3746_v20, %v3746_v20 }
 0x7ff   :  { %v3926_v48 = vshrl.u32 %v3904_v19, 16 }
 0x804   :  { %v3748_v8 = vpop.f32.mrf.mxu0 }
 0x805   :  { %v3720_v13 = vpop.f32.mrf.mxu3 }
 0x806   :  { %v3903_v5 = vpack.c.bf16 %v3720_v13, %v3720_v13 }
 0x808   :  { %v3914_v18 = vshrl.u32 %v3903_v5, 16 }
 0x80d   :  { %v3722_v23 = vpop.f32.mrf.mxu3 }
 0x80e   :  { %v4920_v23 = vld [vmem:[#allocation14 + $0x38] sm:$0xff] }
 0x80f   :  { %v3771_v49 = vpop.f32.mrf.mxu1  ;;  %4233 = vmatpush.bf16.msra.mxu3 %v4920_v23 }
 0x810   :  { %v3905_v51 = vpack.c.bf16 %v3771_v49, %v3771_v49 }
 0x812   :  { %v3797_v44 = vpop.f32.mrf.mxu2  ;;  %v3915_v39 = vshrl.u32 %v3905_v51, 16  ;;  %v3913_v40 = vpack.i.b16 %v3905_v51, %v3903_v5 }
 0x813   :  { %v3906_v24 = vpack.c.bf16 %v3797_v44, %v3797_v44 }
 0x814   :  { %v3916_v35 = vpack.i.b16 %v3915_v39, %v3914_v18  ;;  %v3939_v60 = vperm.slane %v3913_v40, %v5464_v37 }
 0x815   :  { %v3925_v26 = vpack.i.b16 %v3906_v24, %v3904_v19  ;;  %v3927_v6 = vshrl.u32 %v3906_v24, 16 }
 0x816   :  { %v3965_v21 = vperm.slane %v3916_v35, %v5464_v37  ;;  %v3947_v57 = vrot.slane %v3939_v60, 4 }
 0x817   :  { %v3773_v15 = vpop.f32.mrf.mxu1  ;;  %v3848_v28 = vpop.f32.mrf.mxu0  ;;  %v3991_v17 = vperm.slane %v3925_v26, %v5464_v37  ;;  %v3928_v7 = vpack.i.b16 %v3927_v6, %v3926_v48 }
 0x818   :  { %v3908_v61 = vpack.c.bf16 %v3848_v28, %v3848_v28  ;;  %v3973_v10 = vrot.slane %v3965_v21, 4 }
 0x819   :  { %v3999_v2 = vrot.slane %v3991_v17, 4  ;;  %v4017_v52 = vperm.slane %v3928_v7, %v5464_v37 }
 0x81a   :  { %v3799_v42 = vpop.f32.mrf.mxu2  ;;  %v3822_v30 = vpop.f32.mrf.mxu3  ;;  %v3932_v25 = vshrl.u32 %v3908_v61, 16 }
 0x81b   :  { %v3907_v36 = vpack.c.bf16 %v3822_v30, %v3822_v30  ;;  %v4025_v28 = vrot.slane %v4017_v52, 4  ;;  %v4919_v30 = vld [vmem:[#allocation14 + $0x30] sm:$0xff] }
 0x81c   :  { %4234 = vmatpush.bf16.msra.mxu3 %v4919_v30 }
 0x81d   :  { %v3920_v53 = vshrl.u32 %v3907_v36, 16 }
 0x81f   :  { %v3850_v29 = vpop.f32.mrf.mxu0  ;;  %v3873_v11 = vpop.f32.mrf.mxu1 }
 0x820   :  { %v3909_v56 = vpack.c.bf16 %v3873_v11, %v3873_v11 }
 0x822   :  { %v3919_v59 = vpack.i.b16 %v3909_v56, %v3907_v36  ;;  %v3921_v22 = vshrl.u32 %v3909_v56, 16  ;;  %v3824_v9 = vpop.f32.mrf.mxu3  ;;  %v3899_v34 = vpop.f32.mrf.mxu2 }
 0x823   :  { %v3910_v27 = vpack.c.bf16 %v3899_v34, %v3899_v34 }
 0x824   :  { %v3922_v33 = vpack.i.b16 %v3921_v22, %v3920_v53  ;;  %v3944_v46 = vperm.slane %v3919_v59, %v5464_v37 }
 0x825   :  { %v3931_v31 = vpack.i.b16 %v3910_v27, %v3908_v61  ;;  %v3933_v43 = vshrl.u32 %v3910_v27, 16 }
 0x826   :  { %v3945_v45 = vrot.slane %v3944_v46, 4  ;;  %v3948_v50 = vsel %vm218_vm0, %v3944_v46, %v3947_v57  ;;  %v3970_v58 = vperm.slane %v3922_v33, %v5464_v37 }
 0x827   :  { %v3956_v54 = vperm.slane %v3948_v50, %v5474_v1  ;;  %v3934_v3 = vpack.i.b16 %v3933_v43, %v3932_v25  ;;  %v3996_v41 = vperm.slane %v3931_v31, %v5464_v37  ;;  %v3875_v4 = vpop.f32.mrf.mxu1 }
 0x828   :  { %v3946_v62 = vsel %vm218_vm0, %v3945_v45, %v3939_v60  ;;  %v3971_v55 = vrot.slane %v3970_v58, 4  ;;  %v3974_v63 = vsel %vm218_vm0, %v3970_v58, %v3973_v10 }
 0x829   :  { %v3952_v38 = vperm.slane %v3946_v62, %v5474_v1  ;;  %v3959_v47 = vrot.slane %v3956_v54, 4  ;;  %v3982_v16 = vperm.slane %v3974_v63, %v5474_v1  ;;  %v3997_v32 = vrot.slane %v3996_v41, 4 }
 0x82a   :  { %v3972_v0 = vsel %vm218_vm0, %v3971_v55, %v3965_v21  ;;  %v4000_v20 = vsel %vm218_vm0, %v3996_v41, %v3999_v2  ;;  %v4022_v8 = vperm.slane %v3934_v3, %v5464_v37  ;;  %v3901_v13 = vpop.f32.mrf.mxu2 }
 0x82b   :  { %v3957_v49 = vrot.slane %v3952_v38, 4  ;;  %v3960_v44 = vsel %vm218_vm0, 0, %v3959_v47  ;;  %v3978_v51 = vperm.slane %v3972_v0, %v5474_v1  ;;  %v3985_v15 = vrot.slane %v3982_v16, 4 }
 0x82c   :  { %v4044_v5 = vrot.slane %v3960_v44, 4  ;;  %v3998_v39 = vsel %vm218_vm0, %v3997_v32, %v3991_v17  ;;  %v4008_v42 = vperm.slane %v4000_v20, %v5474_v1  ;;  %v4023_v29 = vrot.slane %v4022_v8, 4 }
 0x82d   :  { %v3958_v24 = vsel %vm218_vm0, 0, %v3957_v49  ;;  %v3983_v18 = vrot.slane %v3978_v51, 4  ;;  %v3986_v40 = vsel %vm218_vm0, 0, %v3985_v15  ;;  %v4004_v19 = vperm.slane %v3998_v39, %v5474_v1 }
 0x82e   :  { %v4045_v35 = vsel %vm218_vm0, %v4044_v5, %v3958_v24  ;;  %v4063_v36 = vrot.slane %v3986_v40, 4  ;;  %v4011_v26 = vrot.slane %v4008_v42, 4  ;;  %v4039_v60 = vsel %vm218_vm0, %v3959_v47, %v3952_v38 }
 0x82f   :  { %v3984_v11 = vsel %vm218_vm0, 0, %v3983_v18  ;;  %v4009_v6 = vrot.slane %v4004_v19, 4  ;;  %v4026_v56 = vsel %vm218_vm0, %v4022_v8, %v4025_v28  ;;  %v4024_v61 = vsel %vm218_vm0, %v4023_v29, %v4017_v52 }
 0x830   :  { %v4012_v48 = vsel %vm218_vm0, 0, %v4011_v26  ;;  %v4034_v21 = vperm.slane %v4026_v56, %v5474_v1  ;;  %v4030_v59 = vperm.slane %v4024_v61, %v5474_v1  ;;  %v4049_v9 = vperm.slane %v4045_v35, %v5464_v37 }
 0x831   :  { %v4010_v53 = vsel %vm218_vm0, 0, %v4009_v6  ;;  %v4082_v22 = vrot.slane %v4012_v48, 4  ;;  %v4077_v17 = vsel %vm218_vm0, %v4011_v26, %v4004_v19  ;;  %v4043_v27 = vperm.slane %v4039_v60, %v5464_v37 }
 0x832   :  { %v4037_v34 = vrot.slane %v4034_v21, 4  ;;  %v4064_v57 = vsel %vm218_vm0, %v4063_v36, %v3984_v11  ;;  %v4035_v7 = vrot.slane %v4030_v59, 4  ;;  %v4050_v46 = vrot.slane %v4049_v9, 4 }
 0x833   :  { %v4083_v33 = vsel %vm218_vm0, %v4082_v22, %v4010_v53  ;;  %v4058_v25 = vsel %vm218_vm0, %v3985_v15, %v3978_v51  ;;  %v4068_v43 = vperm.slane %v4064_v57, %v5464_v37  ;;  %v4081_v2 = vperm.slane %v4077_v17, %v5464_v37 }
 0x834   :  { %v4038_v31 = vsel %vm218_vm0, 0, %v4037_v34  ;;  %v4087_v10 = vperm.slane %v4083_v33, %v5464_v37  ;;  %v4036_v45 = vsel %vm218_vm0, 0, %v4035_v7  ;;  %v4051_v58 = vsel %vm218_vm0, %v4050_v46, %v4043_v27  ;;  %v4918_v46 = vld [vmem:[#allocation14 + $0x28] sm:$0xff] }
 0x835   :  { %v4101_v50 = vrot.slane %v4038_v31, 4  ;;  %v4055_v54 = vperm.slane %v4051_v58, %v5474_v1  ;;  %v4062_v3 = vperm.slane %v4058_v25, %v5464_v37  ;;  %v4069_v41 = vrot.slane %v4068_v43, 4  ;;  %4235 = vmatpush.bf16.msra.mxu3 %v4918_v46  ;;  %v4917_v25 = vld [vmem:[#allocation14 + $0x20] sm:$0xff]  ;;  %v4916_v31 = vld [vmem:[#allocation14 + $0x18] sm:$0xff]  ;;  %v4915_v43 = vld [vmem:[#allocation14 + $0x10] sm:$0xff] }
 0x836   :  { %v4088_v4 = vrot.slane %v4087_v10, 4  ;;  %v4096_v52 = vsel %vm218_vm0, %v4037_v34, %v4030_v59  ;;  %v4914_v10 = vld [vmem:[#allocation14 + $0x8] sm:$0xff]  ;;  %v4927_v58 = vld [vmem:[#allocation16 + $0x30] sm:$0xff] }
 0x837   :  { %v4102_v62 = vsel %vm218_vm0, %v4101_v50, %v4036_v45  ;;  %v4070_v55 = vsel %vm218_vm0, %v4069_v41, %v4062_v3  ;;  %v4056_v32 = vrot.slane %v4055_v54, 4  ;;  %v4100_v0 = vperm.slane %v4096_v52, %v5464_v37  ;;  %v4913_v45 = vld [vmem:[#allocation14] sm:$0xff]  ;;  %v4928_v50 = vld [vmem:[#allocation16 + $0x38] sm:$0xff] }
 0x838   :  { %v4089_v63 = vsel %vm218_vm0, %v4088_v4, %v4081_v2  ;;  %v4106_v38 = vperm.slane %v4102_v62, %v5464_v37  ;;  %v4074_v47 = vperm.slane %v4070_v55, %v5474_v1  ;;  %v4118_v15 = vshrl.u32 %v4055_v54, 16  ;;  %4318 = vmatpush.bf16.msra.mxu0 %v4928_v50  ;;  %v4926_v2 = vld [vmem:[#allocation16 + $0x28] sm:$0xff] }
 0x839   :  { %v4093_v16 = vperm.slane %v4089_v63, %v5474_v1  ;;  %v4057_v28 = vsel %vm218_vm0, 0, %v4056_v32  ;;  %4236 = vmatpush.bf16.msra.mxu3 %v4917_v25  ;;  %v4924_v63 = vld [vmem:[#allocation16 + $0x18] sm:$0xff] }
 0x83a   :  { %v4107_v20 = vrot.slane %v4106_v38, 4  ;;  %v4119_v8 = vshrl.u32 %v4074_v47, 16  ;;  %v4075_v13 = vrot.slane %v4074_v47, 4  ;;  %v4117_v44 = vpack.i.b16 %v4074_v47, %v4055_v54  ;;  %v4925_v54 = vld [vmem:[#allocation16 + $0x20] sm:$0xff]  ;;  %v4923_v38 = vld [vmem:[#allocation16 + $0x10] sm:$0xff]  ;;  %v4922_v47 = vld [vmem:[#allocation16 + $0x8] sm:$0xff] }
 0x83b   :  { %v4094_v49 = vrot.slane %v4093_v16, 4  ;;  %v4130_v24 = vshrl.u32 %v4093_v16, 16  ;;  %v4124_v35 = vshrl.u32 %v4057_v28, 16  ;;  %v4936_v32 = vld [vmem:[#allocation17 + $0x38] sm:$0xff] }
 0x83c   :  { %v4108_v23 = vsel %vm218_vm0, %v4107_v20, %v4100_v0  ;;  %v4076_v5 = vsel %vm218_vm0, 0, %v4075_v13  ;;  %v4120_v30 = vpack.i.b16 %v4119_v8, %v4118_v15  ;;  %v4139_v60 = vunpack.c.l.b16 %v4117_v44  ;;  %4319 = vmatpush.bf16.msra.mxu0 %v4927_v58  ;;  %4401 = vmatpush.bf16.msra.mxu1 %v4936_v32  ;;  %v4935_v0 = vld [vmem:[#allocation17 + $0x30] sm:$0xff]  ;;  %v4934_v20 = vld [vmem:[#allocation17 + $0x28] sm:$0xff]  ;;  %v4933_v8 = vld [vmem:[#allocation17 + $0x20] sm:$0xff] }
 0x83d   :  { %v4112_v51 = vperm.slane %v4108_v23, %v5474_v1  ;;  %v4095_v39 = vsel %vm218_vm0, 0, %v4094_v49  ;;  %v4125_v42 = vshrl.u32 %v4076_v5, 16  ;;  %v4123_v19 = vpack.i.b16 %v4076_v5, %v4057_v28  ;;  %4237 = vmatpush.bf16.msra.mxu3 %v4916_v31  ;;  %v4932_v13 = vld [vmem:[#allocation17 + $0x18] sm:$0xff]  ;;  %v4961_v49 = vld [vmem:[%s6620_s11] ss:$0 sm:$0xff] }
 0x83e   :  { %v4136_v11 = vshrl.u32 %v4095_v39, 16  ;;  %v4142_v21 = vunpack.c.l.b16 %v4120_v30  ;;  %v4930_v30 = vld [vmem:[#allocation17 + $0x8] sm:$0xff] }
 0x83f   :  { %v4131_v18 = vshrl.u32 %v4112_v51, 16  ;;  %v4113_v40 = vrot.slane %v4112_v51, 4  ;;  %v4129_v36 = vpack.i.b16 %v4112_v51, %v4093_v16  ;;  %v4126_v48 = vpack.i.b16 %v4125_v42, %v4124_v35  ;;  %v4921_v16 = vld [vmem:[#allocation16] sm:$0xff]  ;;  %v4931_v42 = vld [vmem:[#allocation17 + $0x10] sm:$0xff] }
 0x840   :  { %v4147_v59 = vunpack.c.l.b16 %v4123_v19  ;;  %4320 = vmatpush.bf16.msra.mxu0 %v4926_v2  ;;  %4402 = vmatpush.bf16.msra.mxu1 %v4935_v0 }
 0x841   :  { %v4132_v26 = vpack.i.b16 %v4131_v18, %v4130_v24  ;;  %v4114_v29 = vsel %vm218_vm0, 0, %v4113_v40  ;;  %v4140_v61 = vunpack.c.l.b16 %v4129_v36  ;;  %v4152_v57 = vunpack.c.l.b16 %v4126_v48  ;;  %4238 = vmatpush.bf16.msra.mxu3 %v4915_v43  ;;  %v4929_v24 = vld [vmem:[#allocation17] sm:$0xff]  ;;  %v4962_v40 = vld [vmem:[%s6622_s13] ss:$0 sm:$0xff]  ;;  %s5327_s13 = smov [#allocation19]  }
 0x842   :  { %v4135_v6 = vpack.i.b16 %v4114_v29, %v4095_v39  ;;  %v4137_v56 = vshrl.u32 %v4114_v29, 16 }
 0x843   :  { %v4143_v53 = vunpack.c.l.b16 %v4132_v26  ;;  %v4141_v34 = vpack.c.b16 %v4140_v61, %v4139_v60 }
 0x844   :  { %v4148_v22 = vunpack.c.l.b16 %v4135_v6  ;;  %v4138_v9 = vpack.i.b16 %v4137_v56, %v4136_v11  ;;  %4321 = vmatpush.bf16.msra.mxu0 %v4925_v54  ;;  %4403 = vmatpush.bf16.msra.mxu1 %v4934_v20 }
 0x845   :  { %v4144_v17 = vpack.c.b16 %v4143_v53, %v4142_v21  ;;  %4239 = vmatpush.bf16.msra.mxu3 %v4914_v10 }
 0x846   :  { %v4149_v27 = vpack.c.b16 %v4148_v22, %v4147_v59  ;;  %v4153_v7 = vunpack.c.l.b16 %v4138_v9 }
 0x847   :  { %4145 = vrot.lane.b32.xlu0 %v4144_v17, %s5307_s29 }
 0x848   :  { %4150 = vrot.lane.b32.xlu1 %v4149_v27, %s5311_s26  ;;  %v4154_v33 = vpack.c.b16 %v4153_v7, %v4152_v57  ;;  %4322 = vmatpush.bf16.msra.mxu0 %v4924_v63 }
 0x849   :  { %4240 = vmatpush.bf16.msra.mxu3 %v4913_v45  ;;  %4404 = vmatpush.bf16.msra.mxu1 %v4933_v8 }
 0x84a   :  { %4155 = vrot.lane.b32.xlu2 %v4154_v33, %s5326_s12 }
 0x84c   :  { %4323 = vmatpush.bf16.msra.mxu0 %v4923_v38 }
 0x84d   :  { %4405 = vmatpush.bf16.msra.mxu1 %v4932_v13 }
 0x850   :  { %4324 = vmatpush.bf16.msra.mxu0 %v4922_v47 }
 0x851   :  { %4406 = vmatpush.bf16.msra.mxu1 %v4931_v42 }
 0x854   :  { %4325 = vmatpush.bf16.msra.mxu0 %v4921_v16 }
 0x855   :  { %4407 = vmatpush.bf16.msra.mxu1 %v4930_v30 }
 0x859   :  { %4408 = vmatpush.bf16.msra.mxu1 %v4929_v24 }
 0x8a4   :  { %v4156_v52 = vpop.permute.xlu2 %4155 }
 0x8b9   :  { %v4146_v3 = vpop.permute.xlu0 %4145 }
 0x8ba   :  { %v4159_v41 = vsel %vm1272_vm1, %v4141_v34, %v4146_v3  ;;  %v4151_v4 = vpop.permute.xlu1 %4150 }
 0x8bb   :  { %v4161_v62 = vsel %vm1932_vm4, %v4159_v41, %v4151_v4 }
 0x8bc   :  { %v4163_v55 = vsel %vm1935_vm5, %v4161_v62, %v4156_v52 }
 0x8bd   :  { %4241 = vmatmul.bf16.vlgmr.msra.gmra.mxu3 %v4163_v55 }
 0x940   :  { %v4242_v23 = vpop.f32.mrf.mxu3 }
 0x941   :  { %v4243_v44 = vadd.f32 %v4961_v49, %v4242_v23 }
 0x943   :  { %v4247_v28 = vadd.f32 %v4243_v44, %v6233_v14 }
 0x948   :  { %v4244_v51 = vpop.f32.mrf.mxu3 }
 0x949   :  { %v4245_v15 = vadd.f32 %v4961_v49, %v4244_v51 }
 0x94b   :  { %v4248_v5 = vadd.f32 %v4245_v15, %v6228_v12  ;;  %v4963_v12 = vld [vmem:[%s6624_s15] ss:$0 sm:$0xff]  ;;  %s4481_s15 = sshll.u32 %s5327_s13, 4  ;;  %s4482_s15 = int_to_ptr.vmem [resolvable:$true] %s4481_s15 }
 0x94d   :  { %v4249_v39 = vpack.c.bf16 %v4248_v5, %v4247_v28 }
 0x94f   :  { %4326 = vmatmul.bf16.vlgmr.msra.gmra.mxu0 %v4249_v39 }
 0x9cc   :  { %v4327_v18 = vpop.f32.mrf.mxu0 }
 0x9cd   :  { %v4328_v35 = vadd.f32 %v4962_v40, %v4327_v18 }
 0x9d4   :  { %v4329_v19 = vpop.f32.mrf.mxu0 }
 0x9d5   :  { %v4330_v36 = vadd.f32 %v4962_v40, %v4329_v19 }
 0x9d7   :  { %v4332_v26 = vpack.c.bf16 %v4330_v36, %v4328_v35 }
 0x9d9   :  { %4409 = vmatmul.bf16.vlgmr.msra.gmra.mxu1 %v4332_v26 }
 0xa56   :  { %v4410_v14 = vpop.f32.mrf.mxu1 }
 0xa57   :  { %v4411_v29 = vadd.f32 %v4963_v12, %v4410_v14 }
 0xa59   :  { %v4415_v11 = vadd.f32 %v4411_v29, %v4247_v28 }
 0xa5b   :  { %v4417_v60 = vrot.slane %v4415_v11, 4  ;;  %v4422_v48 = vperm.slane %v4415_v11, %v5464_v37 }
 0xa5d   :  { %v4418_v56 = vsel %vm218_vm0, 0.0, %v4417_v60  ;;  %v4439_v59 = vrot.slane %v4422_v48, 4 }
 0xa5e   :  { %v4412_v6 = vpop.f32.mrf.mxu1  ;;  %v4426_v53 = vperm.slane %v4418_v56, %v5464_v37 }
 0xa5f   :  { %v4413_v61 = vadd.f32 %v4963_v12, %v4412_v6 }
 0xa60   :  { %v4451_v57 = vrot.slane %v4426_v53, 4 }
 0xa61   :  { %v4416_v21 = vadd.f32 %v4413_v61, %v4248_v5 }
 0xa63   :  { %v4427_v22 = vrot.slane %v4416_v21, 4  ;;  %v4432_v9 = vperm.slane %v4416_v21, %v5464_v37 }
 0xa65   :  { %v4428_v34 = vsel %vm218_vm0, 0.0, %v4427_v22  ;;  %v4437_v17 = vrot.slane %v4432_v9, 4  ;;  %v4440_v27 = vsel %vm218_vm0, %v4432_v9, %v4439_v59 }
 0xa66   :  { %v4436_v7 = vperm.slane %v4428_v34, %v5464_v37  ;;  %v4448_v33 = vperm.slane %v4440_v27, %v5474_v1  ;;  %4854 = vst.sshfl [vmem:[#allocation19 + $0x4] sm:$0x11 pattern:$0x73516240] %v4440_v27 }
 0xa67   :  { %v4438_v46 = vsel %vm218_vm0, %v4437_v17, %v4422_v48 }
 0xa68   :  { %v4444_v25 = vperm.slane %v4438_v46, %v5474_v1  ;;  %v4449_v31 = vrot.slane %v4436_v7, 4  ;;  %v4452_v43 = vsel %vm218_vm0, %v4436_v7, %v4451_v57  ;;  %v4463_v10 = vrot.slane %v4448_v33, 4  ;;  %4853 = vst.sshfl [vmem:[#allocation19] sm:$0x11 pattern:$0x73516240] %v4438_v46 }
 0xa69   :  { %v4460_v45 = vperm.slane %v4452_v43, %v5474_v1  ;;  %4856 = vst.sshfl [vmem:[#allocation19 + $0xc] sm:$0x11 pattern:$0x73516240] %v4452_v43 }
 0xa6a   :  { %v4450_v50 = vsel %vm218_vm0, %v4449_v31, %v4426_v53  ;;  %v4461_v58 = vrot.slane %v4444_v25, 4  ;;  %v4464_v37 = vsel %vm218_vm0, 0.0, %v4463_v10 }
 0xa6b   :  { %v4456_v2 = vperm.slane %v4450_v50, %v5474_v1  ;;  %v4467_v54 = vrot.slane %v4460_v45, 4  ;;  %4472 = vst [vmem:[#allocation19 + $0x6] sm:$0x3] %v4464_v37 }
 0xa6c   :  { %v4462_v3 = vsel %vm218_vm0, 0.0, %v4461_v58  ;;  %4855 = vst.sshfl [vmem:[#allocation19 + $0x8] sm:$0x11 pattern:$0x73516240] %v4450_v50 }
 0xa6d   :  { %v4465_v41 = vrot.slane %v4456_v2, 4  ;;  %v4468_v4 = vsel %vm218_vm0, 0.0, %v4467_v54  ;;  %4470 = vst [vmem:[#allocation19 + $0x2] sm:$0x3] %v4462_v3 }
 0xa6e   :  { %4476 = vst [vmem:[#allocation19 + $0xe] sm:$0x3] %v4468_v4 }
 0xa6f   :  { %v4466_v1 = vsel %vm218_vm0, 0.0, %v4465_v41 }
 0xa70   :  { %4474 = vst [vmem:[#allocation19 + $0xa] sm:$0x3] %v4466_v1 }
 0xa71   :  { %4489 = dma.vmem_to_hbm [thread:$0]  %s4482_s15, 256, %s4484_s3, [#allocation4], %s5307_s29, %s5307_s29, %s5308_s30  }
 0xa72   :  { %5304 = dma.done.wait [#allocation4], 256  }
 0xa73   :  { %5305 = vsyncadd [#allocation4], 4294967040 }
 0xa74   :  { %4494 = vsyncpa [#allocation3], 1 }
 0xa75   :  { %4495 = vsyncpa [#allocation6], 1 }
 0xa76   :  { %4496 = vsyncpa [#allocation9], 1 }
 0xa77   :  { %4497 = vsyncpa [#allocation12], 1 }
 0xa78   :  { %4498 = vsyncpa [#allocation15], 1 }
 0xa79   :  { %4499 = vsyncpa [#allocation18], 1 }
 0xa7a   :  { %4500 = vsyncpa [#allocation4], 1 }

</bundles_post_ra>
